<compile_context>
chip_gen: v7x
topology: tpu7x:2x2x1
jax: 0.10.0
libtpu: 0.0.40
codegen_flags: <defaults>
</compile_context>

<pallas_src>
import jax
import jax.numpy as jnp
from jax import lax
from jax.experimental import pallas as pl
from jax.experimental.pallas import tpu as pltpu


def _row_block(h):
    for r in (8, 4, 2):
        if h % r == 0:
            return r
    return 1


# ----------------------------------------------------------------------------
# Fused Pallas kernel: all nsteps of   vec <- vec + warp(vec, grid + vec)
# ----------------------------------------------------------------------------
def _make_vecint_kernel(nsteps, scale, H, W, R, mxu_dtype):
    nb = H // R

    def kernel(vec_ref, grid_ref, *out_refs):
        # Source-index iotas: source index on SUBLANES, output pixel on LANES.
        iy_src = lax.broadcasted_iota(jnp.int32, (H, W), 0).astype(jnp.float32)
        ix_src = lax.broadcasted_iota(jnp.int32, (W, W), 0).astype(jnp.float32)

        for step in range(nsteps):
            src_ref = vec_ref if step == 0 else out_refs[step - 1]
            dst_ref = out_refs[step]
            first = (step == 0)

            # Hoisted per step (loop invariant): the whole current field with both
            # channels stacked on sublanes, cast ONCE to the MXU operand dtype.
            src_full = src_ref[...]
            if first:
                src_full = src_full * scale
            src2_m = src_full.reshape(2 * H, W).astype(mxu_dtype)

            def block_body(b, carry, src_ref=src_ref, dst_ref=dst_ref,
                           src2_m=src2_m, first=first):
                r0 = pl.multiple_of(b * R, R)

                # Lane-dense, unmasked (R, W) loads.
                f0 = src_ref[0, pl.ds(r0, R), :]
                f1 = src_ref[1, pl.ds(r0, R), :]
                if first:
                    f0 = f0 * scale
                    f1 = f1 * scale
                py = grid_ref[0, pl.ds(r0, R), :] + f0   # sample row coords (pixels)
                px = grid_ref[1, pl.ds(r0, R), :] + f1   # sample col coords (pixels)

                # Tent weights == bilinear weights with zeros padding.  Built per
                # output row (static j), then lane-concatenated into one MXU RHS.
                ay_list, ax_list = [], []
                for j in range(R):
                    pyj = py[j:j + 1, :]                 # (1, W) static sublane slice
                    pxj = px[j:j + 1, :]
                    ay_list.append(jnp.maximum(0.0, 1.0 - jnp.abs(iy_src - pyj)))
                    ax_list.append(jnp.maximum(0.0, 1.0 - jnp.abs(ix_src - pxj)))
                ay_blk = jnp.concatenate(ay_list, axis=1)        # (H, R*W) f32
                ax_blk = jnp.concatenate(ax_list, axis=1)        # (W, R*W)

                # Column interpolation for both channels and all R output rows in
                # ONE MXU matmul: (2H, W) x (W, R*W), f32 accumulation.
                v2 = jnp.dot(src2_m, ax_blk.astype(mxu_dtype),
                             preferred_element_type=jnp.float32)  # (2H, R*W) f32

                # Row interpolation: f32 elementwise multiply + sublane reduction.
                w0 = jnp.sum(ay_blk * v2[:H, :], axis=0, keepdims=True)  # (1, R*W)
                w1 = jnp.sum(ay_blk * v2[H:, :], axis=0, keepdims=True)  # (1, R*W)

                # Un-flatten lanes back into (R, W) tiles -> unmasked stores.
                w0_blk = jnp.concatenate(
                    [w0[:, j * W:(j + 1) * W] for j in range(R)], axis=0)
                w1_blk = jnp.concatenate(
                    [w1[:, j * W:(j + 1) * W] for j in range(R)], axis=0)

                dst_ref[0, pl.ds(r0, R), :] = f0 + w0_blk
                dst_ref[1, pl.ds(r0, R), :] = f1 + w1_blk
                return carry

            lax.fori_loop(0, nb, block_body, 0, unroll=2 if nb >= 2 else 1)

    return kernel


def vecint_forward(vec, grid, nsteps, mxu_dtype=jnp.bfloat16):
    """VecInt.forward: returns the list of intermediate deformations."""
    assert nsteps >= 0
    N, C, H, W = vec.shape
    assert C == 2, "2-D flow field expects 2 channels"
    assert grid.shape == (N, C, H, W)
    if nsteps == 0:
        return []

    R = _row_block(H)
    scale = 1.0 / (2 ** nsteps)
    kernel = _make_vecint_kernel(nsteps, scale, H, W, R, mxu_dtype)
    field_spec = pl.BlockSpec((None, 2, H, W), lambda n: (n, 0, 0, 0))

    # Roofline hints: dominated by the (2H, W) x (W, R*W) matmuls (4*H^2*W^2 flops
    # per step per batch item); HBM traffic is just the fields themselves.
    flops = int(N * nsteps * (4 * H * H * W * W + 8 * H * W * (H + W)))
    bytes_accessed = int(4 * N * (2 * 2 * H * W + nsteps * 2 * H * W))

    # VMEM budget: nsteps outputs + 2 inputs (pipeline double-buffered) + per-block
    # intermediates.  Only override the scoped default when it would not fit
    # (matters for v7x-sized fields); cap at 64 MiB (v7x physical VMEM).
    vmem_est = (2 * (nsteps + 2) * 2 * H * W * 4
                + 2 * (3 * H + W) * R * W * 4 + (2 << 20))
    cp_kwargs = dict(dimension_semantics=("parallel",))
    if vmem_est > (32 << 20):
        cp_kwargs["vmem_limit_bytes"] = int(min(vmem_est, 64 << 20))
    # TODO(synk): for N=1 on v7x, split row blocks across the two TensorCores
    # (VMEM_SHARED + per-step barrier) instead of batch-only megacore parallelism.

    outs = pl.pallas_call(
        kernel,
        out_shape=[jax.ShapeDtypeStruct((N, 2, H, W), jnp.float32)] * nsteps,
        grid=(N,),
        in_specs=[field_spec, field_spec],
        out_specs=[field_spec] * nsteps,
        compiler_params=pltpu.CompilerParams(**cp_kwargs),
        cost_estimate=pl.CostEstimate(flops=flops, transcendentals=0,
                                      bytes_accessed=bytes_accessed),
    )(vec.astype(jnp.float32), grid.astype(jnp.float32))
    return list(outs)


# ----------------------------------------------------------------------------
# Pure-JAX reference (explicit 4-neighbour gather) for validation
# ----------------------------------------------------------------------------
def _grid_sample_ref(src, loc_y, loc_x):
    H, W = src.shape
    y0 = jnp.floor(loc_y)
    x0 = jnp.floor(loc_x)
    wy = loc_y - y0
    wx = loc_x - x0

    def samp(yy, xx):
        valid = (yy >= 0) & (yy <= H - 1) & (xx >= 0) & (xx <= W - 1)
        yc = jnp.clip(yy.astype(jnp.int32), 0, H - 1)
        xc = jnp.clip(xx.astype(jnp.int32), 0, W - 1)
        return jnp.where(valid, src[yc, xc], 0.0)

    return ((1 - wy) * (1 - wx) * samp(y0, x0)
            + (1 - wy) * wx * samp(y0, x0 + 1)
            + wy * (1 - wx) * samp(y0 + 1, x0)
            + wy * wx * samp(y0 + 1, x0 + 1))


def vecint_ref(vec, grid, nsteps):
    scale = 1.0 / (2 ** nsteps)
    vec = vec * scale
    outs = []
    for _ in range(nsteps):
        warped = []
        for n in range(vec.shape[0]):
            ly = grid[n, 0] + vec[n, 0]
            lx = grid[n, 1] + vec[n, 1]
            w = jnp.stack([_grid_sample_ref(vec[n, c], ly, lx) for c in range(2)], 0)
            warped.append(w)
        vec = vec + jnp.stack(warped, 0)
        outs.append(vec)
    return outs


if __name__ == "__main__":
    key = jax.random.PRNGKey(0)
    N, C, H, W = 2, 2, 16, 16     # flow field: 2 channels (dy, dx)
    nsteps = 4

    vec = jax.random.normal(key, (N, C, H, W), dtype=jnp.float32) * 2.0

    # Identity sampling grid: channel 0 = row index, channel 1 = col index.
    gy, gx = jnp.meshgrid(jnp.arange(H, dtype=jnp.float32),
                          jnp.arange(W, dtype=jnp.float32), indexing="ij")
    grid = jnp.broadcast_to(jnp.stack([gy, gx], axis=0), (N, C, H, W))

    refs = vecint_ref(vec, grid, nsteps)

    # Exact path (f32 MXU operands -> multi-pass f32 matmul): tight check.
    d32 = jax.block_until_ready(vecint_forward(vec, grid, nsteps,
                                               mxu_dtype=jnp.float32))
    for d, r in zip(d32, refs):
        err = float(jnp.abs(d - r).max())
        assert jnp.allclose(d, r, atol=5e-3, rtol=5e-3), f"f32 path max err {err}"

    # Fast path (default: bf16 MXU operands, f32 accumulate): relative-L2 sanity.
    dbf = jax.block_until_ready(vecint_forward(vec, grid, nsteps))
    for d, r in zip(dbf, refs):
        rel = float(jnp.linalg.norm(d - r) / (jnp.linalg.norm(r) + 1e-12))
        assert rel < 0.15, f"bf16 path rel-L2 err {rel}"

    print("KERNEL_OK")
</pallas_src>

<mosaic_0001>
module attributes {stable_mosaic.version = 11 : i64} {
  func.func @kernel(%arg0: i32, %arg1: memref<1x2x16x16xf32, #tpu.memory_space<vmem>>, %arg2: memref<1x2x16x16xf32, #tpu.memory_space<vmem>>, %arg3: memref<1x2x16x16xf32, #tpu.memory_space<vmem>>, %arg4: memref<1x2x16x16xf32, #tpu.memory_space<vmem>>, %arg5: memref<1x2x16x16xf32, #tpu.memory_space<vmem>>, %arg6: memref<1x2x16x16xf32, #tpu.memory_space<vmem>>) attributes {dimension_semantics = [#tpu.dimension_semantics<parallel>], iteration_bounds = array<i64: 2>, scalar_prefetch = 0 : i64, scratch_operands = 0 : i64, tpu.core_type = #tpu.core_type<tc>, window_params = [{transform_indices = @transform_0, window_bounds = array<i64: 1, 2, 16, 16>}, {transform_indices = @transform_1, window_bounds = array<i64: 1, 2, 16, 16>}, {transform_indices = @transform_2, window_bounds = array<i64: 1, 2, 16, 16>}, {transform_indices = @transform_3, window_bounds = array<i64: 1, 2, 16, 16>}, {transform_indices = @transform_4, window_bounds = array<i64: 1, 2, 16, 16>}, {transform_indices = @transform_5, window_bounds = array<i64: 1, 2, 16, 16>}]} {
    %0 = tpu.iota {dimensions = array<i32: 0>} : vector<16x16xi32>
    %1 = arith.sitofp %0 : vector<16x16xi32> to vector<16x16xf32>
    %2 = tpu.iota {dimensions = array<i32: 0>} : vector<16x16xi32>
    %3 = arith.sitofp %2 : vector<16x16xi32> to vector<16x16xf32>
    %c0 = arith.constant 0 : index
    %c0_0 = arith.constant 0 : index
    %c0_1 = arith.constant 0 : index
    %c0_2 = arith.constant 0 : index
    %4 = vector.load %arg1[%c0, %c0_0, %c0_1, %c0_2] : memref<1x2x16x16xf32, #tpu.memory_space<vmem>>, vector<1x2x16x16xf32>
    %5 = vector.shape_cast %4 : vector<1x2x16x16xf32> to vector<2x16x16xf32>
    %cst = arith.constant 6.250000e-02 : f32
    %6 = vector.broadcast %cst : f32 to vector<2x16x16xf32>
    %7 = arith.mulf %5, %6 : vector<2x16x16xf32>
    %8 = vector.shape_cast %7 : vector<2x16x16xf32> to vector<32x16xf32>
    %c0_i32 = arith.constant 0 : i32
    %c8_i32 = arith.constant 8 : i32
    %9 = arith.muli %c0_i32, %c8_i32 : i32
    %10 = tpu.assume_multiple %9, 8 : i32
    %c0_3 = arith.constant 0 : index
    %c0_4 = arith.constant 0 : index
    %11 = arith.index_cast %10 : i32 to index
    %c0_5 = arith.constant 0 : index
    %12 = vector.load %arg1[%c0_3, %c0_4, %11, %c0_5] : memref<1x2x16x16xf32, #tpu.memory_space<vmem>>, vector<1x1x8x16xf32>
    %13 = vector.shape_cast %12 : vector<1x1x8x16xf32> to vector<8x16xf32>
    %c0_6 = arith.constant 0 : index
    %c1 = arith.constant 1 : index
    %14 = arith.index_cast %10 : i32 to index
    %c0_7 = arith.constant 0 : index
    %15 = vector.load %arg1[%c0_6, %c1, %14, %c0_7] : memref<1x2x16x16xf32, #tpu.memory_space<vmem>>, vector<1x1x8x16xf32>
    %16 = vector.shape_cast %15 : vector<1x1x8x16xf32> to vector<8x16xf32>
    %cst_8 = arith.constant 6.250000e-02 : f32
    %17 = vector.broadcast %cst_8 : f32 to vector<8x16xf32>
    %18 = arith.mulf %13, %17 : vector<8x16xf32>
    %cst_9 = arith.constant 6.250000e-02 : f32
    %19 = vector.broadcast %cst_9 : f32 to vector<8x16xf32>
    %20 = arith.mulf %16, %19 : vector<8x16xf32>
    %c0_10 = arith.constant 0 : index
    %c0_11 = arith.constant 0 : index
    %21 = arith.index_cast %10 : i32 to index
    %c0_12 = arith.constant 0 : index
    %22 = vector.load %arg2[%c0_10, %c0_11, %21, %c0_12] : memref<1x2x16x16xf32, #tpu.memory_space<vmem>>, vector<1x1x8x16xf32>
    %23 = vector.shape_cast %22 : vector<1x1x8x16xf32> to vector<8x16xf32>
    %24 = arith.addf %23, %18 : vector<8x16xf32>
    %c0_13 = arith.constant 0 : index
    %c1_14 = arith.constant 1 : index
    %25 = arith.index_cast %10 : i32 to index
    %c0_15 = arith.constant 0 : index
    %26 = vector.load %arg2[%c0_13, %c1_14, %25, %c0_15] : memref<1x2x16x16xf32, #tpu.memory_space<vmem>>, vector<1x1x8x16xf32>
    %27 = vector.shape_cast %26 : vector<1x1x8x16xf32> to vector<8x16xf32>
    %28 = arith.addf %27, %20 : vector<8x16xf32>
    %29 = vector.extract_strided_slice %24 {offsets = [0, 0], sizes = [1, 16], strides = [1, 1]} : vector<8x16xf32> to vector<1x16xf32>
    %30 = vector.extract_strided_slice %28 {offsets = [0, 0], sizes = [1, 16], strides = [1, 1]} : vector<8x16xf32> to vector<1x16xf32>
    %31 = vector.broadcast %29 : vector<1x16xf32> to vector<16x16xf32>
    %32 = arith.subf %1, %31 : vector<16x16xf32>
    %33 = math.absf %32 : vector<16x16xf32>
    %cst_16 = arith.constant 1.000000e+00 : f32
    %34 = vector.broadcast %cst_16 : f32 to vector<16x16xf32>
    %35 = arith.subf %34, %33 : vector<16x16xf32>
    %cst_17 = arith.constant 0.000000e+00 : f32
    %36 = vector.broadcast %cst_17 : f32 to vector<16x16xf32>
    %37 = arith.maximumf %36, %35 : vector<16x16xf32>
    %38 = vector.broadcast %30 : vector<1x16xf32> to vector<16x16xf32>
    %39 = arith.subf %3, %38 : vector<16x16xf32>
    %40 = math.absf %39 : vector<16x16xf32>
    %cst_18 = arith.constant 1.000000e+00 : f32
    %41 = vector.broadcast %cst_18 : f32 to vector<16x16xf32>
    %42 = arith.subf %41, %40 : vector<16x16xf32>
    %cst_19 = arith.constant 0.000000e+00 : f32
    %43 = vector.broadcast %cst_19 : f32 to vector<16x16xf32>
    %44 = arith.maximumf %43, %42 : vector<16x16xf32>
    %45 = vector.extract_strided_slice %24 {offsets = [1, 0], sizes = [1, 16], strides = [1, 1]} : vector<8x16xf32> to vector<1x16xf32>
    %46 = vector.extract_strided_slice %28 {offsets = [1, 0], sizes = [1, 16], strides = [1, 1]} : vector<8x16xf32> to vector<1x16xf32>
    %47 = vector.broadcast %45 : vector<1x16xf32> to vector<16x16xf32>
    %48 = arith.subf %1, %47 : vector<16x16xf32>
    %49 = math.absf %48 : vector<16x16xf32>
    %cst_20 = arith.constant 1.000000e+00 : f32
    %50 = vector.broadcast %cst_20 : f32 to vector<16x16xf32>
    %51 = arith.subf %50, %49 : vector<16x16xf32>
    %cst_21 = arith.constant 0.000000e+00 : f32
    %52 = vector.broadcast %cst_21 : f32 to vector<16x16xf32>
    %53 = arith.maximumf %52, %51 : vector<16x16xf32>
    %54 = vector.broadcast %46 : vector<1x16xf32> to vector<16x16xf32>
    %55 = arith.subf %3, %54 : vector<16x16xf32>
    %56 = math.absf %55 : vector<16x16xf32>
    %cst_22 = arith.constant 1.000000e+00 : f32
    %57 = vector.broadcast %cst_22 : f32 to vector<16x16xf32>
    %58 = arith.subf %57, %56 : vector<16x16xf32>
    %cst_23 = arith.constant 0.000000e+00 : f32
    %59 = vector.broadcast %cst_23 : f32 to vector<16x16xf32>
    %60 = arith.maximumf %59, %58 : vector<16x16xf32>
    %61 = vector.extract_strided_slice %24 {offsets = [2, 0], sizes = [1, 16], strides = [1, 1]} : vector<8x16xf32> to vector<1x16xf32>
    %62 = vector.extract_strided_slice %28 {offsets = [2, 0], sizes = [1, 16], strides = [1, 1]} : vector<8x16xf32> to vector<1x16xf32>
    %63 = vector.broadcast %61 : vector<1x16xf32> to vector<16x16xf32>
    %64 = arith.subf %1, %63 : vector<16x16xf32>
    %65 = math.absf %64 : vector<16x16xf32>
    %cst_24 = arith.constant 1.000000e+00 : f32
    %66 = vector.broadcast %cst_24 : f32 to vector<16x16xf32>
    %67 = arith.subf %66, %65 : vector<16x16xf32>
    %cst_25 = arith.constant 0.000000e+00 : f32
    %68 = vector.broadcast %cst_25 : f32 to vector<16x16xf32>
    %69 = arith.maximumf %68, %67 : vector<16x16xf32>
    %70 = vector.broadcast %62 : vector<1x16xf32> to vector<16x16xf32>
    %71 = arith.subf %3, %70 : vector<16x16xf32>
    %72 = math.absf %71 : vector<16x16xf32>
    %cst_26 = arith.constant 1.000000e+00 : f32
    %73 = vector.broadcast %cst_26 : f32 to vector<16x16xf32>
    %74 = arith.subf %73, %72 : vector<16x16xf32>
    %cst_27 = arith.constant 0.000000e+00 : f32
    %75 = vector.broadcast %cst_27 : f32 to vector<16x16xf32>
    %76 = arith.maximumf %75, %74 : vector<16x16xf32>
    %77 = vector.extract_strided_slice %24 {offsets = [3, 0], sizes = [1, 16], strides = [1, 1]} : vector<8x16xf32> to vector<1x16xf32>
    %78 = vector.extract_strided_slice %28 {offsets = [3, 0], sizes = [1, 16], strides = [1, 1]} : vector<8x16xf32> to vector<1x16xf32>
    %79 = vector.broadcast %77 : vector<1x16xf32> to vector<16x16xf32>
    %80 = arith.subf %1, %79 : vector<16x16xf32>
    %81 = math.absf %80 : vector<16x16xf32>
    %cst_28 = arith.constant 1.000000e+00 : f32
    %82 = vector.broadcast %cst_28 : f32 to vector<16x16xf32>
    %83 = arith.subf %82, %81 : vector<16x16xf32>
    %cst_29 = arith.constant 0.000000e+00 : f32
    %84 = vector.broadcast %cst_29 : f32 to vector<16x16xf32>
    %85 = arith.maximumf %84, %83 : vector<16x16xf32>
    %86 = vector.broadcast %78 : vector<1x16xf32> to vector<16x16xf32>
    %87 = arith.subf %3, %86 : vector<16x16xf32>
    %88 = math.absf %87 : vector<16x16xf32>
    %cst_30 = arith.constant 1.000000e+00 : f32
    %89 = vector.broadcast %cst_30 : f32 to vector<16x16xf32>
    %90 = arith.subf %89, %88 : vector<16x16xf32>
    %cst_31 = arith.constant 0.000000e+00 : f32
    %91 = vector.broadcast %cst_31 : f32 to vector<16x16xf32>
    %92 = arith.maximumf %91, %90 : vector<16x16xf32>
    %93 = vector.extract_strided_slice %24 {offsets = [4, 0], sizes = [1, 16], strides = [1, 1]} : vector<8x16xf32> to vector<1x16xf32>
    %94 = vector.extract_strided_slice %28 {offsets = [4, 0], sizes = [1, 16], strides = [1, 1]} : vector<8x16xf32> to vector<1x16xf32>
    %95 = vector.broadcast %93 : vector<1x16xf32> to vector<16x16xf32>
    %96 = arith.subf %1, %95 : vector<16x16xf32>
    %97 = math.absf %96 : vector<16x16xf32>
    %cst_32 = arith.constant 1.000000e+00 : f32
    %98 = vector.broadcast %cst_32 : f32 to vector<16x16xf32>
    %99 = arith.subf %98, %97 : vector<16x16xf32>
    %cst_33 = arith.constant 0.000000e+00 : f32
    %100 = vector.broadcast %cst_33 : f32 to vector<16x16xf32>
    %101 = arith.maximumf %100, %99 : vector<16x16xf32>
    %102 = vector.broadcast %94 : vector<1x16xf32> to vector<16x16xf32>
    %103 = arith.subf %3, %102 : vector<16x16xf32>
    %104 = math.absf %103 : vector<16x16xf32>
    %cst_34 = arith.constant 1.000000e+00 : f32
    %105 = vector.broadcast %cst_34 : f32 to vector<16x16xf32>
    %106 = arith.subf %105, %104 : vector<16x16xf32>
    %cst_35 = arith.constant 0.000000e+00 : f32
    %107 = vector.broadcast %cst_35 : f32 to vector<16x16xf32>
    %108 = arith.maximumf %107, %106 : vector<16x16xf32>
    %109 = vector.extract_strided_slice %24 {offsets = [5, 0], sizes = [1, 16], strides = [1, 1]} : vector<8x16xf32> to vector<1x16xf32>
    %110 = vector.extract_strided_slice %28 {offsets = [5, 0], sizes = [1, 16], strides = [1, 1]} : vector<8x16xf32> to vector<1x16xf32>
    %111 = vector.broadcast %109 : vector<1x16xf32> to vector<16x16xf32>
    %112 = arith.subf %1, %111 : vector<16x16xf32>
    %113 = math.absf %112 : vector<16x16xf32>
    %cst_36 = arith.constant 1.000000e+00 : f32
    %114 = vector.broadcast %cst_36 : f32 to vector<16x16xf32>
    %115 = arith.subf %114, %113 : vector<16x16xf32>
    %cst_37 = arith.constant 0.000000e+00 : f32
    %116 = vector.broadcast %cst_37 : f32 to vector<16x16xf32>
    %117 = arith.maximumf %116, %115 : vector<16x16xf32>
    %118 = vector.broadcast %110 : vector<1x16xf32> to vector<16x16xf32>
    %119 = arith.subf %3, %118 : vector<16x16xf32>
    %120 = math.absf %119 : vector<16x16xf32>
    %cst_38 = arith.constant 1.000000e+00 : f32
    %121 = vector.broadcast %cst_38 : f32 to vector<16x16xf32>
    %122 = arith.subf %121, %120 : vector<16x16xf32>
    %cst_39 = arith.constant 0.000000e+00 : f32
    %123 = vector.broadcast %cst_39 : f32 to vector<16x16xf32>
    %124 = arith.maximumf %123, %122 : vector<16x16xf32>
    %125 = vector.extract_strided_slice %24 {offsets = [6, 0], sizes = [1, 16], strides = [1, 1]} : vector<8x16xf32> to vector<1x16xf32>
    %126 = vector.extract_strided_slice %28 {offsets = [6, 0], sizes = [1, 16], strides = [1, 1]} : vector<8x16xf32> to vector<1x16xf32>
    %127 = vector.broadcast %125 : vector<1x16xf32> to vector<16x16xf32>
    %128 = arith.subf %1, %127 : vector<16x16xf32>
    %129 = math.absf %128 : vector<16x16xf32>
    %cst_40 = arith.constant 1.000000e+00 : f32
    %130 = vector.broadcast %cst_40 : f32 to vector<16x16xf32>
    %131 = arith.subf %130, %129 : vector<16x16xf32>
    %cst_41 = arith.constant 0.000000e+00 : f32
    %132 = vector.broadcast %cst_41 : f32 to vector<16x16xf32>
    %133 = arith.maximumf %132, %131 : vector<16x16xf32>
    %134 = vector.broadcast %126 : vector<1x16xf32> to vector<16x16xf32>
    %135 = arith.subf %3, %134 : vector<16x16xf32>
    %136 = math.absf %135 : vector<16x16xf32>
    %cst_42 = arith.constant 1.000000e+00 : f32
    %137 = vector.broadcast %cst_42 : f32 to vector<16x16xf32>
    %138 = arith.subf %137, %136 : vector<16x16xf32>
    %cst_43 = arith.constant 0.000000e+00 : f32
    %139 = vector.broadcast %cst_43 : f32 to vector<16x16xf32>
    %140 = arith.maximumf %139, %138 : vector<16x16xf32>
    %141 = vector.extract_strided_slice %24 {offsets = [7, 0], sizes = [1, 16], strides = [1, 1]} : vector<8x16xf32> to vector<1x16xf32>
    %142 = vector.extract_strided_slice %28 {offsets = [7, 0], sizes = [1, 16], strides = [1, 1]} : vector<8x16xf32> to vector<1x16xf32>
    %143 = vector.broadcast %141 : vector<1x16xf32> to vector<16x16xf32>
    %144 = arith.subf %1, %143 : vector<16x16xf32>
    %145 = math.absf %144 : vector<16x16xf32>
    %cst_44 = arith.constant 1.000000e+00 : f32
    %146 = vector.broadcast %cst_44 : f32 to vector<16x16xf32>
    %147 = arith.subf %146, %145 : vector<16x16xf32>
    %cst_45 = arith.constant 0.000000e+00 : f32
    %148 = vector.broadcast %cst_45 : f32 to vector<16x16xf32>
    %149 = arith.maximumf %148, %147 : vector<16x16xf32>
    %150 = vector.broadcast %142 : vector<1x16xf32> to vector<16x16xf32>
    %151 = arith.subf %3, %150 : vector<16x16xf32>
    %152 = math.absf %151 : vector<16x16xf32>
    %cst_46 = arith.constant 1.000000e+00 : f32
    %153 = vector.broadcast %cst_46 : f32 to vector<16x16xf32>
    %154 = arith.subf %153, %152 : vector<16x16xf32>
    %cst_47 = arith.constant 0.000000e+00 : f32
    %155 = vector.broadcast %cst_47 : f32 to vector<16x16xf32>
    %156 = arith.maximumf %155, %154 : vector<16x16xf32>
    %157 = tpu.concatenate %37, %53, %69, %85, %101, %117, %133, %149 in 1 : vector<16x16xf32>, vector<16x16xf32>, vector<16x16xf32>, vector<16x16xf32>, vector<16x16xf32>, vector<16x16xf32>, vector<16x16xf32>, vector<16x16xf32> -> vector<16x128xf32>
    %158 = tpu.concatenate %44, %60, %76, %92, %108, %124, %140, %156 in 1 : vector<16x16xf32>, vector<16x16xf32>, vector<16x16xf32>, vector<16x16xf32>, vector<16x16xf32>, vector<16x16xf32>, vector<16x16xf32>, vector<16x16xf32> -> vector<16x128xf32>
    %cst_48 = arith.constant dense<0.000000e+00> : vector<32x128xf32>
    %159 = tpu.matmul %8, %158, %cst_48 {dimension_numbers = #tpu.dot_dimension_numbers<[1], [0], [0], [1], [0, 0, 1, 1], [], []>} : vector<32x16xf32>, vector<16x128xf32>, vector<32x128xf32> -> vector<32x128xf32>
    %160 = vector.extract_strided_slice %159 {offsets = [0, 0], sizes = [16, 128], strides = [1, 1]} : vector<32x128xf32> to vector<16x128xf32>
    %161 = arith.mulf %157, %160 : vector<16x128xf32>
    %cst_49 = arith.constant dense<0.000000e+00> : vector<128xf32>
    %162 = vector.multi_reduction <add>, %161, %cst_49 [0] : vector<16x128xf32> to vector<128xf32>
    %163 = vector.shape_cast %162 : vector<128xf32> to vector<1x128xf32>
    %164 = vector.extract_strided_slice %159 {offsets = [16, 0], sizes = [16, 128], strides = [1, 1]} : vector<32x128xf32> to vector<16x128xf32>
    %165 = arith.mulf %157, %164 : vector<16x128xf32>
    %cst_50 = arith.constant dense<0.000000e+00> : vector<128xf32>
    %166 = vector.multi_reduction <add>, %165, %cst_50 [0] : vector<16x128xf32> to vector<128xf32>
    %167 = vector.shape_cast %166 : vector<128xf32> to vector<1x128xf32>
    %168 = vector.extract_strided_slice %163 {offsets = [0, 0], sizes = [1, 16], strides = [1, 1]} : vector<1x128xf32> to vector<1x16xf32>
    %169 = vector.extract_strided_slice %163 {offsets = [0, 16], sizes = [1, 16], strides = [1, 1]} : vector<1x128xf32> to vector<1x16xf32>
    %170 = vector.extract_strided_slice %163 {offsets = [0, 32], sizes = [1, 16], strides = [1, 1]} : vector<1x128xf32> to vector<1x16xf32>
    %171 = vector.extract_strided_slice %163 {offsets = [0, 48], sizes = [1, 16], strides = [1, 1]} : vector<1x128xf32> to vector<1x16xf32>
    %172 = vector.extract_strided_slice %163 {offsets = [0, 64], sizes = [1, 16], strides = [1, 1]} : vector<1x128xf32> to vector<1x16xf32>
    %173 = vector.extract_strided_slice %163 {offsets = [0, 80], sizes = [1, 16], strides = [1, 1]} : vector<1x128xf32> to vector<1x16xf32>
    %174 = vector.extract_strided_slice %163 {offsets = [0, 96], sizes = [1, 16], strides = [1, 1]} : vector<1x128xf32> to vector<1x16xf32>
    %175 = vector.extract_strided_slice %163 {offsets = [0, 112], sizes = [1, 16], strides = [1, 1]} : vector<1x128xf32> to vector<1x16xf32>
    %176 = tpu.concatenate %168, %169, %170, %171, %172, %173, %174, %175 in 0 : vector<1x16xf32>, vector<1x16xf32>, vector<1x16xf32>, vector<1x16xf32>, vector<1x16xf32>, vector<1x16xf32>, vector<1x16xf32>, vector<1x16xf32> -> vector<8x16xf32>
    %177 = vector.extract_strided_slice %167 {offsets = [0, 0], sizes = [1, 16], strides = [1, 1]} : vector<1x128xf32> to vector<1x16xf32>
    %178 = vector.extract_strided_slice %167 {offsets = [0, 16], sizes = [1, 16], strides = [1, 1]} : vector<1x128xf32> to vector<1x16xf32>
    %179 = vector.extract_strided_slice %167 {offsets = [0, 32], sizes = [1, 16], strides = [1, 1]} : vector<1x128xf32> to vector<1x16xf32>
    %180 = vector.extract_strided_slice %167 {offsets = [0, 48], sizes = [1, 16], strides = [1, 1]} : vector<1x128xf32> to vector<1x16xf32>
    %181 = vector.extract_strided_slice %167 {offsets = [0, 64], sizes = [1, 16], strides = [1, 1]} : vector<1x128xf32> to vector<1x16xf32>
    %182 = vector.extract_strided_slice %167 {offsets = [0, 80], sizes = [1, 16], strides = [1, 1]} : vector<1x128xf32> to vector<1x16xf32>
    %183 = vector.extract_strided_slice %167 {offsets = [0, 96], sizes = [1, 16], strides = [1, 1]} : vector<1x128xf32> to vector<1x16xf32>
    %184 = vector.extract_strided_slice %167 {offsets = [0, 112], sizes = [1, 16], strides = [1, 1]} : vector<1x128xf32> to vector<1x16xf32>
    %185 = tpu.concatenate %177, %178, %179, %180, %181, %182, %183, %184 in 0 : vector<1x16xf32>, vector<1x16xf32>, vector<1x16xf32>, vector<1x16xf32>, vector<1x16xf32>, vector<1x16xf32>, vector<1x16xf32>, vector<1x16xf32> -> vector<8x16xf32>
    %186 = arith.addf %18, %176 : vector<8x16xf32>
    %c0_51 = arith.constant 0 : index
    %c0_52 = arith.constant 0 : index
    %187 = arith.index_cast %10 : i32 to index
    %c0_53 = arith.constant 0 : index
    %188 = vector.load %arg3[%c0_51, %c0_52, %187, %c0_53] : memref<1x2x16x16xf32, #tpu.memory_space<vmem>>, vector<1x1x8x16xf32>
    %189 = vector.shape_cast %188 : vector<1x1x8x16xf32> to vector<8x16xf32>
    %190 = vector.shape_cast %186 : vector<8x16xf32> to vector<1x1x8x16xf32>
    tpu.vector_store %arg3[%c0_51, %c0_52, %187, %c0_53], %190 {strides = array<i32>} : memref<1x2x16x16xf32, #tpu.memory_space<vmem>>, vector<1x1x8x16xf32>,
    %191 = arith.addf %20, %185 : vector<8x16xf32>
    %c0_54 = arith.constant 0 : index
    %c1_55 = arith.constant 1 : index
    %192 = arith.index_cast %10 : i32 to index
    %c0_56 = arith.constant 0 : index
    %193 = vector.load %arg3[%c0_54, %c1_55, %192, %c0_56] : memref<1x2x16x16xf32, #tpu.memory_space<vmem>>, vector<1x1x8x16xf32>
    %194 = vector.shape_cast %193 : vector<1x1x8x16xf32> to vector<8x16xf32>
    %195 = vector.shape_cast %191 : vector<8x16xf32> to vector<1x1x8x16xf32>
    tpu.vector_store %arg3[%c0_54, %c1_55, %192, %c0_56], %195 {strides = array<i32>} : memref<1x2x16x16xf32, #tpu.memory_space<vmem>>, vector<1x1x8x16xf32>,
    %c1_i32 = arith.constant 1 : i32
    %c8_i32_57 = arith.constant 8 : i32
    %196 = arith.muli %c1_i32, %c8_i32_57 : i32
    %197 = tpu.assume_multiple %196, 8 : i32
    %c0_58 = arith.constant 0 : index
    %c0_59 = arith.constant 0 : index
    %198 = arith.index_cast %197 : i32 to index
    %c0_60 = arith.constant 0 : index
    %199 = vector.load %arg1[%c0_58, %c0_59, %198, %c0_60] : memref<1x2x16x16xf32, #tpu.memory_space<vmem>>, vector<1x1x8x16xf32>
    %200 = vector.shape_cast %199 : vector<1x1x8x16xf32> to vector<8x16xf32>
    %c0_61 = arith.constant 0 : index
    %c1_62 = arith.constant 1 : index
    %201 = arith.index_cast %197 : i32 to index
    %c0_63 = arith.constant 0 : index
    %202 = vector.load %arg1[%c0_61, %c1_62, %201, %c0_63] : memref<1x2x16x16xf32, #tpu.memory_space<vmem>>, vector<1x1x8x16xf32>
    %203 = vector.shape_cast %202 : vector<1x1x8x16xf32> to vector<8x16xf32>
    %cst_64 = arith.constant 6.250000e-02 : f32
    %204 = vector.broadcast %cst_64 : f32 to vector<8x16xf32>
    %205 = arith.mulf %200, %204 : vector<8x16xf32>
    %cst_65 = arith.constant 6.250000e-02 : f32
    %206 = vector.broadcast %cst_65 : f32 to vector<8x16xf32>
    %207 = arith.mulf %203, %206 : vector<8x16xf32>
    %c0_66 = arith.constant 0 : index
    %c0_67 = arith.constant 0 : index
    %208 = arith.index_cast %197 : i32 to index
    %c0_68 = arith.constant 0 : index
    %209 = vector.load %arg2[%c0_66, %c0_67, %208, %c0_68] : memref<1x2x16x16xf32, #tpu.memory_space<vmem>>, vector<1x1x8x16xf32>
    %210 = vector.shape_cast %209 : vector<1x1x8x16xf32> to vector<8x16xf32>
    %211 = arith.addf %210, %205 : vector<8x16xf32>
    %c0_69 = arith.constant 0 : index
    %c1_70 = arith.constant 1 : index
    %212 = arith.index_cast %197 : i32 to index
    %c0_71 = arith.constant 0 : index
    %213 = vector.load %arg2[%c0_69, %c1_70, %212, %c0_71] : memref<1x2x16x16xf32, #tpu.memory_space<vmem>>, vector<1x1x8x16xf32>
    %214 = vector.shape_cast %213 : vector<1x1x8x16xf32> to vector<8x16xf32>
    %215 = arith.addf %214, %207 : vector<8x16xf32>
    %216 = vector.extract_strided_slice %211 {offsets = [0, 0], sizes = [1, 16], strides = [1, 1]} : vector<8x16xf32> to vector<1x16xf32>
    %217 = vector.extract_strided_slice %215 {offsets = [0, 0], sizes = [1, 16], strides = [1, 1]} : vector<8x16xf32> to vector<1x16xf32>
    %218 = vector.broadcast %216 : vector<1x16xf32> to vector<16x16xf32>
    %219 = arith.subf %1, %218 : vector<16x16xf32>
    %220 = math.absf %219 : vector<16x16xf32>
    %cst_72 = arith.constant 1.000000e+00 : f32
    %221 = vector.broadcast %cst_72 : f32 to vector<16x16xf32>
    %222 = arith.subf %221, %220 : vector<16x16xf32>
    %cst_73 = arith.constant 0.000000e+00 : f32
    %223 = vector.broadcast %cst_73 : f32 to vector<16x16xf32>
    %224 = arith.maximumf %223, %222 : vector<16x16xf32>
    %225 = vector.broadcast %217 : vector<1x16xf32> to vector<16x16xf32>
    %226 = arith.subf %3, %225 : vector<16x16xf32>
    %227 = math.absf %226 : vector<16x16xf32>
    %cst_74 = arith.constant 1.000000e+00 : f32
    %228 = vector.broadcast %cst_74 : f32 to vector<16x16xf32>
    %229 = arith.subf %228, %227 : vector<16x16xf32>
    %cst_75 = arith.constant 0.000000e+00 : f32
    %230 = vector.broadcast %cst_75 : f32 to vector<16x16xf32>
    %231 = arith.maximumf %230, %229 : vector<16x16xf32>
    %232 = vector.extract_strided_slice %211 {offsets = [1, 0], sizes = [1, 16], strides = [1, 1]} : vector<8x16xf32> to vector<1x16xf32>
    %233 = vector.extract_strided_slice %215 {offsets = [1, 0], sizes = [1, 16], strides = [1, 1]} : vector<8x16xf32> to vector<1x16xf32>
    %234 = vector.broadcast %232 : vector<1x16xf32> to vector<16x16xf32>
    %235 = arith.subf %1, %234 : vector<16x16xf32>
    %236 = math.absf %235 : vector<16x16xf32>
    %cst_76 = arith.constant 1.000000e+00 : f32
    %237 = vector.broadcast %cst_76 : f32 to vector<16x16xf32>
    %238 = arith.subf %237, %236 : vector<16x16xf32>
    %cst_77 = arith.constant 0.000000e+00 : f32
    %239 = vector.broadcast %cst_77 : f32 to vector<16x16xf32>
    %240 = arith.maximumf %239, %238 : vector<16x16xf32>
    %241 = vector.broadcast %233 : vector<1x16xf32> to vector<16x16xf32>
    %242 = arith.subf %3, %241 : vector<16x16xf32>
    %243 = math.absf %242 : vector<16x16xf32>
    %cst_78 = arith.constant 1.000000e+00 : f32
    %244 = vector.broadcast %cst_78 : f32 to vector<16x16xf32>
    %245 = arith.subf %244, %243 : vector<16x16xf32>
    %cst_79 = arith.constant 0.000000e+00 : f32
    %246 = vector.broadcast %cst_79 : f32 to vector<16x16xf32>
    %247 = arith.maximumf %246, %245 : vector<16x16xf32>
    %248 = vector.extract_strided_slice %211 {offsets = [2, 0], sizes = [1, 16], strides = [1, 1]} : vector<8x16xf32> to vector<1x16xf32>
    %249 = vector.extract_strided_slice %215 {offsets = [2, 0], sizes = [1, 16], strides = [1, 1]} : vector<8x16xf32> to vector<1x16xf32>
    %250 = vector.broadcast %248 : vector<1x16xf32> to vector<16x16xf32>
    %251 = arith.subf %1, %250 : vector<16x16xf32>
    %252 = math.absf %251 : vector<16x16xf32>
    %cst_80 = arith.constant 1.000000e+00 : f32
    %253 = vector.broadcast %cst_80 : f32 to vector<16x16xf32>
    %254 = arith.subf %253, %252 : vector<16x16xf32>
    %cst_81 = arith.constant 0.000000e+00 : f32
    %255 = vector.broadcast %cst_81 : f32 to vector<16x16xf32>
    %256 = arith.maximumf %255, %254 : vector<16x16xf32>
    %257 = vector.broadcast %249 : vector<1x16xf32> to vector<16x16xf32>
    %258 = arith.subf %3, %257 : vector<16x16xf32>
    %259 = math.absf %258 : vector<16x16xf32>
    %cst_82 = arith.constant 1.000000e+00 : f32
    %260 = vector.broadcast %cst_82 : f32 to vector<16x16xf32>
    %261 = arith.subf %260, %259 : vector<16x16xf32>
    %cst_83 = arith.constant 0.000000e+00 : f32
    %262 = vector.broadcast %cst_83 : f32 to vector<16x16xf32>
    %263 = arith.maximumf %262, %261 : vector<16x16xf32>
    %264 = vector.extract_strided_slice %211 {offsets = [3, 0], sizes = [1, 16], strides = [1, 1]} : vector<8x16xf32> to vector<1x16xf32>
    %265 = vector.extract_strided_slice %215 {offsets = [3, 0], sizes = [1, 16], strides = [1, 1]} : vector<8x16xf32> to vector<1x16xf32>
    %266 = vector.broadcast %264 : vector<1x16xf32> to vector<16x16xf32>
    %267 = arith.subf %1, %266 : vector<16x16xf32>
    %268 = math.absf %267 : vector<16x16xf32>
    %cst_84 = arith.constant 1.000000e+00 : f32
    %269 = vector.broadcast %cst_84 : f32 to vector<16x16xf32>
    %270 = arith.subf %269, %268 : vector<16x16xf32>
    %cst_85 = arith.constant 0.000000e+00 : f32
    %271 = vector.broadcast %cst_85 : f32 to vector<16x16xf32>
    %272 = arith.maximumf %271, %270 : vector<16x16xf32>
    %273 = vector.broadcast %265 : vector<1x16xf32> to vector<16x16xf32>
    %274 = arith.subf %3, %273 : vector<16x16xf32>
    %275 = math.absf %274 : vector<16x16xf32>
    %cst_86 = arith.constant 1.000000e+00 : f32
    %276 = vector.broadcast %cst_86 : f32 to vector<16x16xf32>
    %277 = arith.subf %276, %275 : vector<16x16xf32>
    %cst_87 = arith.constant 0.000000e+00 : f32
    %278 = vector.broadcast %cst_87 : f32 to vector<16x16xf32>
    %279 = arith.maximumf %278, %277 : vector<16x16xf32>
    %280 = vector.extract_strided_slice %211 {offsets = [4, 0], sizes = [1, 16], strides = [1, 1]} : vector<8x16xf32> to vector<1x16xf32>
    %281 = vector.extract_strided_slice %215 {offsets = [4, 0], sizes = [1, 16], strides = [1, 1]} : vector<8x16xf32> to vector<1x16xf32>
    %282 = vector.broadcast %280 : vector<1x16xf32> to vector<16x16xf32>
    %283 = arith.subf %1, %282 : vector<16x16xf32>
    %284 = math.absf %283 : vector<16x16xf32>
    %cst_88 = arith.constant 1.000000e+00 : f32
    %285 = vector.broadcast %cst_88 : f32 to vector<16x16xf32>
    %286 = arith.subf %285, %284 : vector<16x16xf32>
    %cst_89 = arith.constant 0.000000e+00 : f32
    %287 = vector.broadcast %cst_89 : f32 to vector<16x16xf32>
    %288 = arith.maximumf %287, %286 : vector<16x16xf32>
    %289 = vector.broadcast %281 : vector<1x16xf32> to vector<16x16xf32>
    %290 = arith.subf %3, %289 : vector<16x16xf32>
    %291 = math.absf %290 : vector<16x16xf32>
    %cst_90 = arith.constant 1.000000e+00 : f32
    %292 = vector.broadcast %cst_90 : f32 to vector<16x16xf32>
    %293 = arith.subf %292, %291 : vector<16x16xf32>
    %cst_91 = arith.constant 0.000000e+00 : f32
    %294 = vector.broadcast %cst_91 : f32 to vector<16x16xf32>
    %295 = arith.maximumf %294, %293 : vector<16x16xf32>
    %296 = vector.extract_strided_slice %211 {offsets = [5, 0], sizes = [1, 16], strides = [1, 1]} : vector<8x16xf32> to vector<1x16xf32>
    %297 = vector.extract_strided_slice %215 {offsets = [5, 0], sizes = [1, 16], strides = [1, 1]} : vector<8x16xf32> to vector<1x16xf32>
    %298 = vector.broadcast %296 : vector<1x16xf32> to vector<16x16xf32>
    %299 = arith.subf %1, %298 : vector<16x16xf32>
    %300 = math.absf %299 : vector<16x16xf32>
    %cst_92 = arith.constant 1.000000e+00 : f32
    %301 = vector.broadcast %cst_92 : f32 to vector<16x16xf32>
    %302 = arith.subf %301, %300 : vector<16x16xf32>
    %cst_93 = arith.constant 0.000000e+00 : f32
    %303 = vector.broadcast %cst_93 : f32 to vector<16x16xf32>
    %304 = arith.maximumf %303, %302 : vector<16x16xf32>
    %305 = vector.broadcast %297 : vector<1x16xf32> to vector<16x16xf32>
    %306 = arith.subf %3, %305 : vector<16x16xf32>
    %307 = math.absf %306 : vector<16x16xf32>
    %cst_94 = arith.constant 1.000000e+00 : f32
    %308 = vector.broadcast %cst_94 : f32 to vector<16x16xf32>
    %309 = arith.subf %308, %307 : vector<16x16xf32>
    %cst_95 = arith.constant 0.000000e+00 : f32
    %310 = vector.broadcast %cst_95 : f32 to vector<16x16xf32>
    %311 = arith.maximumf %310, %309 : vector<16x16xf32>
    %312 = vector.extract_strided_slice %211 {offsets = [6, 0], sizes = [1, 16], strides = [1, 1]} : vector<8x16xf32> to vector<1x16xf32>
    %313 = vector.extract_strided_slice %215 {offsets = [6, 0], sizes = [1, 16], strides = [1, 1]} : vector<8x16xf32> to vector<1x16xf32>
    %314 = vector.broadcast %312 : vector<1x16xf32> to vector<16x16xf32>
    %315 = arith.subf %1, %314 : vector<16x16xf32>
    %316 = math.absf %315 : vector<16x16xf32>
    %cst_96 = arith.constant 1.000000e+00 : f32
    %317 = vector.broadcast %cst_96 : f32 to vector<16x16xf32>
    %318 = arith.subf %317, %316 : vector<16x16xf32>
    %cst_97 = arith.constant 0.000000e+00 : f32
    %319 = vector.broadcast %cst_97 : f32 to vector<16x16xf32>
    %320 = arith.maximumf %319, %318 : vector<16x16xf32>
    %321 = vector.broadcast %313 : vector<1x16xf32> to vector<16x16xf32>
    %322 = arith.subf %3, %321 : vector<16x16xf32>
    %323 = math.absf %322 : vector<16x16xf32>
    %cst_98 = arith.constant 1.000000e+00 : f32
    %324 = vector.broadcast %cst_98 : f32 to vector<16x16xf32>
    %325 = arith.subf %324, %323 : vector<16x16xf32>
    %cst_99 = arith.constant 0.000000e+00 : f32
    %326 = vector.broadcast %cst_99 : f32 to vector<16x16xf32>
    %327 = arith.maximumf %326, %325 : vector<16x16xf32>
    %328 = vector.extract_strided_slice %211 {offsets = [7, 0], sizes = [1, 16], strides = [1, 1]} : vector<8x16xf32> to vector<1x16xf32>
    %329 = vector.extract_strided_slice %215 {offsets = [7, 0], sizes = [1, 16], strides = [1, 1]} : vector<8x16xf32> to vector<1x16xf32>
    %330 = vector.broadcast %328 : vector<1x16xf32> to vector<16x16xf32>
    %331 = arith.subf %1, %330 : vector<16x16xf32>
    %332 = math.absf %331 : vector<16x16xf32>
    %cst_100 = arith.constant 1.000000e+00 : f32
    %333 = vector.broadcast %cst_100 : f32 to vector<16x16xf32>
    %334 = arith.subf %333, %332 : vector<16x16xf32>
    %cst_101 = arith.constant 0.000000e+00 : f32
    %335 = vector.broadcast %cst_101 : f32 to vector<16x16xf32>
    %336 = arith.maximumf %335, %334 : vector<16x16xf32>
    %337 = vector.broadcast %329 : vector<1x16xf32> to vector<16x16xf32>
    %338 = arith.subf %3, %337 : vector<16x16xf32>
    %339 = math.absf %338 : vector<16x16xf32>
    %cst_102 = arith.constant 1.000000e+00 : f32
    %340 = vector.broadcast %cst_102 : f32 to vector<16x16xf32>
    %341 = arith.subf %340, %339 : vector<16x16xf32>
    %cst_103 = arith.constant 0.000000e+00 : f32
    %342 = vector.broadcast %cst_103 : f32 to vector<16x16xf32>
    %343 = arith.maximumf %342, %341 : vector<16x16xf32>
    %344 = tpu.concatenate %224, %240, %256, %272, %288, %304, %320, %336 in 1 : vector<16x16xf32>, vector<16x16xf32>, vector<16x16xf32>, vector<16x16xf32>, vector<16x16xf32>, vector<16x16xf32>, vector<16x16xf32>, vector<16x16xf32> -> vector<16x128xf32>
    %345 = tpu.concatenate %231, %247, %263, %279, %295, %311, %327, %343 in 1 : vector<16x16xf32>, vector<16x16xf32>, vector<16x16xf32>, vector<16x16xf32>, vector<16x16xf32>, vector<16x16xf32>, vector<16x16xf32>, vector<16x16xf32> -> vector<16x128xf32>
    %cst_104 = arith.constant dense<0.000000e+00> : vector<32x128xf32>
    %346 = tpu.matmul %8, %345, %cst_104 {dimension_numbers = #tpu.dot_dimension_numbers<[1], [0], [0], [1], [0, 0, 1, 1], [], []>} : vector<32x16xf32>, vector<16x128xf32>, vector<32x128xf32> -> vector<32x128xf32>
    %347 = vector.extract_strided_slice %346 {offsets = [0, 0], sizes = [16, 128], strides = [1, 1]} : vector<32x128xf32> to vector<16x128xf32>
    %348 = arith.mulf %344, %347 : vector<16x128xf32>
    %cst_105 = arith.constant dense<0.000000e+00> : vector<128xf32>
    %349 = vector.multi_reduction <add>, %348, %cst_105 [0] : vector<16x128xf32> to vector<128xf32>
    %350 = vector.shape_cast %349 : vector<128xf32> to vector<1x128xf32>
    %351 = vector.extract_strided_slice %346 {offsets = [16, 0], sizes = [16, 128], strides = [1, 1]} : vector<32x128xf32> to vector<16x128xf32>
    %352 = arith.mulf %344, %351 : vector<16x128xf32>
    %cst_106 = arith.constant dense<0.000000e+00> : vector<128xf32>
    %353 = vector.multi_reduction <add>, %352, %cst_106 [0] : vector<16x128xf32> to vector<128xf32>
    %354 = vector.shape_cast %353 : vector<128xf32> to vector<1x128xf32>
    %355 = vector.extract_strided_slice %350 {offsets = [0, 0], sizes = [1, 16], strides = [1, 1]} : vector<1x128xf32> to vector<1x16xf32>
    %356 = vector.extract_strided_slice %350 {offsets = [0, 16], sizes = [1, 16], strides = [1, 1]} : vector<1x128xf32> to vector<1x16xf32>
    %357 = vector.extract_strided_slice %350 {offsets = [0, 32], sizes = [1, 16], strides = [1, 1]} : vector<1x128xf32> to vector<1x16xf32>
    %358 = vector.extract_strided_slice %350 {offsets = [0, 48], sizes = [1, 16], strides = [1, 1]} : vector<1x128xf32> to vector<1x16xf32>
    %359 = vector.extract_strided_slice %350 {offsets = [0, 64], sizes = [1, 16], strides = [1, 1]} : vector<1x128xf32> to vector<1x16xf32>
    %360 = vector.extract_strided_slice %350 {offsets = [0, 80], sizes = [1, 16], strides = [1, 1]} : vector<1x128xf32> to vector<1x16xf32>
    %361 = vector.extract_strided_slice %350 {offsets = [0, 96], sizes = [1, 16], strides = [1, 1]} : vector<1x128xf32> to vector<1x16xf32>
    %362 = vector.extract_strided_slice %350 {offsets = [0, 112], sizes = [1, 16], strides = [1, 1]} : vector<1x128xf32> to vector<1x16xf32>
    %363 = tpu.concatenate %355, %356, %357, %358, %359, %360, %361, %362 in 0 : vector<1x16xf32>, vector<1x16xf32>, vector<1x16xf32>, vector<1x16xf32>, vector<1x16xf32>, vector<1x16xf32>, vector<1x16xf32>, vector<1x16xf32> -> vector<8x16xf32>
    %364 = vector.extract_strided_slice %354 {offsets = [0, 0], sizes = [1, 16], strides = [1, 1]} : vector<1x128xf32> to vector<1x16xf32>
    %365 = vector.extract_strided_slice %354 {offsets = [0, 16], sizes = [1, 16], strides = [1, 1]} : vector<1x128xf32> to vector<1x16xf32>
    %366 = vector.extract_strided_slice %354 {offsets = [0, 32], sizes = [1, 16], strides = [1, 1]} : vector<1x128xf32> to vector<1x16xf32>
    %367 = vector.extract_strided_slice %354 {offsets = [0, 48], sizes = [1, 16], strides = [1, 1]} : vector<1x128xf32> to vector<1x16xf32>
    %368 = vector.extract_strided_slice %354 {offsets = [0, 64], sizes = [1, 16], strides = [1, 1]} : vector<1x128xf32> to vector<1x16xf32>
    %369 = vector.extract_strided_slice %354 {offsets = [0, 80], sizes = [1, 16], strides = [1, 1]} : vector<1x128xf32> to vector<1x16xf32>
    %370 = vector.extract_strided_slice %354 {offsets = [0, 96], sizes = [1, 16], strides = [1, 1]} : vector<1x128xf32> to vector<1x16xf32>
    %371 = vector.extract_strided_slice %354 {offsets = [0, 112], sizes = [1, 16], strides = [1, 1]} : vector<1x128xf32> to vector<1x16xf32>
    %372 = tpu.concatenate %364, %365, %366, %367, %368, %369, %370, %371 in 0 : vector<1x16xf32>, vector<1x16xf32>, vector<1x16xf32>, vector<1x16xf32>, vector<1x16xf32>, vector<1x16xf32>, vector<1x16xf32>, vector<1x16xf32> -> vector<8x16xf32>
    %373 = arith.addf %205, %363 : vector<8x16xf32>
    %c0_107 = arith.constant 0 : index
    %c0_108 = arith.constant 0 : index
    %374 = arith.index_cast %197 : i32 to index
    %c0_109 = arith.constant 0 : index
    %375 = vector.load %arg3[%c0_107, %c0_108, %374, %c0_109] : memref<1x2x16x16xf32, #tpu.memory_space<vmem>>, vector<1x1x8x16xf32>
    %376 = vector.shape_cast %375 : vector<1x1x8x16xf32> to vector<8x16xf32>
    %377 = vector.shape_cast %373 : vector<8x16xf32> to vector<1x1x8x16xf32>
    tpu.vector_store %arg3[%c0_107, %c0_108, %374, %c0_109], %377 {strides = array<i32>} : memref<1x2x16x16xf32, #tpu.memory_space<vmem>>, vector<1x1x8x16xf32>,
    %378 = arith.addf %207, %372 : vector<8x16xf32>
    %c0_110 = arith.constant 0 : index
    %c1_111 = arith.constant 1 : index
    %379 = arith.index_cast %197 : i32 to index
    %c0_112 = arith.constant 0 : index
    %380 = vector.load %arg3[%c0_110, %c1_111, %379, %c0_112] : memref<1x2x16x16xf32, #tpu.memory_space<vmem>>, vector<1x1x8x16xf32>
    %381 = vector.shape_cast %380 : vector<1x1x8x16xf32> to vector<8x16xf32>
    %382 = vector.shape_cast %378 : vector<8x16xf32> to vector<1x1x8x16xf32>
    tpu.vector_store %arg3[%c0_110, %c1_111, %379, %c0_112], %382 {strides = array<i32>} : memref<1x2x16x16xf32, #tpu.memory_space<vmem>>, vector<1x1x8x16xf32>,
    %c2_i32 = arith.constant 2 : i32
    %c0_113 = arith.constant 0 : index
    %c0_114 = arith.constant 0 : index
    %c0_115 = arith.constant 0 : index
    %c0_116 = arith.constant 0 : index
    %383 = vector.load %arg3[%c0_113, %c0_114, %c0_115, %c0_116] : memref<1x2x16x16xf32, #tpu.memory_space<vmem>>, vector<1x2x16x16xf32>
    %384 = vector.shape_cast %383 : vector<1x2x16x16xf32> to vector<2x16x16xf32>
    %385 = vector.shape_cast %384 : vector<2x16x16xf32> to vector<32x16xf32>
    %c0_i32_117 = arith.constant 0 : i32
    %c8_i32_118 = arith.constant 8 : i32
    %386 = arith.muli %c0_i32_117, %c8_i32_118 : i32
    %387 = tpu.assume_multiple %386, 8 : i32
    %c0_119 = arith.constant 0 : index
    %c0_120 = arith.constant 0 : index
    %388 = arith.index_cast %387 : i32 to index
    %c0_121 = arith.constant 0 : index
    %389 = vector.load %arg3[%c0_119, %c0_120, %388, %c0_121] : memref<1x2x16x16xf32, #tpu.memory_space<vmem>>, vector<1x1x8x16xf32>
    %390 = vector.shape_cast %389 : vector<1x1x8x16xf32> to vector<8x16xf32>
    %c0_122 = arith.constant 0 : index
    %c1_123 = arith.constant 1 : index
    %391 = arith.index_cast %387 : i32 to index
    %c0_124 = arith.constant 0 : index
    %392 = vector.load %arg3[%c0_122, %c1_123, %391, %c0_124] : memref<1x2x16x16xf32, #tpu.memory_space<vmem>>, vector<1x1x8x16xf32>
    %393 = vector.shape_cast %392 : vector<1x1x8x16xf32> to vector<8x16xf32>
    %c0_125 = arith.constant 0 : index
    %c0_126 = arith.constant 0 : index
    %394 = arith.index_cast %387 : i32 to index
    %c0_127 = arith.constant 0 : index
    %395 = vector.load %arg2[%c0_125, %c0_126, %394, %c0_127] : memref<1x2x16x16xf32, #tpu.memory_space<vmem>>, vector<1x1x8x16xf32>
    %396 = vector.shape_cast %395 : vector<1x1x8x16xf32> to vector<8x16xf32>
    %397 = arith.addf %396, %390 : vector<8x16xf32>
    %c0_128 = arith.constant 0 : index
    %c1_129 = arith.constant 1 : index
    %398 = arith.index_cast %387 : i32 to index
    %c0_130 = arith.constant 0 : index
    %399 = vector.load %arg2[%c0_128, %c1_129, %398, %c0_130] : memref<1x2x16x16xf32, #tpu.memory_space<vmem>>, vector<1x1x8x16xf32>
    %400 = vector.shape_cast %399 : vector<1x1x8x16xf32> to vector<8x16xf32>
    %401 = arith.addf %400, %393 : vector<8x16xf32>
    %402 = vector.extract_strided_slice %397 {offsets = [0, 0], sizes = [1, 16], strides = [1, 1]} : vector<8x16xf32> to vector<1x16xf32>
    %403 = vector.extract_strided_slice %401 {offsets = [0, 0], sizes = [1, 16], strides = [1, 1]} : vector<8x16xf32> to vector<1x16xf32>
    %404 = vector.broadcast %402 : vector<1x16xf32> to vector<16x16xf32>
    %405 = arith.subf %1, %404 : vector<16x16xf32>
    %406 = math.absf %405 : vector<16x16xf32>
    %cst_131 = arith.constant 1.000000e+00 : f32
    %407 = vector.broadcast %cst_131 : f32 to vector<16x16xf32>
    %408 = arith.subf %407, %406 : vector<16x16xf32>
    %cst_132 = arith.constant 0.000000e+00 : f32
    %409 = vector.broadcast %cst_132 : f32 to vector<16x16xf32>
    %410 = arith.maximumf %409, %408 : vector<16x16xf32>
    %411 = vector.broadcast %403 : vector<1x16xf32> to vector<16x16xf32>
    %412 = arith.subf %3, %411 : vector<16x16xf32>
    %413 = math.absf %412 : vector<16x16xf32>
    %cst_133 = arith.constant 1.000000e+00 : f32
    %414 = vector.broadcast %cst_133 : f32 to vector<16x16xf32>
    %415 = arith.subf %414, %413 : vector<16x16xf32>
    %cst_134 = arith.constant 0.000000e+00 : f32
    %416 = vector.broadcast %cst_134 : f32 to vector<16x16xf32>
    %417 = arith.maximumf %416, %415 : vector<16x16xf32>
    %418 = vector.extract_strided_slice %397 {offsets = [1, 0], sizes = [1, 16], strides = [1, 1]} : vector<8x16xf32> to vector<1x16xf32>
    %419 = vector.extract_strided_slice %401 {offsets = [1, 0], sizes = [1, 16], strides = [1, 1]} : vector<8x16xf32> to vector<1x16xf32>
    %420 = vector.broadcast %418 : vector<1x16xf32> to vector<16x16xf32>
    %421 = arith.subf %1, %420 : vector<16x16xf32>
    %422 = math.absf %421 : vector<16x16xf32>
    %cst_135 = arith.constant 1.000000e+00 : f32
    %423 = vector.broadcast %cst_135 : f32 to vector<16x16xf32>
    %424 = arith.subf %423, %422 : vector<16x16xf32>
    %cst_136 = arith.constant 0.000000e+00 : f32
    %425 = vector.broadcast %cst_136 : f32 to vector<16x16xf32>
    %426 = arith.maximumf %425, %424 : vector<16x16xf32>
    %427 = vector.broadcast %419 : vector<1x16xf32> to vector<16x16xf32>
    %428 = arith.subf %3, %427 : vector<16x16xf32>
    %429 = math.absf %428 : vector<16x16xf32>
    %cst_137 = arith.constant 1.000000e+00 : f32
    %430 = vector.broadcast %cst_137 : f32 to vector<16x16xf32>
    %431 = arith.subf %430, %429 : vector<16x16xf32>
    %cst_138 = arith.constant 0.000000e+00 : f32
    %432 = vector.broadcast %cst_138 : f32 to vector<16x16xf32>
    %433 = arith.maximumf %432, %431 : vector<16x16xf32>
    %434 = vector.extract_strided_slice %397 {offsets = [2, 0], sizes = [1, 16], strides = [1, 1]} : vector<8x16xf32> to vector<1x16xf32>
    %435 = vector.extract_strided_slice %401 {offsets = [2, 0], sizes = [1, 16], strides = [1, 1]} : vector<8x16xf32> to vector<1x16xf32>
    %436 = vector.broadcast %434 : vector<1x16xf32> to vector<16x16xf32>
    %437 = arith.subf %1, %436 : vector<16x16xf32>
    %438 = math.absf %437 : vector<16x16xf32>
    %cst_139 = arith.constant 1.000000e+00 : f32
    %439 = vector.broadcast %cst_139 : f32 to vector<16x16xf32>
    %440 = arith.subf %439, %438 : vector<16x16xf32>
    %cst_140 = arith.constant 0.000000e+00 : f32
    %441 = vector.broadcast %cst_140 : f32 to vector<16x16xf32>
    %442 = arith.maximumf %441, %440 : vector<16x16xf32>
    %443 = vector.broadcast %435 : vector<1x16xf32> to vector<16x16xf32>
    %444 = arith.subf %3, %443 : vector<16x16xf32>
    %445 = math.absf %444 : vector<16x16xf32>
    %cst_141 = arith.constant 1.000000e+00 : f32
    %446 = vector.broadcast %cst_141 : f32 to vector<16x16xf32>
    %447 = arith.subf %446, %445 : vector<16x16xf32>
    %cst_142 = arith.constant 0.000000e+00 : f32
    %448 = vector.broadcast %cst_142 : f32 to vector<16x16xf32>
    %449 = arith.maximumf %448, %447 : vector<16x16xf32>
    %450 = vector.extract_strided_slice %397 {offsets = [3, 0], sizes = [1, 16], strides = [1, 1]} : vector<8x16xf32> to vector<1x16xf32>
    %451 = vector.extract_strided_slice %401 {offsets = [3, 0], sizes = [1, 16], strides = [1, 1]} : vector<8x16xf32> to vector<1x16xf32>
    %452 = vector.broadcast %450 : vector<1x16xf32> to vector<16x16xf32>
    %453 = arith.subf %1, %452 : vector<16x16xf32>
    %454 = math.absf %453 : vector<16x16xf32>
    %cst_143 = arith.constant 1.000000e+00 : f32
    %455 = vector.broadcast %cst_143 : f32 to vector<16x16xf32>
    %456 = arith.subf %455, %454 : vector<16x16xf32>
    %cst_144 = arith.constant 0.000000e+00 : f32
    %457 = vector.broadcast %cst_144 : f32 to vector<16x16xf32>
    %458 = arith.maximumf %457, %456 : vector<16x16xf32>
    %459 = vector.broadcast %451 : vector<1x16xf32> to vector<16x16xf32>
    %460 = arith.subf %3, %459 : vector<16x16xf32>
    %461 = math.absf %460 : vector<16x16xf32>
    %cst_145 = arith.constant 1.000000e+00 : f32
    %462 = vector.broadcast %cst_145 : f32 to vector<16x16xf32>
    %463 = arith.subf %462, %461 : vector<16x16xf32>
    %cst_146 = arith.constant 0.000000e+00 : f32
    %464 = vector.broadcast %cst_146 : f32 to vector<16x16xf32>
    %465 = arith.maximumf %464, %463 : vector<16x16xf32>
    %466 = vector.extract_strided_slice %397 {offsets = [4, 0], sizes = [1, 16], strides = [1, 1]} : vector<8x16xf32> to vector<1x16xf32>
    %467 = vector.extract_strided_slice %401 {offsets = [4, 0], sizes = [1, 16], strides = [1, 1]} : vector<8x16xf32> to vector<1x16xf32>
    %468 = vector.broadcast %466 : vector<1x16xf32> to vector<16x16xf32>
    %469 = arith.subf %1, %468 : vector<16x16xf32>
    %470 = math.absf %469 : vector<16x16xf32>
    %cst_147 = arith.constant 1.000000e+00 : f32
    %471 = vector.broadcast %cst_147 : f32 to vector<16x16xf32>
    %472 = arith.subf %471, %470 : vector<16x16xf32>
    %cst_148 = arith.constant 0.000000e+00 : f32
    %473 = vector.broadcast %cst_148 : f32 to vector<16x16xf32>
    %474 = arith.maximumf %473, %472 : vector<16x16xf32>
    %475 = vector.broadcast %467 : vector<1x16xf32> to vector<16x16xf32>
    %476 = arith.subf %3, %475 : vector<16x16xf32>
    %477 = math.absf %476 : vector<16x16xf32>
    %cst_149 = arith.constant 1.000000e+00 : f32
    %478 = vector.broadcast %cst_149 : f32 to vector<16x16xf32>
    %479 = arith.subf %478, %477 : vector<16x16xf32>
    %cst_150 = arith.constant 0.000000e+00 : f32
    %480 = vector.broadcast %cst_150 : f32 to vector<16x16xf32>
    %481 = arith.maximumf %480, %479 : vector<16x16xf32>
    %482 = vector.extract_strided_slice %397 {offsets = [5, 0], sizes = [1, 16], strides = [1, 1]} : vector<8x16xf32> to vector<1x16xf32>
    %483 = vector.extract_strided_slice %401 {offsets = [5, 0], sizes = [1, 16], strides = [1, 1]} : vector<8x16xf32> to vector<1x16xf32>
    %484 = vector.broadcast %482 : vector<1x16xf32> to vector<16x16xf32>
    %485 = arith.subf %1, %484 : vector<16x16xf32>
    %486 = math.absf %485 : vector<16x16xf32>
    %cst_151 = arith.constant 1.000000e+00 : f32
    %487 = vector.broadcast %cst_151 : f32 to vector<16x16xf32>
    %488 = arith.subf %487, %486 : vector<16x16xf32>
    %cst_152 = arith.constant 0.000000e+00 : f32
    %489 = vector.broadcast %cst_152 : f32 to vector<16x16xf32>
    %490 = arith.maximumf %489, %488 : vector<16x16xf32>
    %491 = vector.broadcast %483 : vector<1x16xf32> to vector<16x16xf32>
    %492 = arith.subf %3, %491 : vector<16x16xf32>
    %493 = math.absf %492 : vector<16x16xf32>
    %cst_153 = arith.constant 1.000000e+00 : f32
    %494 = vector.broadcast %cst_153 : f32 to vector<16x16xf32>
    %495 = arith.subf %494, %493 : vector<16x16xf32>
    %cst_154 = arith.constant 0.000000e+00 : f32
    %496 = vector.broadcast %cst_154 : f32 to vector<16x16xf32>
    %497 = arith.maximumf %496, %495 : vector<16x16xf32>
    %498 = vector.extract_strided_slice %397 {offsets = [6, 0], sizes = [1, 16], strides = [1, 1]} : vector<8x16xf32> to vector<1x16xf32>
    %499 = vector.extract_strided_slice %401 {offsets = [6, 0], sizes = [1, 16], strides = [1, 1]} : vector<8x16xf32> to vector<1x16xf32>
    %500 = vector.broadcast %498 : vector<1x16xf32> to vector<16x16xf32>
    %501 = arith.subf %1, %500 : vector<16x16xf32>
    %502 = math.absf %501 : vector<16x16xf32>
    %cst_155 = arith.constant 1.000000e+00 : f32
    %503 = vector.broadcast %cst_155 : f32 to vector<16x16xf32>
    %504 = arith.subf %503, %502 : vector<16x16xf32>
    %cst_156 = arith.constant 0.000000e+00 : f32
    %505 = vector.broadcast %cst_156 : f32 to vector<16x16xf32>
    %506 = arith.maximumf %505, %504 : vector<16x16xf32>
    %507 = vector.broadcast %499 : vector<1x16xf32> to vector<16x16xf32>
    %508 = arith.subf %3, %507 : vector<16x16xf32>
    %509 = math.absf %508 : vector<16x16xf32>
    %cst_157 = arith.constant 1.000000e+00 : f32
    %510 = vector.broadcast %cst_157 : f32 to vector<16x16xf32>
    %511 = arith.subf %510, %509 : vector<16x16xf32>
    %cst_158 = arith.constant 0.000000e+00 : f32
    %512 = vector.broadcast %cst_158 : f32 to vector<16x16xf32>
    %513 = arith.maximumf %512, %511 : vector<16x16xf32>
    %514 = vector.extract_strided_slice %397 {offsets = [7, 0], sizes = [1, 16], strides = [1, 1]} : vector<8x16xf32> to vector<1x16xf32>
    %515 = vector.extract_strided_slice %401 {offsets = [7, 0], sizes = [1, 16], strides = [1, 1]} : vector<8x16xf32> to vector<1x16xf32>
    %516 = vector.broadcast %514 : vector<1x16xf32> to vector<16x16xf32>
    %517 = arith.subf %1, %516 : vector<16x16xf32>
    %518 = math.absf %517 : vector<16x16xf32>
    %cst_159 = arith.constant 1.000000e+00 : f32
    %519 = vector.broadcast %cst_159 : f32 to vector<16x16xf32>
    %520 = arith.subf %519, %518 : vector<16x16xf32>
    %cst_160 = arith.constant 0.000000e+00 : f32
    %521 = vector.broadcast %cst_160 : f32 to vector<16x16xf32>
    %522 = arith.maximumf %521, %520 : vector<16x16xf32>
    %523 = vector.broadcast %515 : vector<1x16xf32> to vector<16x16xf32>
    %524 = arith.subf %3, %523 : vector<16x16xf32>
    %525 = math.absf %524 : vector<16x16xf32>
    %cst_161 = arith.constant 1.000000e+00 : f32
    %526 = vector.broadcast %cst_161 : f32 to vector<16x16xf32>
    %527 = arith.subf %526, %525 : vector<16x16xf32>
    %cst_162 = arith.constant 0.000000e+00 : f32
    %528 = vector.broadcast %cst_162 : f32 to vector<16x16xf32>
    %529 = arith.maximumf %528, %527 : vector<16x16xf32>
    %530 = tpu.concatenate %410, %426, %442, %458, %474, %490, %506, %522 in 1 : vector<16x16xf32>, vector<16x16xf32>, vector<16x16xf32>, vector<16x16xf32>, vector<16x16xf32>, vector<16x16xf32>, vector<16x16xf32>, vector<16x16xf32> -> vector<16x128xf32>
    %531 = tpu.concatenate %417, %433, %449, %465, %481, %497, %513, %529 in 1 : vector<16x16xf32>, vector<16x16xf32>, vector<16x16xf32>, vector<16x16xf32>, vector<16x16xf32>, vector<16x16xf32>, vector<16x16xf32>, vector<16x16xf32> -> vector<16x128xf32>
    %cst_163 = arith.constant dense<0.000000e+00> : vector<32x128xf32>
    %532 = tpu.matmul %385, %531, %cst_163 {dimension_numbers = #tpu.dot_dimension_numbers<[1], [0], [0], [1], [0, 0, 1, 1], [], []>} : vector<32x16xf32>, vector<16x128xf32>, vector<32x128xf32> -> vector<32x128xf32>
    %533 = vector.extract_strided_slice %532 {offsets = [0, 0], sizes = [16, 128], strides = [1, 1]} : vector<32x128xf32> to vector<16x128xf32>
    %534 = arith.mulf %530, %533 : vector<16x128xf32>
    %cst_164 = arith.constant dense<0.000000e+00> : vector<128xf32>
    %535 = vector.multi_reduction <add>, %534, %cst_164 [0] : vector<16x128xf32> to vector<128xf32>
    %536 = vector.shape_cast %535 : vector<128xf32> to vector<1x128xf32>
    %537 = vector.extract_strided_slice %532 {offsets = [16, 0], sizes = [16, 128], strides = [1, 1]} : vector<32x128xf32> to vector<16x128xf32>
    %538 = arith.mulf %530, %537 : vector<16x128xf32>
    %cst_165 = arith.constant dense<0.000000e+00> : vector<128xf32>
    %539 = vector.multi_reduction <add>, %538, %cst_165 [0] : vector<16x128xf32> to vector<128xf32>
    %540 = vector.shape_cast %539 : vector<128xf32> to vector<1x128xf32>
    %541 = vector.extract_strided_slice %536 {offsets = [0, 0], sizes = [1, 16], strides = [1, 1]} : vector<1x128xf32> to vector<1x16xf32>
    %542 = vector.extract_strided_slice %536 {offsets = [0, 16], sizes = [1, 16], strides = [1, 1]} : vector<1x128xf32> to vector<1x16xf32>
    %543 = vector.extract_strided_slice %536 {offsets = [0, 32], sizes = [1, 16], strides = [1, 1]} : vector<1x128xf32> to vector<1x16xf32>
    %544 = vector.extract_strided_slice %536 {offsets = [0, 48], sizes = [1, 16], strides = [1, 1]} : vector<1x128xf32> to vector<1x16xf32>
    %545 = vector.extract_strided_slice %536 {offsets = [0, 64], sizes = [1, 16], strides = [1, 1]} : vector<1x128xf32> to vector<1x16xf32>
    %546 = vector.extract_strided_slice %536 {offsets = [0, 80], sizes = [1, 16], strides = [1, 1]} : vector<1x128xf32> to vector<1x16xf32>
    %547 = vector.extract_strided_slice %536 {offsets = [0, 96], sizes = [1, 16], strides = [1, 1]} : vector<1x128xf32> to vector<1x16xf32>
    %548 = vector.extract_strided_slice %536 {offsets = [0, 112], sizes = [1, 16], strides = [1, 1]} : vector<1x128xf32> to vector<1x16xf32>
    %549 = tpu.concatenate %541, %542, %543, %544, %545, %546, %547, %548 in 0 : vector<1x16xf32>, vector<1x16xf32>, vector<1x16xf32>, vector<1x16xf32>, vector<1x16xf32>, vector<1x16xf32>, vector<1x16xf32>, vector<1x16xf32> -> vector<8x16xf32>
    %550 = vector.extract_strided_slice %540 {offsets = [0, 0], sizes = [1, 16], strides = [1, 1]} : vector<1x128xf32> to vector<1x16xf32>
    %551 = vector.extract_strided_slice %540 {offsets = [0, 16], sizes = [1, 16], strides = [1, 1]} : vector<1x128xf32> to vector<1x16xf32>
    %552 = vector.extract_strided_slice %540 {offsets = [0, 32], sizes = [1, 16], strides = [1, 1]} : vector<1x128xf32> to vector<1x16xf32>
    %553 = vector.extract_strided_slice %540 {offsets = [0, 48], sizes = [1, 16], strides = [1, 1]} : vector<1x128xf32> to vector<1x16xf32>
    %554 = vector.extract_strided_slice %540 {offsets = [0, 64], sizes = [1, 16], strides = [1, 1]} : vector<1x128xf32> to vector<1x16xf32>
    %555 = vector.extract_strided_slice %540 {offsets = [0, 80], sizes = [1, 16], strides = [1, 1]} : vector<1x128xf32> to vector<1x16xf32>
    %556 = vector.extract_strided_slice %540 {offsets = [0, 96], sizes = [1, 16], strides = [1, 1]} : vector<1x128xf32> to vector<1x16xf32>
    %557 = vector.extract_strided_slice %540 {offsets = [0, 112], sizes = [1, 16], strides = [1, 1]} : vector<1x128xf32> to vector<1x16xf32>
    %558 = tpu.concatenate %550, %551, %552, %553, %554, %555, %556, %557 in 0 : vector<1x16xf32>, vector<1x16xf32>, vector<1x16xf32>, vector<1x16xf32>, vector<1x16xf32>, vector<1x16xf32>, vector<1x16xf32>, vector<1x16xf32> -> vector<8x16xf32>
    %559 = arith.addf %390, %549 : vector<8x16xf32>
    %c0_166 = arith.constant 0 : index
    %c0_167 = arith.constant 0 : index
    %560 = arith.index_cast %387 : i32 to index
    %c0_168 = arith.constant 0 : index
    %561 = vector.load %arg4[%c0_166, %c0_167, %560, %c0_168] : memref<1x2x16x16xf32, #tpu.memory_space<vmem>>, vector<1x1x8x16xf32>
    %562 = vector.shape_cast %561 : vector<1x1x8x16xf32> to vector<8x16xf32>
    %563 = vector.shape_cast %559 : vector<8x16xf32> to vector<1x1x8x16xf32>
    tpu.vector_store %arg4[%c0_166, %c0_167, %560, %c0_168], %563 {strides = array<i32>} : memref<1x2x16x16xf32, #tpu.memory_space<vmem>>, vector<1x1x8x16xf32>,
    %564 = arith.addf %393, %558 : vector<8x16xf32>
    %c0_169 = arith.constant 0 : index
    %c1_170 = arith.constant 1 : index
    %565 = arith.index_cast %387 : i32 to index
    %c0_171 = arith.constant 0 : index
    %566 = vector.load %arg4[%c0_169, %c1_170, %565, %c0_171] : memref<1x2x16x16xf32, #tpu.memory_space<vmem>>, vector<1x1x8x16xf32>
    %567 = vector.shape_cast %566 : vector<1x1x8x16xf32> to vector<8x16xf32>
    %568 = vector.shape_cast %564 : vector<8x16xf32> to vector<1x1x8x16xf32>
    tpu.vector_store %arg4[%c0_169, %c1_170, %565, %c0_171], %568 {strides = array<i32>} : memref<1x2x16x16xf32, #tpu.memory_space<vmem>>, vector<1x1x8x16xf32>,
    %c1_i32_172 = arith.constant 1 : i32
    %c8_i32_173 = arith.constant 8 : i32
    %569 = arith.muli %c1_i32_172, %c8_i32_173 : i32
    %570 = tpu.assume_multiple %569, 8 : i32
    %c0_174 = arith.constant 0 : index
    %c0_175 = arith.constant 0 : index
    %571 = arith.index_cast %570 : i32 to index
    %c0_176 = arith.constant 0 : index
    %572 = vector.load %arg3[%c0_174, %c0_175, %571, %c0_176] : memref<1x2x16x16xf32, #tpu.memory_space<vmem>>, vector<1x1x8x16xf32>
    %573 = vector.shape_cast %572 : vector<1x1x8x16xf32> to vector<8x16xf32>
    %c0_177 = arith.constant 0 : index
    %c1_178 = arith.constant 1 : index
    %574 = arith.index_cast %570 : i32 to index
    %c0_179 = arith.constant 0 : index
    %575 = vector.load %arg3[%c0_177, %c1_178, %574, %c0_179] : memref<1x2x16x16xf32, #tpu.memory_space<vmem>>, vector<1x1x8x16xf32>
    %576 = vector.shape_cast %575 : vector<1x1x8x16xf32> to vector<8x16xf32>
    %c0_180 = arith.constant 0 : index
    %c0_181 = arith.constant 0 : index
    %577 = arith.index_cast %570 : i32 to index
    %c0_182 = arith.constant 0 : index
    %578 = vector.load %arg2[%c0_180, %c0_181, %577, %c0_182] : memref<1x2x16x16xf32, #tpu.memory_space<vmem>>, vector<1x1x8x16xf32>
    %579 = vector.shape_cast %578 : vector<1x1x8x16xf32> to vector<8x16xf32>
    %580 = arith.addf %579, %573 : vector<8x16xf32>
    %c0_183 = arith.constant 0 : index
    %c1_184 = arith.constant 1 : index
    %581 = arith.index_cast %570 : i32 to index
    %c0_185 = arith.constant 0 : index
    %582 = vector.load %arg2[%c0_183, %c1_184, %581, %c0_185] : memref<1x2x16x16xf32, #tpu.memory_space<vmem>>, vector<1x1x8x16xf32>
    %583 = vector.shape_cast %582 : vector<1x1x8x16xf32> to vector<8x16xf32>
    %584 = arith.addf %583, %576 : vector<8x16xf32>
    %585 = vector.extract_strided_slice %580 {offsets = [0, 0], sizes = [1, 16], strides = [1, 1]} : vector<8x16xf32> to vector<1x16xf32>
    %586 = vector.extract_strided_slice %584 {offsets = [0, 0], sizes = [1, 16], strides = [1, 1]} : vector<8x16xf32> to vector<1x16xf32>
    %587 = vector.broadcast %585 : vector<1x16xf32> to vector<16x16xf32>
    %588 = arith.subf %1, %587 : vector<16x16xf32>
    %589 = math.absf %588 : vector<16x16xf32>
    %cst_186 = arith.constant 1.000000e+00 : f32
    %590 = vector.broadcast %cst_186 : f32 to vector<16x16xf32>
    %591 = arith.subf %590, %589 : vector<16x16xf32>
    %cst_187 = arith.constant 0.000000e+00 : f32
    %592 = vector.broadcast %cst_187 : f32 to vector<16x16xf32>
    %593 = arith.maximumf %592, %591 : vector<16x16xf32>
    %594 = vector.broadcast %586 : vector<1x16xf32> to vector<16x16xf32>
    %595 = arith.subf %3, %594 : vector<16x16xf32>
    %596 = math.absf %595 : vector<16x16xf32>
    %cst_188 = arith.constant 1.000000e+00 : f32
    %597 = vector.broadcast %cst_188 : f32 to vector<16x16xf32>
    %598 = arith.subf %597, %596 : vector<16x16xf32>
    %cst_189 = arith.constant 0.000000e+00 : f32
    %599 = vector.broadcast %cst_189 : f32 to vector<16x16xf32>
    %600 = arith.maximumf %599, %598 : vector<16x16xf32>
    %601 = vector.extract_strided_slice %580 {offsets = [1, 0], sizes = [1, 16], strides = [1, 1]} : vector<8x16xf32> to vector<1x16xf32>
    %602 = vector.extract_strided_slice %584 {offsets = [1, 0], sizes = [1, 16], strides = [1, 1]} : vector<8x16xf32> to vector<1x16xf32>
    %603 = vector.broadcast %601 : vector<1x16xf32> to vector<16x16xf32>
    %604 = arith.subf %1, %603 : vector<16x16xf32>
    %605 = math.absf %604 : vector<16x16xf32>
    %cst_190 = arith.constant 1.000000e+00 : f32
    %606 = vector.broadcast %cst_190 : f32 to vector<16x16xf32>
    %607 = arith.subf %606, %605 : vector<16x16xf32>
    %cst_191 = arith.constant 0.000000e+00 : f32
    %608 = vector.broadcast %cst_191 : f32 to vector<16x16xf32>
    %609 = arith.maximumf %608, %607 : vector<16x16xf32>
    %610 = vector.broadcast %602 : vector<1x16xf32> to vector<16x16xf32>
    %611 = arith.subf %3, %610 : vector<16x16xf32>
    %612 = math.absf %611 : vector<16x16xf32>
    %cst_192 = arith.constant 1.000000e+00 : f32
    %613 = vector.broadcast %cst_192 : f32 to vector<16x16xf32>
    %614 = arith.subf %613, %612 : vector<16x16xf32>
    %cst_193 = arith.constant 0.000000e+00 : f32
    %615 = vector.broadcast %cst_193 : f32 to vector<16x16xf32>
    %616 = arith.maximumf %615, %614 : vector<16x16xf32>
    %617 = vector.extract_strided_slice %580 {offsets = [2, 0], sizes = [1, 16], strides = [1, 1]} : vector<8x16xf32> to vector<1x16xf32>
    %618 = vector.extract_strided_slice %584 {offsets = [2, 0], sizes = [1, 16], strides = [1, 1]} : vector<8x16xf32> to vector<1x16xf32>
    %619 = vector.broadcast %617 : vector<1x16xf32> to vector<16x16xf32>
    %620 = arith.subf %1, %619 : vector<16x16xf32>
    %621 = math.absf %620 : vector<16x16xf32>
    %cst_194 = arith.constant 1.000000e+00 : f32
    %622 = vector.broadcast %cst_194 : f32 to vector<16x16xf32>
    %623 = arith.subf %622, %621 : vector<16x16xf32>
    %cst_195 = arith.constant 0.000000e+00 : f32
    %624 = vector.broadcast %cst_195 : f32 to vector<16x16xf32>
    %625 = arith.maximumf %624, %623 : vector<16x16xf32>
    %626 = vector.broadcast %618 : vector<1x16xf32> to vector<16x16xf32>
    %627 = arith.subf %3, %626 : vector<16x16xf32>
    %628 = math.absf %627 : vector<16x16xf32>
    %cst_196 = arith.constant 1.000000e+00 : f32
    %629 = vector.broadcast %cst_196 : f32 to vector<16x16xf32>
    %630 = arith.subf %629, %628 : vector<16x16xf32>
    %cst_197 = arith.constant 0.000000e+00 : f32
    %631 = vector.broadcast %cst_197 : f32 to vector<16x16xf32>
    %632 = arith.maximumf %631, %630 : vector<16x16xf32>
    %633 = vector.extract_strided_slice %580 {offsets = [3, 0], sizes = [1, 16], strides = [1, 1]} : vector<8x16xf32> to vector<1x16xf32>
    %634 = vector.extract_strided_slice %584 {offsets = [3, 0], sizes = [1, 16], strides = [1, 1]} : vector<8x16xf32> to vector<1x16xf32>
    %635 = vector.broadcast %633 : vector<1x16xf32> to vector<16x16xf32>
    %636 = arith.subf %1, %635 : vector<16x16xf32>
    %637 = math.absf %636 : vector<16x16xf32>
    %cst_198 = arith.constant 1.000000e+00 : f32
    %638 = vector.broadcast %cst_198 : f32 to vector<16x16xf32>
    %639 = arith.subf %638, %637 : vector<16x16xf32>
    %cst_199 = arith.constant 0.000000e+00 : f32
    %640 = vector.broadcast %cst_199 : f32 to vector<16x16xf32>
    %641 = arith.maximumf %640, %639 : vector<16x16xf32>
    %642 = vector.broadcast %634 : vector<1x16xf32> to vector<16x16xf32>
    %643 = arith.subf %3, %642 : vector<16x16xf32>
    %644 = math.absf %643 : vector<16x16xf32>
    %cst_200 = arith.constant 1.000000e+00 : f32
    %645 = vector.broadcast %cst_200 : f32 to vector<16x16xf32>
    %646 = arith.subf %645, %644 : vector<16x16xf32>
    %cst_201 = arith.constant 0.000000e+00 : f32
    %647 = vector.broadcast %cst_201 : f32 to vector<16x16xf32>
    %648 = arith.maximumf %647, %646 : vector<16x16xf32>
    %649 = vector.extract_strided_slice %580 {offsets = [4, 0], sizes = [1, 16], strides = [1, 1]} : vector<8x16xf32> to vector<1x16xf32>
    %650 = vector.extract_strided_slice %584 {offsets = [4, 0], sizes = [1, 16], strides = [1, 1]} : vector<8x16xf32> to vector<1x16xf32>
    %651 = vector.broadcast %649 : vector<1x16xf32> to vector<16x16xf32>
    %652 = arith.subf %1, %651 : vector<16x16xf32>
    %653 = math.absf %652 : vector<16x16xf32>
    %cst_202 = arith.constant 1.000000e+00 : f32
    %654 = vector.broadcast %cst_202 : f32 to vector<16x16xf32>
    %655 = arith.subf %654, %653 : vector<16x16xf32>
    %cst_203 = arith.constant 0.000000e+00 : f32
    %656 = vector.broadcast %cst_203 : f32 to vector<16x16xf32>
    %657 = arith.maximumf %656, %655 : vector<16x16xf32>
    %658 = vector.broadcast %650 : vector<1x16xf32> to vector<16x16xf32>
    %659 = arith.subf %3, %658 : vector<16x16xf32>
    %660 = math.absf %659 : vector<16x16xf32>
    %cst_204 = arith.constant 1.000000e+00 : f32
    %661 = vector.broadcast %cst_204 : f32 to vector<16x16xf32>
    %662 = arith.subf %661, %660 : vector<16x16xf32>
    %cst_205 = arith.constant 0.000000e+00 : f32
    %663 = vector.broadcast %cst_205 : f32 to vector<16x16xf32>
    %664 = arith.maximumf %663, %662 : vector<16x16xf32>
    %665 = vector.extract_strided_slice %580 {offsets = [5, 0], sizes = [1, 16], strides = [1, 1]} : vector<8x16xf32> to vector<1x16xf32>
    %666 = vector.extract_strided_slice %584 {offsets = [5, 0], sizes = [1, 16], strides = [1, 1]} : vector<8x16xf32> to vector<1x16xf32>
    %667 = vector.broadcast %665 : vector<1x16xf32> to vector<16x16xf32>
    %668 = arith.subf %1, %667 : vector<16x16xf32>
    %669 = math.absf %668 : vector<16x16xf32>
    %cst_206 = arith.constant 1.000000e+00 : f32
    %670 = vector.broadcast %cst_206 : f32 to vector<16x16xf32>
    %671 = arith.subf %670, %669 : vector<16x16xf32>
    %cst_207 = arith.constant 0.000000e+00 : f32
    %672 = vector.broadcast %cst_207 : f32 to vector<16x16xf32>
    %673 = arith.maximumf %672, %671 : vector<16x16xf32>
    %674 = vector.broadcast %666 : vector<1x16xf32> to vector<16x16xf32>
    %675 = arith.subf %3, %674 : vector<16x16xf32>
    %676 = math.absf %675 : vector<16x16xf32>
    %cst_208 = arith.constant 1.000000e+00 : f32
    %677 = vector.broadcast %cst_208 : f32 to vector<16x16xf32>
    %678 = arith.subf %677, %676 : vector<16x16xf32>
    %cst_209 = arith.constant 0.000000e+00 : f32
    %679 = vector.broadcast %cst_209 : f32 to vector<16x16xf32>
    %680 = arith.maximumf %679, %678 : vector<16x16xf32>
    %681 = vector.extract_strided_slice %580 {offsets = [6, 0], sizes = [1, 16], strides = [1, 1]} : vector<8x16xf32> to vector<1x16xf32>
    %682 = vector.extract_strided_slice %584 {offsets = [6, 0], sizes = [1, 16], strides = [1, 1]} : vector<8x16xf32> to vector<1x16xf32>
    %683 = vector.broadcast %681 : vector<1x16xf32> to vector<16x16xf32>
    %684 = arith.subf %1, %683 : vector<16x16xf32>
    %685 = math.absf %684 : vector<16x16xf32>
    %cst_210 = arith.constant 1.000000e+00 : f32
    %686 = vector.broadcast %cst_210 : f32 to vector<16x16xf32>
    %687 = arith.subf %686, %685 : vector<16x16xf32>
    %cst_211 = arith.constant 0.000000e+00 : f32
    %688 = vector.broadcast %cst_211 : f32 to vector<16x16xf32>
    %689 = arith.maximumf %688, %687 : vector<16x16xf32>
    %690 = vector.broadcast %682 : vector<1x16xf32> to vector<16x16xf32>
    %691 = arith.subf %3, %690 : vector<16x16xf32>
    %692 = math.absf %691 : vector<16x16xf32>
    %cst_212 = arith.constant 1.000000e+00 : f32
    %693 = vector.broadcast %cst_212 : f32 to vector<16x16xf32>
    %694 = arith.subf %693, %692 : vector<16x16xf32>
    %cst_213 = arith.constant 0.000000e+00 : f32
    %695 = vector.broadcast %cst_213 : f32 to vector<16x16xf32>
    %696 = arith.maximumf %695, %694 : vector<16x16xf32>
    %697 = vector.extract_strided_slice %580 {offsets = [7, 0], sizes = [1, 16], strides = [1, 1]} : vector<8x16xf32> to vector<1x16xf32>
    %698 = vector.extract_strided_slice %584 {offsets = [7, 0], sizes = [1, 16], strides = [1, 1]} : vector<8x16xf32> to vector<1x16xf32>
    %699 = vector.broadcast %697 : vector<1x16xf32> to vector<16x16xf32>
    %700 = arith.subf %1, %699 : vector<16x16xf32>
    %701 = math.absf %700 : vector<16x16xf32>
    %cst_214 = arith.constant 1.000000e+00 : f32
    %702 = vector.broadcast %cst_214 : f32 to vector<16x16xf32>
    %703 = arith.subf %702, %701 : vector<16x16xf32>
    %cst_215 = arith.constant 0.000000e+00 : f32
    %704 = vector.broadcast %cst_215 : f32 to vector<16x16xf32>
    %705 = arith.maximumf %704, %703 : vector<16x16xf32>
    %706 = vector.broadcast %698 : vector<1x16xf32> to vector<16x16xf32>
    %707 = arith.subf %3, %706 : vector<16x16xf32>
    %708 = math.absf %707 : vector<16x16xf32>
    %cst_216 = arith.constant 1.000000e+00 : f32
    %709 = vector.broadcast %cst_216 : f32 to vector<16x16xf32>
    %710 = arith.subf %709, %708 : vector<16x16xf32>
    %cst_217 = arith.constant 0.000000e+00 : f32
    %711 = vector.broadcast %cst_217 : f32 to vector<16x16xf32>
    %712 = arith.maximumf %711, %710 : vector<16x16xf32>
    %713 = tpu.concatenate %593, %609, %625, %641, %657, %673, %689, %705 in 1 : vector<16x16xf32>, vector<16x16xf32>, vector<16x16xf32>, vector<16x16xf32>, vector<16x16xf32>, vector<16x16xf32>, vector<16x16xf32>, vector<16x16xf32> -> vector<16x128xf32>
    %714 = tpu.concatenate %600, %616, %632, %648, %664, %680, %696, %712 in 1 : vector<16x16xf32>, vector<16x16xf32>, vector<16x16xf32>, vector<16x16xf32>, vector<16x16xf32>, vector<16x16xf32>, vector<16x16xf32>, vector<16x16xf32> -> vector<16x128xf32>
    %cst_218 = arith.constant dense<0.000000e+00> : vector<32x128xf32>
    %715 = tpu.matmul %385, %714, %cst_218 {dimension_numbers = #tpu.dot_dimension_numbers<[1], [0], [0], [1], [0, 0, 1, 1], [], []>} : vector<32x16xf32>, vector<16x128xf32>, vector<32x128xf32> -> vector<32x128xf32>
    %716 = vector.extract_strided_slice %715 {offsets = [0, 0], sizes = [16, 128], strides = [1, 1]} : vector<32x128xf32> to vector<16x128xf32>
    %717 = arith.mulf %713, %716 : vector<16x128xf32>
    %cst_219 = arith.constant dense<0.000000e+00> : vector<128xf32>
    %718 = vector.multi_reduction <add>, %717, %cst_219 [0] : vector<16x128xf32> to vector<128xf32>
    %719 = vector.shape_cast %718 : vector<128xf32> to vector<1x128xf32>
    %720 = vector.extract_strided_slice %715 {offsets = [16, 0], sizes = [16, 128], strides = [1, 1]} : vector<32x128xf32> to vector<16x128xf32>
    %721 = arith.mulf %713, %720 : vector<16x128xf32>
    %cst_220 = arith.constant dense<0.000000e+00> : vector<128xf32>
    %722 = vector.multi_reduction <add>, %721, %cst_220 [0] : vector<16x128xf32> to vector<128xf32>
    %723 = vector.shape_cast %722 : vector<128xf32> to vector<1x128xf32>
    %724 = vector.extract_strided_slice %719 {offsets = [0, 0], sizes = [1, 16], strides = [1, 1]} : vector<1x128xf32> to vector<1x16xf32>
    %725 = vector.extract_strided_slice %719 {offsets = [0, 16], sizes = [1, 16], strides = [1, 1]} : vector<1x128xf32> to vector<1x16xf32>
    %726 = vector.extract_strided_slice %719 {offsets = [0, 32], sizes = [1, 16], strides = [1, 1]} : vector<1x128xf32> to vector<1x16xf32>
    %727 = vector.extract_strided_slice %719 {offsets = [0, 48], sizes = [1, 16], strides = [1, 1]} : vector<1x128xf32> to vector<1x16xf32>
    %728 = vector.extract_strided_slice %719 {offsets = [0, 64], sizes = [1, 16], strides = [1, 1]} : vector<1x128xf32> to vector<1x16xf32>
    %729 = vector.extract_strided_slice %719 {offsets = [0, 80], sizes = [1, 16], strides = [1, 1]} : vector<1x128xf32> to vector<1x16xf32>
    %730 = vector.extract_strided_slice %719 {offsets = [0, 96], sizes = [1, 16], strides = [1, 1]} : vector<1x128xf32> to vector<1x16xf32>
    %731 = vector.extract_strided_slice %719 {offsets = [0, 112], sizes = [1, 16], strides = [1, 1]} : vector<1x128xf32> to vector<1x16xf32>
    %732 = tpu.concatenate %724, %725, %726, %727, %728, %729, %730, %731 in 0 : vector<1x16xf32>, vector<1x16xf32>, vector<1x16xf32>, vector<1x16xf32>, vector<1x16xf32>, vector<1x16xf32>, vector<1x16xf32>, vector<1x16xf32> -> vector<8x16xf32>
    %733 = vector.extract_strided_slice %723 {offsets = [0, 0], sizes = [1, 16], strides = [1, 1]} : vector<1x128xf32> to vector<1x16xf32>
    %734 = vector.extract_strided_slice %723 {offsets = [0, 16], sizes = [1, 16], strides = [1, 1]} : vector<1x128xf32> to vector<1x16xf32>
    %735 = vector.extract_strided_slice %723 {offsets = [0, 32], sizes = [1, 16], strides = [1, 1]} : vector<1x128xf32> to vector<1x16xf32>
    %736 = vector.extract_strided_slice %723 {offsets = [0, 48], sizes = [1, 16], strides = [1, 1]} : vector<1x128xf32> to vector<1x16xf32>
    %737 = vector.extract_strided_slice %723 {offsets = [0, 64], sizes = [1, 16], strides = [1, 1]} : vector<1x128xf32> to vector<1x16xf32>
    %738 = vector.extract_strided_slice %723 {offsets = [0, 80], sizes = [1, 16], strides = [1, 1]} : vector<1x128xf32> to vector<1x16xf32>
    %739 = vector.extract_strided_slice %723 {offsets = [0, 96], sizes = [1, 16], strides = [1, 1]} : vector<1x128xf32> to vector<1x16xf32>
    %740 = vector.extract_strided_slice %723 {offsets = [0, 112], sizes = [1, 16], strides = [1, 1]} : vector<1x128xf32> to vector<1x16xf32>
    %741 = tpu.concatenate %733, %734, %735, %736, %737, %738, %739, %740 in 0 : vector<1x16xf32>, vector<1x16xf32>, vector<1x16xf32>, vector<1x16xf32>, vector<1x16xf32>, vector<1x16xf32>, vector<1x16xf32>, vector<1x16xf32> -> vector<8x16xf32>
    %742 = arith.addf %573, %732 : vector<8x16xf32>
    %c0_221 = arith.constant 0 : index
    %c0_222 = arith.constant 0 : index
    %743 = arith.index_cast %570 : i32 to index
    %c0_223 = arith.constant 0 : index
    %744 = vector.load %arg4[%c0_221, %c0_222, %743, %c0_223] : memref<1x2x16x16xf32, #tpu.memory_space<vmem>>, vector<1x1x8x16xf32>
    %745 = vector.shape_cast %744 : vector<1x1x8x16xf32> to vector<8x16xf32>
    %746 = vector.shape_cast %742 : vector<8x16xf32> to vector<1x1x8x16xf32>
    tpu.vector_store %arg4[%c0_221, %c0_222, %743, %c0_223], %746 {strides = array<i32>} : memref<1x2x16x16xf32, #tpu.memory_space<vmem>>, vector<1x1x8x16xf32>,
    %747 = arith.addf %576, %741 : vector<8x16xf32>
    %c0_224 = arith.constant 0 : index
    %c1_225 = arith.constant 1 : index
    %748 = arith.index_cast %570 : i32 to index
    %c0_226 = arith.constant 0 : index
    %749 = vector.load %arg4[%c0_224, %c1_225, %748, %c0_226] : memref<1x2x16x16xf32, #tpu.memory_space<vmem>>, vector<1x1x8x16xf32>
    %750 = vector.shape_cast %749 : vector<1x1x8x16xf32> to vector<8x16xf32>
    %751 = vector.shape_cast %747 : vector<8x16xf32> to vector<1x1x8x16xf32>
    tpu.vector_store %arg4[%c0_224, %c1_225, %748, %c0_226], %751 {strides = array<i32>} : memref<1x2x16x16xf32, #tpu.memory_space<vmem>>, vector<1x1x8x16xf32>,
    %c2_i32_227 = arith.constant 2 : i32
    %c0_228 = arith.constant 0 : index
    %c0_229 = arith.constant 0 : index
    %c0_230 = arith.constant 0 : index
    %c0_231 = arith.constant 0 : index
    %752 = vector.load %arg4[%c0_228, %c0_229, %c0_230, %c0_231] : memref<1x2x16x16xf32, #tpu.memory_space<vmem>>, vector<1x2x16x16xf32>
    %753 = vector.shape_cast %752 : vector<1x2x16x16xf32> to vector<2x16x16xf32>
    %754 = vector.shape_cast %753 : vector<2x16x16xf32> to vector<32x16xf32>
    %c0_i32_232 = arith.constant 0 : i32
    %c8_i32_233 = arith.constant 8 : i32
    %755 = arith.muli %c0_i32_232, %c8_i32_233 : i32
    %756 = tpu.assume_multiple %755, 8 : i32
    %c0_234 = arith.constant 0 : index
    %c0_235 = arith.constant 0 : index
    %757 = arith.index_cast %756 : i32 to index
    %c0_236 = arith.constant 0 : index
    %758 = vector.load %arg4[%c0_234, %c0_235, %757, %c0_236] : memref<1x2x16x16xf32, #tpu.memory_space<vmem>>, vector<1x1x8x16xf32>
    %759 = vector.shape_cast %758 : vector<1x1x8x16xf32> to vector<8x16xf32>
    %c0_237 = arith.constant 0 : index
    %c1_238 = arith.constant 1 : index
    %760 = arith.index_cast %756 : i32 to index
    %c0_239 = arith.constant 0 : index
    %761 = vector.load %arg4[%c0_237, %c1_238, %760, %c0_239] : memref<1x2x16x16xf32, #tpu.memory_space<vmem>>, vector<1x1x8x16xf32>
    %762 = vector.shape_cast %761 : vector<1x1x8x16xf32> to vector<8x16xf32>
    %c0_240 = arith.constant 0 : index
    %c0_241 = arith.constant 0 : index
    %763 = arith.index_cast %756 : i32 to index
    %c0_242 = arith.constant 0 : index
    %764 = vector.load %arg2[%c0_240, %c0_241, %763, %c0_242] : memref<1x2x16x16xf32, #tpu.memory_space<vmem>>, vector<1x1x8x16xf32>
    %765 = vector.shape_cast %764 : vector<1x1x8x16xf32> to vector<8x16xf32>
    %766 = arith.addf %765, %759 : vector<8x16xf32>
    %c0_243 = arith.constant 0 : index
    %c1_244 = arith.constant 1 : index
    %767 = arith.index_cast %756 : i32 to index
    %c0_245 = arith.constant 0 : index
    %768 = vector.load %arg2[%c0_243, %c1_244, %767, %c0_245] : memref<1x2x16x16xf32, #tpu.memory_space<vmem>>, vector<1x1x8x16xf32>
    %769 = vector.shape_cast %768 : vector<1x1x8x16xf32> to vector<8x16xf32>
    %770 = arith.addf %769, %762 : vector<8x16xf32>
    %771 = vector.extract_strided_slice %766 {offsets = [0, 0], sizes = [1, 16], strides = [1, 1]} : vector<8x16xf32> to vector<1x16xf32>
    %772 = vector.extract_strided_slice %770 {offsets = [0, 0], sizes = [1, 16], strides = [1, 1]} : vector<8x16xf32> to vector<1x16xf32>
    %773 = vector.broadcast %771 : vector<1x16xf32> to vector<16x16xf32>
    %774 = arith.subf %1, %773 : vector<16x16xf32>
    %775 = math.absf %774 : vector<16x16xf32>
    %cst_246 = arith.constant 1.000000e+00 : f32
    %776 = vector.broadcast %cst_246 : f32 to vector<16x16xf32>
    %777 = arith.subf %776, %775 : vector<16x16xf32>
    %cst_247 = arith.constant 0.000000e+00 : f32
    %778 = vector.broadcast %cst_247 : f32 to vector<16x16xf32>
    %779 = arith.maximumf %778, %777 : vector<16x16xf32>
    %780 = vector.broadcast %772 : vector<1x16xf32> to vector<16x16xf32>
    %781 = arith.subf %3, %780 : vector<16x16xf32>
    %782 = math.absf %781 : vector<16x16xf32>
    %cst_248 = arith.constant 1.000000e+00 : f32
    %783 = vector.broadcast %cst_248 : f32 to vector<16x16xf32>
    %784 = arith.subf %783, %782 : vector<16x16xf32>
    %cst_249 = arith.constant 0.000000e+00 : f32
    %785 = vector.broadcast %cst_249 : f32 to vector<16x16xf32>
    %786 = arith.maximumf %785, %784 : vector<16x16xf32>
    %787 = vector.extract_strided_slice %766 {offsets = [1, 0], sizes = [1, 16], strides = [1, 1]} : vector<8x16xf32> to vector<1x16xf32>
    %788 = vector.extract_strided_slice %770 {offsets = [1, 0], sizes = [1, 16], strides = [1, 1]} : vector<8x16xf32> to vector<1x16xf32>
    %789 = vector.broadcast %787 : vector<1x16xf32> to vector<16x16xf32>
    %790 = arith.subf %1, %789 : vector<16x16xf32>
    %791 = math.absf %790 : vector<16x16xf32>
    %cst_250 = arith.constant 1.000000e+00 : f32
    %792 = vector.broadcast %cst_250 : f32 to vector<16x16xf32>
    %793 = arith.subf %792, %791 : vector<16x16xf32>
    %cst_251 = arith.constant 0.000000e+00 : f32
    %794 = vector.broadcast %cst_251 : f32 to vector<16x16xf32>
    %795 = arith.maximumf %794, %793 : vector<16x16xf32>
    %796 = vector.broadcast %788 : vector<1x16xf32> to vector<16x16xf32>
    %797 = arith.subf %3, %796 : vector<16x16xf32>
    %798 = math.absf %797 : vector<16x16xf32>
    %cst_252 = arith.constant 1.000000e+00 : f32
    %799 = vector.broadcast %cst_252 : f32 to vector<16x16xf32>
    %800 = arith.subf %799, %798 : vector<16x16xf32>
    %cst_253 = arith.constant 0.000000e+00 : f32
    %801 = vector.broadcast %cst_253 : f32 to vector<16x16xf32>
    %802 = arith.maximumf %801, %800 : vector<16x16xf32>
    %803 = vector.extract_strided_slice %766 {offsets = [2, 0], sizes = [1, 16], strides = [1, 1]} : vector<8x16xf32> to vector<1x16xf32>
    %804 = vector.extract_strided_slice %770 {offsets = [2, 0], sizes = [1, 16], strides = [1, 1]} : vector<8x16xf32> to vector<1x16xf32>
    %805 = vector.broadcast %803 : vector<1x16xf32> to vector<16x16xf32>
    %806 = arith.subf %1, %805 : vector<16x16xf32>
    %807 = math.absf %806 : vector<16x16xf32>
    %cst_254 = arith.constant 1.000000e+00 : f32
    %808 = vector.broadcast %cst_254 : f32 to vector<16x16xf32>
    %809 = arith.subf %808, %807 : vector<16x16xf32>
    %cst_255 = arith.constant 0.000000e+00 : f32
    %810 = vector.broadcast %cst_255 : f32 to vector<16x16xf32>
    %811 = arith.maximumf %810, %809 : vector<16x16xf32>
    %812 = vector.broadcast %804 : vector<1x16xf32> to vector<16x16xf32>
    %813 = arith.subf %3, %812 : vector<16x16xf32>
    %814 = math.absf %813 : vector<16x16xf32>
    %cst_256 = arith.constant 1.000000e+00 : f32
    %815 = vector.broadcast %cst_256 : f32 to vector<16x16xf32>
    %816 = arith.subf %815, %814 : vector<16x16xf32>
    %cst_257 = arith.constant 0.000000e+00 : f32
    %817 = vector.broadcast %cst_257 : f32 to vector<16x16xf32>
    %818 = arith.maximumf %817, %816 : vector<16x16xf32>
    %819 = vector.extract_strided_slice %766 {offsets = [3, 0], sizes = [1, 16], strides = [1, 1]} : vector<8x16xf32> to vector<1x16xf32>
    %820 = vector.extract_strided_slice %770 {offsets = [3, 0], sizes = [1, 16], strides = [1, 1]} : vector<8x16xf32> to vector<1x16xf32>
    %821 = vector.broadcast %819 : vector<1x16xf32> to vector<16x16xf32>
    %822 = arith.subf %1, %821 : vector<16x16xf32>
    %823 = math.absf %822 : vector<16x16xf32>
    %cst_258 = arith.constant 1.000000e+00 : f32
    %824 = vector.broadcast %cst_258 : f32 to vector<16x16xf32>
    %825 = arith.subf %824, %823 : vector<16x16xf32>
    %cst_259 = arith.constant 0.000000e+00 : f32
    %826 = vector.broadcast %cst_259 : f32 to vector<16x16xf32>
    %827 = arith.maximumf %826, %825 : vector<16x16xf32>
    %828 = vector.broadcast %820 : vector<1x16xf32> to vector<16x16xf32>
    %829 = arith.subf %3, %828 : vector<16x16xf32>
    %830 = math.absf %829 : vector<16x16xf32>
    %cst_260 = arith.constant 1.000000e+00 : f32
    %831 = vector.broadcast %cst_260 : f32 to vector<16x16xf32>
    %832 = arith.subf %831, %830 : vector<16x16xf32>
    %cst_261 = arith.constant 0.000000e+00 : f32
    %833 = vector.broadcast %cst_261 : f32 to vector<16x16xf32>
    %834 = arith.maximumf %833, %832 : vector<16x16xf32>
    %835 = vector.extract_strided_slice %766 {offsets = [4, 0], sizes = [1, 16], strides = [1, 1]} : vector<8x16xf32> to vector<1x16xf32>
    %836 = vector.extract_strided_slice %770 {offsets = [4, 0], sizes = [1, 16], strides = [1, 1]} : vector<8x16xf32> to vector<1x16xf32>
    %837 = vector.broadcast %835 : vector<1x16xf32> to vector<16x16xf32>
    %838 = arith.subf %1, %837 : vector<16x16xf32>
    %839 = math.absf %838 : vector<16x16xf32>
    %cst_262 = arith.constant 1.000000e+00 : f32
    %840 = vector.broadcast %cst_262 : f32 to vector<16x16xf32>
    %841 = arith.subf %840, %839 : vector<16x16xf32>
    %cst_263 = arith.constant 0.000000e+00 : f32
    %842 = vector.broadcast %cst_263 : f32 to vector<16x16xf32>
    %843 = arith.maximumf %842, %841 : vector<16x16xf32>
    %844 = vector.broadcast %836 : vector<1x16xf32> to vector<16x16xf32>
    %845 = arith.subf %3, %844 : vector<16x16xf32>
    %846 = math.absf %845 : vector<16x16xf32>
    %cst_264 = arith.constant 1.000000e+00 : f32
    %847 = vector.broadcast %cst_264 : f32 to vector<16x16xf32>
    %848 = arith.subf %847, %846 : vector<16x16xf32>
    %cst_265 = arith.constant 0.000000e+00 : f32
    %849 = vector.broadcast %cst_265 : f32 to vector<16x16xf32>
    %850 = arith.maximumf %849, %848 : vector<16x16xf32>
    %851 = vector.extract_strided_slice %766 {offsets = [5, 0], sizes = [1, 16], strides = [1, 1]} : vector<8x16xf32> to vector<1x16xf32>
    %852 = vector.extract_strided_slice %770 {offsets = [5, 0], sizes = [1, 16], strides = [1, 1]} : vector<8x16xf32> to vector<1x16xf32>
    %853 = vector.broadcast %851 : vector<1x16xf32> to vector<16x16xf32>
    %854 = arith.subf %1, %853 : vector<16x16xf32>
    %855 = math.absf %854 : vector<16x16xf32>
    %cst_266 = arith.constant 1.000000e+00 : f32
    %856 = vector.broadcast %cst_266 : f32 to vector<16x16xf32>
    %857 = arith.subf %856, %855 : vector<16x16xf32>
    %cst_267 = arith.constant 0.000000e+00 : f32
    %858 = vector.broadcast %cst_267 : f32 to vector<16x16xf32>
    %859 = arith.maximumf %858, %857 : vector<16x16xf32>
    %860 = vector.broadcast %852 : vector<1x16xf32> to vector<16x16xf32>
    %861 = arith.subf %3, %860 : vector<16x16xf32>
    %862 = math.absf %861 : vector<16x16xf32>
    %cst_268 = arith.constant 1.000000e+00 : f32
    %863 = vector.broadcast %cst_268 : f32 to vector<16x16xf32>
    %864 = arith.subf %863, %862 : vector<16x16xf32>
    %cst_269 = arith.constant 0.000000e+00 : f32
    %865 = vector.broadcast %cst_269 : f32 to vector<16x16xf32>
    %866 = arith.maximumf %865, %864 : vector<16x16xf32>
    %867 = vector.extract_strided_slice %766 {offsets = [6, 0], sizes = [1, 16], strides = [1, 1]} : vector<8x16xf32> to vector<1x16xf32>
    %868 = vector.extract_strided_slice %770 {offsets = [6, 0], sizes = [1, 16], strides = [1, 1]} : vector<8x16xf32> to vector<1x16xf32>
    %869 = vector.broadcast %867 : vector<1x16xf32> to vector<16x16xf32>
    %870 = arith.subf %1, %869 : vector<16x16xf32>
    %871 = math.absf %870 : vector<16x16xf32>
    %cst_270 = arith.constant 1.000000e+00 : f32
    %872 = vector.broadcast %cst_270 : f32 to vector<16x16xf32>
    %873 = arith.subf %872, %871 : vector<16x16xf32>
    %cst_271 = arith.constant 0.000000e+00 : f32
    %874 = vector.broadcast %cst_271 : f32 to vector<16x16xf32>
    %875 = arith.maximumf %874, %873 : vector<16x16xf32>
    %876 = vector.broadcast %868 : vector<1x16xf32> to vector<16x16xf32>
    %877 = arith.subf %3, %876 : vector<16x16xf32>
    %878 = math.absf %877 : vector<16x16xf32>
    %cst_272 = arith.constant 1.000000e+00 : f32
    %879 = vector.broadcast %cst_272 : f32 to vector<16x16xf32>
    %880 = arith.subf %879, %878 : vector<16x16xf32>
    %cst_273 = arith.constant 0.000000e+00 : f32
    %881 = vector.broadcast %cst_273 : f32 to vector<16x16xf32>
    %882 = arith.maximumf %881, %880 : vector<16x16xf32>
    %883 = vector.extract_strided_slice %766 {offsets = [7, 0], sizes = [1, 16], strides = [1, 1]} : vector<8x16xf32> to vector<1x16xf32>
    %884 = vector.extract_strided_slice %770 {offsets = [7, 0], sizes = [1, 16], strides = [1, 1]} : vector<8x16xf32> to vector<1x16xf32>
    %885 = vector.broadcast %883 : vector<1x16xf32> to vector<16x16xf32>
    %886 = arith.subf %1, %885 : vector<16x16xf32>
    %887 = math.absf %886 : vector<16x16xf32>
    %cst_274 = arith.constant 1.000000e+00 : f32
    %888 = vector.broadcast %cst_274 : f32 to vector<16x16xf32>
    %889 = arith.subf %888, %887 : vector<16x16xf32>
    %cst_275 = arith.constant 0.000000e+00 : f32
    %890 = vector.broadcast %cst_275 : f32 to vector<16x16xf32>
    %891 = arith.maximumf %890, %889 : vector<16x16xf32>
    %892 = vector.broadcast %884 : vector<1x16xf32> to vector<16x16xf32>
    %893 = arith.subf %3, %892 : vector<16x16xf32>
    %894 = math.absf %893 : vector<16x16xf32>
    %cst_276 = arith.constant 1.000000e+00 : f32
    %895 = vector.broadcast %cst_276 : f32 to vector<16x16xf32>
    %896 = arith.subf %895, %894 : vector<16x16xf32>
    %cst_277 = arith.constant 0.000000e+00 : f32
    %897 = vector.broadcast %cst_277 : f32 to vector<16x16xf32>
    %898 = arith.maximumf %897, %896 : vector<16x16xf32>
    %899 = tpu.concatenate %779, %795, %811, %827, %843, %859, %875, %891 in 1 : vector<16x16xf32>, vector<16x16xf32>, vector<16x16xf32>, vector<16x16xf32>, vector<16x16xf32>, vector<16x16xf32>, vector<16x16xf32>, vector<16x16xf32> -> vector<16x128xf32>
    %900 = tpu.concatenate %786, %802, %818, %834, %850, %866, %882, %898 in 1 : vector<16x16xf32>, vector<16x16xf32>, vector<16x16xf32>, vector<16x16xf32>, vector<16x16xf32>, vector<16x16xf32>, vector<16x16xf32>, vector<16x16xf32> -> vector<16x128xf32>
    %cst_278 = arith.constant dense<0.000000e+00> : vector<32x128xf32>
    %901 = tpu.matmul %754, %900, %cst_278 {dimension_numbers = #tpu.dot_dimension_numbers<[1], [0], [0], [1], [0, 0, 1, 1], [], []>} : vector<32x16xf32>, vector<16x128xf32>, vector<32x128xf32> -> vector<32x128xf32>
    %902 = vector.extract_strided_slice %901 {offsets = [0, 0], sizes = [16, 128], strides = [1, 1]} : vector<32x128xf32> to vector<16x128xf32>
    %903 = arith.mulf %899, %902 : vector<16x128xf32>
    %cst_279 = arith.constant dense<0.000000e+00> : vector<128xf32>
    %904 = vector.multi_reduction <add>, %903, %cst_279 [0] : vector<16x128xf32> to vector<128xf32>
    %905 = vector.shape_cast %904 : vector<128xf32> to vector<1x128xf32>
    %906 = vector.extract_strided_slice %901 {offsets = [16, 0], sizes = [16, 128], strides = [1, 1]} : vector<32x128xf32> to vector<16x128xf32>
    %907 = arith.mulf %899, %906 : vector<16x128xf32>
    %cst_280 = arith.constant dense<0.000000e+00> : vector<128xf32>
    %908 = vector.multi_reduction <add>, %907, %cst_280 [0] : vector<16x128xf32> to vector<128xf32>
    %909 = vector.shape_cast %908 : vector<128xf32> to vector<1x128xf32>
    %910 = vector.extract_strided_slice %905 {offsets = [0, 0], sizes = [1, 16], strides = [1, 1]} : vector<1x128xf32> to vector<1x16xf32>
    %911 = vector.extract_strided_slice %905 {offsets = [0, 16], sizes = [1, 16], strides = [1, 1]} : vector<1x128xf32> to vector<1x16xf32>
    %912 = vector.extract_strided_slice %905 {offsets = [0, 32], sizes = [1, 16], strides = [1, 1]} : vector<1x128xf32> to vector<1x16xf32>
    %913 = vector.extract_strided_slice %905 {offsets = [0, 48], sizes = [1, 16], strides = [1, 1]} : vector<1x128xf32> to vector<1x16xf32>
    %914 = vector.extract_strided_slice %905 {offsets = [0, 64], sizes = [1, 16], strides = [1, 1]} : vector<1x128xf32> to vector<1x16xf32>
    %915 = vector.extract_strided_slice %905 {offsets = [0, 80], sizes = [1, 16], strides = [1, 1]} : vector<1x128xf32> to vector<1x16xf32>
    %916 = vector.extract_strided_slice %905 {offsets = [0, 96], sizes = [1, 16], strides = [1, 1]} : vector<1x128xf32> to vector<1x16xf32>
    %917 = vector.extract_strided_slice %905 {offsets = [0, 112], sizes = [1, 16], strides = [1, 1]} : vector<1x128xf32> to vector<1x16xf32>
    %918 = tpu.concatenate %910, %911, %912, %913, %914, %915, %916, %917 in 0 : vector<1x16xf32>, vector<1x16xf32>, vector<1x16xf32>, vector<1x16xf32>, vector<1x16xf32>, vector<1x16xf32>, vector<1x16xf32>, vector<1x16xf32> -> vector<8x16xf32>
    %919 = vector.extract_strided_slice %909 {offsets = [0, 0], sizes = [1, 16], strides = [1, 1]} : vector<1x128xf32> to vector<1x16xf32>
    %920 = vector.extract_strided_slice %909 {offsets = [0, 16], sizes = [1, 16], strides = [1, 1]} : vector<1x128xf32> to vector<1x16xf32>
    %921 = vector.extract_strided_slice %909 {offsets = [0, 32], sizes = [1, 16], strides = [1, 1]} : vector<1x128xf32> to vector<1x16xf32>
    %922 = vector.extract_strided_slice %909 {offsets = [0, 48], sizes = [1, 16], strides = [1, 1]} : vector<1x128xf32> to vector<1x16xf32>
    %923 = vector.extract_strided_slice %909 {offsets = [0, 64], sizes = [1, 16], strides = [1, 1]} : vector<1x128xf32> to vector<1x16xf32>
    %924 = vector.extract_strided_slice %909 {offsets = [0, 80], sizes = [1, 16], strides = [1, 1]} : vector<1x128xf32> to vector<1x16xf32>
    %925 = vector.extract_strided_slice %909 {offsets = [0, 96], sizes = [1, 16], strides = [1, 1]} : vector<1x128xf32> to vector<1x16xf32>
    %926 = vector.extract_strided_slice %909 {offsets = [0, 112], sizes = [1, 16], strides = [1, 1]} : vector<1x128xf32> to vector<1x16xf32>
    %927 = tpu.concatenate %919, %920, %921, %922, %923, %924, %925, %926 in 0 : vector<1x16xf32>, vector<1x16xf32>, vector<1x16xf32>, vector<1x16xf32>, vector<1x16xf32>, vector<1x16xf32>, vector<1x16xf32>, vector<1x16xf32> -> vector<8x16xf32>
    %928 = arith.addf %759, %918 : vector<8x16xf32>
    %c0_281 = arith.constant 0 : index
    %c0_282 = arith.constant 0 : index
    %929 = arith.index_cast %756 : i32 to index
    %c0_283 = arith.constant 0 : index
    %930 = vector.load %arg5[%c0_281, %c0_282, %929, %c0_283] : memref<1x2x16x16xf32, #tpu.memory_space<vmem>>, vector<1x1x8x16xf32>
    %931 = vector.shape_cast %930 : vector<1x1x8x16xf32> to vector<8x16xf32>
    %932 = vector.shape_cast %928 : vector<8x16xf32> to vector<1x1x8x16xf32>
    tpu.vector_store %arg5[%c0_281, %c0_282, %929, %c0_283], %932 {strides = array<i32>} : memref<1x2x16x16xf32, #tpu.memory_space<vmem>>, vector<1x1x8x16xf32>,
    %933 = arith.addf %762, %927 : vector<8x16xf32>
    %c0_284 = arith.constant 0 : index
    %c1_285 = arith.constant 1 : index
    %934 = arith.index_cast %756 : i32 to index
    %c0_286 = arith.constant 0 : index
    %935 = vector.load %arg5[%c0_284, %c1_285, %934, %c0_286] : memref<1x2x16x16xf32, #tpu.memory_space<vmem>>, vector<1x1x8x16xf32>
    %936 = vector.shape_cast %935 : vector<1x1x8x16xf32> to vector<8x16xf32>
    %937 = vector.shape_cast %933 : vector<8x16xf32> to vector<1x1x8x16xf32>
    tpu.vector_store %arg5[%c0_284, %c1_285, %934, %c0_286], %937 {strides = array<i32>} : memref<1x2x16x16xf32, #tpu.memory_space<vmem>>, vector<1x1x8x16xf32>,
    %c1_i32_287 = arith.constant 1 : i32
    %c8_i32_288 = arith.constant 8 : i32
    %938 = arith.muli %c1_i32_287, %c8_i32_288 : i32
    %939 = tpu.assume_multiple %938, 8 : i32
    %c0_289 = arith.constant 0 : index
    %c0_290 = arith.constant 0 : index
    %940 = arith.index_cast %939 : i32 to index
    %c0_291 = arith.constant 0 : index
    %941 = vector.load %arg4[%c0_289, %c0_290, %940, %c0_291] : memref<1x2x16x16xf32, #tpu.memory_space<vmem>>, vector<1x1x8x16xf32>
    %942 = vector.shape_cast %941 : vector<1x1x8x16xf32> to vector<8x16xf32>
    %c0_292 = arith.constant 0 : index
    %c1_293 = arith.constant 1 : index
    %943 = arith.index_cast %939 : i32 to index
    %c0_294 = arith.constant 0 : index
    %944 = vector.load %arg4[%c0_292, %c1_293, %943, %c0_294] : memref<1x2x16x16xf32, #tpu.memory_space<vmem>>, vector<1x1x8x16xf32>
    %945 = vector.shape_cast %944 : vector<1x1x8x16xf32> to vector<8x16xf32>
    %c0_295 = arith.constant 0 : index
    %c0_296 = arith.constant 0 : index
    %946 = arith.index_cast %939 : i32 to index
    %c0_297 = arith.constant 0 : index
    %947 = vector.load %arg2[%c0_295, %c0_296, %946, %c0_297] : memref<1x2x16x16xf32, #tpu.memory_space<vmem>>, vector<1x1x8x16xf32>
    %948 = vector.shape_cast %947 : vector<1x1x8x16xf32> to vector<8x16xf32>
    %949 = arith.addf %948, %942 : vector<8x16xf32>
    %c0_298 = arith.constant 0 : index
    %c1_299 = arith.constant 1 : index
    %950 = arith.index_cast %939 : i32 to index
    %c0_300 = arith.constant 0 : index
    %951 = vector.load %arg2[%c0_298, %c1_299, %950, %c0_300] : memref<1x2x16x16xf32, #tpu.memory_space<vmem>>, vector<1x1x8x16xf32>
    %952 = vector.shape_cast %951 : vector<1x1x8x16xf32> to vector<8x16xf32>
    %953 = arith.addf %952, %945 : vector<8x16xf32>
    %954 = vector.extract_strided_slice %949 {offsets = [0, 0], sizes = [1, 16], strides = [1, 1]} : vector<8x16xf32> to vector<1x16xf32>
    %955 = vector.extract_strided_slice %953 {offsets = [0, 0], sizes = [1, 16], strides = [1, 1]} : vector<8x16xf32> to vector<1x16xf32>
    %956 = vector.broadcast %954 : vector<1x16xf32> to vector<16x16xf32>
    %957 = arith.subf %1, %956 : vector<16x16xf32>
    %958 = math.absf %957 : vector<16x16xf32>
    %cst_301 = arith.constant 1.000000e+00 : f32
    %959 = vector.broadcast %cst_301 : f32 to vector<16x16xf32>
    %960 = arith.subf %959, %958 : vector<16x16xf32>
    %cst_302 = arith.constant 0.000000e+00 : f32
    %961 = vector.broadcast %cst_302 : f32 to vector<16x16xf32>
    %962 = arith.maximumf %961, %960 : vector<16x16xf32>
    %963 = vector.broadcast %955 : vector<1x16xf32> to vector<16x16xf32>
    %964 = arith.subf %3, %963 : vector<16x16xf32>
    %965 = math.absf %964 : vector<16x16xf32>
    %cst_303 = arith.constant 1.000000e+00 : f32
    %966 = vector.broadcast %cst_303 : f32 to vector<16x16xf32>
    %967 = arith.subf %966, %965 : vector<16x16xf32>
    %cst_304 = arith.constant 0.000000e+00 : f32
    %968 = vector.broadcast %cst_304 : f32 to vector<16x16xf32>
    %969 = arith.maximumf %968, %967 : vector<16x16xf32>
    %970 = vector.extract_strided_slice %949 {offsets = [1, 0], sizes = [1, 16], strides = [1, 1]} : vector<8x16xf32> to vector<1x16xf32>
    %971 = vector.extract_strided_slice %953 {offsets = [1, 0], sizes = [1, 16], strides = [1, 1]} : vector<8x16xf32> to vector<1x16xf32>
    %972 = vector.broadcast %970 : vector<1x16xf32> to vector<16x16xf32>
    %973 = arith.subf %1, %972 : vector<16x16xf32>
    %974 = math.absf %973 : vector<16x16xf32>
    %cst_305 = arith.constant 1.000000e+00 : f32
    %975 = vector.broadcast %cst_305 : f32 to vector<16x16xf32>
    %976 = arith.subf %975, %974 : vector<16x16xf32>
    %cst_306 = arith.constant 0.000000e+00 : f32
    %977 = vector.broadcast %cst_306 : f32 to vector<16x16xf32>
    %978 = arith.maximumf %977, %976 : vector<16x16xf32>
    %979 = vector.broadcast %971 : vector<1x16xf32> to vector<16x16xf32>
    %980 = arith.subf %3, %979 : vector<16x16xf32>
    %981 = math.absf %980 : vector<16x16xf32>
    %cst_307 = arith.constant 1.000000e+00 : f32
    %982 = vector.broadcast %cst_307 : f32 to vector<16x16xf32>
    %983 = arith.subf %982, %981 : vector<16x16xf32>
    %cst_308 = arith.constant 0.000000e+00 : f32
    %984 = vector.broadcast %cst_308 : f32 to vector<16x16xf32>
    %985 = arith.maximumf %984, %983 : vector<16x16xf32>
    %986 = vector.extract_strided_slice %949 {offsets = [2, 0], sizes = [1, 16], strides = [1, 1]} : vector<8x16xf32> to vector<1x16xf32>
    %987 = vector.extract_strided_slice %953 {offsets = [2, 0], sizes = [1, 16], strides = [1, 1]} : vector<8x16xf32> to vector<1x16xf32>
    %988 = vector.broadcast %986 : vector<1x16xf32> to vector<16x16xf32>
    %989 = arith.subf %1, %988 : vector<16x16xf32>
    %990 = math.absf %989 : vector<16x16xf32>
    %cst_309 = arith.constant 1.000000e+00 : f32
    %991 = vector.broadcast %cst_309 : f32 to vector<16x16xf32>
    %992 = arith.subf %991, %990 : vector<16x16xf32>
    %cst_310 = arith.constant 0.000000e+00 : f32
    %993 = vector.broadcast %cst_310 : f32 to vector<16x16xf32>
    %994 = arith.maximumf %993, %992 : vector<16x16xf32>
    %995 = vector.broadcast %987 : vector<1x16xf32> to vector<16x16xf32>
    %996 = arith.subf %3, %995 : vector<16x16xf32>
    %997 = math.absf %996 : vector<16x16xf32>
    %cst_311 = arith.constant 1.000000e+00 : f32
    %998 = vector.broadcast %cst_311 : f32 to vector<16x16xf32>
    %999 = arith.subf %998, %997 : vector<16x16xf32>
    %cst_312 = arith.constant 0.000000e+00 : f32
    %1000 = vector.broadcast %cst_312 : f32 to vector<16x16xf32>
    %1001 = arith.maximumf %1000, %999 : vector<16x16xf32>
    %1002 = vector.extract_strided_slice %949 {offsets = [3, 0], sizes = [1, 16], strides = [1, 1]} : vector<8x16xf32> to vector<1x16xf32>
    %1003 = vector.extract_strided_slice %953 {offsets = [3, 0], sizes = [1, 16], strides = [1, 1]} : vector<8x16xf32> to vector<1x16xf32>
    %1004 = vector.broadcast %1002 : vector<1x16xf32> to vector<16x16xf32>
    %1005 = arith.subf %1, %1004 : vector<16x16xf32>
    %1006 = math.absf %1005 : vector<16x16xf32>
    %cst_313 = arith.constant 1.000000e+00 : f32
    %1007 = vector.broadcast %cst_313 : f32 to vector<16x16xf32>
    %1008 = arith.subf %1007, %1006 : vector<16x16xf32>
    %cst_314 = arith.constant 0.000000e+00 : f32
    %1009 = vector.broadcast %cst_314 : f32 to vector<16x16xf32>
    %1010 = arith.maximumf %1009, %1008 : vector<16x16xf32>
    %1011 = vector.broadcast %1003 : vector<1x16xf32> to vector<16x16xf32>
    %1012 = arith.subf %3, %1011 : vector<16x16xf32>
    %1013 = math.absf %1012 : vector<16x16xf32>
    %cst_315 = arith.constant 1.000000e+00 : f32
    %1014 = vector.broadcast %cst_315 : f32 to vector<16x16xf32>
    %1015 = arith.subf %1014, %1013 : vector<16x16xf32>
    %cst_316 = arith.constant 0.000000e+00 : f32
    %1016 = vector.broadcast %cst_316 : f32 to vector<16x16xf32>
    %1017 = arith.maximumf %1016, %1015 : vector<16x16xf32>
    %1018 = vector.extract_strided_slice %949 {offsets = [4, 0], sizes = [1, 16], strides = [1, 1]} : vector<8x16xf32> to vector<1x16xf32>
    %1019 = vector.extract_strided_slice %953 {offsets = [4, 0], sizes = [1, 16], strides = [1, 1]} : vector<8x16xf32> to vector<1x16xf32>
    %1020 = vector.broadcast %1018 : vector<1x16xf32> to vector<16x16xf32>
    %1021 = arith.subf %1, %1020 : vector<16x16xf32>
    %1022 = math.absf %1021 : vector<16x16xf32>
    %cst_317 = arith.constant 1.000000e+00 : f32
    %1023 = vector.broadcast %cst_317 : f32 to vector<16x16xf32>
    %1024 = arith.subf %1023, %1022 : vector<16x16xf32>
    %cst_318 = arith.constant 0.000000e+00 : f32
    %1025 = vector.broadcast %cst_318 : f32 to vector<16x16xf32>
    %1026 = arith.maximumf %1025, %1024 : vector<16x16xf32>
    %1027 = vector.broadcast %1019 : vector<1x16xf32> to vector<16x16xf32>
    %1028 = arith.subf %3, %1027 : vector<16x16xf32>
    %1029 = math.absf %1028 : vector<16x16xf32>
    %cst_319 = arith.constant 1.000000e+00 : f32
    %1030 = vector.broadcast %cst_319 : f32 to vector<16x16xf32>
    %1031 = arith.subf %1030, %1029 : vector<16x16xf32>
    %cst_320 = arith.constant 0.000000e+00 : f32
    %1032 = vector.broadcast %cst_320 : f32 to vector<16x16xf32>
    %1033 = arith.maximumf %1032, %1031 : vector<16x16xf32>
    %1034 = vector.extract_strided_slice %949 {offsets = [5, 0], sizes = [1, 16], strides = [1, 1]} : vector<8x16xf32> to vector<1x16xf32>
    %1035 = vector.extract_strided_slice %953 {offsets = [5, 0], sizes = [1, 16], strides = [1, 1]} : vector<8x16xf32> to vector<1x16xf32>
    %1036 = vector.broadcast %1034 : vector<1x16xf32> to vector<16x16xf32>
    %1037 = arith.subf %1, %1036 : vector<16x16xf32>
    %1038 = math.absf %1037 : vector<16x16xf32>
    %cst_321 = arith.constant 1.000000e+00 : f32
    %1039 = vector.broadcast %cst_321 : f32 to vector<16x16xf32>
    %1040 = arith.subf %1039, %1038 : vector<16x16xf32>
    %cst_322 = arith.constant 0.000000e+00 : f32
    %1041 = vector.broadcast %cst_322 : f32 to vector<16x16xf32>
    %1042 = arith.maximumf %1041, %1040 : vector<16x16xf32>
    %1043 = vector.broadcast %1035 : vector<1x16xf32> to vector<16x16xf32>
    %1044 = arith.subf %3, %1043 : vector<16x16xf32>
    %1045 = math.absf %1044 : vector<16x16xf32>
    %cst_323 = arith.constant 1.000000e+00 : f32
    %1046 = vector.broadcast %cst_323 : f32 to vector<16x16xf32>
    %1047 = arith.subf %1046, %1045 : vector<16x16xf32>
    %cst_324 = arith.constant 0.000000e+00 : f32
    %1048 = vector.broadcast %cst_324 : f32 to vector<16x16xf32>
    %1049 = arith.maximumf %1048, %1047 : vector<16x16xf32>
    %1050 = vector.extract_strided_slice %949 {offsets = [6, 0], sizes = [1, 16], strides = [1, 1]} : vector<8x16xf32> to vector<1x16xf32>
    %1051 = vector.extract_strided_slice %953 {offsets = [6, 0], sizes = [1, 16], strides = [1, 1]} : vector<8x16xf32> to vector<1x16xf32>
    %1052 = vector.broadcast %1050 : vector<1x16xf32> to vector<16x16xf32>
    %1053 = arith.subf %1, %1052 : vector<16x16xf32>
    %1054 = math.absf %1053 : vector<16x16xf32>
    %cst_325 = arith.constant 1.000000e+00 : f32
    %1055 = vector.broadcast %cst_325 : f32 to vector<16x16xf32>
    %1056 = arith.subf %1055, %1054 : vector<16x16xf32>
    %cst_326 = arith.constant 0.000000e+00 : f32
    %1057 = vector.broadcast %cst_326 : f32 to vector<16x16xf32>
    %1058 = arith.maximumf %1057, %1056 : vector<16x16xf32>
    %1059 = vector.broadcast %1051 : vector<1x16xf32> to vector<16x16xf32>
    %1060 = arith.subf %3, %1059 : vector<16x16xf32>
    %1061 = math.absf %1060 : vector<16x16xf32>
    %cst_327 = arith.constant 1.000000e+00 : f32
    %1062 = vector.broadcast %cst_327 : f32 to vector<16x16xf32>
    %1063 = arith.subf %1062, %1061 : vector<16x16xf32>
    %cst_328 = arith.constant 0.000000e+00 : f32
    %1064 = vector.broadcast %cst_328 : f32 to vector<16x16xf32>
    %1065 = arith.maximumf %1064, %1063 : vector<16x16xf32>
    %1066 = vector.extract_strided_slice %949 {offsets = [7, 0], sizes = [1, 16], strides = [1, 1]} : vector<8x16xf32> to vector<1x16xf32>
    %1067 = vector.extract_strided_slice %953 {offsets = [7, 0], sizes = [1, 16], strides = [1, 1]} : vector<8x16xf32> to vector<1x16xf32>
    %1068 = vector.broadcast %1066 : vector<1x16xf32> to vector<16x16xf32>
    %1069 = arith.subf %1, %1068 : vector<16x16xf32>
    %1070 = math.absf %1069 : vector<16x16xf32>
    %cst_329 = arith.constant 1.000000e+00 : f32
    %1071 = vector.broadcast %cst_329 : f32 to vector<16x16xf32>
    %1072 = arith.subf %1071, %1070 : vector<16x16xf32>
    %cst_330 = arith.constant 0.000000e+00 : f32
    %1073 = vector.broadcast %cst_330 : f32 to vector<16x16xf32>
    %1074 = arith.maximumf %1073, %1072 : vector<16x16xf32>
    %1075 = vector.broadcast %1067 : vector<1x16xf32> to vector<16x16xf32>
    %1076 = arith.subf %3, %1075 : vector<16x16xf32>
    %1077 = math.absf %1076 : vector<16x16xf32>
    %cst_331 = arith.constant 1.000000e+00 : f32
    %1078 = vector.broadcast %cst_331 : f32 to vector<16x16xf32>
    %1079 = arith.subf %1078, %1077 : vector<16x16xf32>
    %cst_332 = arith.constant 0.000000e+00 : f32
    %1080 = vector.broadcast %cst_332 : f32 to vector<16x16xf32>
    %1081 = arith.maximumf %1080, %1079 : vector<16x16xf32>
    %1082 = tpu.concatenate %962, %978, %994, %1010, %1026, %1042, %1058, %1074 in 1 : vector<16x16xf32>, vector<16x16xf32>, vector<16x16xf32>, vector<16x16xf32>, vector<16x16xf32>, vector<16x16xf32>, vector<16x16xf32>, vector<16x16xf32> -> vector<16x128xf32>
    %1083 = tpu.concatenate %969, %985, %1001, %1017, %1033, %1049, %1065, %1081 in 1 : vector<16x16xf32>, vector<16x16xf32>, vector<16x16xf32>, vector<16x16xf32>, vector<16x16xf32>, vector<16x16xf32>, vector<16x16xf32>, vector<16x16xf32> -> vector<16x128xf32>
    %cst_333 = arith.constant dense<0.000000e+00> : vector<32x128xf32>
    %1084 = tpu.matmul %754, %1083, %cst_333 {dimension_numbers = #tpu.dot_dimension_numbers<[1], [0], [0], [1], [0, 0, 1, 1], [], []>} : vector<32x16xf32>, vector<16x128xf32>, vector<32x128xf32> -> vector<32x128xf32>
    %1085 = vector.extract_strided_slice %1084 {offsets = [0, 0], sizes = [16, 128], strides = [1, 1]} : vector<32x128xf32> to vector<16x128xf32>
    %1086 = arith.mulf %1082, %1085 : vector<16x128xf32>
    %cst_334 = arith.constant dense<0.000000e+00> : vector<128xf32>
    %1087 = vector.multi_reduction <add>, %1086, %cst_334 [0] : vector<16x128xf32> to vector<128xf32>
    %1088 = vector.shape_cast %1087 : vector<128xf32> to vector<1x128xf32>
    %1089 = vector.extract_strided_slice %1084 {offsets = [16, 0], sizes = [16, 128], strides = [1, 1]} : vector<32x128xf32> to vector<16x128xf32>
    %1090 = arith.mulf %1082, %1089 : vector<16x128xf32>
    %cst_335 = arith.constant dense<0.000000e+00> : vector<128xf32>
    %1091 = vector.multi_reduction <add>, %1090, %cst_335 [0] : vector<16x128xf32> to vector<128xf32>
    %1092 = vector.shape_cast %1091 : vector<128xf32> to vector<1x128xf32>
    %1093 = vector.extract_strided_slice %1088 {offsets = [0, 0], sizes = [1, 16], strides = [1, 1]} : vector<1x128xf32> to vector<1x16xf32>
    %1094 = vector.extract_strided_slice %1088 {offsets = [0, 16], sizes = [1, 16], strides = [1, 1]} : vector<1x128xf32> to vector<1x16xf32>
    %1095 = vector.extract_strided_slice %1088 {offsets = [0, 32], sizes = [1, 16], strides = [1, 1]} : vector<1x128xf32> to vector<1x16xf32>
    %1096 = vector.extract_strided_slice %1088 {offsets = [0, 48], sizes = [1, 16], strides = [1, 1]} : vector<1x128xf32> to vector<1x16xf32>
    %1097 = vector.extract_strided_slice %1088 {offsets = [0, 64], sizes = [1, 16], strides = [1, 1]} : vector<1x128xf32> to vector<1x16xf32>
    %1098 = vector.extract_strided_slice %1088 {offsets = [0, 80], sizes = [1, 16], strides = [1, 1]} : vector<1x128xf32> to vector<1x16xf32>
    %1099 = vector.extract_strided_slice %1088 {offsets = [0, 96], sizes = [1, 16], strides = [1, 1]} : vector<1x128xf32> to vector<1x16xf32>
    %1100 = vector.extract_strided_slice %1088 {offsets = [0, 112], sizes = [1, 16], strides = [1, 1]} : vector<1x128xf32> to vector<1x16xf32>
    %1101 = tpu.concatenate %1093, %1094, %1095, %1096, %1097, %1098, %1099, %1100 in 0 : vector<1x16xf32>, vector<1x16xf32>, vector<1x16xf32>, vector<1x16xf32>, vector<1x16xf32>, vector<1x16xf32>, vector<1x16xf32>, vector<1x16xf32> -> vector<8x16xf32>
    %1102 = vector.extract_strided_slice %1092 {offsets = [0, 0], sizes = [1, 16], strides = [1, 1]} : vector<1x128xf32> to vector<1x16xf32>
    %1103 = vector.extract_strided_slice %1092 {offsets = [0, 16], sizes = [1, 16], strides = [1, 1]} : vector<1x128xf32> to vector<1x16xf32>
    %1104 = vector.extract_strided_slice %1092 {offsets = [0, 32], sizes = [1, 16], strides = [1, 1]} : vector<1x128xf32> to vector<1x16xf32>
    %1105 = vector.extract_strided_slice %1092 {offsets = [0, 48], sizes = [1, 16], strides = [1, 1]} : vector<1x128xf32> to vector<1x16xf32>
    %1106 = vector.extract_strided_slice %1092 {offsets = [0, 64], sizes = [1, 16], strides = [1, 1]} : vector<1x128xf32> to vector<1x16xf32>
    %1107 = vector.extract_strided_slice %1092 {offsets = [0, 80], sizes = [1, 16], strides = [1, 1]} : vector<1x128xf32> to vector<1x16xf32>
    %1108 = vector.extract_strided_slice %1092 {offsets = [0, 96], sizes = [1, 16], strides = [1, 1]} : vector<1x128xf32> to vector<1x16xf32>
    %1109 = vector.extract_strided_slice %1092 {offsets = [0, 112], sizes = [1, 16], strides = [1, 1]} : vector<1x128xf32> to vector<1x16xf32>
    %1110 = tpu.concatenate %1102, %1103, %1104, %1105, %1106, %1107, %1108, %1109 in 0 : vector<1x16xf32>, vector<1x16xf32>, vector<1x16xf32>, vector<1x16xf32>, vector<1x16xf32>, vector<1x16xf32>, vector<1x16xf32>, vector<1x16xf32> -> vector<8x16xf32>
    %1111 = arith.addf %942, %1101 : vector<8x16xf32>
    %c0_336 = arith.constant 0 : index
    %c0_337 = arith.constant 0 : index
    %1112 = arith.index_cast %939 : i32 to index
    %c0_338 = arith.constant 0 : index
    %1113 = vector.load %arg5[%c0_336, %c0_337, %1112, %c0_338] : memref<1x2x16x16xf32, #tpu.memory_space<vmem>>, vector<1x1x8x16xf32>
    %1114 = vector.shape_cast %1113 : vector<1x1x8x16xf32> to vector<8x16xf32>
    %1115 = vector.shape_cast %1111 : vector<8x16xf32> to vector<1x1x8x16xf32>
    tpu.vector_store %arg5[%c0_336, %c0_337, %1112, %c0_338], %1115 {strides = array<i32>} : memref<1x2x16x16xf32, #tpu.memory_space<vmem>>, vector<1x1x8x16xf32>,
    %1116 = arith.addf %945, %1110 : vector<8x16xf32>
    %c0_339 = arith.constant 0 : index
    %c1_340 = arith.constant 1 : index
    %1117 = arith.index_cast %939 : i32 to index
    %c0_341 = arith.constant 0 : index
    %1118 = vector.load %arg5[%c0_339, %c1_340, %1117, %c0_341] : memref<1x2x16x16xf32, #tpu.memory_space<vmem>>, vector<1x1x8x16xf32>
    %1119 = vector.shape_cast %1118 : vector<1x1x8x16xf32> to vector<8x16xf32>
    %1120 = vector.shape_cast %1116 : vector<8x16xf32> to vector<1x1x8x16xf32>
    tpu.vector_store %arg5[%c0_339, %c1_340, %1117, %c0_341], %1120 {strides = array<i32>} : memref<1x2x16x16xf32, #tpu.memory_space<vmem>>, vector<1x1x8x16xf32>,
    %c2_i32_342 = arith.constant 2 : i32
    %c0_343 = arith.constant 0 : index
    %c0_344 = arith.constant 0 : index
    %c0_345 = arith.constant 0 : index
    %c0_346 = arith.constant 0 : index
    %1121 = vector.load %arg5[%c0_343, %c0_344, %c0_345, %c0_346] : memref<1x2x16x16xf32, #tpu.memory_space<vmem>>, vector<1x2x16x16xf32>
    %1122 = vector.shape_cast %1121 : vector<1x2x16x16xf32> to vector<2x16x16xf32>
    %1123 = vector.shape_cast %1122 : vector<2x16x16xf32> to vector<32x16xf32>
    %c0_i32_347 = arith.constant 0 : i32
    %c8_i32_348 = arith.constant 8 : i32
    %1124 = arith.muli %c0_i32_347, %c8_i32_348 : i32
    %1125 = tpu.assume_multiple %1124, 8 : i32
    %c0_349 = arith.constant 0 : index
    %c0_350 = arith.constant 0 : index
    %1126 = arith.index_cast %1125 : i32 to index
    %c0_351 = arith.constant 0 : index
    %1127 = vector.load %arg5[%c0_349, %c0_350, %1126, %c0_351] : memref<1x2x16x16xf32, #tpu.memory_space<vmem>>, vector<1x1x8x16xf32>
    %1128 = vector.shape_cast %1127 : vector<1x1x8x16xf32> to vector<8x16xf32>
    %c0_352 = arith.constant 0 : index
    %c1_353 = arith.constant 1 : index
    %1129 = arith.index_cast %1125 : i32 to index
    %c0_354 = arith.constant 0 : index
    %1130 = vector.load %arg5[%c0_352, %c1_353, %1129, %c0_354] : memref<1x2x16x16xf32, #tpu.memory_space<vmem>>, vector<1x1x8x16xf32>
    %1131 = vector.shape_cast %1130 : vector<1x1x8x16xf32> to vector<8x16xf32>
    %c0_355 = arith.constant 0 : index
    %c0_356 = arith.constant 0 : index
    %1132 = arith.index_cast %1125 : i32 to index
    %c0_357 = arith.constant 0 : index
    %1133 = vector.load %arg2[%c0_355, %c0_356, %1132, %c0_357] : memref<1x2x16x16xf32, #tpu.memory_space<vmem>>, vector<1x1x8x16xf32>
    %1134 = vector.shape_cast %1133 : vector<1x1x8x16xf32> to vector<8x16xf32>
    %1135 = arith.addf %1134, %1128 : vector<8x16xf32>
    %c0_358 = arith.constant 0 : index
    %c1_359 = arith.constant 1 : index
    %1136 = arith.index_cast %1125 : i32 to index
    %c0_360 = arith.constant 0 : index
    %1137 = vector.load %arg2[%c0_358, %c1_359, %1136, %c0_360] : memref<1x2x16x16xf32, #tpu.memory_space<vmem>>, vector<1x1x8x16xf32>
    %1138 = vector.shape_cast %1137 : vector<1x1x8x16xf32> to vector<8x16xf32>
    %1139 = arith.addf %1138, %1131 : vector<8x16xf32>
    %1140 = vector.extract_strided_slice %1135 {offsets = [0, 0], sizes = [1, 16], strides = [1, 1]} : vector<8x16xf32> to vector<1x16xf32>
    %1141 = vector.extract_strided_slice %1139 {offsets = [0, 0], sizes = [1, 16], strides = [1, 1]} : vector<8x16xf32> to vector<1x16xf32>
    %1142 = vector.broadcast %1140 : vector<1x16xf32> to vector<16x16xf32>
    %1143 = arith.subf %1, %1142 : vector<16x16xf32>
    %1144 = math.absf %1143 : vector<16x16xf32>
    %cst_361 = arith.constant 1.000000e+00 : f32
    %1145 = vector.broadcast %cst_361 : f32 to vector<16x16xf32>
    %1146 = arith.subf %1145, %1144 : vector<16x16xf32>
    %cst_362 = arith.constant 0.000000e+00 : f32
    %1147 = vector.broadcast %cst_362 : f32 to vector<16x16xf32>
    %1148 = arith.maximumf %1147, %1146 : vector<16x16xf32>
    %1149 = vector.broadcast %1141 : vector<1x16xf32> to vector<16x16xf32>
    %1150 = arith.subf %3, %1149 : vector<16x16xf32>
    %1151 = math.absf %1150 : vector<16x16xf32>
    %cst_363 = arith.constant 1.000000e+00 : f32
    %1152 = vector.broadcast %cst_363 : f32 to vector<16x16xf32>
    %1153 = arith.subf %1152, %1151 : vector<16x16xf32>
    %cst_364 = arith.constant 0.000000e+00 : f32
    %1154 = vector.broadcast %cst_364 : f32 to vector<16x16xf32>
    %1155 = arith.maximumf %1154, %1153 : vector<16x16xf32>
    %1156 = vector.extract_strided_slice %1135 {offsets = [1, 0], sizes = [1, 16], strides = [1, 1]} : vector<8x16xf32> to vector<1x16xf32>
    %1157 = vector.extract_strided_slice %1139 {offsets = [1, 0], sizes = [1, 16], strides = [1, 1]} : vector<8x16xf32> to vector<1x16xf32>
    %1158 = vector.broadcast %1156 : vector<1x16xf32> to vector<16x16xf32>
    %1159 = arith.subf %1, %1158 : vector<16x16xf32>
    %1160 = math.absf %1159 : vector<16x16xf32>
    %cst_365 = arith.constant 1.000000e+00 : f32
    %1161 = vector.broadcast %cst_365 : f32 to vector<16x16xf32>
    %1162 = arith.subf %1161, %1160 : vector<16x16xf32>
    %cst_366 = arith.constant 0.000000e+00 : f32
    %1163 = vector.broadcast %cst_366 : f32 to vector<16x16xf32>
    %1164 = arith.maximumf %1163, %1162 : vector<16x16xf32>
    %1165 = vector.broadcast %1157 : vector<1x16xf32> to vector<16x16xf32>
    %1166 = arith.subf %3, %1165 : vector<16x16xf32>
    %1167 = math.absf %1166 : vector<16x16xf32>
    %cst_367 = arith.constant 1.000000e+00 : f32
    %1168 = vector.broadcast %cst_367 : f32 to vector<16x16xf32>
    %1169 = arith.subf %1168, %1167 : vector<16x16xf32>
    %cst_368 = arith.constant 0.000000e+00 : f32
    %1170 = vector.broadcast %cst_368 : f32 to vector<16x16xf32>
    %1171 = arith.maximumf %1170, %1169 : vector<16x16xf32>
    %1172 = vector.extract_strided_slice %1135 {offsets = [2, 0], sizes = [1, 16], strides = [1, 1]} : vector<8x16xf32> to vector<1x16xf32>
    %1173 = vector.extract_strided_slice %1139 {offsets = [2, 0], sizes = [1, 16], strides = [1, 1]} : vector<8x16xf32> to vector<1x16xf32>
    %1174 = vector.broadcast %1172 : vector<1x16xf32> to vector<16x16xf32>
    %1175 = arith.subf %1, %1174 : vector<16x16xf32>
    %1176 = math.absf %1175 : vector<16x16xf32>
    %cst_369 = arith.constant 1.000000e+00 : f32
    %1177 = vector.broadcast %cst_369 : f32 to vector<16x16xf32>
    %1178 = arith.subf %1177, %1176 : vector<16x16xf32>
    %cst_370 = arith.constant 0.000000e+00 : f32
    %1179 = vector.broadcast %cst_370 : f32 to vector<16x16xf32>
    %1180 = arith.maximumf %1179, %1178 : vector<16x16xf32>
    %1181 = vector.broadcast %1173 : vector<1x16xf32> to vector<16x16xf32>
    %1182 = arith.subf %3, %1181 : vector<16x16xf32>
    %1183 = math.absf %1182 : vector<16x16xf32>
    %cst_371 = arith.constant 1.000000e+00 : f32
    %1184 = vector.broadcast %cst_371 : f32 to vector<16x16xf32>
    %1185 = arith.subf %1184, %1183 : vector<16x16xf32>
    %cst_372 = arith.constant 0.000000e+00 : f32
    %1186 = vector.broadcast %cst_372 : f32 to vector<16x16xf32>
    %1187 = arith.maximumf %1186, %1185 : vector<16x16xf32>
    %1188 = vector.extract_strided_slice %1135 {offsets = [3, 0], sizes = [1, 16], strides = [1, 1]} : vector<8x16xf32> to vector<1x16xf32>
    %1189 = vector.extract_strided_slice %1139 {offsets = [3, 0], sizes = [1, 16], strides = [1, 1]} : vector<8x16xf32> to vector<1x16xf32>
    %1190 = vector.broadcast %1188 : vector<1x16xf32> to vector<16x16xf32>
    %1191 = arith.subf %1, %1190 : vector<16x16xf32>
    %1192 = math.absf %1191 : vector<16x16xf32>
    %cst_373 = arith.constant 1.000000e+00 : f32
    %1193 = vector.broadcast %cst_373 : f32 to vector<16x16xf32>
    %1194 = arith.subf %1193, %1192 : vector<16x16xf32>
    %cst_374 = arith.constant 0.000000e+00 : f32
    %1195 = vector.broadcast %cst_374 : f32 to vector<16x16xf32>
    %1196 = arith.maximumf %1195, %1194 : vector<16x16xf32>
    %1197 = vector.broadcast %1189 : vector<1x16xf32> to vector<16x16xf32>
    %1198 = arith.subf %3, %1197 : vector<16x16xf32>
    %1199 = math.absf %1198 : vector<16x16xf32>
    %cst_375 = arith.constant 1.000000e+00 : f32
    %1200 = vector.broadcast %cst_375 : f32 to vector<16x16xf32>
    %1201 = arith.subf %1200, %1199 : vector<16x16xf32>
    %cst_376 = arith.constant 0.000000e+00 : f32
    %1202 = vector.broadcast %cst_376 : f32 to vector<16x16xf32>
    %1203 = arith.maximumf %1202, %1201 : vector<16x16xf32>
    %1204 = vector.extract_strided_slice %1135 {offsets = [4, 0], sizes = [1, 16], strides = [1, 1]} : vector<8x16xf32> to vector<1x16xf32>
    %1205 = vector.extract_strided_slice %1139 {offsets = [4, 0], sizes = [1, 16], strides = [1, 1]} : vector<8x16xf32> to vector<1x16xf32>
    %1206 = vector.broadcast %1204 : vector<1x16xf32> to vector<16x16xf32>
    %1207 = arith.subf %1, %1206 : vector<16x16xf32>
    %1208 = math.absf %1207 : vector<16x16xf32>
    %cst_377 = arith.constant 1.000000e+00 : f32
    %1209 = vector.broadcast %cst_377 : f32 to vector<16x16xf32>
    %1210 = arith.subf %1209, %1208 : vector<16x16xf32>
    %cst_378 = arith.constant 0.000000e+00 : f32
    %1211 = vector.broadcast %cst_378 : f32 to vector<16x16xf32>
    %1212 = arith.maximumf %1211, %1210 : vector<16x16xf32>
    %1213 = vector.broadcast %1205 : vector<1x16xf32> to vector<16x16xf32>
    %1214 = arith.subf %3, %1213 : vector<16x16xf32>
    %1215 = math.absf %1214 : vector<16x16xf32>
    %cst_379 = arith.constant 1.000000e+00 : f32
    %1216 = vector.broadcast %cst_379 : f32 to vector<16x16xf32>
    %1217 = arith.subf %1216, %1215 : vector<16x16xf32>
    %cst_380 = arith.constant 0.000000e+00 : f32
    %1218 = vector.broadcast %cst_380 : f32 to vector<16x16xf32>
    %1219 = arith.maximumf %1218, %1217 : vector<16x16xf32>
    %1220 = vector.extract_strided_slice %1135 {offsets = [5, 0], sizes = [1, 16], strides = [1, 1]} : vector<8x16xf32> to vector<1x16xf32>
    %1221 = vector.extract_strided_slice %1139 {offsets = [5, 0], sizes = [1, 16], strides = [1, 1]} : vector<8x16xf32> to vector<1x16xf32>
    %1222 = vector.broadcast %1220 : vector<1x16xf32> to vector<16x16xf32>
    %1223 = arith.subf %1, %1222 : vector<16x16xf32>
    %1224 = math.absf %1223 : vector<16x16xf32>
    %cst_381 = arith.constant 1.000000e+00 : f32
    %1225 = vector.broadcast %cst_381 : f32 to vector<16x16xf32>
    %1226 = arith.subf %1225, %1224 : vector<16x16xf32>
    %cst_382 = arith.constant 0.000000e+00 : f32
    %1227 = vector.broadcast %cst_382 : f32 to vector<16x16xf32>
    %1228 = arith.maximumf %1227, %1226 : vector<16x16xf32>
    %1229 = vector.broadcast %1221 : vector<1x16xf32> to vector<16x16xf32>
    %1230 = arith.subf %3, %1229 : vector<16x16xf32>
    %1231 = math.absf %1230 : vector<16x16xf32>
    %cst_383 = arith.constant 1.000000e+00 : f32
    %1232 = vector.broadcast %cst_383 : f32 to vector<16x16xf32>
    %1233 = arith.subf %1232, %1231 : vector<16x16xf32>
    %cst_384 = arith.constant 0.000000e+00 : f32
    %1234 = vector.broadcast %cst_384 : f32 to vector<16x16xf32>
    %1235 = arith.maximumf %1234, %1233 : vector<16x16xf32>
    %1236 = vector.extract_strided_slice %1135 {offsets = [6, 0], sizes = [1, 16], strides = [1, 1]} : vector<8x16xf32> to vector<1x16xf32>
    %1237 = vector.extract_strided_slice %1139 {offsets = [6, 0], sizes = [1, 16], strides = [1, 1]} : vector<8x16xf32> to vector<1x16xf32>
    %1238 = vector.broadcast %1236 : vector<1x16xf32> to vector<16x16xf32>
    %1239 = arith.subf %1, %1238 : vector<16x16xf32>
    %1240 = math.absf %1239 : vector<16x16xf32>
    %cst_385 = arith.constant 1.000000e+00 : f32
    %1241 = vector.broadcast %cst_385 : f32 to vector<16x16xf32>
    %1242 = arith.subf %1241, %1240 : vector<16x16xf32>
    %cst_386 = arith.constant 0.000000e+00 : f32
    %1243 = vector.broadcast %cst_386 : f32 to vector<16x16xf32>
    %1244 = arith.maximumf %1243, %1242 : vector<16x16xf32>
    %1245 = vector.broadcast %1237 : vector<1x16xf32> to vector<16x16xf32>
    %1246 = arith.subf %3, %1245 : vector<16x16xf32>
    %1247 = math.absf %1246 : vector<16x16xf32>
    %cst_387 = arith.constant 1.000000e+00 : f32
    %1248 = vector.broadcast %cst_387 : f32 to vector<16x16xf32>
    %1249 = arith.subf %1248, %1247 : vector<16x16xf32>
    %cst_388 = arith.constant 0.000000e+00 : f32
    %1250 = vector.broadcast %cst_388 : f32 to vector<16x16xf32>
    %1251 = arith.maximumf %1250, %1249 : vector<16x16xf32>
    %1252 = vector.extract_strided_slice %1135 {offsets = [7, 0], sizes = [1, 16], strides = [1, 1]} : vector<8x16xf32> to vector<1x16xf32>
    %1253 = vector.extract_strided_slice %1139 {offsets = [7, 0], sizes = [1, 16], strides = [1, 1]} : vector<8x16xf32> to vector<1x16xf32>
    %1254 = vector.broadcast %1252 : vector<1x16xf32> to vector<16x16xf32>
    %1255 = arith.subf %1, %1254 : vector<16x16xf32>
    %1256 = math.absf %1255 : vector<16x16xf32>
    %cst_389 = arith.constant 1.000000e+00 : f32
    %1257 = vector.broadcast %cst_389 : f32 to vector<16x16xf32>
    %1258 = arith.subf %1257, %1256 : vector<16x16xf32>
    %cst_390 = arith.constant 0.000000e+00 : f32
    %1259 = vector.broadcast %cst_390 : f32 to vector<16x16xf32>
    %1260 = arith.maximumf %1259, %1258 : vector<16x16xf32>
    %1261 = vector.broadcast %1253 : vector<1x16xf32> to vector<16x16xf32>
    %1262 = arith.subf %3, %1261 : vector<16x16xf32>
    %1263 = math.absf %1262 : vector<16x16xf32>
    %cst_391 = arith.constant 1.000000e+00 : f32
    %1264 = vector.broadcast %cst_391 : f32 to vector<16x16xf32>
    %1265 = arith.subf %1264, %1263 : vector<16x16xf32>
    %cst_392 = arith.constant 0.000000e+00 : f32
    %1266 = vector.broadcast %cst_392 : f32 to vector<16x16xf32>
    %1267 = arith.maximumf %1266, %1265 : vector<16x16xf32>
    %1268 = tpu.concatenate %1148, %1164, %1180, %1196, %1212, %1228, %1244, %1260 in 1 : vector<16x16xf32>, vector<16x16xf32>, vector<16x16xf32>, vector<16x16xf32>, vector<16x16xf32>, vector<16x16xf32>, vector<16x16xf32>, vector<16x16xf32> -> vector<16x128xf32>
    %1269 = tpu.concatenate %1155, %1171, %1187, %1203, %1219, %1235, %1251, %1267 in 1 : vector<16x16xf32>, vector<16x16xf32>, vector<16x16xf32>, vector<16x16xf32>, vector<16x16xf32>, vector<16x16xf32>, vector<16x16xf32>, vector<16x16xf32> -> vector<16x128xf32>
    %cst_393 = arith.constant dense<0.000000e+00> : vector<32x128xf32>
    %1270 = tpu.matmul %1123, %1269, %cst_393 {dimension_numbers = #tpu.dot_dimension_numbers<[1], [0], [0], [1], [0, 0, 1, 1], [], []>} : vector<32x16xf32>, vector<16x128xf32>, vector<32x128xf32> -> vector<32x128xf32>
    %1271 = vector.extract_strided_slice %1270 {offsets = [0, 0], sizes = [16, 128], strides = [1, 1]} : vector<32x128xf32> to vector<16x128xf32>
    %1272 = arith.mulf %1268, %1271 : vector<16x128xf32>
    %cst_394 = arith.constant dense<0.000000e+00> : vector<128xf32>
    %1273 = vector.multi_reduction <add>, %1272, %cst_394 [0] : vector<16x128xf32> to vector<128xf32>
    %1274 = vector.shape_cast %1273 : vector<128xf32> to vector<1x128xf32>
    %1275 = vector.extract_strided_slice %1270 {offsets = [16, 0], sizes = [16, 128], strides = [1, 1]} : vector<32x128xf32> to vector<16x128xf32>
    %1276 = arith.mulf %1268, %1275 : vector<16x128xf32>
    %cst_395 = arith.constant dense<0.000000e+00> : vector<128xf32>
    %1277 = vector.multi_reduction <add>, %1276, %cst_395 [0] : vector<16x128xf32> to vector<128xf32>
    %1278 = vector.shape_cast %1277 : vector<128xf32> to vector<1x128xf32>
    %1279 = vector.extract_strided_slice %1274 {offsets = [0, 0], sizes = [1, 16], strides = [1, 1]} : vector<1x128xf32> to vector<1x16xf32>
    %1280 = vector.extract_strided_slice %1274 {offsets = [0, 16], sizes = [1, 16], strides = [1, 1]} : vector<1x128xf32> to vector<1x16xf32>
    %1281 = vector.extract_strided_slice %1274 {offsets = [0, 32], sizes = [1, 16], strides = [1, 1]} : vector<1x128xf32> to vector<1x16xf32>
    %1282 = vector.extract_strided_slice %1274 {offsets = [0, 48], sizes = [1, 16], strides = [1, 1]} : vector<1x128xf32> to vector<1x16xf32>
    %1283 = vector.extract_strided_slice %1274 {offsets = [0, 64], sizes = [1, 16], strides = [1, 1]} : vector<1x128xf32> to vector<1x16xf32>
    %1284 = vector.extract_strided_slice %1274 {offsets = [0, 80], sizes = [1, 16], strides = [1, 1]} : vector<1x128xf32> to vector<1x16xf32>
    %1285 = vector.extract_strided_slice %1274 {offsets = [0, 96], sizes = [1, 16], strides = [1, 1]} : vector<1x128xf32> to vector<1x16xf32>
    %1286 = vector.extract_strided_slice %1274 {offsets = [0, 112], sizes = [1, 16], strides = [1, 1]} : vector<1x128xf32> to vector<1x16xf32>
    %1287 = tpu.concatenate %1279, %1280, %1281, %1282, %1283, %1284, %1285, %1286 in 0 : vector<1x16xf32>, vector<1x16xf32>, vector<1x16xf32>, vector<1x16xf32>, vector<1x16xf32>, vector<1x16xf32>, vector<1x16xf32>, vector<1x16xf32> -> vector<8x16xf32>
    %1288 = vector.extract_strided_slice %1278 {offsets = [0, 0], sizes = [1, 16], strides = [1, 1]} : vector<1x128xf32> to vector<1x16xf32>
    %1289 = vector.extract_strided_slice %1278 {offsets = [0, 16], sizes = [1, 16], strides = [1, 1]} : vector<1x128xf32> to vector<1x16xf32>
    %1290 = vector.extract_strided_slice %1278 {offsets = [0, 32], sizes = [1, 16], strides = [1, 1]} : vector<1x128xf32> to vector<1x16xf32>
    %1291 = vector.extract_strided_slice %1278 {offsets = [0, 48], sizes = [1, 16], strides = [1, 1]} : vector<1x128xf32> to vector<1x16xf32>
    %1292 = vector.extract_strided_slice %1278 {offsets = [0, 64], sizes = [1, 16], strides = [1, 1]} : vector<1x128xf32> to vector<1x16xf32>
    %1293 = vector.extract_strided_slice %1278 {offsets = [0, 80], sizes = [1, 16], strides = [1, 1]} : vector<1x128xf32> to vector<1x16xf32>
    %1294 = vector.extract_strided_slice %1278 {offsets = [0, 96], sizes = [1, 16], strides = [1, 1]} : vector<1x128xf32> to vector<1x16xf32>
    %1295 = vector.extract_strided_slice %1278 {offsets = [0, 112], sizes = [1, 16], strides = [1, 1]} : vector<1x128xf32> to vector<1x16xf32>
    %1296 = tpu.concatenate %1288, %1289, %1290, %1291, %1292, %1293, %1294, %1295 in 0 : vector<1x16xf32>, vector<1x16xf32>, vector<1x16xf32>, vector<1x16xf32>, vector<1x16xf32>, vector<1x16xf32>, vector<1x16xf32>, vector<1x16xf32> -> vector<8x16xf32>
    %1297 = arith.addf %1128, %1287 : vector<8x16xf32>
    %c0_396 = arith.constant 0 : index
    %c0_397 = arith.constant 0 : index
    %1298 = arith.index_cast %1125 : i32 to index
    %c0_398 = arith.constant 0 : index
    %1299 = vector.load %arg6[%c0_396, %c0_397, %1298, %c0_398] : memref<1x2x16x16xf32, #tpu.memory_space<vmem>>, vector<1x1x8x16xf32>
    %1300 = vector.shape_cast %1299 : vector<1x1x8x16xf32> to vector<8x16xf32>
    %1301 = vector.shape_cast %1297 : vector<8x16xf32> to vector<1x1x8x16xf32>
    tpu.vector_store %arg6[%c0_396, %c0_397, %1298, %c0_398], %1301 {strides = array<i32>} : memref<1x2x16x16xf32, #tpu.memory_space<vmem>>, vector<1x1x8x16xf32>,
    %1302 = arith.addf %1131, %1296 : vector<8x16xf32>
    %c0_399 = arith.constant 0 : index
    %c1_400 = arith.constant 1 : index
    %1303 = arith.index_cast %1125 : i32 to index
    %c0_401 = arith.constant 0 : index
    %1304 = vector.load %arg6[%c0_399, %c1_400, %1303, %c0_401] : memref<1x2x16x16xf32, #tpu.memory_space<vmem>>, vector<1x1x8x16xf32>
    %1305 = vector.shape_cast %1304 : vector<1x1x8x16xf32> to vector<8x16xf32>
    %1306 = vector.shape_cast %1302 : vector<8x16xf32> to vector<1x1x8x16xf32>
    tpu.vector_store %arg6[%c0_399, %c1_400, %1303, %c0_401], %1306 {strides = array<i32>} : memref<1x2x16x16xf32, #tpu.memory_space<vmem>>, vector<1x1x8x16xf32>,
    %c1_i32_402 = arith.constant 1 : i32
    %c8_i32_403 = arith.constant 8 : i32
    %1307 = arith.muli %c1_i32_402, %c8_i32_403 : i32
    %1308 = tpu.assume_multiple %1307, 8 : i32
    %c0_404 = arith.constant 0 : index
    %c0_405 = arith.constant 0 : index
    %1309 = arith.index_cast %1308 : i32 to index
    %c0_406 = arith.constant 0 : index
    %1310 = vector.load %arg5[%c0_404, %c0_405, %1309, %c0_406] : memref<1x2x16x16xf32, #tpu.memory_space<vmem>>, vector<1x1x8x16xf32>
    %1311 = vector.shape_cast %1310 : vector<1x1x8x16xf32> to vector<8x16xf32>
    %c0_407 = arith.constant 0 : index
    %c1_408 = arith.constant 1 : index
    %1312 = arith.index_cast %1308 : i32 to index
    %c0_409 = arith.constant 0 : index
    %1313 = vector.load %arg5[%c0_407, %c1_408, %1312, %c0_409] : memref<1x2x16x16xf32, #tpu.memory_space<vmem>>, vector<1x1x8x16xf32>
    %1314 = vector.shape_cast %1313 : vector<1x1x8x16xf32> to vector<8x16xf32>
    %c0_410 = arith.constant 0 : index
    %c0_411 = arith.constant 0 : index
    %1315 = arith.index_cast %1308 : i32 to index
    %c0_412 = arith.constant 0 : index
    %1316 = vector.load %arg2[%c0_410, %c0_411, %1315, %c0_412] : memref<1x2x16x16xf32, #tpu.memory_space<vmem>>, vector<1x1x8x16xf32>
    %1317 = vector.shape_cast %1316 : vector<1x1x8x16xf32> to vector<8x16xf32>
    %1318 = arith.addf %1317, %1311 : vector<8x16xf32>
    %c0_413 = arith.constant 0 : index
    %c1_414 = arith.constant 1 : index
    %1319 = arith.index_cast %1308 : i32 to index
    %c0_415 = arith.constant 0 : index
    %1320 = vector.load %arg2[%c0_413, %c1_414, %1319, %c0_415] : memref<1x2x16x16xf32, #tpu.memory_space<vmem>>, vector<1x1x8x16xf32>
    %1321 = vector.shape_cast %1320 : vector<1x1x8x16xf32> to vector<8x16xf32>
    %1322 = arith.addf %1321, %1314 : vector<8x16xf32>
    %1323 = vector.extract_strided_slice %1318 {offsets = [0, 0], sizes = [1, 16], strides = [1, 1]} : vector<8x16xf32> to vector<1x16xf32>
    %1324 = vector.extract_strided_slice %1322 {offsets = [0, 0], sizes = [1, 16], strides = [1, 1]} : vector<8x16xf32> to vector<1x16xf32>
    %1325 = vector.broadcast %1323 : vector<1x16xf32> to vector<16x16xf32>
    %1326 = arith.subf %1, %1325 : vector<16x16xf32>
    %1327 = math.absf %1326 : vector<16x16xf32>
    %cst_416 = arith.constant 1.000000e+00 : f32
    %1328 = vector.broadcast %cst_416 : f32 to vector<16x16xf32>
    %1329 = arith.subf %1328, %1327 : vector<16x16xf32>
    %cst_417 = arith.constant 0.000000e+00 : f32
    %1330 = vector.broadcast %cst_417 : f32 to vector<16x16xf32>
    %1331 = arith.maximumf %1330, %1329 : vector<16x16xf32>
    %1332 = vector.broadcast %1324 : vector<1x16xf32> to vector<16x16xf32>
    %1333 = arith.subf %3, %1332 : vector<16x16xf32>
    %1334 = math.absf %1333 : vector<16x16xf32>
    %cst_418 = arith.constant 1.000000e+00 : f32
    %1335 = vector.broadcast %cst_418 : f32 to vector<16x16xf32>
    %1336 = arith.subf %1335, %1334 : vector<16x16xf32>
    %cst_419 = arith.constant 0.000000e+00 : f32
    %1337 = vector.broadcast %cst_419 : f32 to vector<16x16xf32>
    %1338 = arith.maximumf %1337, %1336 : vector<16x16xf32>
    %1339 = vector.extract_strided_slice %1318 {offsets = [1, 0], sizes = [1, 16], strides = [1, 1]} : vector<8x16xf32> to vector<1x16xf32>
    %1340 = vector.extract_strided_slice %1322 {offsets = [1, 0], sizes = [1, 16], strides = [1, 1]} : vector<8x16xf32> to vector<1x16xf32>
    %1341 = vector.broadcast %1339 : vector<1x16xf32> to vector<16x16xf32>
    %1342 = arith.subf %1, %1341 : vector<16x16xf32>
    %1343 = math.absf %1342 : vector<16x16xf32>
    %cst_420 = arith.constant 1.000000e+00 : f32
    %1344 = vector.broadcast %cst_420 : f32 to vector<16x16xf32>
    %1345 = arith.subf %1344, %1343 : vector<16x16xf32>
    %cst_421 = arith.constant 0.000000e+00 : f32
    %1346 = vector.broadcast %cst_421 : f32 to vector<16x16xf32>
    %1347 = arith.maximumf %1346, %1345 : vector<16x16xf32>
    %1348 = vector.broadcast %1340 : vector<1x16xf32> to vector<16x16xf32>
    %1349 = arith.subf %3, %1348 : vector<16x16xf32>
    %1350 = math.absf %1349 : vector<16x16xf32>
    %cst_422 = arith.constant 1.000000e+00 : f32
    %1351 = vector.broadcast %cst_422 : f32 to vector<16x16xf32>
    %1352 = arith.subf %1351, %1350 : vector<16x16xf32>
    %cst_423 = arith.constant 0.000000e+00 : f32
    %1353 = vector.broadcast %cst_423 : f32 to vector<16x16xf32>
    %1354 = arith.maximumf %1353, %1352 : vector<16x16xf32>
    %1355 = vector.extract_strided_slice %1318 {offsets = [2, 0], sizes = [1, 16], strides = [1, 1]} : vector<8x16xf32> to vector<1x16xf32>
    %1356 = vector.extract_strided_slice %1322 {offsets = [2, 0], sizes = [1, 16], strides = [1, 1]} : vector<8x16xf32> to vector<1x16xf32>
    %1357 = vector.broadcast %1355 : vector<1x16xf32> to vector<16x16xf32>
    %1358 = arith.subf %1, %1357 : vector<16x16xf32>
    %1359 = math.absf %1358 : vector<16x16xf32>
    %cst_424 = arith.constant 1.000000e+00 : f32
    %1360 = vector.broadcast %cst_424 : f32 to vector<16x16xf32>
    %1361 = arith.subf %1360, %1359 : vector<16x16xf32>
    %cst_425 = arith.constant 0.000000e+00 : f32
    %1362 = vector.broadcast %cst_425 : f32 to vector<16x16xf32>
    %1363 = arith.maximumf %1362, %1361 : vector<16x16xf32>
    %1364 = vector.broadcast %1356 : vector<1x16xf32> to vector<16x16xf32>
    %1365 = arith.subf %3, %1364 : vector<16x16xf32>
    %1366 = math.absf %1365 : vector<16x16xf32>
    %cst_426 = arith.constant 1.000000e+00 : f32
    %1367 = vector.broadcast %cst_426 : f32 to vector<16x16xf32>
    %1368 = arith.subf %1367, %1366 : vector<16x16xf32>
    %cst_427 = arith.constant 0.000000e+00 : f32
    %1369 = vector.broadcast %cst_427 : f32 to vector<16x16xf32>
    %1370 = arith.maximumf %1369, %1368 : vector<16x16xf32>
    %1371 = vector.extract_strided_slice %1318 {offsets = [3, 0], sizes = [1, 16], strides = [1, 1]} : vector<8x16xf32> to vector<1x16xf32>
    %1372 = vector.extract_strided_slice %1322 {offsets = [3, 0], sizes = [1, 16], strides = [1, 1]} : vector<8x16xf32> to vector<1x16xf32>
    %1373 = vector.broadcast %1371 : vector<1x16xf32> to vector<16x16xf32>
    %1374 = arith.subf %1, %1373 : vector<16x16xf32>
    %1375 = math.absf %1374 : vector<16x16xf32>
    %cst_428 = arith.constant 1.000000e+00 : f32
    %1376 = vector.broadcast %cst_428 : f32 to vector<16x16xf32>
    %1377 = arith.subf %1376, %1375 : vector<16x16xf32>
    %cst_429 = arith.constant 0.000000e+00 : f32
    %1378 = vector.broadcast %cst_429 : f32 to vector<16x16xf32>
    %1379 = arith.maximumf %1378, %1377 : vector<16x16xf32>
    %1380 = vector.broadcast %1372 : vector<1x16xf32> to vector<16x16xf32>
    %1381 = arith.subf %3, %1380 : vector<16x16xf32>
    %1382 = math.absf %1381 : vector<16x16xf32>
    %cst_430 = arith.constant 1.000000e+00 : f32
    %1383 = vector.broadcast %cst_430 : f32 to vector<16x16xf32>
    %1384 = arith.subf %1383, %1382 : vector<16x16xf32>
    %cst_431 = arith.constant 0.000000e+00 : f32
    %1385 = vector.broadcast %cst_431 : f32 to vector<16x16xf32>
    %1386 = arith.maximumf %1385, %1384 : vector<16x16xf32>
    %1387 = vector.extract_strided_slice %1318 {offsets = [4, 0], sizes = [1, 16], strides = [1, 1]} : vector<8x16xf32> to vector<1x16xf32>
    %1388 = vector.extract_strided_slice %1322 {offsets = [4, 0], sizes = [1, 16], strides = [1, 1]} : vector<8x16xf32> to vector<1x16xf32>
    %1389 = vector.broadcast %1387 : vector<1x16xf32> to vector<16x16xf32>
    %1390 = arith.subf %1, %1389 : vector<16x16xf32>
    %1391 = math.absf %1390 : vector<16x16xf32>
    %cst_432 = arith.constant 1.000000e+00 : f32
    %1392 = vector.broadcast %cst_432 : f32 to vector<16x16xf32>
    %1393 = arith.subf %1392, %1391 : vector<16x16xf32>
    %cst_433 = arith.constant 0.000000e+00 : f32
    %1394 = vector.broadcast %cst_433 : f32 to vector<16x16xf32>
    %1395 = arith.maximumf %1394, %1393 : vector<16x16xf32>
    %1396 = vector.broadcast %1388 : vector<1x16xf32> to vector<16x16xf32>
    %1397 = arith.subf %3, %1396 : vector<16x16xf32>
    %1398 = math.absf %1397 : vector<16x16xf32>
    %cst_434 = arith.constant 1.000000e+00 : f32
    %1399 = vector.broadcast %cst_434 : f32 to vector<16x16xf32>
    %1400 = arith.subf %1399, %1398 : vector<16x16xf32>
    %cst_435 = arith.constant 0.000000e+00 : f32
    %1401 = vector.broadcast %cst_435 : f32 to vector<16x16xf32>
    %1402 = arith.maximumf %1401, %1400 : vector<16x16xf32>
    %1403 = vector.extract_strided_slice %1318 {offsets = [5, 0], sizes = [1, 16], strides = [1, 1]} : vector<8x16xf32> to vector<1x16xf32>
    %1404 = vector.extract_strided_slice %1322 {offsets = [5, 0], sizes = [1, 16], strides = [1, 1]} : vector<8x16xf32> to vector<1x16xf32>
    %1405 = vector.broadcast %1403 : vector<1x16xf32> to vector<16x16xf32>
    %1406 = arith.subf %1, %1405 : vector<16x16xf32>
    %1407 = math.absf %1406 : vector<16x16xf32>
    %cst_436 = arith.constant 1.000000e+00 : f32
    %1408 = vector.broadcast %cst_436 : f32 to vector<16x16xf32>
    %1409 = arith.subf %1408, %1407 : vector<16x16xf32>
    %cst_437 = arith.constant 0.000000e+00 : f32
    %1410 = vector.broadcast %cst_437 : f32 to vector<16x16xf32>
    %1411 = arith.maximumf %1410, %1409 : vector<16x16xf32>
    %1412 = vector.broadcast %1404 : vector<1x16xf32> to vector<16x16xf32>
    %1413 = arith.subf %3, %1412 : vector<16x16xf32>
    %1414 = math.absf %1413 : vector<16x16xf32>
    %cst_438 = arith.constant 1.000000e+00 : f32
    %1415 = vector.broadcast %cst_438 : f32 to vector<16x16xf32>
    %1416 = arith.subf %1415, %1414 : vector<16x16xf32>
    %cst_439 = arith.constant 0.000000e+00 : f32
    %1417 = vector.broadcast %cst_439 : f32 to vector<16x16xf32>
    %1418 = arith.maximumf %1417, %1416 : vector<16x16xf32>
    %1419 = vector.extract_strided_slice %1318 {offsets = [6, 0], sizes = [1, 16], strides = [1, 1]} : vector<8x16xf32> to vector<1x16xf32>
    %1420 = vector.extract_strided_slice %1322 {offsets = [6, 0], sizes = [1, 16], strides = [1, 1]} : vector<8x16xf32> to vector<1x16xf32>
    %1421 = vector.broadcast %1419 : vector<1x16xf32> to vector<16x16xf32>
    %1422 = arith.subf %1, %1421 : vector<16x16xf32>
    %1423 = math.absf %1422 : vector<16x16xf32>
    %cst_440 = arith.constant 1.000000e+00 : f32
    %1424 = vector.broadcast %cst_440 : f32 to vector<16x16xf32>
    %1425 = arith.subf %1424, %1423 : vector<16x16xf32>
    %cst_441 = arith.constant 0.000000e+00 : f32
    %1426 = vector.broadcast %cst_441 : f32 to vector<16x16xf32>
    %1427 = arith.maximumf %1426, %1425 : vector<16x16xf32>
    %1428 = vector.broadcast %1420 : vector<1x16xf32> to vector<16x16xf32>
    %1429 = arith.subf %3, %1428 : vector<16x16xf32>
    %1430 = math.absf %1429 : vector<16x16xf32>
    %cst_442 = arith.constant 1.000000e+00 : f32
    %1431 = vector.broadcast %cst_442 : f32 to vector<16x16xf32>
    %1432 = arith.subf %1431, %1430 : vector<16x16xf32>
    %cst_443 = arith.constant 0.000000e+00 : f32
    %1433 = vector.broadcast %cst_443 : f32 to vector<16x16xf32>
    %1434 = arith.maximumf %1433, %1432 : vector<16x16xf32>
    %1435 = vector.extract_strided_slice %1318 {offsets = [7, 0], sizes = [1, 16], strides = [1, 1]} : vector<8x16xf32> to vector<1x16xf32>
    %1436 = vector.extract_strided_slice %1322 {offsets = [7, 0], sizes = [1, 16], strides = [1, 1]} : vector<8x16xf32> to vector<1x16xf32>
    %1437 = vector.broadcast %1435 : vector<1x16xf32> to vector<16x16xf32>
    %1438 = arith.subf %1, %1437 : vector<16x16xf32>
    %1439 = math.absf %1438 : vector<16x16xf32>
    %cst_444 = arith.constant 1.000000e+00 : f32
    %1440 = vector.broadcast %cst_444 : f32 to vector<16x16xf32>
    %1441 = arith.subf %1440, %1439 : vector<16x16xf32>
    %cst_445 = arith.constant 0.000000e+00 : f32
    %1442 = vector.broadcast %cst_445 : f32 to vector<16x16xf32>
    %1443 = arith.maximumf %1442, %1441 : vector<16x16xf32>
    %1444 = vector.broadcast %1436 : vector<1x16xf32> to vector<16x16xf32>
    %1445 = arith.subf %3, %1444 : vector<16x16xf32>
    %1446 = math.absf %1445 : vector<16x16xf32>
    %cst_446 = arith.constant 1.000000e+00 : f32
    %1447 = vector.broadcast %cst_446 : f32 to vector<16x16xf32>
    %1448 = arith.subf %1447, %1446 : vector<16x16xf32>
    %cst_447 = arith.constant 0.000000e+00 : f32
    %1449 = vector.broadcast %cst_447 : f32 to vector<16x16xf32>
    %1450 = arith.maximumf %1449, %1448 : vector<16x16xf32>
    %1451 = tpu.concatenate %1331, %1347, %1363, %1379, %1395, %1411, %1427, %1443 in 1 : vector<16x16xf32>, vector<16x16xf32>, vector<16x16xf32>, vector<16x16xf32>, vector<16x16xf32>, vector<16x16xf32>, vector<16x16xf32>, vector<16x16xf32> -> vector<16x128xf32>
    %1452 = tpu.concatenate %1338, %1354, %1370, %1386, %1402, %1418, %1434, %1450 in 1 : vector<16x16xf32>, vector<16x16xf32>, vector<16x16xf32>, vector<16x16xf32>, vector<16x16xf32>, vector<16x16xf32>, vector<16x16xf32>, vector<16x16xf32> -> vector<16x128xf32>
    %cst_448 = arith.constant dense<0.000000e+00> : vector<32x128xf32>
    %1453 = tpu.matmul %1123, %1452, %cst_448 {dimension_numbers = #tpu.dot_dimension_numbers<[1], [0], [0], [1], [0, 0, 1, 1], [], []>} : vector<32x16xf32>, vector<16x128xf32>, vector<32x128xf32> -> vector<32x128xf32>
    %1454 = vector.extract_strided_slice %1453 {offsets = [0, 0], sizes = [16, 128], strides = [1, 1]} : vector<32x128xf32> to vector<16x128xf32>
    %1455 = arith.mulf %1451, %1454 : vector<16x128xf32>
    %cst_449 = arith.constant dense<0.000000e+00> : vector<128xf32>
    %1456 = vector.multi_reduction <add>, %1455, %cst_449 [0] : vector<16x128xf32> to vector<128xf32>
    %1457 = vector.shape_cast %1456 : vector<128xf32> to vector<1x128xf32>
    %1458 = vector.extract_strided_slice %1453 {offsets = [16, 0], sizes = [16, 128], strides = [1, 1]} : vector<32x128xf32> to vector<16x128xf32>
    %1459 = arith.mulf %1451, %1458 : vector<16x128xf32>
    %cst_450 = arith.constant dense<0.000000e+00> : vector<128xf32>
    %1460 = vector.multi_reduction <add>, %1459, %cst_450 [0] : vector<16x128xf32> to vector<128xf32>
    %1461 = vector.shape_cast %1460 : vector<128xf32> to vector<1x128xf32>
    %1462 = vector.extract_strided_slice %1457 {offsets = [0, 0], sizes = [1, 16], strides = [1, 1]} : vector<1x128xf32> to vector<1x16xf32>
    %1463 = vector.extract_strided_slice %1457 {offsets = [0, 16], sizes = [1, 16], strides = [1, 1]} : vector<1x128xf32> to vector<1x16xf32>
    %1464 = vector.extract_strided_slice %1457 {offsets = [0, 32], sizes = [1, 16], strides = [1, 1]} : vector<1x128xf32> to vector<1x16xf32>
    %1465 = vector.extract_strided_slice %1457 {offsets = [0, 48], sizes = [1, 16], strides = [1, 1]} : vector<1x128xf32> to vector<1x16xf32>
    %1466 = vector.extract_strided_slice %1457 {offsets = [0, 64], sizes = [1, 16], strides = [1, 1]} : vector<1x128xf32> to vector<1x16xf32>
    %1467 = vector.extract_strided_slice %1457 {offsets = [0, 80], sizes = [1, 16], strides = [1, 1]} : vector<1x128xf32> to vector<1x16xf32>
    %1468 = vector.extract_strided_slice %1457 {offsets = [0, 96], sizes = [1, 16], strides = [1, 1]} : vector<1x128xf32> to vector<1x16xf32>
    %1469 = vector.extract_strided_slice %1457 {offsets = [0, 112], sizes = [1, 16], strides = [1, 1]} : vector<1x128xf32> to vector<1x16xf32>
    %1470 = tpu.concatenate %1462, %1463, %1464, %1465, %1466, %1467, %1468, %1469 in 0 : vector<1x16xf32>, vector<1x16xf32>, vector<1x16xf32>, vector<1x16xf32>, vector<1x16xf32>, vector<1x16xf32>, vector<1x16xf32>, vector<1x16xf32> -> vector<8x16xf32>
    %1471 = vector.extract_strided_slice %1461 {offsets = [0, 0], sizes = [1, 16], strides = [1, 1]} : vector<1x128xf32> to vector<1x16xf32>
    %1472 = vector.extract_strided_slice %1461 {offsets = [0, 16], sizes = [1, 16], strides = [1, 1]} : vector<1x128xf32> to vector<1x16xf32>
    %1473 = vector.extract_strided_slice %1461 {offsets = [0, 32], sizes = [1, 16], strides = [1, 1]} : vector<1x128xf32> to vector<1x16xf32>
    %1474 = vector.extract_strided_slice %1461 {offsets = [0, 48], sizes = [1, 16], strides = [1, 1]} : vector<1x128xf32> to vector<1x16xf32>
    %1475 = vector.extract_strided_slice %1461 {offsets = [0, 64], sizes = [1, 16], strides = [1, 1]} : vector<1x128xf32> to vector<1x16xf32>
    %1476 = vector.extract_strided_slice %1461 {offsets = [0, 80], sizes = [1, 16], strides = [1, 1]} : vector<1x128xf32> to vector<1x16xf32>
    %1477 = vector.extract_strided_slice %1461 {offsets = [0, 96], sizes = [1, 16], strides = [1, 1]} : vector<1x128xf32> to vector<1x16xf32>
    %1478 = vector.extract_strided_slice %1461 {offsets = [0, 112], sizes = [1, 16], strides = [1, 1]} : vector<1x128xf32> to vector<1x16xf32>
    %1479 = tpu.concatenate %1471, %1472, %1473, %1474, %1475, %1476, %1477, %1478 in 0 : vector<1x16xf32>, vector<1x16xf32>, vector<1x16xf32>, vector<1x16xf32>, vector<1x16xf32>, vector<1x16xf32>, vector<1x16xf32>, vector<1x16xf32> -> vector<8x16xf32>
    %1480 = arith.addf %1311, %1470 : vector<8x16xf32>
    %c0_451 = arith.constant 0 : index
    %c0_452 = arith.constant 0 : index
    %1481 = arith.index_cast %1308 : i32 to index
    %c0_453 = arith.constant 0 : index
    %1482 = vector.load %arg6[%c0_451, %c0_452, %1481, %c0_453] : memref<1x2x16x16xf32, #tpu.memory_space<vmem>>, vector<1x1x8x16xf32>
    %1483 = vector.shape_cast %1482 : vector<1x1x8x16xf32> to vector<8x16xf32>
    %1484 = vector.shape_cast %1480 : vector<8x16xf32> to vector<1x1x8x16xf32>
    tpu.vector_store %arg6[%c0_451, %c0_452, %1481, %c0_453], %1484 {strides = array<i32>} : memref<1x2x16x16xf32, #tpu.memory_space<vmem>>, vector<1x1x8x16xf32>,
    %1485 = arith.addf %1314, %1479 : vector<8x16xf32>
    %c0_454 = arith.constant 0 : index
    %c1_455 = arith.constant 1 : index
    %1486 = arith.index_cast %1308 : i32 to index
    %c0_456 = arith.constant 0 : index
    %1487 = vector.load %arg6[%c0_454, %c1_455, %1486, %c0_456] : memref<1x2x16x16xf32, #tpu.memory_space<vmem>>, vector<1x1x8x16xf32>
    %1488 = vector.shape_cast %1487 : vector<1x1x8x16xf32> to vector<8x16xf32>
    %1489 = vector.shape_cast %1485 : vector<8x16xf32> to vector<1x1x8x16xf32>
    tpu.vector_store %arg6[%c0_454, %c1_455, %1486, %c0_456], %1489 {strides = array<i32>} : memref<1x2x16x16xf32, #tpu.memory_space<vmem>>, vector<1x1x8x16xf32>,
    %c2_i32_457 = arith.constant 2 : i32
    return
  }
  func.func @transform_0(%arg0: i32) -> (i32, i32, i32, i32) {
    %c0_i32 = arith.constant 0 : i32
    %c0_i32_0 = arith.constant 0 : i32
    %c0_i32_1 = arith.constant 0 : i32
    %c0_i32_2 = arith.constant 0 : i32
    return %arg0, %c0_i32, %c0_i32_0, %c0_i32_1 : i32, i32, i32, i32
  }
  func.func @transform_1(%arg0: i32) -> (i32, i32, i32, i32) {
    %c0_i32 = arith.constant 0 : i32
    %c0_i32_0 = arith.constant 0 : i32
    %c0_i32_1 = arith.constant 0 : i32
    %c0_i32_2 = arith.constant 0 : i32
    return %arg0, %c0_i32, %c0_i32_0, %c0_i32_1 : i32, i32, i32, i32
  }
  func.func @transform_2(%arg0: i32) -> (i32, i32, i32, i32) {
    %c0_i32 = arith.constant 0 : i32
    %c0_i32_0 = arith.constant 0 : i32
    %c0_i32_1 = arith.constant 0 : i32
    %c0_i32_2 = arith.constant 0 : i32
    return %arg0, %c0_i32, %c0_i32_0, %c0_i32_1 : i32, i32, i32, i32
  }
  func.func @transform_3(%arg0: i32) -> (i32, i32, i32, i32) {
    %c0_i32 = arith.constant 0 : i32
    %c0_i32_0 = arith.constant 0 : i32
    %c0_i32_1 = arith.constant 0 : i32
    %c0_i32_2 = arith.constant 0 : i32
    return %arg0, %c0_i32, %c0_i32_0, %c0_i32_1 : i32, i32, i32, i32
  }
  func.func @transform_4(%arg0: i32) -> (i32, i32, i32, i32) {
    %c0_i32 = arith.constant 0 : i32
    %c0_i32_0 = arith.constant 0 : i32
    %c0_i32_1 = arith.constant 0 : i32
    %c0_i32_2 = arith.constant 0 : i32
    return %arg0, %c0_i32, %c0_i32_0, %c0_i32_1 : i32, i32, i32, i32
  }
  func.func @transform_5(%arg0: i32) -> (i32, i32, i32, i32) {
    %c0_i32 = arith.constant 0 : i32
    %c0_i32_0 = arith.constant 0 : i32
    %c0_i32_1 = arith.constant 0 : i32
    %c0_i32_2 = arith.constant 0 : i32
    return %arg0, %c0_i32, %c0_i32_0, %c0_i32_1 : i32, i32, i32, i32
  }
}

</mosaic_0001>

<bundles_post_ra>
// kernel: tpu_custom_call.1
= control target key start
LH: loop header
LB: loop body
LE: loop exit
PB: predicated region body
PF: predicated region fallthrough
CT: control target
= control target key end

     0   :  { %s7468_s0 = inlined_call_operand.hbm [shape: f32[2,2,16,16], index: 0, kind: input, shape index: {}]   ;;  %s7469_s1 = inlined_call_operand.hbm [shape: f32[2,2,16,16], index: 1, kind: input, shape index: {}]   ;;  %s7470_s2 = inlined_call_operand.hbm [shape: f32[2,2,16,16], index: 2, kind: output, shape index: {0}]   ;;  %s7471_s3 = inlined_call_operand.hbm [shape: f32[2,2,16,16], index: 3, kind: output, shape index: {1}]   ;;  %s7472_s4 = inlined_call_operand.hbm [shape: f32[2,2,16,16], index: 4, kind: output, shape index: {2}]   ;;  %s7473_s5 = inlined_call_operand.hbm [shape: f32[2,2,16,16], index: 5, kind: output, shape index: {3}]  }
   0x1   :  { %7482 = sst [smem:[#allocation18_spill]] %s7468_s0 }
   0x2   :  { %11 = vsyncpa [#allocation3], 0 }
   0x3   :  { %13 = vsyncpa [#allocation3 + $0x1], 0 }
   0x4   :  { %14 = vsyncpa [#allocation6], 0 }
   0x5   :  { %16 = vsyncpa [#allocation6 + $0x1], 0 }
   0x6   :  { %17 = vsyncpa [#allocation4], 0 }
   0x7   :  { %19 = vsyncpa [#allocation4 + $0x1], 0 }
   0x8   :  { %20 = vsyncpa [#allocation9], 0 }
   0x9   :  { %22 = vsyncpa [#allocation9 + $0x1], 0 }
   0xa   :  { %23 = vsyncpa [#allocation12], 0 }
   0xb   :  { %25 = vsyncpa [#allocation12 + $0x1], 0  ;;  %s5627_s18 = smov 0   ;;  %s5629_s19 = smov 0  }
   0xc   :  { %s5631_s20 = smov 0   ;;  %s5633_s21 = smov 0  }
   0xd LB: > { %s5648_s22 = sadd.s32 4294967295, %s5578_s21   ;;  %s7475_s23 = sadd.s32 4294967294, %s5578_s21   ;;  %s5578_s21 = sphi %s5633_s21, %s7503_s21   ;;  %s5574_s20 = sphi %s5631_s20, %s7502_s20   ;;  %s5570_s19 = sphi %s5629_s19, %s7501_s19   ;;  %s5566_s18 = sphi %s5627_s18, %s7500_s18  }
   0xe   : > { %s5652_s24 = sadd.s32 1, %s5578_s21   ;;  %s38_s25 = sadd.s32 1, %s5574_s20 }
   0xf   : > { %s35_s26 = ssub.s32 %s5578_s21, %s5652_s24  ;;  %p45_p0 = scmp.ne.s32.totalorder %s5574_s20, %s5570_s19 }
  0x10   : > { %p36_p1 = scmp.eq.s32.totalorder %s35_s26, 0  ;;  %p46_p2 = scmp.eq.s32.totalorder %s5578_s21, 0 }
  0x11   : > { %p51_p3 = scmp.ne.s32.totalorder %s5570_s19, %s5566_s18  ;;  %p52_p4 = scmp.eq.s32.totalorder %s5648_s22, 0 }
  0x12   : > { %s5664_s27 = scalar_select %p36_p1, %s5574_s20, %s38_s25  }
  0x13   : > { %p5666_p5 = por %p46_p2, %p45_p0  ;;  %p5670_p6 = por %p52_p4, %p51_p3 }
  0x14   : > { %p101_p7 = scmp.eq.s32.totalorder %s5648_s22, 1  ;;  %p107_p8 = scmp.eq.s32.totalorder %s7475_s23, 1 }
  0x15   : > { %s7484_s29 = scalar_select %p5670_p6, 1, 0 }
  0x16   : > { %p5020_p10 = scmp.lt.s32.totalorder %s5578_s21, 2  ;;  %p5679_p11 = por %p101_p7, %p45_p0 }
  0x17   : > { %p5683_p12 = por %p107_p8, %p51_p3  ;;  %s5688_s7 = sand.u32 1, %s5574_s20  }
  0x18   : > { %s7485_s30 = scalar_select %p5679_p11, 1, 0 }
  0x19   : > { %s7486_s6 = scalar_select %p5683_p12, 1, 0 }
  0x1a   : > { %s4822_s8 = sshll.u32 %s5578_s21, 9  ;;  %s4727_s9 = sshll.u32 %s5688_s7, 5 }
  0x1b   : > { %s7487_s0 = sld [smem:[#allocation18_spill]]  ;;  %s209_s13 = scalar_lea.vmem [#allocation2], %s4727_s9 }
  0x1c   : > { %s216_s14 = sshll.u32 %s209_s13, 4  ;;  %p5703_p13 = pnand %p5020_p10, %p5666_p5  ;;  %s5707_s14 = int_to_ptr.vmem [resolvable:$true] %s216_s14 }
  0x1d   : > { %s206_s16 = scalar_lea.sflag [#allocation3], %s5688_s7 }
  0x1e   : > { %p5358_p1 = pneg %p5703_p13 }
  0x21   : > { %s5697_s12 = scalar_lea.hbm %s7487_s0, %s4822_s8  ;;  %s5361_s28 = scalar_lea.hbm %s7487_s0, 1024 }
  0x22   : > { %s5356_s17 = scalar_lea.hbm %s5697_s12, 512  ;;  %p5362_p4 = scmp.lt.u32.totalorder %s5697_s12, %s7487_s0 }
  0x23   : > { %p5357_p0 = scmp.ne.s32.totalorder %s5697_s12, %s5356_s17  ;;  %p5363_p5 = scmp.lt.u32.totalorder %s5361_s28, %s5356_s17 }
  0x24   : > { %p5365_p8 = scmp.lt.u32.totalorder %s5356_s17, %s5697_s12 }
  0x25   : > { %p5359_p2 = pnand %p5358_p1, %p5357_p0  ;;  %p5364_p7 = por %p5363_p5, %p5362_p4 }
  0x27   : > { %p5360_p3 = pneg %p5359_p2  ;;  %p5366_p10 = por %p5365_p8, %p5364_p7 }
  0x29   : > { %p5367_p9 = pnand %p5366_p10, %p5360_p3 }
  0x2b   : > { %5370 = shalt.err (!%p5367_p9)
}
  0x2c   : > { %s5371_s13 = scalar_lea.vmem %s5707_s14, 512  ;;  %s5580_s25 = smov [#allocation2]  }
  0x2d   : > { %p5372_p0 = scmp.ne.s32.totalorder %s5707_s14, %s5371_s13  ;;  %s5376_s26 = sshll.u32 %s5580_s25, 4  ;;  %s5377_s26 = int_to_ptr.vmem [resolvable:$false] %s5376_s26 }
  0x2e   : > { %s5378_s10 = scalar_lea.vmem %s5377_s26, 1024  ;;  %p5379_p11 = scmp.lt.s32.totalorder %s5707_s14, %s5377_s26 }
  0x2f   : > { %p5374_p2 = pnand %p5372_p0, %p5358_p1  ;;  %p5380_p4 = scmp.lt.s32.totalorder %s5378_s10, %s5371_s13 }
  0x31   : > { %p5375_p12 = pneg %p5374_p2  ;;  %p5381_p5 = por %p5380_p4, %p5379_p11 }
  0x33   : > { %p5382_p7 = pnand %p5381_p5, %p5375_p12 }
  0x35   : > { %5385 = shalt.err (!%p5382_p7)
}
  0x36   : > { %s7476_s17 = smov 128   ;;  %s5582_s28 = smov 8  }
  0x37   : > { %5003 = dma.hbm_to_vmem [thread:$0]  (!%p5703_p13), %s5697_s12, 512, %s5707_s14, %s206_s16, %s7476_s17, %s7476_s17, %s5582_s28  }
  0x38   : > { %p4733_p9 = scmp.ge.s32.totalorder %s5578_s21, 1  ;;  %p245_p11 = scmp.lt.s32.totalorder %s5578_s21, 3 }
  0x39   : > { %s5751_s26 = scalar_lea.hbm %s7469_s1, %s4822_s8  ;;  %s230_s10 = scalar_lea.vmem [#allocation5], %s4727_s9 }
  0x3a   : > { %p5742_p12 = pnand %p4733_p9, %p245_p11  ;;  %s237_s23 = sshll.u32 %s230_s10, 4  ;;  %s5755_s23 = int_to_ptr.vmem [resolvable:$true] %s237_s23 }
  0x3b   : > { %s227_s12 = scalar_lea.sflag [#allocation6], %s5688_s7  ;;  %s5386_s14 = scalar_lea.hbm %s5751_s26, 512 }
  0x3c   : > { %p5387_p3 = scmp.ne.s32.totalorder %s5751_s26, %s5386_s14  ;;  %s5391_s8 = scalar_lea.hbm %s7469_s1, 1024 }
  0x3d   : > { %p5392_p0 = scmp.lt.u32.totalorder %s5751_s26, %s7469_s1  ;;  %p5393_p2 = scmp.lt.u32.totalorder %s5391_s8, %s5386_s14 }
  0x3e   : > { %p5389_p8 = pnand %p5387_p3, %p5358_p1  ;;  %p5395_p5 = scmp.lt.u32.totalorder %s5386_s14, %s5751_s26 }
  0x3f   : > { %p5394_p4 = por %p5393_p2, %p5392_p0 }
  0x40   : > { %p5390_p10 = pneg %p5389_p8 }
  0x41   : > { %p5396_p7 = por %p5395_p5, %p5394_p4 }
  0x43   : > { %p5397_p9 = pnand %p5396_p7, %p5390_p10 }
  0x45   : > { %5400 = shalt.err (!%p5397_p9)
}
  0x46   : > { %s5401_s9 = scalar_lea.vmem %s5755_s23, 512  ;;  %s5583_s10 = smov [#allocation5]  }
  0x47   : > { %p5402_p11 = scmp.ne.s32.totalorder %s5755_s23, %s5401_s9  ;;  %s5406_s16 = sshll.u32 %s5583_s10, 4  ;;  %s5407_s16 = int_to_ptr.vmem [resolvable:$false] %s5406_s16 }
  0x48   : > { %s5408_s17 = scalar_lea.vmem %s5407_s16, 1024  ;;  %p5409_p6 = scmp.lt.s32.totalorder %s5755_s23, %s5407_s16 }
  0x49   : > { %p5404_p3 = pnand %p5402_p11, %p5358_p1  ;;  %p5410_p0 = scmp.lt.s32.totalorder %s5408_s17, %s5401_s9 }
  0x4b   : > { %p5405_p8 = pneg %p5404_p3  ;;  %p5411_p2 = por %p5410_p0, %p5409_p6 }
  0x4d   : > { %p5412_p4 = pnand %p5411_p2, %p5405_p8 }
  0x4f   : > { %5415 = shalt.err (!%p5412_p4)
}
  0x50   : > { %s7490_s14 = smov 128   ;;  %249 = sbr.rel (%p5742_p12) target bundleno = 2365 (0x93d), region = 28 }
  0x51   : > { %5006 = dma.hbm_to_vmem [thread:$0]  (!%p5703_p13), %s5751_s26, 512, %s5755_s23, %s227_s12, %s7490_s14, %s7490_s14, %s5582_s28  }
  0x52   : > { %s5789_s13 = sand.u32 (!%p5742_p12), 1, %s5570_s19   ;;  %p7491_p6 = scmp.ne.s32.totalorder (!%p5742_p12), %s7484_s29, 0 }
  0x53   : > { %s5792_s8 = sshll.u32 (!%p5742_p12), %s5789_s13, 5  ;;  %s252_s15 = scalar_lea.sflag (!%p5742_p12), [#allocation3], %s5789_s13 }
  0x54   : > { %s5796_s25 = scalar_lea.vmem (!%p5742_p12), [#allocation2], %s5792_s8 }
  0x57   : > { %5545 = dma.done.wait (%p7491_p6), %s252_s15, 512  }
  0x58   : > { %5547 = vsyncadd (%p7491_p6), %s252_s15, 4294966784  ;;  %s261_s23 = scalar_lea.sflag [#allocation6], %s5789_s13  ;;  %s5804_s7 = scalar_lea.vmem [#allocation5], %s5792_s8 }
  0x59   : > { %5549 = dma.done.wait (%p7491_p6), %s261_s23, 512  }
  0x5a   : > { %5551 = vsyncadd (%p7491_p6), %s261_s23, 4294966784  ;;  %v311_v0 = vlaneseq  ;;  %v4740_v3 = vld [vmem:[%s5796_s25 + $0x10] sm:$0xff]  ;;  %v4748_v5 = vld [vmem:[%s5796_s25 + $0x18] sm:$0xff]  ;;  %s5584_s29 = smov 32   ;;  %s7478_s28 = smov 16   ;;  %vm583_vm0 = vcmask 130048  }
  0x5b   : > { %v4741_v4 = vld [vmem:[%s5804_s7 + $0x10] sm:$0xff]  ;;  %v5816_v6 = vmul.f32 0.0625, %v4740_v3  ;;  %v5824_v9 = vmul.f32 0.0625, %v4748_v5  ;;  %v4750_v10 = vld [vmem:[%s5804_s7 + $0x18] sm:$0xff]  ;;  %s5586_s11 = smov 48   ;;  %s5587_s26 = smov 64  }
  0x5c   : > { %v5810_v1 = vshrl.u32 %v311_v0, 7  ;;  %s5588_s12 = smov 80   ;;  %s5589_s9 = smov 96   ;;  %vm586_vm1 = vcmask 261120   ;;  %vm589_vm2 = vcmask 392192   ;;  %vm592_vm3 = vcmask 523264  }
  0x5d   : > { %v5839_v15 = vadd.f32 %v4741_v4, %v5816_v6  ;;  %v5842_v16 = vadd.f32 %v4750_v10, %v5824_v9  ;;  %s5590_s10 = smov 112   ;;  %vm595_vm4 = vcmask 654336   ;;  %vm598_vm5 = vcmask 785408   ;;  %s6172_s16 = scalar_lea.vmem [#allocation7], %s5792_s8 }
  0x5e   : > { %v313_v2 = vadd.s32 8, %v5810_v1  ;;  %v5819_v7 = vsub.s32 2, %v5810_v1  ;;  %v5822_v8 = vsub.s32 1, %v5810_v1  ;;  %v5828_v11 = vsub.s32 3, %v5810_v1  ;;  %s6536_s17 = scalar_lea.vmem [#allocation8], %s5792_s8  ;;  %s6878_s14 = scalar_lea.vmem [#allocation10], %s5792_s8 }
  0x5f   : > { %v5831_v12 = vsub.s32 4, %v5810_v1  ;;  %v5834_v13 = vcvt.s32.f32 %v5810_v1  ;;  %v5845_v17 = vsub.s32 5, %v5810_v1  ;;  %v5848_v18 = vsub.s32 6, %v5810_v1  ;;  %s4451_s15 = sand.u32 1, %s5648_s22   ;;  %p7492_p1 = scmp.ne.s32.totalorder %s7485_s30, 0 }
  0x60   : > { %v5836_v14 = vcvt.s32.f32 %v313_v2  ;;  %v5851_v19 = vsub.s32 7, %v5810_v1  ;;  %v398_v20 = vrot.slane %v5839_v15, %v5819_v7  ;;  %v374_v21 = vrot.slane %v5839_v15, %v5822_v8 }
  0x61   : > { %v935_v22 = vrot.slane %v5842_v16, %v5819_v7  ;;  %v911_v23 = vrot.slane %v5842_v16, %v5822_v8  ;;  %v959_v24 = vrot.slane %v5842_v16, %v5828_v11  ;;  %v422_v25 = vrot.slane %v5839_v15, %v5828_v11 }
  0x62   : > { %v983_v26 = vrot.slane %v5842_v16, %v5831_v12  ;;  %v5869_v27 = vrot.slane %v5839_v15, %v5831_v12  ;;  %v399_v28 = vsub.f32 %v5834_v13, %v398_v20  ;;  %v400_v29 = vsub.f32 %v5836_v14, %v398_v20 }
  0x63   : > { %v375_v30 = vsub.f32 %v5834_v13, %v374_v21  ;;  %v376_v31 = vsub.f32 %v5836_v14, %v374_v21  ;;  %v936_v32 = vsub.f32 %v5834_v13, %v935_v22  ;;  %v937_v33 = vsub.f32 %v5836_v14, %v935_v22 }
  0x64   : > { %v912_v34 = vsub.f32 %v5834_v13, %v911_v23  ;;  %v913_v35 = vsub.f32 %v5836_v14, %v911_v23  ;;  %v401_v36 = vand.u32 2147483647, %v399_v28  ;;  %v402_v37 = vand.u32 2147483647, %v400_v29 }
  0x65   : > { %v377_v38 = vand.u32 2147483647, %v375_v30  ;;  %v960_v39 = vsub.f32 %v5834_v13, %v959_v24  ;;  %v378_v40 = vand.u32 2147483647, %v376_v31  ;;  %v938_v41 = vand.u32 2147483647, %v936_v32 }
  0x66   : > { %v939_v42 = vand.u32 2147483647, %v937_v33  ;;  %v961_v43 = vsub.f32 %v5836_v14, %v959_v24  ;;  %v403_v44 = vsub.f32 1.0, %v401_v36  ;;  %v404_v45 = vsub.f32 1.0, %v402_v37 }
  0x67   : > { %v379_v46 = vsub.f32 1.0, %v377_v38  ;;  %v914_v47 = vand.u32 2147483647, %v912_v34  ;;  %v380_v48 = vsub.f32 1.0, %v378_v40  ;;  %v940_v49 = vsub.f32 1.0, %v938_v41 }
  0x68   : > { %v941_v50 = vsub.f32 1.0, %v939_v42  ;;  %v915_v51 = vand.u32 2147483647, %v913_v35  ;;  %v405_v52 = vmax.f32 %v403_v44, 0.0  ;;  %v406_v53 = vmax.f32 %v404_v45, 0.0 }
  0x69   : > { %v381_v54 = vmax.f32 %v379_v46, 0.0  ;;  %v916_v55 = vsub.f32 1.0, %v914_v47  ;;  %v382_v56 = vmax.f32 %v380_v48, 0.0  ;;  %v942_v57 = vmax.f32 %v940_v49, 0.0 }
  0x6a   : > { %v943_v58 = vmax.f32 %v941_v50, 0.0  ;;  %v917_v59 = vsub.f32 1.0, %v915_v51  ;;  %v5075_v60 = vpack.i.bf16 %v406_v53, %v405_v52  ;;  %v962_v62 = vand.u32 2147483647, %v960_v39 }
  0x6b   : > { %v918_v61 = vmax.f32 %v916_v55, 0.0  ;;  %v963_v63 = vand.u32 2147483647, %v961_v43  ;;  %v5065_v0 = vpack.i.bf16 %v382_v56, %v381_v54  ;;  %v423_v4 = vsub.f32 %v5834_v13, %v422_v25 }
  0x6c   : > { %v5080_v2 = vpack.i.bf16 %v943_v58, %v942_v57  ;;  %v919_v3 = vmax.f32 %v917_v59, 0.0  ;;  %5076 = vrot.lane.b32.xlu1 %v5075_v60, %s5584_s29  ;;  %v964_v5 = vsub.f32 1.0, %v962_v62  ;;  %v424_v20 = vsub.f32 %v5836_v14, %v422_v25 }
  0x6d   : > { %v965_v10 = vsub.f32 1.0, %v963_v63  ;;  %v984_v21 = vsub.f32 %v5834_v13, %v983_v26  ;;  %5066 = vrot.lane.b32.xlu0 %v5065_v0, %s7478_s28  ;;  %v425_v23 = vand.u32 2147483647, %v423_v4  ;;  %v985_v24 = vsub.f32 %v5836_v14, %v983_v26 }
  0x6e   : > { %v5070_v22 = vpack.i.bf16 %v919_v3, %v918_v61  ;;  %v447_v28 = vsub.f32 %v5834_v13, %v5869_v27  ;;  %v966_v29 = vmax.f32 %v964_v5, 0.0  ;;  %v426_v31 = vand.u32 2147483647, %v424_v20 }
  0x6f   : > { %v967_v30 = vmax.f32 %v965_v10, 0.0  ;;  %v986_v32 = vand.u32 2147483647, %v984_v21  ;;  %v427_v33 = vsub.f32 1.0, %v425_v23  ;;  %v987_v34 = vand.u32 2147483647, %v985_v24 }
  0x70   : > { %v448_v25 = vsub.f32 %v5836_v14, %v5869_v27  ;;  %v449_v35 = vand.u32 2147483647, %v447_v28  ;;  %5081 = vrot.lane.b32.xlu1 %v5080_v2, %s5584_s29  ;;  %v428_v37 = vsub.f32 1.0, %v426_v31  ;;  %v1007_v26 = vrot.slane %v5842_v16, %v5845_v17 }
  0x71   : > { %v5090_v36 = vpack.i.bf16 %v967_v30, %v966_v29  ;;  %v988_v38 = vsub.f32 1.0, %v986_v32  ;;  %5071 = vrot.lane.b32.xlu0 %v5070_v22, %s7478_s28  ;;  %v429_v39 = vmax.f32 %v427_v33, 0.0  ;;  %v989_v40 = vsub.f32 1.0, %v987_v34 }
  0x72   : > { %v450_v41 = vand.u32 2147483647, %v448_v25  ;;  %v451_v42 = vsub.f32 1.0, %v449_v35  ;;  %v430_v43 = vmax.f32 %v428_v37, 0.0  ;;  %v1008_v45 = vsub.f32 %v5834_v13, %v1007_v26 }
  0x73   : > { %v990_v44 = vmax.f32 %v988_v38, 0.0  ;;  %v1009_v27 = vsub.f32 %v5836_v14, %v1007_v26  ;;  %v991_v46 = vmax.f32 %v989_v40, 0.0  ;;  %v470_v49 = vrot.slane %v5839_v15, %v5845_v17 }
  0x74   : > { %v452_v47 = vsub.f32 1.0, %v450_v41  ;;  %v453_v48 = vmax.f32 %v451_v42, 0.0  ;;  %5091 = vrot.lane.b32.xlu1 %v5090_v36, %s5586_s11  ;;  %v5085_v50 = vpack.i.bf16 %v430_v43, %v429_v39  ;;  %v1010_v51 = vand.u32 2147483647, %v1008_v45 }
  0x75   : > { %v1011_v52 = vand.u32 2147483647, %v1009_v27  ;;  %v1031_v53 = vrot.slane %v5842_v16, %v5848_v18  ;;  %v5100_v54 = vpack.i.bf16 %v991_v46, %v990_v44  ;;  %v471_v56 = vsub.f32 %v5834_v13, %v470_v49 }
  0x76   : > { %v454_v55 = vmax.f32 %v452_v47, 0.0  ;;  %v472_v57 = vsub.f32 %v5836_v14, %v470_v49  ;;  %5086 = vrot.lane.b32.xlu0 %v5085_v50, %s5586_s11  ;;  %v1012_v58 = vsub.f32 1.0, %v1010_v51  ;;  %v494_v2 = vrot.slane %v5839_v15, %v5848_v18 }
  0x77   : > { %v1013_v59 = vsub.f32 1.0, %v1011_v52  ;;  %v1032_v60 = vsub.f32 %v5834_v13, %v1031_v53  ;;  %v1033_v61 = vsub.f32 %v5836_v14, %v1031_v53  ;;  %v473_v63 = vand.u32 2147483647, %v471_v56 }
  0x78   : > { %v5095_v62 = vpack.i.bf16 %v454_v55, %v453_v48  ;;  %v474_v0 = vand.u32 2147483647, %v472_v57  ;;  %5101 = vrot.lane.b32.xlu1 %v5100_v54, %s5587_s26  ;;  %v1014_v3 = vmax.f32 %v1012_v58, 0.0  ;;  %v495_v22 = vsub.f32 %v5834_v13, %v494_v2 }
  0x79   : > { %v1015_v4 = vmax.f32 %v1013_v59, 0.0  ;;  %v1034_v5 = vand.u32 2147483647, %v1032_v60  ;;  %v1035_v10 = vand.u32 2147483647, %v1033_v61  ;;  %v475_v20 = vsub.f32 1.0, %v473_v63 }
  0x7a   : > { %v476_v21 = vsub.f32 1.0, %v474_v0  ;;  %v496_v23 = vsub.f32 %v5836_v14, %v494_v2  ;;  %5096 = vrot.lane.b32.xlu0 %v5095_v62, %s5587_s26  ;;  %v1055_v30 = vrot.slane %v5842_v16, %v5851_v19  ;;  %v497_v33 = vand.u32 2147483647, %v495_v22  ;;  %v316_v59 = vld [vmem:[%s5796_s25] sm:$0xff]  ;;  %v317_v60 = vld [vmem:[%s5796_s25 + $0x8] sm:$0xff]  ;;  %s7252_s25 = sshll.u32 %s5648_s22, 9 }
  0x7b   : > { %v5110_v24 = vpack.i.bf16 %v1015_v4, %v1014_v3  ;;  %v1036_v28 = vsub.f32 1.0, %v1034_v5  ;;  %v1037_v29 = vsub.f32 1.0, %v1035_v10  ;;  %v477_v31 = vmax.f32 %v475_v20, 0.0  ;;  %v330_v62 = vld [vmem:[%s5804_s7] sm:$0xff]  ;;  %v4749_v63 = vld [vmem:[%s5804_s7 + $0x8] sm:$0xff]  ;;  %s7271_s22 = scalar_lea.hbm %s7470_s2, %s7252_s25 }
  0x7c   : > { %v478_v32 = vmax.f32 %v476_v21, 0.0  ;;  %v498_v34 = vand.u32 2147483647, %v496_v23  ;;  %v1056_v36 = vsub.f32 %v5834_v13, %v1055_v30  ;;  %v1057_v37 = vsub.f32 %v5836_v14, %v1055_v30 }
  0x7d   : > { %5111 = vrot.lane.b32.xlu1 %v5110_v24, %s5588_s12  ;;  %v1038_v25 = vmax.f32 %v1036_v28, 0.0  ;;  %v1039_v35 = vmax.f32 %v1037_v29, 0.0  ;;  %v499_v26 = vsub.f32 1.0, %v497_v33  ;;  %v518_v40 = vrot.slane %v5839_v15, %v5851_v19 }
  0x7e   : > { %v5105_v38 = vpack.i.bf16 %v478_v32, %v477_v31  ;;  %v500_v39 = vsub.f32 1.0, %v498_v34  ;;  %v1058_v42 = vand.u32 2147483647, %v1056_v36  ;;  %v1059_v43 = vand.u32 2147483647, %v1057_v37 }
  0x7f   : > { %v5120_v41 = vpack.i.bf16 %v1039_v35, %v1038_v25  ;;  %v501_v44 = vmax.f32 %v499_v26, 0.0  ;;  %v519_v27 = vsub.f32 %v5834_v13, %v518_v40  ;;  %v520_v46 = vsub.f32 %v5836_v14, %v518_v40 }
  0x80   : > { %5106 = vrot.lane.b32.xlu0 %v5105_v38, %s5588_s12  ;;  %v502_v45 = vmax.f32 %v500_v39, 0.0  ;;  %v1060_v47 = vsub.f32 1.0, %v1058_v42  ;;  %v1061_v48 = vsub.f32 1.0, %v1059_v43  ;;  %v5930_v0 = vmul.f32 0.0625, %v316_v59 }
  0x81   : > { %5121 = vrot.lane.b32.xlu1 %v5120_v41, %s5589_s9  ;;  %v521_v50 = vand.u32 2147483647, %v519_v27  ;;  %v522_v51 = vand.u32 2147483647, %v520_v46  ;;  %v5932_v2 = vmul.f32 0.0625, %v317_v60  ;;  %vm601_vm6 = vcmask 916480  }
  0x82   : > { %v5115_v49 = vpack.i.bf16 %v502_v45, %v501_v44  ;;  %v1062_v52 = vmax.f32 %v1060_v47, 0.0  ;;  %v1063_v53 = vmax.f32 %v1061_v48, 0.0  ;;  %4880 = vmatprep.mubr.msk.f32.mxu0 %vm583_vm0, %v5930_v0  ;;  %4890 = vmatprep.mubr.msk.f32.mxu1 %vm583_vm0, %v5930_v0  ;;  %v5940_v3 = vadd.f32 %v330_v62, %v5930_v0 }
  0x83   : > { %v523_v54 = vsub.f32 1.0, %v521_v50  ;;  %v524_v55 = vsub.f32 1.0, %v522_v51  ;;  %v5943_v4 = vadd.f32 %v4749_v63, %v5932_v2  ;;  %vm811_vm7 = vcmask 1040384  }
  0x84   : > { %5116 = vrot.lane.b32.xlu0 %v5115_v49, %s5589_s9  ;;  %v5130_v56 = vpack.i.bf16 %v1063_v53, %v1062_v52  ;;  %v362_v5 = vrot.slane %v5940_v3, %v5822_v8  ;;  %v386_v20 = vrot.slane %v5940_v3, %v5819_v7  ;;  %v410_v34 = vrot.slane %v5940_v3, %v5828_v11 }
  0x85   : > { %v525_v57 = vmax.f32 %v523_v54, 0.0  ;;  %v526_v58 = vmax.f32 %v524_v55, 0.0  ;;  %v899_v10 = vrot.slane %v5943_v4, %v5822_v8  ;;  %v923_v21 = vrot.slane %v5943_v4, %v5819_v7 }
  0x86   : > { %5131 = vrot.lane.b32.xlu1 %v5130_v56, %s5590_s10  ;;  %v364_v22 = vsub.f32 %v5836_v14, %v362_v5  ;;  %v363_v23 = vsub.f32 %v5834_v13, %v362_v5  ;;  %v388_v29 = vsub.f32 %v5836_v14, %v386_v20  ;;  %v387_v30 = vsub.f32 %v5834_v13, %v386_v20 }
  0x87   : > { %v5125_v61 = vpack.i.bf16 %v526_v58, %v525_v57  ;;  %v901_v24 = vsub.f32 %v5836_v14, %v899_v10  ;;  %v900_v28 = vsub.f32 %v5834_v13, %v899_v10  ;;  %v925_v37 = vsub.f32 %v5836_v14, %v923_v21 }
  0x88   : > { %v366_v31 = vand.u32 2147483647, %v364_v22  ;;  %v365_v32 = vand.u32 2147483647, %v363_v23  ;;  %v390_v35 = vand.u32 2147483647, %v388_v29  ;;  %v924_v40 = vsub.f32 %v5834_v13, %v923_v21 }
  0x89   : > { %5126 = vrot.lane.b32.xlu0 %v5125_v61, %s5590_s10  ;;  %v903_v33 = vand.u32 2147483647, %v901_v24  ;;  %v902_v25 = vand.u32 2147483647, %v900_v28  ;;  %v389_v36 = vand.u32 2147483647, %v387_v30  ;;  %v947_v44 = vrot.slane %v5943_v4, %v5828_v11 }
  0x8a   : > { %v368_v38 = vsub.f32 1.0, %v366_v31  ;;  %v367_v26 = vsub.f32 1.0, %v365_v32  ;;  %v392_v45 = vsub.f32 1.0, %v390_v35  ;;  %v927_v46 = vand.u32 2147483647, %v925_v37 }
  0x8b   : > { %v905_v39 = vsub.f32 1.0, %v903_v33  ;;  %v904_v41 = vsub.f32 1.0, %v902_v25  ;;  %v391_v27 = vsub.f32 1.0, %v389_v36  ;;  %v412_v47 = vsub.f32 %v5836_v14, %v410_v34 }
  0x8c   : > { %v370_v42 = vmax.f32 %v368_v38, 0.0  ;;  %v369_v43 = vmax.f32 %v367_v26, 0.0  ;;  %v926_v50 = vand.u32 2147483647, %v924_v40  ;;  %v411_v51 = vsub.f32 %v5834_v13, %v410_v34 }
  0x8d   : > { %v907_v48 = vmax.f32 %v905_v39, 0.0  ;;  %v906_v49 = vmax.f32 %v904_v41, 0.0  ;;  %v434_v52 = vrot.slane %v5940_v3, %v5831_v12  ;;  %v394_v53 = vmax.f32 %v392_v45, 0.0 }
  0x8e   : > { %531 = vrot.lane.b32.xlu1 %v370_v42, %s7478_s28  ;;  %529 = vrot.lane.b32.xlu0 %v369_v43, %s7478_s28  ;;  %v393_v54 = vmax.f32 %v391_v27, 0.0  ;;  %v929_v55 = vsub.f32 1.0, %v927_v46  ;;  %v414_v56 = vand.u32 2147483647, %v412_v47  ;;  %v928_v57 = vsub.f32 1.0, %v926_v50 }
  0x8f   : > { %v413_v58 = vand.u32 2147483647, %v411_v51  ;;  %v949_v59 = vsub.f32 %v5836_v14, %v947_v44  ;;  %v948_v60 = vsub.f32 %v5834_v13, %v947_v44  ;;  %v971_v61 = vrot.slane %v5943_v4, %v5831_v12 }
  0x90   : > { %v931_v62 = vmax.f32 %v929_v55, 0.0  ;;  %v416_v63 = vsub.f32 1.0, %v414_v56  ;;  %v436_v5 = vsub.f32 %v5836_v14, %v434_v52  ;;  %v435_v10 = vsub.f32 %v5834_v13, %v434_v52 }
  0x91   : > { %v930_v20 = vmax.f32 %v928_v57, 0.0  ;;  %v415_v21 = vsub.f32 1.0, %v413_v58  ;;  %v951_v22 = vand.u32 2147483647, %v949_v59  ;;  %v950_v23 = vand.u32 2147483647, %v948_v60 }
  0x92   : > { %1068 = vrot.lane.b32.xlu1 %v907_v48, %s7478_s28  ;;  %1066 = vrot.lane.b32.xlu0 %v906_v49, %s7478_s28  ;;  %v973_v24 = vsub.f32 %v5836_v14, %v971_v61  ;;  %v418_v28 = vmax.f32 %v416_v63, 0.0  ;;  %v438_v29 = vand.u32 2147483647, %v436_v5  ;;  %v437_v30 = vand.u32 2147483647, %v435_v10 }
  0x93   : > { %v972_v31 = vsub.f32 %v5834_v13, %v971_v61  ;;  %v417_v32 = vmax.f32 %v415_v21, 0.0  ;;  %v953_v33 = vsub.f32 1.0, %v951_v22  ;;  %v952_v34 = vsub.f32 1.0, %v950_v23 }
  0x94   : > { %v458_v25 = vrot.slane %v5940_v3, %v5845_v17  ;;  %v975_v35 = vand.u32 2147483647, %v973_v24  ;;  %v440_v36 = vsub.f32 1.0, %v438_v29  ;;  %v439_v37 = vsub.f32 1.0, %v437_v30 }
  0x95   : > { %v974_v38 = vand.u32 2147483647, %v972_v31  ;;  %v995_v26 = vrot.slane %v5943_v4, %v5845_v17  ;;  %v955_v39 = vmax.f32 %v953_v33, 0.0  ;;  %v954_v40 = vmax.f32 %v952_v34, 0.0 }
  0x96   : > { %539 = vrot.lane.b32.xlu1 %v394_v53, %s5584_s29  ;;  %537 = vrot.lane.b32.xlu0 %v393_v54, %s5584_s29  ;;  %v460_v41 = vsub.f32 %v5836_v14, %v458_v25  ;;  %v459_v42 = vsub.f32 %v5834_v13, %v458_v25  ;;  %v977_v43 = vsub.f32 1.0, %v975_v35  ;;  %v442_v44 = vmax.f32 %v440_v36, 0.0 }
  0x97   : > { %v441_v45 = vmax.f32 %v439_v37, 0.0  ;;  %v997_v27 = vsub.f32 %v5836_v14, %v995_v26  ;;  %v482_v46 = vrot.slane %v5940_v3, %v5848_v18  ;;  %v976_v47 = vsub.f32 1.0, %v974_v38 }
  0x98   : > { %v462_v48 = vand.u32 2147483647, %v460_v41  ;;  %v461_v49 = vand.u32 2147483647, %v459_v42  ;;  %v996_v50 = vsub.f32 %v5834_v13, %v995_v26  ;;  %v979_v51 = vmax.f32 %v977_v43, 0.0 }
  0x99   : > { %v999_v52 = vand.u32 2147483647, %v997_v27  ;;  %v484_v53 = vsub.f32 %v5836_v14, %v482_v46  ;;  %v483_v54 = vsub.f32 %v5834_v13, %v482_v46  ;;  %v1019_v55 = vrot.slane %v5943_v4, %v5848_v18 }
  0x9a   : > { %1076 = vrot.lane.b32.xlu1 %v931_v62, %s5584_s29  ;;  %1074 = vrot.lane.b32.xlu0 %v930_v20, %s5584_s29  ;;  %v978_v56 = vmax.f32 %v976_v47, 0.0  ;;  %v464_v57 = vsub.f32 1.0, %v462_v48  ;;  %v463_v58 = vsub.f32 1.0, %v461_v49  ;;  %v998_v59 = vand.u32 2147483647, %v996_v50 }
  0x9b   : > { %v506_v60 = vrot.slane %v5940_v3, %v5851_v19  ;;  %v1001_v61 = vsub.f32 1.0, %v999_v52  ;;  %v486_v62 = vand.u32 2147483647, %v484_v53  ;;  %v485_v63 = vand.u32 2147483647, %v483_v54 }
  0x9c   : > { %v1021_v5 = vsub.f32 %v5836_v14, %v1019_v55  ;;  %v466_v10 = vmax.f32 %v464_v57, 0.0  ;;  %v465_v20 = vmax.f32 %v463_v58, 0.0  ;;  %v1000_v21 = vsub.f32 1.0, %v998_v59 }
  0x9d   : > { %v1020_v22 = vsub.f32 %v5834_v13, %v1019_v55  ;;  %v508_v23 = vsub.f32 %v5836_v14, %v506_v60  ;;  %v1003_v24 = vmax.f32 %v1001_v61, 0.0  ;;  %v487_v29 = vsub.f32 1.0, %v485_v63 }
  0x9e   : > { %547 = vrot.lane.b32.xlu1 %v418_v28, %s5586_s11  ;;  %545 = vrot.lane.b32.xlu0 %v417_v32, %s5586_s11  ;;  %v488_v28 = vsub.f32 1.0, %v486_v62  ;;  %v1023_v30 = vand.u32 2147483647, %v1021_v5  ;;  %v1002_v31 = vmax.f32 %v1000_v21, 0.0  ;;  %v507_v33 = vsub.f32 %v5834_v13, %v506_v60 }
  0x9f   : > { %v1022_v32 = vand.u32 2147483647, %v1020_v22  ;;  %v1043_v34 = vrot.slane %v5943_v4, %v5851_v19  ;;  %v489_v35 = vmax.f32 %v487_v29, 0.0  ;;  %v510_v37 = vand.u32 2147483647, %v508_v23 }
  0xa0   : > { %v490_v25 = vmax.f32 %v488_v28, 0.0  ;;  %v1025_v36 = vsub.f32 1.0, %v1023_v30  ;;  %v509_v26 = vand.u32 2147483647, %v507_v33  ;;  %v6030_v52 = vsub.s32 0, %v5810_v1 }
  0xa1   : > { %v1024_v38 = vsub.f32 1.0, %v1022_v32  ;;  %v512_v42 = vsub.f32 1.0, %v510_v37  ;;  %vm813_vm8 = vcmask 1041408   ;;  %vm815_vm9 = vcmask 1042432  }
  0xa2   : > { %1084 = vrot.lane.b32.xlu1 %v955_v39, %s5586_s11  ;;  %1082 = vrot.lane.b32.xlu0 %v954_v40, %s5586_s11  ;;  %v1045_v39 = vsub.f32 %v5836_v14, %v1043_v34  ;;  %v1044_v40 = vsub.f32 %v5834_v13, %v1043_v34  ;;  %v1027_v41 = vmax.f32 %v1025_v36, 0.0  ;;  %v887_v53 = vrot.slane %v5842_v16, %v6030_v52 }
  0xa3   : > { %v1026_v43 = vmax.f32 %v1024_v38, 0.0  ;;  %v514_v46 = vmax.f32 %v512_v42, 0.0  ;;  %v350_v55 = vrot.slane %v5839_v15, %v6030_v52  ;;  %vm817_vm10 = vcmask 1043456  }
  0xa4   : > { %v1046_v27 = vand.u32 2147483647, %v1044_v40  ;;  %v888_v57 = vsub.f32 %v5834_v13, %v887_v53  ;;  %v889_v58 = vsub.f32 %v5836_v14, %v887_v53  ;;  %vm819_vm11 = vcmask 1044480  }
  0xa5   : > { %v351_v59 = vsub.f32 %v5834_v13, %v350_v55  ;;  %v352_v60 = vsub.f32 %v5836_v14, %v350_v55  ;;  %vm821_vm12 = vcmask 1045504   ;;  %vm823_vm13 = vcmask 1046528  }
  0xa6   : > { %555 = vrot.lane.b32.xlu1 %v442_v44, %s5587_s26  ;;  %553 = vrot.lane.b32.xlu0 %v441_v45, %s5587_s26  ;;  %v511_v44 = vsub.f32 1.0, %v509_v26  ;;  %v1047_v45 = vand.u32 2147483647, %v1045_v39  ;;  %v1048_v49 = vsub.f32 1.0, %v1046_v27  ;;  %v890_v1 = vand.u32 2147483647, %v888_v57 }
  0xa7   : > { %v891_v63 = vand.u32 2147483647, %v889_v58  ;;  %v353_v5 = vand.u32 2147483647, %v351_v59 }
  0xa8   : > { %v513_v47 = vmax.f32 %v511_v44, 0.0  ;;  %v1049_v48 = vsub.f32 1.0, %v1047_v45 }
  0xa9   : > { %v893_v15 = vsub.f32 1.0, %v891_v63  ;;  %v355_v22 = vsub.f32 1.0, %v353_v5 }
  0xaa   : > { %1092 = vrot.lane.b32.xlu1 %v979_v51, %s5587_s26  ;;  %1090 = vrot.lane.b32.xlu0 %v978_v56, %s5587_s26  ;;  %v1051_v50 = vmax.f32 %v1049_v48, 0.0  ;;  %v1050_v51 = vmax.f32 %v1048_v49, 0.0 }
  0xae   : > { %563 = vrot.lane.b32.xlu1 %v466_v10, %s5588_s12  ;;  %561 = vrot.lane.b32.xlu0 %v465_v20, %s5588_s12  ;;  %v354_v10 = vand.u32 2147483647, %v352_v60  ;;  %v892_v20 = vsub.f32 1.0, %v890_v1 }
  0xb0   : > { %v356_v23 = vsub.f32 1.0, %v354_v10  ;;  %v894_v28 = vmax.f32 %v892_v20, 0.0 }
  0xb2   : > { %1100 = vrot.lane.b32.xlu1 %v1003_v24, %s5588_s12  ;;  %1098 = vrot.lane.b32.xlu0 %v1002_v31, %s5588_s12  ;;  %v895_v31 = vmax.f32 %v893_v15, 0.0 }
  0xb6   : > { %571 = vrot.lane.b32.xlu1 %v490_v25, %s5589_s9  ;;  %569 = vrot.lane.b32.xlu0 %v489_v35, %s5589_s9  ;;  %v357_v25 = vmax.f32 %v355_v22, 0.0  ;;  %v358_v35 = vmax.f32 %v356_v23, 0.0 }
  0xba   : > { %1108 = vrot.lane.b32.xlu1 %v1027_v41, %s5589_s9  ;;  %1106 = vrot.lane.b32.xlu0 %v1026_v43, %s5589_s9 }
  0xbe   : > { %579 = vrot.lane.b32.xlu1 %v514_v46, %s5590_s10  ;;  %577 = vrot.lane.b32.xlu0 %v513_v47, %s5590_s10 }
  0xc2   : > { %1116 = vrot.lane.b32.xlu1 %v1051_v50, %s5590_s10  ;;  %1114 = vrot.lane.b32.xlu0 %v1050_v51, %s5590_s10 }
  0xde   : > { %v5077_v54 = vpop.permute.xlu1 %5076 }
  0xdf   : > { %v5067_v56 = vpop.permute.xlu0 %5066  ;;  %v5079_v38 = vunpack.i.h.bf16 %v5077_v54  ;;  %v5078_v40 = vunpack.i.l.bf16 %v5077_v54 }
  0xe0   : > { %v5069_v33 = vunpack.i.h.bf16 %v5067_v56  ;;  %v5068_v34 = vunpack.i.l.bf16 %v5067_v56 }
  0xe2   : > { %v5082_v61 = vpop.permute.xlu1 %5081  ;;  %v660_v45 = vsel %vm583_vm0, %v357_v25, %v5068_v34  ;;  %v661_v27 = vsel %vm583_vm0, %v358_v35, %v5069_v33 }
  0xe3   : > { %v5072_v62 = vpop.permute.xlu0 %5071  ;;  %v5083_v37 = vunpack.i.l.bf16 %v5082_v61  ;;  %v5084_v26 = vunpack.i.h.bf16 %v5082_v61  ;;  %v662_v57 = vsel %vm586_vm1, %v660_v45, %v5078_v40  ;;  %v663_v58 = vsel %vm586_vm1, %v661_v27, %v5079_v38 }
  0xe4   : > { %v5073_v29 = vunpack.i.l.bf16 %v5072_v62  ;;  %v5074_v32 = vunpack.i.h.bf16 %v5072_v62 }
  0xe6   : > { %v5092_v16 = vpop.permute.xlu1 %5091  ;;  %v1190_v39 = vsel %vm583_vm0, %v894_v28, %v5073_v29  ;;  %v1191_v41 = vsel %vm583_vm0, %v895_v31, %v5074_v32 }
  0xe7   : > { %v5094_v42 = vunpack.i.h.bf16 %v5092_v16  ;;  %v5093_v43 = vunpack.i.l.bf16 %v5092_v16  ;;  %v1192_v47 = vsel %vm586_vm1, %v1190_v39, %v5083_v37  ;;  %v1193_v50 = vsel %vm586_vm1, %v1191_v41, %v5084_v26 }
  0xe8   : > { %v6040_v21 = vpop.permute.xlu0 %5086 }
  0xe9   : > { %v5088_v51 = vunpack.i.l.bf16 %v6040_v21  ;;  %v1194_v55 = vsel %vm589_vm2, %v1192_v47, %v5093_v43  ;;  %v1195_v56 = vsel %vm589_vm2, %v1193_v50, %v5094_v42  ;;  %v5089_v60 = vunpack.i.h.bf16 %v6040_v21 }
  0xea   : > { %v5102_v24 = vpop.permute.xlu1 %5101 }
  0xeb   : > { %v5104_v48 = vunpack.i.h.bf16 %v5102_v24  ;;  %v5103_v49 = vunpack.i.l.bf16 %v5102_v24  ;;  %v664_v20 = vsel %vm589_vm2, %v662_v57, %v5088_v51  ;;  %v665_v32 = vsel %vm589_vm2, %v663_v58, %v5089_v60 }
  0xec   : > { %v5097_v30 = vpop.permute.xlu0 %5096 }
  0xed   : > { %v5098_v61 = vunpack.i.l.bf16 %v5097_v30  ;;  %v1196_v63 = vsel %vm592_vm3, %v1194_v55, %v5103_v49  ;;  %v1197_v5 = vsel %vm592_vm3, %v1195_v56, %v5104_v48  ;;  %v5099_v10 = vunpack.i.h.bf16 %v5097_v30 }
  0xef   : > { %v5112_v36 = vpop.permute.xlu1 %5111  ;;  %v666_v33 = vsel %vm592_vm3, %v664_v20, %v5098_v61  ;;  %v667_v25 = vsel %vm592_vm3, %v665_v32, %v5099_v10 }
  0xf0   : > { %v5114_v53 = vunpack.i.h.bf16 %v5112_v36  ;;  %v5113_v54 = vunpack.i.l.bf16 %v5112_v36 }
  0xf2   : > { %v5107_v44 = vpop.permute.xlu0 %5106  ;;  %v1198_v23 = vsel %vm595_vm4, %v1196_v63, %v5113_v54  ;;  %v1199_v24 = vsel %vm595_vm4, %v1197_v5, %v5114_v53  ;;  %v338_v63 = vrot.slane %v5940_v3, %v6030_v52 }
  0xf3   : > { %v5122_v46 = vpop.permute.xlu1 %5121  ;;  %v5108_v16 = vunpack.i.l.bf16 %v5107_v44  ;;  %v5109_v15 = vunpack.i.h.bf16 %v5107_v44 }
  0xf4   : > { %v5124_v62 = vunpack.i.h.bf16 %v5122_v46  ;;  %v5123_v1 = vunpack.i.l.bf16 %v5122_v46 }
  0xf5   : > { %v668_v36 = vsel %vm595_vm4, %v666_v33, %v5108_v16  ;;  %v669_v40 = vsel %vm595_vm4, %v667_v25, %v5109_v15  ;;  %v340_v15 = vsub.f32 %v5836_v14, %v338_v63 }
  0xf6   : > { %v5117_v59 = vpop.permute.xlu0 %5116  ;;  %v1200_v34 = vsel %vm598_vm5, %v1198_v23, %v5123_v1  ;;  %v1201_v30 = vsel %vm598_vm5, %v1199_v24, %v5124_v62  ;;  %v875_v62 = vrot.slane %v5943_v4, %v6030_v52 }
  0xf7   : > { %v5119_v28 = vunpack.i.h.bf16 %v5117_v59  ;;  %v5118_v29 = vunpack.i.l.bf16 %v5117_v59 }
  0xf8   : > { %v5132_v22 = vpop.permute.xlu1 %5131  ;;  %v877_v5 = vsub.f32 %v5836_v14, %v875_v62  ;;  %v876_v10 = vsub.f32 %v5834_v13, %v875_v62 }
  0xf9   : > { %v5134_v21 = vunpack.i.h.bf16 %v5132_v22  ;;  %v5133_v31 = vunpack.i.l.bf16 %v5132_v22  ;;  %v670_v42 = vsel %vm598_vm5, %v668_v36, %v5118_v29  ;;  %v671_v43 = vsel %vm598_vm5, %v669_v40, %v5119_v28 }
  0xfa   : > { %v339_v22 = vsub.f32 %v5834_v13, %v338_v63  ;;  %v879_v23 = vand.u32 2147483647, %v877_v5  ;;  %v878_v24 = vand.u32 2147483647, %v876_v10  ;;  %v342_v28 = vand.u32 2147483647, %v340_v15 }
  0xfb   : > { %v5127_v35 = vpop.permute.xlu0 %5126  ;;  %v1202_v37 = vsel %vm601_vm6, %v1200_v34, %v5133_v31  ;;  %v1203_v38 = vsel %vm601_vm6, %v1201_v30, %v5134_v21 }
  0xfc   : > { %v5129_v26 = vunpack.i.h.bf16 %v5127_v35  ;;  %v5128_v39 = vunpack.i.l.bf16 %v5127_v35  ;;  %v4960_v41 = vpack.c.bf16 %v1203_v38, %v1202_v37  ;;  %v341_v21 = vand.u32 2147483647, %v339_v22 }
  0xfd   : > { %v881_v4 = vsub.f32 1.0, %v879_v23  ;;  %v880_v32 = vsub.f32 1.0, %v878_v24  ;;  %v344_v33 = vsub.f32 1.0, %v342_v28 }
  0xfe   : > { %v672_v44 = vsel %vm601_vm6, %v670_v42, %v5128_v39  ;;  %v673_v45 = vsel %vm601_vm6, %v671_v43, %v5129_v26  ;;  %4961 = vmatprep.subr.bf16.mxu1 %v4960_v41  ;;  %v343_v3 = vsub.f32 1.0, %v341_v21 }
  0xff   : > { %v4956_v27 = vpack.c.bf16 %v673_v45, %v672_v44  ;;  %4963 = vmatpush3.bf16.msra.mxu1 %v4960_v41  ;;  %v883_v34 = vmax.f32 %v881_v4, 0.0  ;;  %v882_v30 = vmax.f32 %v880_v32, 0.0  ;;  %v346_v36 = vmax.f32 %v344_v33, 0.0 }
 0x100   : > { %v532_v46 = vpop.permute.xlu1 %531  ;;  %v530_v47 = vpop.permute.xlu0 %529  ;;  %v345_v37 = vmax.f32 %v343_v3, 0.0 }
 0x101   : > { %4957 = vmatprep.subr.bf16.mxu0 %v4956_v27  ;;  %v585_v39 = vsel %vm583_vm0, %v346_v36, %v532_v46 }
 0x102   : > { %4959 = vmatpush3.bf16.msra.mxu0 %v4956_v27  ;;  %4891 = vmatmul.mubr.msk.f32.vlgmr.msra.gmra.mrb[0].mxu1 %vm583_vm0, %v5932_v2  ;;  %v584_v42 = vsel %vm583_vm0, %v345_v37, %v530_v47 }
 0x103   : > { %4893 = vmatprep.mubr.msk.f32.mxu1 %vm583_vm0, %v5816_v6 }
 0x104   : > { %v1069_v48 = vpop.permute.xlu1 %1068  ;;  %v1067_v49 = vpop.permute.xlu0 %1066 }
 0x105   : > { %4881 = vmatmul.mubr.msk.f32.vlgmr.msra.gmra.mrb[0].mxu0 %vm583_vm0, %v5932_v2  ;;  %v1121_v38 = vsel %vm583_vm0, %v883_v34, %v1069_v48  ;;  %v1120_v26 = vsel %vm583_vm0, %v882_v30, %v1067_v49 }
 0x106   : > { %4883 = vmatprep.mubr.msk.f32.mxu0 %vm583_vm0, %v5816_v6  ;;  %4894 = vmatmul.mubr.msk.f32.gmra.mrb[2].mxu1 %vm583_vm0, %v5824_v9 }
 0x108   : > { %v540_v50 = vpop.permute.xlu1 %539  ;;  %v538_v51 = vpop.permute.xlu0 %537 }
 0x109   : > { %4884 = vmatmul.mubr.msk.f32.gmra.mrb[2].mxu0 %vm583_vm0, %v5824_v9  ;;  %v588_v45 = vsel %vm586_vm1, %v585_v39, %v540_v50  ;;  %v587_v62 = vsel %vm586_vm1, %v584_v42, %v538_v51 }
 0x10c   : > { %v1077_v53 = vpop.permute.xlu1 %1076  ;;  %v1075_v54 = vpop.permute.xlu0 %1074 }
 0x10d   : > { %v1123_v40 = vsel %vm586_vm1, %v1121_v38, %v1077_v53  ;;  %v1122_v43 = vsel %vm586_vm1, %v1120_v26, %v1075_v54 }
 0x110   : > { %v548_v55 = vpop.permute.xlu1 %547  ;;  %v546_v56 = vpop.permute.xlu0 %545 }
 0x111   : > { %v591_v49 = vsel %vm589_vm2, %v588_v45, %v548_v55  ;;  %v590_v53 = vsel %vm589_vm2, %v587_v62, %v546_v56 }
 0x114   : > { %v1085_v57 = vpop.permute.xlu1 %1084  ;;  %v1083_v58 = vpop.permute.xlu0 %1082 }
 0x115   : > { %v1125_v27 = vsel %vm589_vm2, %v1123_v40, %v1085_v57  ;;  %v1124_v48 = vsel %vm589_vm2, %v1122_v43, %v1083_v58 }
 0x118   : > { %v556_v59 = vpop.permute.xlu1 %555  ;;  %v554_v60 = vpop.permute.xlu0 %553 }
 0x119   : > { %v594_v54 = vsel %vm592_vm3, %v591_v49, %v556_v59  ;;  %v593_v57 = vsel %vm592_vm3, %v590_v53, %v554_v60 }
 0x11c   : > { %v1093_v61 = vpop.permute.xlu1 %1092  ;;  %v1091_v1 = vpop.permute.xlu0 %1090 }
 0x11d   : > { %v1127_v46 = vsel %vm592_vm3, %v1125_v27, %v1093_v61  ;;  %v1126_v47 = vsel %vm592_vm3, %v1124_v48, %v1091_v1 }
 0x120   : > { %v564_v16 = vpop.permute.xlu1 %563  ;;  %v562_v20 = vpop.permute.xlu0 %561 }
 0x121   : > { %v597_v58 = vsel %vm595_vm4, %v594_v54, %v564_v16  ;;  %v596_v61 = vsel %vm595_vm4, %v593_v57, %v562_v20 }
 0x124   : > { %v1101_v29 = vpop.permute.xlu1 %1100  ;;  %v1099_v31 = vpop.permute.xlu0 %1098 }
 0x125   : > { %v1129_v50 = vsel %vm595_vm4, %v1127_v46, %v1101_v29  ;;  %v1128_v51 = vsel %vm595_vm4, %v1126_v47, %v1099_v31 }
 0x128   : > { %v572_v25 = vpop.permute.xlu1 %571  ;;  %v570_v35 = vpop.permute.xlu0 %569 }
 0x129   : > { %v600_v1 = vsel %vm598_vm5, %v597_v58, %v572_v25  ;;  %v599_v23 = vsel %vm598_vm5, %v596_v61, %v570_v35 }
 0x12c   : > { %v1109_v41 = vpop.permute.xlu1 %1108  ;;  %v1107_v44 = vpop.permute.xlu0 %1106 }
 0x12d   : > { %v1131_v55 = vsel %vm598_vm5, %v1129_v50, %v1109_v41  ;;  %v1130_v56 = vsel %vm598_vm5, %v1128_v51, %v1107_v44 }
 0x130   : > { %v580_v63 = vpop.permute.xlu1 %579  ;;  %v578_v5 = vpop.permute.xlu0 %577 }
 0x131   : > { %v603_v29 = vsel %vm601_vm6, %v600_v1, %v580_v63  ;;  %v602_v20 = vsel %vm601_vm6, %v599_v23, %v578_v5 }
 0x134   : > { %v1117_v10 = vpop.permute.xlu1 %1116  ;;  %v1115_v15 = vpop.permute.xlu0 %1114 }
 0x135   : > { %v1133_v59 = vsel %vm601_vm6, %v1131_v55, %v1117_v10  ;;  %v1132_v24 = vsel %vm601_vm6, %v1130_v56, %v1115_v15 }
 0x1d5   : > { %v4892_v22 = vpop.f32.mrb[0].mxu1 }
 0x1d6   : > { %v1290_v60 = vmul.f32 %v4892_v22, %v1133_v59  ;;  %v1270_v28 = vpop.f32.mrb[1].mxu1 }
 0x1d7   : > { %v1289_v16 = vmul.f32 %v1270_v28, %v1132_v24 }
 0x1d8   : > { %v4882_v21 = vpop.f32.mrb[0].mxu0 }
 0x1d9   : > { %v772_v4 = vmul.f32 %v4882_v21, %v603_v29  ;;  %v752_v31 = vpop.f32.mrb[1].mxu0  ;;  %v1291_v32 = vadd.f32 %v1290_v60, %v1289_v16  ;;  %v4895_v33 = vpop.f32.mrb[2].mxu1 }
 0x1da   : > { %v771_v3 = vmul.f32 %v752_v31, %v602_v20  ;;  %v1299_v34 = vmul.f32 %v4895_v33, %v1133_v59  ;;  %v1280_v30 = vpop.f32.mrb[3].mxu1 }
 0x1db   : > { %v1298_v25 = vmul.f32 %v1280_v30, %v1132_v24  ;;  %v1292_v54 = vrot.slane %v1291_v32, 4 }
 0x1dc   : > { %v773_v36 = vadd.f32 %v772_v4, %v771_v3  ;;  %v4885_v35 = vpop.f32.mrb[2].mxu0 }
 0x1dd   : > { %v781_v37 = vmul.f32 %v4885_v35, %v603_v29  ;;  %v762_v38 = vpop.f32.mrb[3].mxu0  ;;  %v1300_v26 = vadd.f32 %v1299_v34, %v1298_v25  ;;  %v1293_v57 = vadd.f32 %v1292_v54, %v1291_v32 }
 0x1de   : > { %v780_v39 = vmul.f32 %v762_v38, %v602_v20  ;;  %v774_v47 = vrot.slane %v773_v36, 4 }
 0x1df   : > { %v1301_v40 = vrot.slane %v1300_v26, 4  ;;  %v1294_v58 = vrot.slane %v1293_v57, 2 }
 0x1e0   : > { %v782_v41 = vadd.f32 %v781_v37, %v780_v39  ;;  %v775_v5 = vadd.f32 %v774_v47, %v773_v36 }
 0x1e1   : > { %v1302_v42 = vadd.f32 %v1301_v40, %v1300_v26  ;;  %v1295_v10 = vadd.f32 %v1294_v58, %v1293_v57 }
 0x1e2   : > { %v783_v43 = vrot.slane %v782_v41, 4  ;;  %v776_v50 = vrot.slane %v775_v5, 2 }
 0x1e3   : > { %v1303_v44 = vrot.slane %v1302_v42, 2  ;;  %v1296_v56 = vrot.slane %v1295_v10, 1 }
 0x1e4   : > { %v784_v45 = vadd.f32 %v783_v43, %v782_v41  ;;  %v777_v51 = vadd.f32 %v776_v50, %v775_v5 }
 0x1e5   : > { %v1304_v27 = vadd.f32 %v1303_v44, %v1302_v42  ;;  %v6137_v15 = vadd.f32 %v1296_v56, %v1295_v10 }
 0x1e6   : > { %v785_v62 = vrot.slane %v784_v45, 2  ;;  %v778_v55 = vrot.slane %v777_v51, 1 }
 0x1e7   : > { %v1305_v48 = vrot.slane %v1304_v27, 1 }
 0x1e8   : > { %v786_v49 = vadd.f32 %v785_v62, %v784_v45  ;;  %v779_v61 = vadd.f32 %v778_v55, %v777_v51 }
 0x1e9   : > { %v1306_v46 = vadd.f32 %v1305_v48, %v1304_v27  ;;  %v4767_v48 = vld [vmem:[%s5804_s7 + $0x18] sm:$0xff] }
 0x1ea   : > { %v787_v63 = vrot.slane %v786_v49, 1 }
 0x1eb   : > { %1337 = vrot.lane.b32.xlu1 %v1306_v46, %s5590_s10 }
 0x1ec   : > { %v788_v53 = vadd.f32 %v787_v63, %v786_v49 }
 0x1ee   : > { %826 = vrot.lane.b32.xlu0 %v788_v53, %s5590_s10 }
 0x1ef   : > { %1340 = vrot.lane.b32.xlu1 %v1306_v46, %s5589_s9 }
 0x1f2   : > { %829 = vrot.lane.b32.xlu0 %v788_v53, %s5589_s9 }
 0x1f3   : > { %1343 = vrot.lane.b32.xlu1 %v1306_v46, %s5588_s12 }
 0x1f6   : > { %832 = vrot.lane.b32.xlu0 %v788_v53, %s5588_s12 }
 0x1f7   : > { %1346 = vrot.lane.b32.xlu1 %v1306_v46, %s5587_s26 }
 0x1fa   : > { %835 = vrot.lane.b32.xlu0 %v788_v53, %s5587_s26 }
 0x1fb   : > { %1349 = vrot.lane.b32.xlu1 %v1306_v46, %s5586_s11 }
 0x1fe   : > { %838 = vrot.lane.b32.xlu0 %v788_v53, %s5586_s11 }
 0x1ff   : > { %1352 = vrot.lane.b32.xlu1 %v1306_v46, %s5584_s29 }
 0x202   : > { %841 = vrot.lane.b32.xlu0 %v788_v53, %s5584_s29 }
 0x203   : > { %1355 = vrot.lane.b32.xlu1 %v1306_v46, %s7478_s28 }
 0x206   : > { %844 = vrot.lane.b32.xlu0 %v788_v53, %s7478_s28 }
 0x207   : > { %793 = vrot.lane.b32.xlu1 %v779_v61, %s5589_s9 }
 0x20a   : > { %790 = vrot.lane.b32.xlu0 %v779_v61, %s5590_s10 }
 0x20b   : > { %796 = vrot.lane.b32.xlu1 %v779_v61, %s5588_s12 }
 0x20e   : > { %1308 = vrot.lane.b32.xlu0 %v6137_v15, %s5590_s10 }
 0x20f   : > { %799 = vrot.lane.b32.xlu1 %v779_v61, %s5587_s26 }
 0x212   : > { %1311 = vrot.lane.b32.xlu0 %v6137_v15, %s5589_s9 }
 0x213   : > { %802 = vrot.lane.b32.xlu1 %v779_v61, %s5586_s11 }
 0x216   : > { %1314 = vrot.lane.b32.xlu0 %v6137_v15, %s5588_s12 }
 0x217   : > { %805 = vrot.lane.b32.xlu1 %v779_v61, %s5584_s29 }
 0x21a   : > { %1317 = vrot.lane.b32.xlu0 %v6137_v15, %s5587_s26 }
 0x21b   : > { %808 = vrot.lane.b32.xlu1 %v779_v61, %s7478_s28 }
 0x21e   : > { %1320 = vrot.lane.b32.xlu0 %v6137_v15, %s5586_s11 }
 0x21f   : > { %1326 = vrot.lane.b32.xlu1 %v6137_v15, %s7478_s28 }
 0x222   : > { %1323 = vrot.lane.b32.xlu0 %v6137_v15, %s5584_s29 }
 0x25d   : > { %v1338_v1 = vpop.permute.xlu1 %1337 }
 0x25e   : > { %v1358_v21 = vsel %vm811_vm7, %v1306_v46, %v1338_v1 }
 0x260   : > { %v827_v59 = vpop.permute.xlu0 %826 }
 0x261   : > { %v1341_v22 = vpop.permute.xlu1 %1340  ;;  %v847_v33 = vsel %vm811_vm7, %v788_v53, %v827_v59 }
 0x262   : > { %v1359_v20 = vsel %vm813_vm8, %v1358_v21, %v1341_v22 }
 0x264   : > { %v830_v23 = vpop.permute.xlu0 %829 }
 0x265   : > { %v1344_v60 = vpop.permute.xlu1 %1343  ;;  %v848_v34 = vsel %vm813_vm8, %v847_v33, %v830_v23 }
 0x266   : > { %v1360_v32 = vsel %vm815_vm9, %v1359_v20, %v1344_v60 }
 0x268   : > { %v833_v24 = vpop.permute.xlu0 %832 }
 0x269   : > { %v1347_v28 = vpop.permute.xlu1 %1346  ;;  %v849_v36 = vsel %vm815_vm9, %v848_v34, %v833_v24 }
 0x26a   : > { %v1361_v3 = vsel %vm817_vm10, %v1360_v32, %v1347_v28 }
 0x26c   : > { %v836_v16 = vpop.permute.xlu0 %835 }
 0x26d   : > { %v1350_v29 = vpop.permute.xlu1 %1349  ;;  %v850_v38 = vsel %vm817_vm10, %v849_v36, %v836_v16 }
 0x26e   : > { %v1362_v30 = vsel %vm819_vm11, %v1361_v3, %v1350_v29 }
 0x270   : > { %v839_v4 = vpop.permute.xlu0 %838 }
 0x271   : > { %v1353_v31 = vpop.permute.xlu1 %1352  ;;  %v851_v39 = vsel %vm819_vm11, %v850_v38, %v839_v4 }
 0x272   : > { %v1363_v35 = vsel %vm821_vm12, %v1362_v30, %v1353_v31 }
 0x274   : > { %v842_v25 = vpop.permute.xlu0 %841 }
 0x275   : > { %v1356_v37 = vpop.permute.xlu1 %1355  ;;  %v852_v41 = vsel %vm821_vm12, %v851_v39, %v842_v25 }
 0x276   : > { %v1364_v26 = vsel %vm823_vm13, %v1363_v35, %v1356_v37 }
 0x277   : > { %v1368_v40 = vadd.f32 %v1364_v26, %v5824_v9 }
 0x278   : > { %v845_v42 = vpop.permute.xlu0 %844 }
 0x279   : > { %4756 = vst.msk [vmem:[%s6172_s16 + $0x18] sm:$0xff] %vm583_vm0, %v1368_v40  ;;  %v853_v43 = vsel %vm823_vm13, %v852_v41, %v845_v42  ;;  %v794_v44 = vpop.permute.xlu1 %793 }
 0x27a   : > { %v856_v45 = vadd.f32 %v853_v43, %v5816_v6  ;;  %v4758_v6 = vld [vmem:[%s5804_s7 + $0x10] sm:$0xff] }
 0x27c   : > { %4746 = vst.msk [vmem:[%s6172_s16 + $0x10] sm:$0xff] %vm583_vm0, %v856_v45  ;;  %v791_v9 = vpop.permute.xlu0 %790 }
 0x27d   : > { %v812_v27 = vsel %vm811_vm7, %v779_v61, %v791_v9  ;;  %v797_v62 = vpop.permute.xlu1 %796 }
 0x27e   : > { %v814_v49 = vsel %vm813_vm8, %v812_v27, %v794_v44 }
 0x27f   : > { %v816_v53 = vsel %vm815_vm9, %v814_v49, %v797_v62 }
 0x280   : > { %v1309_v46 = vpop.permute.xlu0 %1308  ;;  %v6184_v63 = vld [vmem:[%s6172_s16 + $0x18] sm:$0xff] }
 0x281   : > { %v800_v47 = vpop.permute.xlu1 %799  ;;  %v6188_v5 = vadd.f32 %v4767_v48, %v6184_v63  ;;  %v1329_v54 = vsel %vm811_vm7, %v6137_v15, %v1309_v46 }
 0x282   : > { %v818_v50 = vsel %vm817_vm10, %v816_v53, %v800_v47 }
 0x283   : > { %v1936_v57 = vrot.slane %v6188_v5, %v5822_v8  ;;  %v6197_v51 = vld [vmem:[%s6172_s16 + $0x10] sm:$0xff]  ;;  %v1960_v58 = vrot.slane %v6188_v5, %v5819_v7  ;;  %v6203_v55 = vrot.slane %v6188_v5, %v5828_v11  ;;  %v6207_v10 = vrot.slane %v6188_v5, %v5831_v12 }
 0x284   : > { %v1312_v61 = vpop.permute.xlu0 %1311  ;;  %v6210_v56 = vadd.f32 %v4758_v6, %v6197_v51  ;;  %v6214_v15 = vrot.slane %v6188_v5, %v5845_v17  ;;  %v6218_v1 = vrot.slane %v6188_v5, %v5848_v18  ;;  %v6222_v59 = vrot.slane %v6188_v5, %v5851_v19 }
 0x285   : > { %v1330_v22 = vsel %vm813_vm8, %v1329_v54, %v1312_v61  ;;  %v803_v23 = vpop.permute.xlu1 %802  ;;  %v1937_v60 = vsub.f32 %v5834_v13, %v1936_v57  ;;  %v1938_v24 = vsub.f32 %v5836_v14, %v1936_v57  ;;  %v1961_v28 = vsub.f32 %v5834_v13, %v1960_v58 }
 0x286   : > { %v820_v16 = vsel %vm819_vm11, %v818_v50, %v803_v23  ;;  %v1420_v29 = vrot.slane %v6210_v56, %v5822_v8  ;;  %v1962_v21 = vsub.f32 %v5836_v14, %v1960_v58  ;;  %v1444_v4 = vrot.slane %v6210_v56, %v5819_v7 }
 0x287   : > { %v1939_v20 = vand.u32 2147483647, %v1937_v60  ;;  %v1940_v31 = vand.u32 2147483647, %v1938_v24  ;;  %v1963_v32 = vand.u32 2147483647, %v1961_v28  ;;  %v1468_v33 = vrot.slane %v6210_v56, %v5828_v11 }
 0x288   : > { %v1315_v3 = vpop.permute.xlu0 %1314  ;;  %v1421_v34 = vsub.f32 %v5834_v13, %v1420_v29  ;;  %v1422_v30 = vsub.f32 %v5836_v14, %v1420_v29  ;;  %v1964_v25 = vand.u32 2147483647, %v1962_v21  ;;  %v1445_v36 = vsub.f32 %v5834_v13, %v1444_v4 }
 0x289   : > { %v1331_v35 = vsel %vm815_vm9, %v1330_v22, %v1315_v3  ;;  %v806_v37 = vpop.permute.xlu1 %805  ;;  %v1941_v38 = vsub.f32 1.0, %v1939_v20  ;;  %v1942_v26 = vsub.f32 1.0, %v1940_v31  ;;  %v1965_v39 = vsub.f32 1.0, %v1963_v32 }
 0x28a   : > { %v822_v40 = vsel %vm821_vm12, %v820_v16, %v806_v37  ;;  %v1423_v41 = vand.u32 2147483647, %v1421_v34  ;;  %v1424_v42 = vand.u32 2147483647, %v1422_v30  ;;  %v1966_v43 = vsub.f32 1.0, %v1964_v25 }
 0x28b   : > { %v1943_v44 = vmax.f32 %v1941_v38, 0.0  ;;  %v1944_v45 = vmax.f32 %v1942_v26, 0.0  ;;  %v1967_v9 = vmax.f32 %v1965_v39, 0.0  ;;  %v1446_v27 = vsub.f32 %v5836_v14, %v1444_v4 }
 0x28c   : > { %v1318_v62 = vpop.permute.xlu0 %1317  ;;  %v1425_v48 = vsub.f32 1.0, %v1423_v41  ;;  %v1426_v49 = vsub.f32 1.0, %v1424_v42  ;;  %v1968_v46 = vmax.f32 %v1966_v43, 0.0  ;;  %v1447_v53 = vand.u32 2147483647, %v1445_v36 }
 0x28d   : > { %v1332_v47 = vsel %vm817_vm10, %v1331_v35, %v1318_v62  ;;  %v809_v6 = vpop.permute.xlu1 %808  ;;  %v5140_v54 = vpack.i.bf16 %v1944_v45, %v1943_v44  ;;  %v1448_v50 = vand.u32 2147483647, %v1446_v27  ;;  %v1469_v57 = vsub.f32 %v5834_v13, %v1468_v33 }
 0x28e   : > { %v824_v58 = vsel %vm823_vm13, %v822_v40, %v809_v6  ;;  %v1427_v61 = vmax.f32 %v1425_v48, 0.0  ;;  %v1428_v22 = vmax.f32 %v1426_v49, 0.0  ;;  %v5150_v23 = vpack.i.bf16 %v1968_v46, %v1967_v9 }
 0x28f   : > { %v854_v60 = vadd.f32 %v824_v58, %v5930_v0  ;;  %5141 = vrot.lane.b32.xlu0 %v5140_v54, %s7478_s28  ;;  %v1449_v24 = vsub.f32 1.0, %v1447_v53  ;;  %v1450_v28 = vsub.f32 1.0, %v1448_v50  ;;  %v1470_v16 = vsub.f32 %v5836_v14, %v1468_v33 }
 0x290   : > { %v1321_v29 = vpop.permute.xlu0 %1320  ;;  %v5135_v21 = vpack.i.bf16 %v1428_v22, %v1427_v61  ;;  %v1471_v4 = vand.u32 2147483647, %v1469_v57  ;;  %v1985_v20 = vsub.f32 %v5834_v13, %v6203_v55  ;;  %v1986_v31 = vsub.f32 %v5836_v14, %v6203_v55 }
 0x291   : > { %855 = vst.msk [vmem:[%s6172_s16] sm:$0xff] %vm583_vm0, %v854_v60  ;;  %v1333_v32 = vsel %vm819_vm11, %v1332_v47, %v1321_v29  ;;  %v1451_v0 = vmax.f32 %v1449_v24, 0.0  ;;  %v1452_v3 = vmax.f32 %v1450_v28, 0.0  ;;  %v1472_v34 = vand.u32 2147483647, %v1470_v16  ;;  %v1327_v35 = vpop.permute.xlu1 %1326 }
 0x292   : > { %5136 = vrot.lane.b32.xlu1 %v5135_v21, %s7478_s28  ;;  %v1473_v30 = vsub.f32 1.0, %v1471_v4  ;;  %v1987_v33 = vand.u32 2147483647, %v1985_v20  ;;  %v1988_v25 = vand.u32 2147483647, %v1986_v31  ;;  %v1492_v36 = vrot.slane %v6210_v56, %v5831_v12 }
 0x293   : > { %5151 = vrot.lane.b32.xlu0 %v5150_v23, %s5584_s29  ;;  %v5145_v37 = vpack.i.bf16 %v1452_v3, %v1451_v0  ;;  %v1474_v55 = vsub.f32 1.0, %v1472_v34  ;;  %v2009_v38 = vsub.f32 %v5834_v13, %v6207_v10  ;;  %v2010_v26 = vsub.f32 %v5836_v14, %v6207_v10 }
 0x294   : > { %v1324_v39 = vpop.permute.xlu0 %1323  ;;  %v1475_v40 = vmax.f32 %v1473_v30, 0.0  ;;  %v1989_v41 = vsub.f32 1.0, %v1987_v33  ;;  %v1990_v42 = vsub.f32 1.0, %v1988_v25  ;;  %v1493_v43 = vsub.f32 %v5834_v13, %v1492_v36 }
 0x295   : > { %v1334_v44 = vsel %vm821_vm12, %v1333_v32, %v1324_v39  ;;  %v1476_v45 = vmax.f32 %v1474_v55, 0.0  ;;  %v1494_v9 = vsub.f32 %v5836_v14, %v1492_v36  ;;  %v2011_v27 = vand.u32 2147483647, %v2009_v38 }
 0x296   : > { %v1335_v62 = vsel %vm823_vm13, %v1334_v44, %v1327_v35  ;;  %5146 = vrot.lane.b32.xlu1 %v5145_v37, %s5584_s29  ;;  %v1991_v48 = vmax.f32 %v1989_v41, 0.0  ;;  %v1992_v10 = vmax.f32 %v1990_v42, 0.0  ;;  %v1495_v49 = vand.u32 2147483647, %v1493_v43 }
 0x297   : > { %v1365_v46 = vadd.f32 %v1335_v62, %v5932_v2  ;;  %v5155_v53 = vpack.i.bf16 %v1476_v45, %v1475_v40  ;;  %v1496_v47 = vand.u32 2147483647, %v1494_v9  ;;  %v2012_v6 = vand.u32 2147483647, %v2010_v26 }
 0x298   : > { %v5160_v54 = vpack.i.bf16 %v1992_v10, %v1991_v48  ;;  %v6270_v50 = vld [vmem:[%s6172_s16] sm:$0xff]  ;;  %v1497_v57 = vsub.f32 1.0, %v1495_v49  ;;  %v2013_v58 = vsub.f32 1.0, %v2011_v27  ;;  %v1516_v61 = vrot.slane %v6210_v56, %v5845_v17 }
 0x299   : > { %4755 = vst.msk [vmem:[%s6172_s16 + $0x8] sm:$0xff] %vm583_vm0, %v1365_v46  ;;  %5156 = vrot.lane.b32.xlu0 %v5155_v53, %s5586_s11  ;;  %4900 = vmatprep.mubr.msk.f32.mxu0 %vm583_vm0, %v6270_v50  ;;  %v1498_v22 = vsub.f32 1.0, %v1496_v47  ;;  %v2014_v2 = vsub.f32 1.0, %v2012_v6  ;;  %v2033_v23 = vsub.f32 %v5834_v13, %v6214_v15  ;;  %v2034_v60 = vsub.f32 %v5836_v14, %v6214_v15 }
 0x29a   : > { %5161 = vrot.lane.b32.xlu1 %v5160_v54, %s5586_s11  ;;  %4910 = vmatprep.mubr.msk.f32.mxu1 %vm583_vm0, %v6270_v50  ;;  %v1499_v24 = vmax.f32 %v1497_v57, 0.0  ;;  %v2015_v28 = vmax.f32 %v2013_v58, 0.0  ;;  %v1517_v16 = vsub.f32 %v5834_v13, %v1516_v61  ;;  %v1518_v29 = vsub.f32 %v5836_v14, %v1516_v61  ;;  %v4766_v58 = vld [vmem:[%s5804_s7 + $0x8] sm:$0xff] }
 0x29b   : > { %v1500_v21 = vmax.f32 %v1498_v22, 0.0  ;;  %v2016_v4 = vmax.f32 %v2014_v2, 0.0  ;;  %v2035_v20 = vand.u32 2147483647, %v2033_v23  ;;  %v2036_v31 = vand.u32 2147483647, %v2034_v60 }
 0x29c   : > { %v1519_v32 = vand.u32 2147483647, %v1517_v16  ;;  %v1520_v0 = vand.u32 2147483647, %v1518_v29  ;;  %v1540_v15 = vrot.slane %v6210_v56, %v5848_v18  ;;  %v2057_v3 = vsub.f32 %v5834_v13, %v6218_v1 }
 0x29d   : > { %v5165_v34 = vpack.i.bf16 %v1500_v21, %v1499_v24  ;;  %v5170_v30 = vpack.i.bf16 %v2016_v4, %v2015_v28  ;;  %v2037_v33 = vsub.f32 1.0, %v2035_v20  ;;  %v2038_v25 = vsub.f32 1.0, %v2036_v31 }
 0x29e   : > { %v1521_v36 = vsub.f32 1.0, %v1519_v32  ;;  %v1522_v35 = vsub.f32 1.0, %v1520_v0  ;;  %v1541_v37 = vsub.f32 %v5834_v13, %v1540_v15  ;;  %v1542_v55 = vsub.f32 %v5836_v14, %v1540_v15 }
 0x29f   : > { %5166 = vrot.lane.b32.xlu0 %v5165_v34, %s5587_s26  ;;  %5171 = vrot.lane.b32.xlu1 %v5170_v30, %s5587_s26  ;;  %v2039_v38 = vmax.f32 %v2037_v33, 0.0  ;;  %v2040_v26 = vmax.f32 %v2038_v25, 0.0  ;;  %v2058_v39 = vsub.f32 %v5836_v14, %v6218_v1  ;;  %v2059_v40 = vand.u32 2147483647, %v2057_v3  ;;  %v1377_v1 = vld [vmem:[%s5804_s7] sm:$0xff] }
 0x2a0   : > { %v1523_v41 = vmax.f32 %v1521_v36, 0.0  ;;  %v1524_v42 = vmax.f32 %v1522_v35, 0.0  ;;  %v1543_v43 = vand.u32 2147483647, %v1541_v37  ;;  %v1544_v44 = vand.u32 2147483647, %v1542_v55 }
 0x2a1   : > { %v5180_v45 = vpack.i.bf16 %v2040_v26, %v2039_v38  ;;  %v2060_v9 = vand.u32 2147483647, %v2058_v39  ;;  %v2061_v27 = vsub.f32 1.0, %v2059_v40  ;;  %v1564_v62 = vrot.slane %v6210_v56, %v5851_v19  ;;  %v6307_v57 = vld [vmem:[%s6172_s16 + $0x8] sm:$0xff] }
 0x2a2   : > { %v5175_v48 = vpack.i.bf16 %v1524_v42, %v1523_v41  ;;  %v1545_v10 = vsub.f32 1.0, %v1543_v43  ;;  %v1546_v49 = vsub.f32 1.0, %v1544_v44  ;;  %v2081_v46 = vsub.f32 %v5834_v13, %v6222_v59 }
 0x2a3   : > { %5181 = vrot.lane.b32.xlu1 %v5180_v45, %s5588_s12  ;;  %v2062_v53 = vsub.f32 1.0, %v2060_v9  ;;  %v2063_v47 = vmax.f32 %v2061_v27, 0.0  ;;  %v1565_v6 = vsub.f32 %v5834_v13, %v1564_v62  ;;  %v1566_v54 = vsub.f32 %v5836_v14, %v1564_v62 }
 0x2a4   : > { %5176 = vrot.lane.b32.xlu0 %v5175_v48, %s5588_s12  ;;  %v1547_v61 = vmax.f32 %v1545_v10, 0.0  ;;  %v1548_v22 = vmax.f32 %v1546_v49, 0.0  ;;  %v2082_v2 = vsub.f32 %v5836_v14, %v6222_v59  ;;  %v2083_v23 = vand.u32 2147483647, %v2081_v46 }
 0x2a5   : > { %v2064_v60 = vmax.f32 %v2062_v53, 0.0  ;;  %v1567_v24 = vand.u32 2147483647, %v1565_v6  ;;  %v1568_v28 = vand.u32 2147483647, %v1566_v54  ;;  %v6314_v16 = vadd.f32 %v1377_v1, %v6270_v50 }
 0x2a6   : > { %v5185_v29 = vpack.i.bf16 %v1548_v22, %v1547_v61  ;;  %v2084_v21 = vand.u32 2147483647, %v2082_v2  ;;  %v2085_v4 = vsub.f32 1.0, %v2083_v23  ;;  %v6317_v20 = vadd.f32 %v4766_v58, %v6307_v57 }
 0x2a7   : > { %v5190_v31 = vpack.i.bf16 %v2064_v60, %v2063_v47  ;;  %v1569_v32 = vsub.f32 1.0, %v1567_v24  ;;  %v1570_v0 = vsub.f32 1.0, %v1568_v28  ;;  %v1408_v15 = vrot.slane %v6314_v16, %v5822_v8 }
 0x2a8   : > { %5186 = vrot.lane.b32.xlu0 %v5185_v29, %s5589_s9  ;;  %v2086_v59 = vsub.f32 1.0, %v2084_v21  ;;  %v2087_v3 = vmax.f32 %v2085_v4, 0.0  ;;  %v1924_v50 = vrot.slane %v6317_v20, %v5822_v8  ;;  %v1432_v34 = vrot.slane %v6314_v16, %v5819_v7 }
 0x2a9   : > { %5191 = vrot.lane.b32.xlu1 %v5190_v31, %s5589_s9  ;;  %v1571_v30 = vmax.f32 %v1569_v32, 0.0  ;;  %v1572_v33 = vmax.f32 %v1570_v0, 0.0  ;;  %v1410_v25 = vsub.f32 %v5836_v14, %v1408_v15  ;;  %v1409_v36 = vsub.f32 %v5834_v13, %v1408_v15 }
 0x2aa   : > { %v2088_v35 = vmax.f32 %v2086_v59, 0.0  ;;  %v1926_v37 = vsub.f32 %v5836_v14, %v1924_v50  ;;  %v1925_v55 = vsub.f32 %v5834_v13, %v1924_v50  ;;  %v1434_v38 = vsub.f32 %v5836_v14, %v1432_v34 }
 0x2ab   : > { %v5195_v26 = vpack.i.bf16 %v1572_v33, %v1571_v30  ;;  %v1412_v39 = vand.u32 2147483647, %v1410_v25  ;;  %v1411_v40 = vand.u32 2147483647, %v1409_v36  ;;  %v1433_v41 = vsub.f32 %v5834_v13, %v1432_v34 }
 0x2ac   : > { %v5200_v42 = vpack.i.bf16 %v2088_v35, %v2087_v3  ;;  %v1928_v43 = vand.u32 2147483647, %v1926_v37  ;;  %v1927_v44 = vand.u32 2147483647, %v1925_v55  ;;  %v1948_v27 = vrot.slane %v6317_v20, %v5819_v7 }
 0x2ad   : > { %5196 = vrot.lane.b32.xlu0 %v5195_v26, %s5590_s10  ;;  %v1414_v45 = vsub.f32 1.0, %v1412_v39  ;;  %v1413_v9 = vsub.f32 1.0, %v1411_v40  ;;  %v1435_v62 = vand.u32 2147483647, %v1433_v41  ;;  %v1436_v49 = vand.u32 2147483647, %v1434_v38 }
 0x2ae   : > { %5201 = vrot.lane.b32.xlu1 %v5200_v42, %s5590_s10  ;;  %v1929_v10 = vsub.f32 1.0, %v1927_v44  ;;  %v1456_v46 = vrot.slane %v6314_v16, %v5828_v11  ;;  %v1930_v53 = vsub.f32 1.0, %v1928_v43  ;;  %v1950_v47 = vsub.f32 %v5836_v14, %v1948_v27 }
 0x2af   : > { %v1415_v48 = vmax.f32 %v1413_v9, 0.0  ;;  %v1416_v1 = vmax.f32 %v1414_v45, 0.0  ;;  %v1949_v6 = vsub.f32 %v5834_v13, %v1948_v27  ;;  %v1437_v54 = vsub.f32 1.0, %v1435_v62 }
 0x2b0   : > { %v1931_v58 = vmax.f32 %v1929_v10, 0.0  ;;  %v1457_v22 = vsub.f32 %v5834_v13, %v1456_v46  ;;  %v1972_v2 = vrot.slane %v6317_v20, %v5828_v11  ;;  %v1932_v23 = vmax.f32 %v1930_v53, 0.0 }
 0x2b1   : > { %1575 = vrot.lane.b32.xlu0 %v1415_v48, %s7478_s28  ;;  %v1951_v61 = vand.u32 2147483647, %v1949_v6  ;;  %v1438_v60 = vsub.f32 1.0, %v1436_v49  ;;  %v1952_v24 = vand.u32 2147483647, %v1950_v47  ;;  %v1458_v28 = vsub.f32 %v5836_v14, %v1456_v46 }
 0x2b2   : > { %1577 = vrot.lane.b32.xlu1 %v1416_v1, %s7478_s28  ;;  %v1439_v29 = vmax.f32 %v1437_v54, 0.0  ;;  %v1459_v4 = vand.u32 2147483647, %v1457_v22  ;;  %v1973_v31 = vsub.f32 %v5834_v13, %v1972_v2  ;;  %v1480_v32 = vrot.slane %v6314_v16, %v5831_v12 }
 0x2b3   : > { %v1953_v21 = vsub.f32 1.0, %v1951_v61  ;;  %v1440_v0 = vmax.f32 %v1438_v60, 0.0  ;;  %v1954_v15 = vsub.f32 1.0, %v1952_v24  ;;  %v1460_v59 = vand.u32 2147483647, %v1458_v28 }
 0x2b4   : > { %v1974_v3 = vsub.f32 %v5836_v14, %v1972_v2  ;;  %v1996_v50 = vrot.slane %v6317_v20, %v5831_v12  ;;  %v1461_v30 = vsub.f32 1.0, %v1459_v4  ;;  %v1975_v33 = vand.u32 2147483647, %v1973_v31 }
 0x2b5   : > { %2091 = vrot.lane.b32.xlu0 %v1931_v58, %s7478_s28  ;;  %v1955_v34 = vmax.f32 %v1953_v21, 0.0  ;;  %v1481_v25 = vsub.f32 %v5834_v13, %v1480_v32  ;;  %v1956_v36 = vmax.f32 %v1954_v15, 0.0  ;;  %v1462_v35 = vsub.f32 1.0, %v1460_v59 }
 0x2b6   : > { %2093 = vrot.lane.b32.xlu1 %v1932_v23, %s7478_s28  ;;  %v1976_v37 = vand.u32 2147483647, %v1974_v3  ;;  %v1482_v55 = vsub.f32 %v5836_v14, %v1480_v32  ;;  %v1504_v38 = vrot.slane %v6314_v16, %v5845_v17  ;;  %v1463_v26 = vmax.f32 %v1461_v30, 0.0 }
 0x2b7   : > { %v1977_v39 = vsub.f32 1.0, %v1975_v33  ;;  %v1483_v40 = vand.u32 2147483647, %v1481_v25  ;;  %v1997_v41 = vsub.f32 %v5834_v13, %v1996_v50  ;;  %v1464_v42 = vmax.f32 %v1462_v35, 0.0 }
 0x2b8   : > { %v1978_v43 = vsub.f32 1.0, %v1976_v37  ;;  %v1484_v44 = vand.u32 2147483647, %v1482_v55  ;;  %v1998_v45 = vsub.f32 %v5836_v14, %v1996_v50  ;;  %v1505_v9 = vsub.f32 %v5834_v13, %v1504_v38 }
 0x2b9   : > { %1583 = vrot.lane.b32.xlu0 %v1439_v29, %s5584_s29  ;;  %v1979_v27 = vmax.f32 %v1977_v39, 0.0  ;;  %v1485_v62 = vsub.f32 1.0, %v1483_v40  ;;  %v1999_v48 = vand.u32 2147483647, %v1997_v41  ;;  %v2020_v10 = vrot.slane %v6317_v20, %v5845_v17 }
 0x2ba   : > { %1585 = vrot.lane.b32.xlu1 %v1440_v0, %s5584_s29  ;;  %v1980_v49 = vmax.f32 %v1978_v43, 0.0  ;;  %v1486_v46 = vsub.f32 1.0, %v1484_v44  ;;  %v2000_v1 = vand.u32 2147483647, %v1998_v45  ;;  %v1506_v53 = vsub.f32 %v5836_v14, %v1504_v38 }
 0x2bb   : > { %v1507_v47 = vand.u32 2147483647, %v1505_v9  ;;  %v1487_v6 = vmax.f32 %v1485_v62, 0.0  ;;  %v2001_v54 = vsub.f32 1.0, %v1999_v48  ;;  %v2021_v58 = vsub.f32 %v5834_v13, %v2020_v10 }
 0x2bc   : > { %v1528_v61 = vrot.slane %v6314_v16, %v5848_v18  ;;  %v1488_v22 = vmax.f32 %v1486_v46, 0.0  ;;  %v2002_v2 = vsub.f32 1.0, %v2000_v1  ;;  %v1508_v23 = vand.u32 2147483647, %v1506_v53 }
 0x2bd   : > { %2099 = vrot.lane.b32.xlu0 %v1955_v34, %s5584_s29  ;;  %v2022_v60 = vsub.f32 %v5836_v14, %v2020_v10  ;;  %v1509_v24 = vsub.f32 1.0, %v1507_v47  ;;  %v2003_v28 = vmax.f32 %v2001_v54, 0.0  ;;  %v2023_v29 = vand.u32 2147483647, %v2021_v58 }
 0x2be   : > { %2101 = vrot.lane.b32.xlu1 %v1956_v36, %s5584_s29  ;;  %v1529_v21 = vsub.f32 %v5834_v13, %v1528_v61  ;;  %v2044_v4 = vrot.slane %v6317_v20, %v5848_v18  ;;  %v2004_v31 = vmax.f32 %v2002_v2, 0.0  ;;  %v1510_v32 = vsub.f32 1.0, %v1508_v23 }
 0x2bf   : > { %v2024_v0 = vand.u32 2147483647, %v2022_v60  ;;  %v1530_v15 = vsub.f32 %v5836_v14, %v1528_v61  ;;  %v1552_v59 = vrot.slane %v6314_v16, %v5851_v19  ;;  %v1511_v3 = vmax.f32 %v1509_v24, 0.0 }
 0x2c0   : > { %v2025_v50 = vsub.f32 1.0, %v2023_v29  ;;  %v1531_v34 = vand.u32 2147483647, %v1529_v21  ;;  %v2045_v30 = vsub.f32 %v5834_v13, %v2044_v4  ;;  %v1512_v33 = vmax.f32 %v1510_v32, 0.0 }
 0x2c1   : > { %1591 = vrot.lane.b32.xlu0 %v1463_v26, %s5586_s11  ;;  %v2026_v25 = vsub.f32 1.0, %v2024_v0  ;;  %v1532_v36 = vand.u32 2147483647, %v1530_v15  ;;  %v2046_v35 = vsub.f32 %v5836_v14, %v2044_v4  ;;  %v1553_v37 = vsub.f32 %v5834_v13, %v1552_v59 }
 0x2c2   : > { %1593 = vrot.lane.b32.xlu1 %v1464_v42, %s5586_s11  ;;  %v2027_v55 = vmax.f32 %v2025_v50, 0.0  ;;  %v1533_v38 = vsub.f32 1.0, %v1531_v34  ;;  %v2047_v26 = vand.u32 2147483647, %v2045_v30  ;;  %v2068_v39 = vrot.slane %v6317_v20, %v5851_v19 }
 0x2c3   : > { %v2028_v40 = vmax.f32 %v2026_v25, 0.0  ;;  %v1534_v41 = vsub.f32 1.0, %v1532_v36  ;;  %v2048_v42 = vand.u32 2147483647, %v2046_v35  ;;  %v1554_v43 = vsub.f32 %v5836_v14, %v1552_v59 }
 0x2c4   : > { %v1535_v44 = vmax.f32 %v1533_v38, 0.0  ;;  %v2049_v45 = vsub.f32 1.0, %v2047_v26  ;;  %v1555_v9 = vand.u32 2147483647, %v1553_v37  ;;  %v1912_v29 = vrot.slane %v6188_v5, %v6030_v52 }
 0x2c5   : > { %2107 = vrot.lane.b32.xlu0 %v1979_v27, %s5586_s11  ;;  %v2069_v27 = vsub.f32 %v5834_v13, %v2068_v39  ;;  %v1536_v62 = vmax.f32 %v1534_v41, 0.0  ;;  %v2050_v48 = vsub.f32 1.0, %v2048_v42  ;;  %v1556_v10 = vand.u32 2147483647, %v1554_v43 }
 0x2c6   : > { %2109 = vrot.lane.b32.xlu1 %v1980_v49, %s5586_s11  ;;  %v2070_v49 = vsub.f32 %v5836_v14, %v2068_v39  ;;  %v2051_v46 = vmax.f32 %v2049_v45, 0.0  ;;  %v1557_v1 = vsub.f32 1.0, %v1555_v9  ;;  %v1396_v4 = vrot.slane %v6210_v56, %v6030_v52 }
 0x2c7   : > { %v2071_v53 = vand.u32 2147483647, %v2069_v27  ;;  %v2052_v47 = vmax.f32 %v2050_v48, 0.0  ;;  %v1913_v32 = vsub.f32 %v5834_v13, %v1912_v29  ;;  %v1914_v0 = vsub.f32 %v5836_v14, %v1912_v29 }
 0x2c8   : > { %v2072_v54 = vand.u32 2147483647, %v2070_v49  ;;  %v1559_v58 = vmax.f32 %v1557_v1, 0.0  ;;  %v1397_v15 = vsub.f32 %v5834_v13, %v1396_v4  ;;  %v1398_v59 = vsub.f32 %v5836_v14, %v1396_v4 }
 0x2c9   : > { %1599 = vrot.lane.b32.xlu0 %v1487_v6, %s5587_s26  ;;  %v1558_v6 = vsub.f32 1.0, %v1556_v10  ;;  %v2073_v61 = vsub.f32 1.0, %v2071_v53  ;;  %v1915_v34 = vand.u32 2147483647, %v1913_v32  ;;  %v1916_v30 = vand.u32 2147483647, %v1914_v0 }
 0x2ca   : > { %1601 = vrot.lane.b32.xlu1 %v1488_v22, %s5587_s26  ;;  %v2074_v2 = vsub.f32 1.0, %v2072_v54  ;;  %v1400_v25 = vand.u32 2147483647, %v1398_v59 }
 0x2cb   : > { %v1560_v22 = vmax.f32 %v1558_v6, 0.0  ;;  %v2075_v23 = vmax.f32 %v2073_v61, 0.0  ;;  %v1917_v5 = vsub.f32 1.0, %v1915_v34  ;;  %v1918_v36 = vsub.f32 1.0, %v1916_v30 }
 0x2cc   : > { %v2076_v60 = vmax.f32 %v2074_v2, 0.0 }
 0x2cd   : > { %2115 = vrot.lane.b32.xlu0 %v2003_v28, %s5587_s26  ;;  %v1919_v41 = vmax.f32 %v1917_v5, 0.0  ;;  %v1920_v42 = vmax.f32 %v1918_v36, 0.0 }
 0x2ce   : > { %2117 = vrot.lane.b32.xlu1 %v2004_v31, %s5587_s26 }
 0x2d1   : > { %1607 = vrot.lane.b32.xlu0 %v1511_v3, %s5588_s12 }
 0x2d2   : > { %1609 = vrot.lane.b32.xlu1 %v1512_v33, %s5588_s12  ;;  %v1399_v33 = vand.u32 2147483647, %v1397_v15 }
 0x2d4   : > { %v1401_v56 = vsub.f32 1.0, %v1399_v33 }
 0x2d5   : > { %2123 = vrot.lane.b32.xlu0 %v2027_v55, %s5588_s12  ;;  %v1402_v55 = vsub.f32 1.0, %v1400_v25 }
 0x2d6   : > { %2125 = vrot.lane.b32.xlu1 %v2028_v40, %s5588_s12  ;;  %v1403_v9 = vmax.f32 %v1401_v56, 0.0 }
 0x2d7   : > { %v1404_v27 = vmax.f32 %v1402_v55, 0.0 }
 0x2d9   : > { %1615 = vrot.lane.b32.xlu0 %v1535_v44, %s5589_s9 }
 0x2da   : > { %1617 = vrot.lane.b32.xlu1 %v1536_v62, %s5589_s9 }
 0x2dd   : > { %2131 = vrot.lane.b32.xlu0 %v2051_v46, %s5589_s9 }
 0x2de   : > { %2133 = vrot.lane.b32.xlu1 %v2052_v47, %s5589_s9 }
 0x2e1   : > { %1623 = vrot.lane.b32.xlu0 %v1559_v58, %s5590_s10 }
 0x2e2   : > { %1625 = vrot.lane.b32.xlu1 %v1560_v22, %s5590_s10 }
 0x2e5   : > { %2139 = vrot.lane.b32.xlu0 %v2075_v23, %s5590_s10 }
 0x2e6   : > { %2141 = vrot.lane.b32.xlu1 %v2076_v60, %s5590_s10 }
 0x301   : > { %v5142_v24 = vpop.permute.xlu0 %5141 }
 0x302   : > { %v5144_v38 = vunpack.i.h.bf16 %v5142_v24  ;;  %v5143_v26 = vunpack.i.l.bf16 %v5142_v24 }
 0x304   : > { %v5137_v28 = vpop.permute.xlu1 %5136  ;;  %v2216_v49 = vsel %vm583_vm0, %v1920_v42, %v5144_v38  ;;  %v2215_v46 = vsel %vm583_vm0, %v1919_v41, %v5143_v26 }
 0x305   : > { %v5152_v21 = vpop.permute.xlu0 %5151  ;;  %v5139_v39 = vunpack.i.h.bf16 %v5137_v28  ;;  %v5138_v40 = vunpack.i.l.bf16 %v5137_v28 }
 0x306   : > { %v5154_v43 = vunpack.i.h.bf16 %v5152_v21  ;;  %v5153_v44 = vunpack.i.l.bf16 %v5152_v21 }
 0x307   : > { %v1699_v1 = vsel %vm583_vm0, %v1403_v9, %v5138_v40  ;;  %v1700_v53 = vsel %vm583_vm0, %v1404_v27, %v5139_v39 }
 0x308   : > { %v5147_v31 = vpop.permute.xlu1 %5146  ;;  %v2217_v54 = vsel %vm586_vm1, %v2215_v46, %v5153_v44  ;;  %v2218_v58 = vsel %vm586_vm1, %v2216_v49, %v5154_v43 }
 0x309   : > { %v5149_v62 = vunpack.i.h.bf16 %v5147_v31  ;;  %v5148_v48 = vunpack.i.l.bf16 %v5147_v31 }
 0x30b   : > { %v5157_v3 = vpop.permute.xlu0 %5156  ;;  %v1701_v2 = vsel %vm586_vm1, %v1699_v1, %v5148_v48  ;;  %v1702_v23 = vsel %vm586_vm1, %v1700_v53, %v5149_v62 }
 0x30c   : > { %v5162_v50 = vpop.permute.xlu1 %5161  ;;  %v5159_v47 = vunpack.i.h.bf16 %v5157_v3  ;;  %v5158_v6 = vunpack.i.l.bf16 %v5157_v3 }
 0x30d   : > { %v5164_v61 = vunpack.i.h.bf16 %v5162_v50  ;;  %v5163_v22 = vunpack.i.l.bf16 %v5162_v50 }
 0x30e   : > { %v1704_v0 = vsel %vm589_vm2, %v1702_v23, %v5159_v47  ;;  %v1703_v15 = vsel %vm589_vm2, %v1701_v2, %v5158_v6 }
 0x30f   : > { %v2219_v50 = vsel %vm589_vm2, %v2217_v54, %v5163_v22  ;;  %v2220_v34 = vsel %vm589_vm2, %v2218_v58, %v5164_v61 }
 0x311   : > { %v5172_v35 = vpop.permute.xlu1 %5171  ;;  %v5167_v37 = vpop.permute.xlu0 %5166 }
 0x312   : > { %v5174_v60 = vunpack.i.h.bf16 %v5172_v35  ;;  %v5173_v24 = vunpack.i.l.bf16 %v5172_v35  ;;  %v5169_v29 = vunpack.i.h.bf16 %v5167_v37  ;;  %v5168_v21 = vunpack.i.l.bf16 %v5167_v37 }
 0x314   : > { %v2221_v25 = vsel %vm592_vm3, %v2219_v50, %v5173_v24  ;;  %v2222_v5 = vsel %vm592_vm3, %v2220_v34, %v5174_v60  ;;  %v1705_v37 = vsel %vm592_vm3, %v1703_v15, %v5168_v21  ;;  %v1706_v56 = vsel %vm592_vm3, %v1704_v0, %v5169_v29 }
 0x315   : > { %v5182_v45 = vpop.permute.xlu1 %5181 }
 0x316   : > { %v5177_v10 = vpop.permute.xlu0 %5176  ;;  %v5184_v4 = vunpack.i.h.bf16 %v5182_v45  ;;  %v5183_v31 = vunpack.i.l.bf16 %v5182_v45 }
 0x317   : > { %v5179_v59 = vunpack.i.h.bf16 %v5177_v10  ;;  %v5178_v3 = vunpack.i.l.bf16 %v5177_v10 }
 0x318   : > { %v2223_v55 = vsel %vm595_vm4, %v2221_v25, %v5183_v31  ;;  %v2224_v38 = vsel %vm595_vm4, %v2222_v5, %v5184_v4 }
 0x319   : > { %v1707_v39 = vsel %vm595_vm4, %v1705_v37, %v5178_v3  ;;  %v1708_v40 = vsel %vm595_vm4, %v1706_v56, %v5179_v59  ;;  %v1384_v59 = vrot.slane %v6314_v16, %v6030_v52  ;;  %v1900_v3 = vrot.slane %v6317_v20, %v6030_v52 }
 0x31a   : > { %v5187_v28 = vpop.permute.xlu0 %5186 }
 0x31b   : > { %v5192_v32 = vpop.permute.xlu1 %5191  ;;  %v5189_v30 = vunpack.i.h.bf16 %v5187_v28  ;;  %v5188_v33 = vunpack.i.l.bf16 %v5187_v28  ;;  %v1386_v50 = vsub.f32 %v5836_v14, %v1384_v59  ;;  %v1901_v5 = vsub.f32 %v5834_v13, %v1900_v3 }
 0x31c   : > { %v5194_v36 = vunpack.i.h.bf16 %v5192_v32  ;;  %v5193_v35 = vunpack.i.l.bf16 %v5192_v32 }
 0x31d   : > { %v1709_v9 = vsel %vm598_vm5, %v1707_v39, %v5188_v33  ;;  %v1710_v27 = vsel %vm598_vm5, %v1708_v40, %v5189_v30  ;;  %v1385_v30 = vsub.f32 %v5834_v13, %v1384_v59  ;;  %v1902_v33 = vsub.f32 %v5836_v14, %v1900_v3 }
 0x31e   : > { %v2225_v10 = vsel %vm598_vm5, %v2223_v55, %v5193_v35  ;;  %v2226_v49 = vsel %vm598_vm5, %v2224_v38, %v5194_v36  ;;  %v1388_v36 = vand.u32 2147483647, %v1386_v50  ;;  %v1903_v56 = vand.u32 2147483647, %v1901_v5 }
 0x31f   : > { %v5197_v26 = vpop.permute.xlu0 %5196  ;;  %v1387_v35 = vand.u32 2147483647, %v1385_v30  ;;  %v1904_v37 = vand.u32 2147483647, %v1902_v33 }
 0x320   : > { %v5202_v41 = vpop.permute.xlu1 %5201  ;;  %v5199_v42 = vunpack.i.h.bf16 %v5197_v26  ;;  %v5198_v43 = vunpack.i.l.bf16 %v5197_v26  ;;  %v1390_v16 = vsub.f32 1.0, %v1388_v36  ;;  %v1905_v20 = vsub.f32 1.0, %v1903_v56 }
 0x321   : > { %v5204_v44 = vunpack.i.h.bf16 %v5202_v41  ;;  %v5203_v45 = vunpack.i.l.bf16 %v5202_v41  ;;  %v1389_v26 = vsub.f32 1.0, %v1387_v35  ;;  %v1906_v39 = vsub.f32 1.0, %v1904_v37 }
 0x322   : > { %v1711_v62 = vsel %vm601_vm6, %v1709_v9, %v5198_v43  ;;  %v1712_v48 = vsel %vm601_vm6, %v1710_v27, %v5199_v42  ;;  %v1392_v40 = vmax.f32 %v1390_v16, 0.0  ;;  %v1907_v9 = vmax.f32 %v1905_v20, 0.0 }
 0x323   : > { %v4964_v46 = vpack.c.bf16 %v1712_v48, %v1711_v62  ;;  %v2227_v1 = vsel %vm601_vm6, %v2225_v10, %v5203_v45  ;;  %v2228_v53 = vsel %vm601_vm6, %v2226_v49, %v5204_v44  ;;  %v1576_v54 = vpop.permute.xlu0 %1575  ;;  %v1391_v42 = vmax.f32 %v1389_v26, 0.0 }
 0x324   : > { %v4968_v47 = vpack.c.bf16 %v2228_v53, %v2227_v1  ;;  %v1578_v6 = vpop.permute.xlu1 %1577  ;;  %v1908_v43 = vmax.f32 %v1906_v39, 0.0 }
 0x325   : > { %4965 = vmatprep.subr.bf16.mxu0 %v4964_v46  ;;  %v1630_v45 = vsel %vm583_vm0, %v1392_v40, %v1578_v6  ;;  %v1629_v27 = vsel %vm583_vm0, %v1391_v42, %v1576_v54 }
 0x326   : > { %4969 = vmatprep.subr.bf16.mxu1 %v4968_v47  ;;  %4967 = vmatpush3.bf16.msra.mxu0 %v4964_v46 }
 0x327   : > { %4971 = vmatpush3.bf16.msra.mxu1 %v4968_v47  ;;  %v2092_v61 = vpop.permute.xlu0 %2091 }
 0x328   : > { %v2094_v58 = vpop.permute.xlu1 %2093  ;;  %v2145_v10 = vsel %vm583_vm0, %v1907_v9, %v2092_v61 }
 0x329   : > { %4901 = vmatmul.mubr.msk.f32.vlgmr.msra.gmra.mrb[4].mxu0 %vm583_vm0, %v6307_v57  ;;  %v2146_v62 = vsel %vm583_vm0, %v1908_v43, %v2094_v58 }
 0x32a   : > { %4911 = vmatmul.mubr.msk.f32.vlgmr.msra.gmra.mrb[4].mxu1 %vm583_vm0, %v6307_v57  ;;  %4903 = vmatprep.mubr.msk.f32.mxu0 %vm583_vm0, %v6197_v51 }
 0x32b   : > { %4913 = vmatprep.mubr.msk.f32.mxu1 %vm583_vm0, %v6197_v51  ;;  %v1584_v2 = vpop.permute.xlu0 %1583 }
 0x32c   : > { %v1586_v22 = vpop.permute.xlu1 %1585  ;;  %v1631_v49 = vsel %vm586_vm1, %v1629_v27, %v1584_v2 }
 0x32d   : > { %4904 = vmatmul.mubr.msk.f32.gmra.mrb[6].mxu0 %vm583_vm0, %v6184_v63  ;;  %v1632_v48 = vsel %vm586_vm1, %v1630_v45, %v1586_v22 }
 0x32e   : > { %4914 = vmatmul.mubr.msk.f32.gmra.mrb[6].mxu1 %vm583_vm0, %v6184_v63 }
 0x32f   : > { %v2100_v57 = vpop.permute.xlu0 %2099 }
 0x330   : > { %v2102_v23 = vpop.permute.xlu1 %2101  ;;  %v2147_v53 = vsel %vm586_vm1, %v2145_v10, %v2100_v57 }
 0x331   : > { %v2148_v46 = vsel %vm586_vm1, %v2146_v62, %v2102_v23 }
 0x333   : > { %v1592_v24 = vpop.permute.xlu0 %1591 }
 0x334   : > { %v1594_v60 = vpop.permute.xlu1 %1593  ;;  %v1633_v47 = vsel %vm589_vm2, %v1631_v49, %v1592_v24 }
 0x335   : > { %v1634_v1 = vsel %vm589_vm2, %v1632_v48, %v1594_v60 }
 0x337   : > { %v2108_v29 = vpop.permute.xlu0 %2107 }
 0x338   : > { %v2110_v28 = vpop.permute.xlu1 %2109  ;;  %v2149_v58 = vsel %vm589_vm2, %v2147_v53, %v2108_v29 }
 0x339   : > { %v2150_v6 = vsel %vm589_vm2, %v2148_v46, %v2110_v28 }
 0x33b   : > { %v1600_v51 = vpop.permute.xlu0 %1599 }
 0x33c   : > { %v1602_v21 = vpop.permute.xlu1 %1601  ;;  %v1635_v22 = vsel %vm592_vm3, %v1633_v47, %v1600_v51 }
 0x33d   : > { %v1636_v54 = vsel %vm592_vm3, %v1634_v1, %v1602_v21 }
 0x33f   : > { %v2116_v31 = vpop.permute.xlu0 %2115 }
 0x340   : > { %v2118_v4 = vpop.permute.xlu1 %2117  ;;  %v2151_v23 = vsel %vm592_vm3, %v2149_v58, %v2116_v31 }
 0x341   : > { %v2152_v61 = vsel %vm592_vm3, %v2150_v6, %v2118_v4 }
 0x343   : > { %v1608_v0 = vpop.permute.xlu0 %1607 }
 0x344   : > { %v1610_v32 = vpop.permute.xlu1 %1609  ;;  %v1637_v60 = vsel %vm595_vm4, %v1635_v22, %v1608_v0 }
 0x345   : > { %v1638_v2 = vsel %vm595_vm4, %v1636_v54, %v1610_v32 }
 0x347   : > { %v2124_v63 = vpop.permute.xlu0 %2123 }
 0x348   : > { %v2126_v15 = vpop.permute.xlu1 %2125  ;;  %v2153_v21 = vsel %vm595_vm4, %v2151_v23, %v2124_v63 }
 0x349   : > { %v2154_v57 = vsel %vm595_vm4, %v2152_v61, %v2126_v15 }
 0x34b   : > { %v1616_v25 = vpop.permute.xlu0 %1615 }
 0x34c   : > { %v1618_v34 = vpop.permute.xlu1 %1617  ;;  %v1639_v29 = vsel %vm598_vm5, %v1637_v60, %v1616_v25 }
 0x34d   : > { %v1640_v24 = vsel %vm598_vm5, %v1638_v2, %v1618_v34 }
 0x34f   : > { %v2132_v38 = vpop.permute.xlu0 %2131 }
 0x350   : > { %v2134_v55 = vpop.permute.xlu1 %2133  ;;  %v2155_v32 = vsel %vm598_vm5, %v2153_v21, %v2132_v38 }
 0x351   : > { %v2156_v51 = vsel %vm598_vm5, %v2154_v57, %v2134_v55 }
 0x353   : > { %v1624_v44 = vpop.permute.xlu0 %1623 }
 0x354   : > { %v1626_v41 = vpop.permute.xlu1 %1625  ;;  %v1641_v15 = vsel %vm601_vm6, %v1639_v29, %v1624_v44 }
 0x355   : > { %v1642_v4 = vsel %vm601_vm6, %v1640_v24, %v1626_v41 }
 0x357   : > { %v2140_v28 = vpop.permute.xlu0 %2139 }
 0x358   : > { %v2142_v59 = vpop.permute.xlu1 %2141  ;;  %v2157_v63 = vsel %vm601_vm6, %v2155_v32, %v2140_v28 }
 0x359   : > { %v2158_v31 = vsel %vm601_vm6, %v2156_v51, %v2142_v59 }
 0x3fc   : > { %v4902_v3 = vpop.f32.mrb[4].mxu0 }
 0x3fd   : > { %v1811_v50 = vmul.f32 %v4902_v3, %v1642_v4  ;;  %v4912_v0 = vpop.f32.mrb[4].mxu1  ;;  %v1791_v30 = vpop.f32.mrb[5].mxu0 }
 0x3fe   : > { %v2315_v34 = vmul.f32 %v4912_v0, %v2158_v31  ;;  %v1810_v33 = vmul.f32 %v1791_v30, %v1641_v15  ;;  %v2295_v5 = vpop.f32.mrb[5].mxu1 }
 0x3ff   : > { %v2314_v25 = vmul.f32 %v2295_v5, %v2157_v63 }
 0x400   : > { %v1812_v36 = vadd.f32 %v1811_v50, %v1810_v33  ;;  %v4905_v35 = vpop.f32.mrb[6].mxu0 }
 0x401   : > { %v2316_v37 = vadd.f32 %v2315_v34, %v2314_v25  ;;  %v1820_v56 = vmul.f32 %v4905_v35, %v1642_v4  ;;  %v4915_v55 = vpop.f32.mrb[6].mxu1  ;;  %v1801_v16 = vpop.f32.mrb[7].mxu0 }
 0x402   : > { %v2324_v38 = vmul.f32 %v4915_v55, %v2158_v31  ;;  %v1819_v26 = vmul.f32 %v1801_v16, %v1641_v15  ;;  %v2305_v39 = vpop.f32.mrb[7].mxu1  ;;  %v1813_v53 = vrot.slane %v1812_v36, 4 }
 0x403   : > { %v2323_v20 = vmul.f32 %v2305_v39, %v2157_v63  ;;  %v2317_v6 = vrot.slane %v2316_v37, 4 }
 0x404   : > { %v1821_v40 = vadd.f32 %v1820_v56, %v1819_v26  ;;  %v1814_v47 = vadd.f32 %v1813_v53, %v1812_v36 }
 0x405   : > { %v2325_v41 = vadd.f32 %v2324_v38, %v2323_v20  ;;  %v2318_v58 = vadd.f32 %v2317_v6, %v2316_v37  ;;  %v5345_v20 = vld [vmem:[%s6172_s16 + $0x10] sm:$0xff] }
 0x406   : > { %v1822_v42 = vrot.slane %v1821_v40, 4  ;;  %v1815_v54 = vrot.slane %v1814_v47, 2 }
 0x407   : > { %v2326_v43 = vrot.slane %v2325_v41, 4  ;;  %v2319_v61 = vrot.slane %v2318_v58, 2 }
 0x408   : > { %v1823_v44 = vadd.f32 %v1822_v42, %v1821_v40  ;;  %v1816_v22 = vadd.f32 %v1815_v54, %v1814_v47  ;;  %v5346_v42 = vld [vmem:[%s6172_s16 + $0x18] sm:$0xff] }
 0x409   : > { %v2327_v45 = vadd.f32 %v2326_v43, %v2325_v41  ;;  %v2320_v59 = vadd.f32 %v2319_v61, %v2318_v58 }
 0x40a   : > { %v1824_v9 = vrot.slane %v1823_v44, 2  ;;  %v1817_v2 = vrot.slane %v1816_v22, 1 }
 0x40b   : > { %v2328_v27 = vrot.slane %v2327_v45, 2  ;;  %v2321_v60 = vrot.slane %v2320_v59, 1 }
 0x40c   : > { %v1825_v62 = vadd.f32 %v1824_v9, %v1823_v44  ;;  %v1818_v23 = vadd.f32 %v1817_v2, %v1816_v22 }
 0x40d   : > { %v2329_v48 = vadd.f32 %v2328_v27, %v2327_v45  ;;  %v2322_v57 = vadd.f32 %v2321_v60, %v2320_v59  ;;  %v4775_v27 = vld [vmem:[%s5804_s7 + $0x10] sm:$0xff] }
 0x40e   : > { %v1826_v10 = vrot.slane %v1825_v62, 1 }
 0x40f   : > { %v2330_v49 = vrot.slane %v2329_v48, 1 }
 0x410   : > { %v1827_v46 = vadd.f32 %v1826_v10, %v1825_v62  ;;  %v4784_v10 = vld [vmem:[%s5804_s7 + $0x18] sm:$0xff] }
 0x411   : > { %v2331_v1 = vadd.f32 %v2330_v49, %v2329_v48 }
 0x412   : > { %1858 = vrot.lane.b32.xlu0 %v1827_v46, %s5590_s10 }
 0x413   : > { %2362 = vrot.lane.b32.xlu1 %v2331_v1, %s5590_s10 }
 0x416   : > { %1861 = vrot.lane.b32.xlu0 %v1827_v46, %s5589_s9 }
 0x417   : > { %2365 = vrot.lane.b32.xlu1 %v2331_v1, %s5589_s9 }
 0x41a   : > { %1864 = vrot.lane.b32.xlu0 %v1827_v46, %s5588_s12 }
 0x41b   : > { %2368 = vrot.lane.b32.xlu1 %v2331_v1, %s5588_s12 }
 0x41e   : > { %1867 = vrot.lane.b32.xlu0 %v1827_v46, %s5587_s26 }
 0x41f   : > { %2371 = vrot.lane.b32.xlu1 %v2331_v1, %s5587_s26 }
 0x422   : > { %1870 = vrot.lane.b32.xlu0 %v1827_v46, %s5586_s11 }
 0x423   : > { %2374 = vrot.lane.b32.xlu1 %v2331_v1, %s5586_s11 }
 0x426   : > { %1873 = vrot.lane.b32.xlu0 %v1827_v46, %s5584_s29 }
 0x427   : > { %2377 = vrot.lane.b32.xlu1 %v2331_v1, %s5584_s29 }
 0x42a   : > { %1876 = vrot.lane.b32.xlu0 %v1827_v46, %s7478_s28 }
 0x42b   : > { %2380 = vrot.lane.b32.xlu1 %v2331_v1, %s7478_s28 }
 0x42e   : > { %1829 = vrot.lane.b32.xlu0 %v1818_v23, %s5590_s10 }
 0x42f   : > { %1832 = vrot.lane.b32.xlu1 %v1818_v23, %s5589_s9 }
 0x432   : > { %2333 = vrot.lane.b32.xlu0 %v2322_v57, %s5590_s10 }
 0x433   : > { %1835 = vrot.lane.b32.xlu1 %v1818_v23, %s5588_s12 }
 0x436   : > { %2336 = vrot.lane.b32.xlu0 %v2322_v57, %s5589_s9 }
 0x437   : > { %1838 = vrot.lane.b32.xlu1 %v1818_v23, %s5587_s26 }
 0x43a   : > { %2339 = vrot.lane.b32.xlu0 %v2322_v57, %s5588_s12 }
 0x43b   : > { %1841 = vrot.lane.b32.xlu1 %v1818_v23, %s5586_s11 }
 0x43e   : > { %2342 = vrot.lane.b32.xlu0 %v2322_v57, %s5587_s26 }
 0x43f   : > { %1844 = vrot.lane.b32.xlu1 %v1818_v23, %s5584_s29 }
 0x442   : > { %2345 = vrot.lane.b32.xlu0 %v2322_v57, %s5586_s11 }
 0x443   : > { %1847 = vrot.lane.b32.xlu1 %v1818_v23, %s7478_s28 }
 0x446   : > { %2348 = vrot.lane.b32.xlu0 %v2322_v57, %s5584_s29 }
 0x447   : > { %2351 = vrot.lane.b32.xlu1 %v2322_v57, %s7478_s28 }
 0x484   : > { %v1859_v24 = vpop.permute.xlu0 %1858 }
 0x485   : > { %v2363_v28 = vpop.permute.xlu1 %2362  ;;  %v1879_v0 = vsel %vm811_vm7, %v1827_v46, %v1859_v24 }
 0x486   : > { %v2383_v15 = vsel %vm811_vm7, %v2331_v1, %v2363_v28 }
 0x488   : > { %v1862_v21 = vpop.permute.xlu0 %1861 }
 0x489   : > { %v2366_v29 = vpop.permute.xlu1 %2365  ;;  %v1880_v30 = vsel %vm813_vm8, %v1879_v0, %v1862_v21 }
 0x48a   : > { %v2384_v33 = vsel %vm813_vm8, %v2383_v15, %v2366_v29 }
 0x48c   : > { %v1865_v51 = vpop.permute.xlu0 %1864 }
 0x48d   : > { %v2369_v4 = vpop.permute.xlu1 %2368  ;;  %v1881_v63 = vsel %vm815_vm9, %v1880_v30, %v1865_v51 }
 0x48e   : > { %v2385_v25 = vsel %vm815_vm9, %v2384_v33, %v2369_v4 }
 0x490   : > { %v1868_v3 = vpop.permute.xlu0 %1867 }
 0x491   : > { %v2372_v32 = vpop.permute.xlu1 %2371  ;;  %v1882_v36 = vsel %vm817_vm10, %v1881_v63, %v1868_v3 }
 0x492   : > { %v2386_v35 = vsel %vm817_vm10, %v2385_v25, %v2372_v32 }
 0x494   : > { %v1871_v50 = vpop.permute.xlu0 %1870 }
 0x495   : > { %v2375_v31 = vpop.permute.xlu1 %2374  ;;  %v1883_v37 = vsel %vm819_vm11, %v1882_v36, %v1871_v50 }
 0x496   : > { %v2387_v56 = vsel %vm819_vm11, %v2386_v35, %v2375_v31 }
 0x498   : > { %v1874_v34 = vpop.permute.xlu0 %1873 }
 0x499   : > { %v2378_v5 = vpop.permute.xlu1 %2377  ;;  %v1884_v55 = vsel %vm821_vm12, %v1883_v37, %v1874_v34 }
 0x49a   : > { %v2388_v38 = vsel %vm821_vm12, %v2387_v56, %v2378_v5 }
 0x49c   : > { %v1877_v16 = vpop.permute.xlu0 %1876 }
 0x49d   : > { %v1885_v26 = vsel %vm823_vm13, %v1884_v55, %v1877_v16  ;;  %v2381_v39 = vpop.permute.xlu1 %2380 }
 0x49e   : > { %v1888_v40 = vadd.f32 %v5345_v20, %v1885_v26  ;;  %v2389_v41 = vsel %vm823_vm13, %v2388_v38, %v2381_v39 }
 0x49f   : > { %v2393_v43 = vadd.f32 %v5346_v42, %v2389_v41 }
 0x4a0   : > { %4763 = vst.msk [vmem:[%s6536_s17 + $0x10] sm:$0xff] %vm583_vm0, %v1888_v40  ;;  %v1830_v44 = vpop.permute.xlu0 %1829 }
 0x4a1   : > { %4773 = vst.msk [vmem:[%s6536_s17 + $0x18] sm:$0xff] %vm583_vm0, %v2393_v43  ;;  %v1833_v45 = vpop.permute.xlu1 %1832  ;;  %v1850_v62 = vsel %vm811_vm7, %v1818_v23, %v1830_v44 }
 0x4a2   : > { %v1851_v53 = vsel %vm813_vm8, %v1850_v62, %v1833_v45 }
 0x4a4   : > { %v2334_v9 = vpop.permute.xlu0 %2333 }
 0x4a5   : > { %v1836_v48 = vpop.permute.xlu1 %1835  ;;  %v2354_v47 = vsel %vm811_vm7, %v2322_v57, %v2334_v9 }
 0x4a6   : > { %v1852_v58 = vsel %vm815_vm9, %v1851_v53, %v1836_v48 }
 0x4a7   : > { %v6546_v49 = vld [vmem:[%s6536_s17 + $0x10] sm:$0xff] }
 0x4a8   : > { %v6549_v46 = vadd.f32 %v4775_v27, %v6546_v49  ;;  %v6552_v1 = vld [vmem:[%s6536_s17 + $0x18] sm:$0xff]  ;;  %v2337_v6 = vpop.permute.xlu0 %2336 }
 0x4a9   : > { %v6557_v54 = vadd.f32 %v4784_v10, %v6552_v1  ;;  %v2355_v22 = vsel %vm813_vm8, %v2354_v47, %v2337_v6  ;;  %v1839_v61 = vpop.permute.xlu1 %1838 }
 0x4aa   : > { %v1853_v2 = vsel %vm817_vm10, %v1852_v58, %v1839_v61  ;;  %v2445_v59 = vrot.slane %v6549_v46, %v5822_v8  ;;  %v2469_v23 = vrot.slane %v6549_v46, %v5819_v7  ;;  %v6568_v60 = vrot.slane %v6549_v46, %v5828_v11 }
 0x4ab   : > { %v2961_v57 = vrot.slane %v6557_v54, %v5822_v8  ;;  %v2985_v24 = vrot.slane %v6557_v54, %v5819_v7  ;;  %v3009_v28 = vrot.slane %v6557_v54, %v5828_v11  ;;  %v6578_v21 = vrot.slane %v6557_v54, %v5831_v12 }
 0x4ac   : > { %v2340_v29 = vpop.permute.xlu0 %2339  ;;  %v2446_v51 = vsub.f32 %v5834_v13, %v2445_v59  ;;  %v2447_v4 = vsub.f32 %v5836_v14, %v2445_v59  ;;  %v2470_v3 = vsub.f32 %v5834_v13, %v2469_v23  ;;  %v2471_v32 = vsub.f32 %v5836_v14, %v2469_v23 }
 0x4ad   : > { %v2356_v50 = vsel %vm815_vm9, %v2355_v22, %v2340_v29  ;;  %v1842_v31 = vpop.permute.xlu1 %1841  ;;  %v2962_v0 = vsub.f32 %v5834_v13, %v2961_v57  ;;  %v2963_v15 = vsub.f32 %v5836_v14, %v2961_v57  ;;  %v2986_v30 = vsub.f32 %v5834_v13, %v2985_v24 }
 0x4ae   : > { %v1854_v34 = vsel %vm819_vm11, %v1853_v2, %v1842_v31  ;;  %v2448_v33 = vand.u32 2147483647, %v2446_v51  ;;  %v2449_v63 = vand.u32 2147483647, %v2447_v4  ;;  %v2472_v5 = vand.u32 2147483647, %v2470_v3 }
 0x4af   : > { %v2964_v25 = vand.u32 2147483647, %v2962_v0  ;;  %v2965_v36 = vand.u32 2147483647, %v2963_v15  ;;  %v2473_v35 = vand.u32 2147483647, %v2471_v32  ;;  %v2987_v37 = vsub.f32 %v5836_v14, %v2985_v24 }
 0x4b0   : > { %v2343_v56 = vpop.permute.xlu0 %2342  ;;  %v2450_v55 = vsub.f32 1.0, %v2448_v33  ;;  %v2451_v16 = vsub.f32 1.0, %v2449_v63  ;;  %v2474_v38 = vsub.f32 1.0, %v2472_v5  ;;  %v2988_v26 = vand.u32 2147483647, %v2986_v30  ;;  %v5347_v3 = vld [vmem:[%s6172_s16] sm:$0xff] }
 0x4b1   : > { %v2357_v39 = vsel %vm817_vm10, %v2356_v50, %v2343_v56  ;;  %v1845_v20 = vpop.permute.xlu1 %1844  ;;  %v2966_v40 = vsub.f32 1.0, %v2964_v25  ;;  %v2967_v41 = vsub.f32 1.0, %v2965_v36  ;;  %v2475_v42 = vsub.f32 1.0, %v2473_v35 }
 0x4b2   : > { %v1855_v43 = vsel %vm821_vm12, %v1854_v34, %v1845_v20  ;;  %v2452_v44 = vmax.f32 %v2450_v55, 0.0  ;;  %v2453_v45 = vmax.f32 %v2451_v16, 0.0  ;;  %v2476_v9 = vmax.f32 %v2474_v38, 0.0  ;;  %v5348_v16 = vld [vmem:[%s6172_s16 + $0x8] sm:$0xff] }
 0x4b3   : > { %v2968_v27 = vmax.f32 %v2966_v40, 0.0  ;;  %v2969_v62 = vmax.f32 %v2967_v41, 0.0  ;;  %v2477_v48 = vmax.f32 %v2475_v42, 0.0  ;;  %v2989_v10 = vand.u32 2147483647, %v2987_v37 }
 0x4b4   : > { %v2346_v53 = vpop.permute.xlu0 %2345  ;;  %v5205_v47 = vpack.i.bf16 %v2453_v45, %v2452_v44  ;;  %v2990_v6 = vsub.f32 1.0, %v2988_v26  ;;  %v3010_v58 = vsub.f32 %v5834_v13, %v3009_v28  ;;  %v3011_v22 = vsub.f32 %v5836_v14, %v3009_v28 }
 0x4b5   : > { %v2358_v61 = vsel %vm819_vm11, %v2357_v39, %v2346_v53  ;;  %v1848_v2 = vpop.permute.xlu1 %1847  ;;  %v5210_v59 = vpack.i.bf16 %v2969_v62, %v2968_v27  ;;  %v5215_v23 = vpack.i.bf16 %v2477_v48, %v2476_v9  ;;  %v2991_v57 = vsub.f32 1.0, %v2989_v10 }
 0x4b6   : > { %v1856_v24 = vsel %vm823_vm13, %v1855_v43, %v1848_v2  ;;  %5206 = vrot.lane.b32.xlu1 %v5205_v47, %s7478_s28  ;;  %v2992_v29 = vmax.f32 %v2990_v6, 0.0  ;;  %v3012_v51 = vand.u32 2147483647, %v3010_v58  ;;  %v3013_v4 = vand.u32 2147483647, %v3011_v22 }
 0x4b7   : > { %v1886_v32 = vadd.f32 %v5347_v3, %v1856_v24  ;;  %5211 = vrot.lane.b32.xlu0 %v5210_v59, %s7478_s28  ;;  %v2993_v50 = vmax.f32 %v2991_v57, 0.0  ;;  %v2494_v28 = vsub.f32 %v5834_v13, %v6568_v60  ;;  %v2495_v31 = vsub.f32 %v5836_v14, %v6568_v60 }
 0x4b8   : > { %v2349_v0 = vpop.permute.xlu0 %2348  ;;  %v3014_v15 = vsub.f32 1.0, %v3012_v51  ;;  %v3015_v30 = vsub.f32 1.0, %v3013_v4  ;;  %v3034_v34 = vsub.f32 %v5834_v13, %v6578_v21  ;;  %v3035_v33 = vsub.f32 %v5836_v14, %v6578_v21 }
 0x4b9   : > { %1887 = vst.msk [vmem:[%s6536_s17] sm:$0xff] %vm583_vm0, %v1886_v32  ;;  %v2359_v63 = vsel %vm821_vm12, %v2358_v61, %v2349_v0  ;;  %v2352_v5 = vpop.permute.xlu1 %2351  ;;  %v5220_v25 = vpack.i.bf16 %v2993_v50, %v2992_v29  ;;  %v2496_v36 = vand.u32 2147483647, %v2494_v28  ;;  %v2497_v35 = vand.u32 2147483647, %v2495_v31 }
 0x4ba   : > { %v2360_v60 = vsel %vm823_vm13, %v2359_v63, %v2352_v5  ;;  %5216 = vrot.lane.b32.xlu1 %v5215_v23, %s5584_s29  ;;  %v3016_v37 = vmax.f32 %v3014_v15, 0.0  ;;  %v3017_v56 = vmax.f32 %v3015_v30, 0.0  ;;  %v3036_v55 = vand.u32 2147483647, %v3034_v34 }
 0x4bb   : > { %v2390_v38 = vadd.f32 %v5348_v16, %v2360_v60  ;;  %5221 = vrot.lane.b32.xlu0 %v5220_v25, %s5584_s29  ;;  %v2498_v21 = vsub.f32 1.0, %v2496_v36  ;;  %v2499_v26 = vsub.f32 1.0, %v2497_v35  ;;  %v3037_v39 = vand.u32 2147483647, %v3035_v33 }
 0x4bc   : > { %v5230_v20 = vpack.i.bf16 %v3017_v56, %v3016_v37  ;;  %v3038_v40 = vsub.f32 1.0, %v3036_v55  ;;  %v2517_v41 = vrot.slane %v6549_v46, %v5831_v12  ;;  %v3057_v42 = vrot.slane %v6557_v54, %v5845_v17 }
 0x4bd   : > { %4772 = vst.msk [vmem:[%s6536_s17 + $0x8] sm:$0xff] %vm583_vm0, %v2390_v38  ;;  %v2500_v43 = vmax.f32 %v2498_v21, 0.0  ;;  %v2501_v44 = vmax.f32 %v2499_v26, 0.0  ;;  %v3039_v45 = vsub.f32 1.0, %v3037_v39  ;;  %v2541_v9 = vrot.slane %v6549_v46, %v5845_v17  ;;  %v2402_v39 = vld [vmem:[%s5804_s7] sm:$0xff] }
 0x4be   : > { %5231 = vrot.lane.b32.xlu1 %v5230_v20, %s5586_s11  ;;  %v3040_v27 = vmax.f32 %v3038_v40, 0.0  ;;  %v2518_v62 = vsub.f32 %v5834_v13, %v2517_v41  ;;  %v2519_v48 = vsub.f32 %v5836_v14, %v2517_v41  ;;  %v3058_v10 = vsub.f32 %v5834_v13, %v3057_v42 }
 0x4bf   : > { %v5225_v53 = vpack.i.bf16 %v2501_v44, %v2500_v43  ;;  %v3041_v47 = vmax.f32 %v3039_v45, 0.0  ;;  %v3059_v6 = vsub.f32 %v5836_v14, %v3057_v42  ;;  %v2542_v58 = vsub.f32 %v5834_v13, %v2541_v9 }
 0x4c0   : > { %v2400_v22 = vld [vmem:[%s6536_s17] sm:$0xff]  ;;  %v2520_v61 = vand.u32 2147483647, %v2518_v62  ;;  %v2521_v2 = vand.u32 2147483647, %v2519_v48  ;;  %v2543_v59 = vsub.f32 %v5836_v14, %v2541_v9  ;;  %v3081_v23 = vrot.slane %v6557_v54, %v5848_v18 }
 0x4c1   : > { %5226 = vrot.lane.b32.xlu0 %v5225_v53, %s5586_s11  ;;  %4920 = vmatprep.mubr.msk.f32.mxu0 %vm583_vm0, %v2400_v22  ;;  %v5240_v57 = vpack.i.bf16 %v3041_v47, %v3040_v27  ;;  %v3060_v24 = vand.u32 2147483647, %v3058_v10  ;;  %v3061_v29 = vand.u32 2147483647, %v3059_v6  ;;  %v2544_v51 = vand.u32 2147483647, %v2542_v58 }
 0x4c2   : > { %4930 = vmatprep.mubr.msk.f32.mxu1 %vm583_vm0, %v2400_v22  ;;  %v2522_v4 = vsub.f32 1.0, %v2520_v61  ;;  %v2523_v3 = vsub.f32 1.0, %v2521_v2  ;;  %v2545_v32 = vand.u32 2147483647, %v2543_v59  ;;  %v3082_v50 = vsub.f32 %v5834_v13, %v3081_v23  ;;  %v4783_v47 = vld [vmem:[%s5804_s7 + $0x8] sm:$0xff] }
 0x4c3   : > { %5241 = vrot.lane.b32.xlu1 %v5240_v57, %s5587_s26  ;;  %v3062_v28 = vsub.f32 1.0, %v3060_v24  ;;  %v3063_v31 = vsub.f32 1.0, %v3061_v29  ;;  %v2546_v0 = vsub.f32 1.0, %v2544_v51  ;;  %v3083_v15 = vsub.f32 %v5836_v14, %v3081_v23 }
 0x4c4   : > { %v2524_v30 = vmax.f32 %v2522_v4, 0.0  ;;  %v2525_v34 = vmax.f32 %v2523_v3, 0.0  ;;  %v2547_v33 = vsub.f32 1.0, %v2545_v32  ;;  %v3084_v63 = vand.u32 2147483647, %v3082_v50  ;;  %v6653_v27 = vld [vmem:[%s6536_s17 + $0x8] sm:$0xff] }
 0x4c5   : > { %v3064_v5 = vmax.f32 %v3062_v28, 0.0  ;;  %v3065_v25 = vmax.f32 %v3063_v31, 0.0  ;;  %v2548_v36 = vmax.f32 %v2546_v0, 0.0  ;;  %v3085_v35 = vand.u32 2147483647, %v3083_v15 }
 0x4c6   : > { %v5235_v60 = vpack.i.bf16 %v2525_v34, %v2524_v30  ;;  %v2549_v37 = vmax.f32 %v2547_v33, 0.0  ;;  %v3086_v56 = vsub.f32 1.0, %v3084_v63  ;;  %v2565_v55 = vrot.slane %v6549_v46, %v5848_v18 }
 0x4c7   : > { %v5250_v16 = vpack.i.bf16 %v3065_v25, %v3064_v5  ;;  %v3087_v38 = vsub.f32 1.0, %v3085_v35  ;;  %v3105_v21 = vrot.slane %v6557_v54, %v5851_v19  ;;  %v2589_v26 = vrot.slane %v6549_v46, %v5851_v19 }
 0x4c8   : > { %5236 = vrot.lane.b32.xlu0 %v5235_v60, %s5587_s26  ;;  %v5245_v20 = vpack.i.bf16 %v2549_v37, %v2548_v36  ;;  %v3088_v40 = vmax.f32 %v3086_v56, 0.0  ;;  %v2566_v41 = vsub.f32 %v5834_v13, %v2565_v55  ;;  %v2567_v42 = vsub.f32 %v5836_v14, %v2565_v55 }
 0x4c9   : > { %5251 = vrot.lane.b32.xlu1 %v5250_v16, %s5588_s12  ;;  %v3089_v43 = vmax.f32 %v3087_v38, 0.0  ;;  %v3106_v44 = vsub.f32 %v5834_v13, %v3105_v21  ;;  %v3107_v45 = vsub.f32 %v5836_v14, %v3105_v21  ;;  %v2590_v9 = vsub.f32 %v5834_v13, %v2589_v26 }
 0x4ca   : > { %v2568_v62 = vand.u32 2147483647, %v2566_v41  ;;  %v2569_v48 = vand.u32 2147483647, %v2567_v42  ;;  %v2591_v10 = vsub.f32 %v5836_v14, %v2589_v26  ;;  %v6656_v53 = vadd.f32 %v2402_v39, %v2400_v22 }
 0x4cb   : > { %v5260_v6 = vpack.i.bf16 %v3089_v43, %v3088_v40  ;;  %v3108_v58 = vand.u32 2147483647, %v3106_v44  ;;  %v3109_v61 = vand.u32 2147483647, %v3107_v45  ;;  %v2592_v2 = vand.u32 2147483647, %v2590_v9 }
 0x4cc   : > { %5246 = vrot.lane.b32.xlu0 %v5245_v20, %s5588_s12  ;;  %v2570_v59 = vsub.f32 1.0, %v2568_v62  ;;  %v2571_v23 = vsub.f32 1.0, %v2569_v48  ;;  %v2593_v57 = vand.u32 2147483647, %v2591_v10  ;;  %v2433_v24 = vrot.slane %v6656_v53, %v5822_v8 }
 0x4cd   : > { %5261 = vrot.lane.b32.xlu1 %v5260_v6, %s5589_s9  ;;  %v3110_v29 = vsub.f32 1.0, %v3108_v58  ;;  %v3111_v51 = vsub.f32 1.0, %v3109_v61  ;;  %v2594_v4 = vsub.f32 1.0, %v2592_v2  ;;  %v6664_v22 = vadd.f32 %v4783_v47, %v6653_v27 }
 0x4ce   : > { %v2572_v3 = vmax.f32 %v2570_v59, 0.0  ;;  %v2573_v32 = vmax.f32 %v2571_v23, 0.0  ;;  %v2595_v50 = vsub.f32 1.0, %v2593_v57  ;;  %v2435_v28 = vsub.f32 %v5836_v14, %v2433_v24 }
 0x4cf   : > { %v3112_v31 = vmax.f32 %v3110_v29, 0.0  ;;  %v3113_v0 = vmax.f32 %v3111_v51, 0.0  ;;  %v2596_v15 = vmax.f32 %v2594_v4, 0.0  ;;  %v2434_v30 = vsub.f32 %v5834_v13, %v2433_v24 }
 0x4d0   : > { %v5255_v34 = vpack.i.bf16 %v2573_v32, %v2572_v3  ;;  %v2597_v33 = vmax.f32 %v2595_v50, 0.0  ;;  %v2437_v63 = vand.u32 2147483647, %v2435_v28  ;;  %v2949_v5 = vrot.slane %v6664_v22, %v5822_v8 }
 0x4d1   : > { %v5270_v25 = vpack.i.bf16 %v3113_v0, %v3112_v31  ;;  %v2436_v36 = vand.u32 2147483647, %v2434_v30  ;;  %v2457_v35 = vrot.slane %v6656_v53, %v5819_v7  ;;  %v2973_v60 = vrot.slane %v6664_v22, %v5819_v7 }
 0x4d2   : > { %5256 = vrot.lane.b32.xlu0 %v5255_v34, %s5589_s9  ;;  %v2439_v37 = vsub.f32 1.0, %v2437_v63  ;;  %v2951_v56 = vsub.f32 %v5836_v14, %v2949_v5  ;;  %v2950_v55 = vsub.f32 %v5834_v13, %v2949_v5  ;;  %v5265_v16 = vpack.i.bf16 %v2597_v33, %v2596_v15 }
 0x4d3   : > { %5271 = vrot.lane.b32.xlu1 %v5270_v25, %s5590_s10  ;;  %v2438_v38 = vsub.f32 1.0, %v2436_v36  ;;  %v2459_v21 = vsub.f32 %v5836_v14, %v2457_v35  ;;  %v2458_v20 = vsub.f32 %v5834_v13, %v2457_v35  ;;  %v2975_v40 = vsub.f32 %v5836_v14, %v2973_v60 }
 0x4d4   : > { %v2953_v26 = vand.u32 2147483647, %v2951_v56  ;;  %v2952_v39 = vand.u32 2147483647, %v2950_v55  ;;  %v2441_v41 = vmax.f32 %v2439_v37, 0.0  ;;  %v2481_v43 = vrot.slane %v6656_v53, %v5828_v11 }
 0x4d5   : > { %v2461_v42 = vand.u32 2147483647, %v2459_v21  ;;  %v2974_v45 = vsub.f32 %v5834_v13, %v2973_v60  ;;  %v2440_v9 = vmax.f32 %v2438_v38, 0.0  ;;  %v2460_v48 = vand.u32 2147483647, %v2458_v20 }
 0x4d6   : > { %5266 = vrot.lane.b32.xlu0 %v5265_v16, %s5590_s10  ;;  %v2955_v44 = vsub.f32 1.0, %v2953_v26  ;;  %v2954_v62 = vsub.f32 1.0, %v2952_v39  ;;  %v2977_v10 = vand.u32 2147483647, %v2975_v40  ;;  %v2483_v58 = vsub.f32 %v5836_v14, %v2481_v43 }
 0x4d7   : > { %2602 = vrot.lane.b32.xlu1 %v2441_v41, %s7478_s28  ;;  %v2463_v6 = vsub.f32 1.0, %v2461_v42  ;;  %v2997_v61 = vrot.slane %v6664_v22, %v5828_v11  ;;  %v2482_v2 = vsub.f32 %v5834_v13, %v2481_v43  ;;  %v2462_v23 = vsub.f32 1.0, %v2460_v48 }
 0x4d8   : > { %v2957_v47 = vmax.f32 %v2955_v44, 0.0  ;;  %v2956_v59 = vmax.f32 %v2954_v62, 0.0  ;;  %v2979_v57 = vsub.f32 1.0, %v2977_v10  ;;  %v2976_v24 = vand.u32 2147483647, %v2974_v45 }
 0x4d9   : > { %v2465_v29 = vmax.f32 %v2463_v6, 0.0  ;;  %v2485_v51 = vand.u32 2147483647, %v2483_v58  ;;  %v2999_v4 = vsub.f32 %v5836_v14, %v2997_v61  ;;  %v2505_v3 = vrot.slane %v6656_v53, %v5831_v12 }
 0x4da   : > { %2600 = vrot.lane.b32.xlu0 %v2440_v9, %s7478_s28  ;;  %v2484_v32 = vand.u32 2147483647, %v2482_v2  ;;  %v2464_v50 = vmax.f32 %v2462_v23, 0.0  ;;  %v2981_v28 = vmax.f32 %v2979_v57, 0.0  ;;  %v2978_v31 = vsub.f32 1.0, %v2976_v24 }
 0x4db   : > { %3118 = vrot.lane.b32.xlu1 %v2957_v47, %s7478_s28  ;;  %v2998_v0 = vsub.f32 %v5834_v13, %v2997_v61  ;;  %v2487_v15 = vsub.f32 1.0, %v2485_v51  ;;  %v3001_v30 = vand.u32 2147483647, %v2999_v4  ;;  %v2507_v34 = vsub.f32 %v5836_v14, %v2505_v3 }
 0x4dc   : > { %v3021_v33 = vrot.slane %v6664_v22, %v5831_v12  ;;  %v2486_v63 = vsub.f32 1.0, %v2484_v32  ;;  %v2980_v5 = vmax.f32 %v2978_v31, 0.0  ;;  %v2506_v36 = vsub.f32 %v5834_v13, %v2505_v3 }
 0x4dd   : > { %v3000_v25 = vand.u32 2147483647, %v2998_v0  ;;  %v2529_v35 = vrot.slane %v6656_v53, %v5845_v17  ;;  %v2489_v60 = vmax.f32 %v2487_v15, 0.0  ;;  %v3003_v37 = vsub.f32 1.0, %v3001_v30 }
 0x4de   : > { %3116 = vrot.lane.b32.xlu0 %v2956_v59, %s7478_s28  ;;  %v2509_v56 = vand.u32 2147483647, %v2507_v34  ;;  %v3023_v55 = vsub.f32 %v5836_v14, %v3021_v33  ;;  %v2488_v16 = vmax.f32 %v2486_v63, 0.0  ;;  %v2508_v21 = vand.u32 2147483647, %v2506_v36 }
 0x4df   : > { %2610 = vrot.lane.b32.xlu1 %v2465_v29, %s5584_s29  ;;  %v3002_v38 = vsub.f32 1.0, %v3000_v25  ;;  %v3022_v26 = vsub.f32 %v5834_v13, %v3021_v33  ;;  %v2531_v39 = vsub.f32 %v5836_v14, %v2529_v35  ;;  %v3005_v20 = vmax.f32 %v3003_v37, 0.0 }
 0x4e0   : > { %v2511_v40 = vsub.f32 1.0, %v2509_v56  ;;  %v3025_v41 = vand.u32 2147483647, %v3023_v55  ;;  %v3045_v42 = vrot.slane %v6664_v22, %v5845_v17  ;;  %v2530_v43 = vsub.f32 %v5834_v13, %v2529_v35 }
 0x4e1   : > { %v3004_v44 = vmax.f32 %v3002_v38, 0.0  ;;  %v2510_v45 = vsub.f32 1.0, %v2508_v21  ;;  %v3024_v9 = vand.u32 2147483647, %v3022_v26  ;;  %v2533_v62 = vand.u32 2147483647, %v2531_v39 }
 0x4e2   : > { %2608 = vrot.lane.b32.xlu0 %v2464_v50, %s5584_s29  ;;  %v2513_v48 = vmax.f32 %v2511_v40, 0.0  ;;  %v3027_v10 = vsub.f32 1.0, %v3025_v41  ;;  %v3047_v47 = vsub.f32 %v5836_v14, %v3045_v42  ;;  %v2553_v6 = vrot.slane %v6656_v53, %v5848_v18 }
 0x4e3   : > { %3126 = vrot.lane.b32.xlu1 %v2981_v28, %s5584_s29  ;;  %v2532_v58 = vand.u32 2147483647, %v2530_v43  ;;  %v2512_v61 = vmax.f32 %v2510_v45, 0.0  ;;  %v3026_v2 = vsub.f32 1.0, %v3024_v9  ;;  %v2535_v59 = vsub.f32 1.0, %v2533_v62 }
 0x4e4   : > { %v3046_v23 = vsub.f32 %v5834_v13, %v3045_v42  ;;  %v3029_v57 = vmax.f32 %v3027_v10, 0.0  ;;  %v3049_v24 = vand.u32 2147483647, %v3047_v47  ;;  %v2555_v29 = vsub.f32 %v5836_v14, %v2553_v6 }
 0x4e5   : > { %v3069_v51 = vrot.slane %v6664_v22, %v5848_v18  ;;  %v2534_v4 = vsub.f32 1.0, %v2532_v58  ;;  %v3028_v3 = vmax.f32 %v3026_v2, 0.0  ;;  %v2537_v32 = vmax.f32 %v2535_v59, 0.0 }
 0x4e6   : > { %3124 = vrot.lane.b32.xlu0 %v2980_v5, %s5584_s29  ;;  %v3048_v50 = vand.u32 2147483647, %v3046_v23  ;;  %v2554_v28 = vsub.f32 %v5834_v13, %v2553_v6  ;;  %v3051_v31 = vsub.f32 1.0, %v3049_v24  ;;  %v2557_v0 = vand.u32 2147483647, %v2555_v29 }
 0x4e7   : > { %2618 = vrot.lane.b32.xlu1 %v2489_v60, %s5586_s11  ;;  %v3071_v15 = vsub.f32 %v5836_v14, %v3069_v51  ;;  %v2577_v30 = vrot.slane %v6656_v53, %v5851_v19  ;;  %v2536_v34 = vmax.f32 %v2534_v4, 0.0  ;;  %v3070_v5 = vsub.f32 %v5834_v13, %v3069_v51 }
 0x4e8   : > { %v3050_v33 = vsub.f32 1.0, %v3048_v50  ;;  %v2556_v63 = vand.u32 2147483647, %v2554_v28  ;;  %v3093_v25 = vrot.slane %v6664_v22, %v5851_v19  ;;  %v3053_v36 = vmax.f32 %v3051_v31, 0.0 }
 0x4e9   : > { %v2559_v35 = vsub.f32 1.0, %v2557_v0  ;;  %v3073_v60 = vand.u32 2147483647, %v3071_v15  ;;  %v2579_v37 = vsub.f32 %v5836_v14, %v2577_v30  ;;  %v2578_v38 = vsub.f32 %v5834_v13, %v2577_v30 }
 0x4ea   : > { %2616 = vrot.lane.b32.xlu0 %v2488_v16, %s5586_s11  ;;  %v3052_v56 = vmax.f32 %v3050_v33, 0.0  ;;  %v2558_v55 = vsub.f32 1.0, %v2556_v63  ;;  %v3072_v16 = vand.u32 2147483647, %v3070_v5  ;;  %v3094_v43 = vsub.f32 %v5834_v13, %v3093_v25 }
 0x4eb   : > { %3134 = vrot.lane.b32.xlu1 %v3005_v20, %s5586_s11  ;;  %v2561_v21 = vmax.f32 %v2559_v35, 0.0  ;;  %v3075_v26 = vsub.f32 1.0, %v3073_v60  ;;  %v2581_v39 = vand.u32 2147483647, %v2579_v37  ;;  %v3095_v20 = vsub.f32 %v5836_v14, %v3093_v25 }
 0x4ec   : > { %v2560_v40 = vmax.f32 %v2558_v55, 0.0  ;;  %v3074_v41 = vsub.f32 1.0, %v3072_v16  ;;  %v2580_v42 = vand.u32 2147483647, %v2578_v38  ;;  %v3096_v10 = vand.u32 2147483647, %v3094_v43 }
 0x4ed   : > { %v2583_v45 = vsub.f32 1.0, %v2581_v39  ;;  %v3097_v9 = vand.u32 2147483647, %v3095_v20  ;;  %v2937_v24 = vrot.slane %v6557_v54, %v6030_v52  ;;  %v2421_v51 = vrot.slane %v6549_v46, %v6030_v52 }
 0x4ee   : > { %3132 = vrot.lane.b32.xlu0 %v3004_v44, %s5586_s11  ;;  %v3077_v44 = vmax.f32 %v3075_v26, 0.0  ;;  %v3076_v62 = vmax.f32 %v3074_v41, 0.0 }
 0x4ef   : > { %2626 = vrot.lane.b32.xlu1 %v2513_v48, %s5587_s26  ;;  %v2582_v48 = vsub.f32 1.0, %v2580_v42  ;;  %v2585_v47 = vmax.f32 %v2583_v45, 0.0  ;;  %v3099_v6 = vsub.f32 1.0, %v3097_v9  ;;  %v2939_v50 = vsub.f32 %v5836_v14, %v2937_v24 }
 0x4f0   : > { %v2422_v28 = vsub.f32 %v5834_v13, %v2421_v51  ;;  %v2423_v31 = vsub.f32 %v5836_v14, %v2421_v51 }
 0x4f1   : > { %v2584_v58 = vmax.f32 %v2582_v48, 0.0  ;;  %v3101_v2 = vmax.f32 %v3099_v6, 0.0  ;;  %v2941_v30 = vand.u32 2147483647, %v2939_v50 }
 0x4f2   : > { %2624 = vrot.lane.b32.xlu0 %v2512_v61, %s5587_s26  ;;  %v3098_v61 = vsub.f32 1.0, %v3096_v10  ;;  %v2425_v33 = vand.u32 2147483647, %v2423_v31 }
 0x4f3   : > { %3142 = vrot.lane.b32.xlu1 %v3029_v57, %s5587_s26  ;;  %v2943_v5 = vsub.f32 1.0, %v2941_v30 }
 0x4f4   : > { %v3100_v59 = vmax.f32 %v3098_v61, 0.0  ;;  %v2427_v46 = vsub.f32 1.0, %v2425_v33 }
 0x4f6   : > { %3140 = vrot.lane.b32.xlu0 %v3028_v3, %s5587_s26  ;;  %v2938_v3 = vsub.f32 %v5834_v13, %v2937_v24  ;;  %v2429_v39 = vmax.f32 %v2427_v46, 0.0 }
 0x4f7   : > { %2634 = vrot.lane.b32.xlu1 %v2537_v32, %s5588_s12 }
 0x4f8   : > { %v2940_v0 = vand.u32 2147483647, %v2938_v3 }
 0x4fa   : > { %2632 = vrot.lane.b32.xlu0 %v2536_v34, %s5588_s12  ;;  %v2424_v34 = vand.u32 2147483647, %v2422_v28  ;;  %v2942_v63 = vsub.f32 1.0, %v2940_v0 }
 0x4fb   : > { %3150 = vrot.lane.b32.xlu1 %v3053_v36, %s5588_s12 }
 0x4fc   : > { %v2426_v25 = vsub.f32 1.0, %v2424_v34  ;;  %v2944_v16 = vmax.f32 %v2942_v63, 0.0 }
 0x4fe   : > { %3148 = vrot.lane.b32.xlu0 %v3052_v56, %s5588_s12  ;;  %v2428_v26 = vmax.f32 %v2426_v25, 0.0 }
 0x4ff   : > { %2642 = vrot.lane.b32.xlu1 %v2561_v21, %s5589_s9  ;;  %v2945_v21 = vmax.f32 %v2943_v5, 0.0 }
 0x502   : > { %2640 = vrot.lane.b32.xlu0 %v2560_v40, %s5589_s9 }
 0x503   : > { %3158 = vrot.lane.b32.xlu1 %v3077_v44, %s5589_s9 }
 0x506   : > { %3156 = vrot.lane.b32.xlu0 %v3076_v62, %s5589_s9 }
 0x507   : > { %2650 = vrot.lane.b32.xlu1 %v2585_v47, %s5590_s10 }
 0x50a   : > { %2648 = vrot.lane.b32.xlu0 %v2584_v58, %s5590_s10 }
 0x50b   : > { %3166 = vrot.lane.b32.xlu1 %v3101_v2, %s5590_s10 }
 0x50e   : > { %3164 = vrot.lane.b32.xlu0 %v3100_v59, %s5590_s10 }
 0x528   : > { %v5207_v23 = vpop.permute.xlu1 %5206 }
 0x529   : > { %v5212_v57 = vpop.permute.xlu0 %5211  ;;  %v5209_v60 = vunpack.i.h.bf16 %v5207_v23  ;;  %v5208_v37 = vunpack.i.l.bf16 %v5207_v23 }
 0x52a   : > { %v5213_v35 = vunpack.i.l.bf16 %v5212_v57  ;;  %v5214_v55 = vunpack.i.h.bf16 %v5212_v57 }
 0x52b   : > { %v2725_v9 = vsel %vm583_vm0, %v2429_v39, %v5209_v60  ;;  %v2724_v62 = vsel %vm583_vm0, %v2428_v26, %v5208_v37 }
 0x52c   : > { %v5217_v29 = vpop.permute.xlu1 %5216  ;;  %v3240_v45 = vsel %vm583_vm0, %v2944_v16, %v5213_v35  ;;  %v3241_v10 = vsel %vm583_vm0, %v2945_v21, %v5214_v55 }
 0x52d   : > { %v5222_v4 = vpop.permute.xlu0 %5221  ;;  %v5219_v40 = vunpack.i.h.bf16 %v5217_v29  ;;  %v5218_v41 = vunpack.i.l.bf16 %v5217_v29 }
 0x52e   : > { %v5223_v38 = vunpack.i.l.bf16 %v5222_v4  ;;  %v5224_v20 = vunpack.i.h.bf16 %v5222_v4 }
 0x52f   : > { %v2726_v57 = vsel %vm586_vm1, %v2724_v62, %v5218_v41  ;;  %v2727_v24 = vsel %vm586_vm1, %v2725_v9, %v5219_v40 }
 0x530   : > { %v5232_v32 = vpop.permute.xlu1 %5231  ;;  %v3242_v47 = vsel %vm586_vm1, %v3240_v45, %v5223_v38  ;;  %v3243_v61 = vsel %vm586_vm1, %v3241_v10, %v5224_v20 }
 0x531   : > { %v5234_v42 = vunpack.i.h.bf16 %v5232_v32  ;;  %v5233_v43 = vunpack.i.l.bf16 %v5232_v32 }
 0x533   : > { %v5227_v15 = vpop.permute.xlu0 %5226  ;;  %v3245_v29 = vsel %vm589_vm2, %v3243_v61, %v5234_v42  ;;  %v3244_v51 = vsel %vm589_vm2, %v3242_v47, %v5233_v43 }
 0x534   : > { %v5228_v2 = vunpack.i.l.bf16 %v5227_v15  ;;  %v5229_v4 = vunpack.i.h.bf16 %v5227_v15 }
 0x535   : > { %v5242_v54 = vpop.permute.xlu1 %5241 }
 0x536   : > { %v5244_v6 = vunpack.i.h.bf16 %v5242_v54  ;;  %v5243_v58 = vunpack.i.l.bf16 %v5242_v54  ;;  %v2728_v33 = vsel %vm589_vm2, %v2726_v57, %v5228_v2 }
 0x538   : > { %v3246_v31 = vsel %vm592_vm3, %v3244_v51, %v5243_v58  ;;  %v3247_v0 = vsel %vm592_vm3, %v3245_v29, %v5244_v6 }
 0x53a   : > { %v5237_v36 = vpop.permute.xlu0 %5236 }
 0x53b   : > { %v5252_v56 = vpop.permute.xlu1 %5251  ;;  %v5238_v3 = vunpack.i.l.bf16 %v5237_v36  ;;  %v5239_v28 = vunpack.i.h.bf16 %v5237_v36  ;;  %v2729_v36 = vsel %vm589_vm2, %v2727_v24, %v5229_v4 }
 0x53c   : > { %v5254_v59 = vunpack.i.h.bf16 %v5252_v56  ;;  %v5253_v23 = vunpack.i.l.bf16 %v5252_v56 }
 0x53d   : > { %v2730_v37 = vsel %vm592_vm3, %v2728_v33, %v5238_v3  ;;  %v2731_v16 = vsel %vm592_vm3, %v2729_v36, %v5239_v28  ;;  %v2925_v28 = vrot.slane %v6664_v22, %v6030_v52 }
 0x53e   : > { %v5247_v44 = vpop.permute.xlu0 %5246  ;;  %v3248_v63 = vsel %vm595_vm4, %v3246_v31, %v5253_v23  ;;  %v3249_v5 = vsel %vm595_vm4, %v3247_v0, %v5254_v59  ;;  %v2409_v31 = vrot.slane %v6656_v53, %v6030_v52 }
 0x53f   : > { %v5262_v48 = vpop.permute.xlu1 %5261  ;;  %v5248_v30 = vunpack.i.l.bf16 %v5247_v44  ;;  %v5249_v54 = vunpack.i.h.bf16 %v5247_v44  ;;  %v2926_v33 = vsub.f32 %v5834_v13, %v2925_v28 }
 0x540   : > { %v5264_v32 = vunpack.i.h.bf16 %v5262_v48  ;;  %v5263_v50 = vunpack.i.l.bf16 %v5262_v48 }
 0x541   : > { %v2732_v38 = vsel %vm595_vm4, %v2730_v37, %v5248_v30  ;;  %v2733_v20 = vsel %vm595_vm4, %v2731_v16, %v5249_v54  ;;  %v2927_v30 = vsub.f32 %v5836_v14, %v2925_v28  ;;  %v2411_v54 = vsub.f32 %v5836_v14, %v2409_v31 }
 0x542   : > { %v3250_v56 = vsel %vm598_vm5, %v3248_v63, %v5263_v50  ;;  %v3251_v55 = vsel %vm598_vm5, %v3249_v5, %v5264_v32  ;;  %v2410_v63 = vsub.f32 %v5834_v13, %v2409_v31 }
 0x543   : > { %v2929_v5 = vand.u32 2147483647, %v2927_v30 }
 0x544   : > { %v5257_v34 = vpop.permute.xlu0 %5256 }
 0x545   : > { %v5272_v25 = vpop.permute.xlu1 %5271  ;;  %v5259_v46 = vunpack.i.h.bf16 %v5257_v34  ;;  %v5258_v15 = vunpack.i.l.bf16 %v5257_v34  ;;  %v2931_v22 = vsub.f32 1.0, %v2929_v5 }
 0x546   : > { %v5274_v35 = vunpack.i.h.bf16 %v5272_v25  ;;  %v5273_v60 = vunpack.i.l.bf16 %v5272_v25  ;;  %v2928_v25 = vand.u32 2147483647, %v2926_v33 }
 0x547   : > { %v2734_v43 = vsel %vm598_vm5, %v2732_v38, %v5258_v15  ;;  %v2735_v44 = vsel %vm598_vm5, %v2733_v20, %v5259_v46 }
 0x548   : > { %v5267_v21 = vpop.permute.xlu0 %5266  ;;  %v3252_v26 = vsel %vm601_vm6, %v3250_v56, %v5273_v60  ;;  %v3253_v39 = vsel %vm601_vm6, %v3251_v55, %v5274_v35  ;;  %v2413_v35 = vand.u32 2147483647, %v2411_v54  ;;  %v2412_v60 = vand.u32 2147483647, %v2410_v63 }
 0x549   : > { %v5269_v40 = vunpack.i.h.bf16 %v5267_v21  ;;  %v5268_v41 = vunpack.i.l.bf16 %v5267_v21  ;;  %v4976_v42 = vpack.c.bf16 %v3253_v39, %v3252_v26  ;;  %v2603_v48 = vpop.permute.xlu1 %2602  ;;  %v2930_v36 = vsub.f32 1.0, %v2928_v25 }
 0x54a   : > { %v2415_v37 = vsub.f32 1.0, %v2413_v35  ;;  %v2414_v56 = vsub.f32 1.0, %v2412_v60  ;;  %v2933_v55 = vmax.f32 %v2931_v22, 0.0 }
 0x54b   : > { %v2736_v45 = vsel %vm601_vm6, %v2734_v43, %v5268_v41  ;;  %v2737_v9 = vsel %vm601_vm6, %v2735_v44, %v5269_v40  ;;  %4977 = vmatprep.subr.bf16.mxu1 %v4976_v42  ;;  %v2932_v38 = vmax.f32 %v2930_v36, 0.0 }
 0x54c   : > { %v4972_v62 = vpack.c.bf16 %v2737_v9, %v2736_v45  ;;  %4979 = vmatpush3.bf16.msra.mxu1 %v4976_v42  ;;  %v2601_v10 = vpop.permute.xlu0 %2600  ;;  %v2417_v26 = vmax.f32 %v2415_v37, 0.0  ;;  %v2416_v40 = vmax.f32 %v2414_v56, 0.0 }
 0x54d   : > { %v3119_v47 = vpop.permute.xlu1 %3118 }
 0x54e   : > { %4973 = vmatprep.subr.bf16.mxu0 %v4972_v62  ;;  %v3171_v21 = vsel %vm583_vm0, %v2933_v55, %v3119_v47  ;;  %v2655_v43 = vsel %vm583_vm0, %v2417_v26, %v2603_v48 }
 0x54f   : > { %4975 = vmatpush3.bf16.msra.mxu0 %v4972_v62  ;;  %4931 = vmatmul.mubr.msk.f32.vlgmr.msra.gmra.mrb[8].mxu1 %vm583_vm0, %v6653_v27  ;;  %v2654_v62 = vsel %vm583_vm0, %v2416_v40, %v2601_v10 }
 0x550   : > { %4933 = vmatprep.mubr.msk.f32.mxu1 %vm583_vm0, %v6546_v49  ;;  %v3117_v6 = vpop.permute.xlu0 %3116 }
 0x551   : > { %v2611_v58 = vpop.permute.xlu1 %2610  ;;  %v3170_v39 = vsel %vm583_vm0, %v2932_v38, %v3117_v6 }
 0x552   : > { %4921 = vmatmul.mubr.msk.f32.vlgmr.msra.gmra.mrb[8].mxu0 %vm583_vm0, %v6653_v27  ;;  %v2657_v47 = vsel %vm586_vm1, %v2655_v43, %v2611_v58 }
 0x553   : > { %4923 = vmatprep.mubr.msk.f32.mxu0 %vm583_vm0, %v6546_v49  ;;  %4934 = vmatmul.mubr.msk.f32.gmra.mrb[10].mxu1 %vm583_vm0, %v6552_v1 }
 0x554   : > { %v2609_v61 = vpop.permute.xlu0 %2608 }
 0x555   : > { %v3127_v2 = vpop.permute.xlu1 %3126 }
 0x556   : > { %4924 = vmatmul.mubr.msk.f32.gmra.mrb[10].mxu0 %vm583_vm0, %v6552_v1  ;;  %v3173_v20 = vsel %vm586_vm1, %v3171_v21, %v3127_v2 }
 0x558   : > { %v3125_v59 = vpop.permute.xlu0 %3124 }
 0x559   : > { %v2619_v23 = vpop.permute.xlu1 %2618  ;;  %v3172_v41 = vsel %vm586_vm1, %v3170_v39, %v3125_v59  ;;  %v2656_v59 = vsel %vm586_vm1, %v2654_v62, %v2609_v61 }
 0x55c   : > { %v2617_v57 = vpop.permute.xlu0 %2616 }
 0x55d   : > { %v3135_v27 = vpop.permute.xlu1 %3134 }
 0x55e   : > { %v3175_v42 = vsel %vm589_vm2, %v3173_v20, %v3135_v27  ;;  %v2659_v27 = vsel %vm589_vm2, %v2657_v47, %v2619_v23 }
 0x560   : > { %v3133_v24 = vpop.permute.xlu0 %3132 }
 0x561   : > { %v2627_v29 = vpop.permute.xlu1 %2626  ;;  %v3174_v44 = vsel %vm589_vm2, %v3172_v41, %v3133_v24 }
 0x562   : > { %v2661_v31 = vsel %vm592_vm3, %v2659_v27, %v2627_v29 }
 0x564   : > { %v2625_v49 = vpop.permute.xlu0 %2624 }
 0x565   : > { %v3143_v51 = vpop.permute.xlu1 %3142 }
 0x566   : > { %v3177_v45 = vsel %vm592_vm3, %v3175_v42, %v3143_v51  ;;  %v2658_v51 = vsel %vm589_vm2, %v2656_v59, %v2617_v57 }
 0x568   : > { %v3141_v4 = vpop.permute.xlu0 %3140 }
 0x569   : > { %v2635_v3 = vpop.permute.xlu1 %2634  ;;  %v3176_v6 = vsel %vm592_vm3, %v3174_v44, %v3141_v4 }
 0x56a   : > { %v2663_v30 = vsel %vm595_vm4, %v2661_v31, %v2635_v3 }
 0x56c   : > { %v2633_v32 = vpop.permute.xlu0 %2632 }
 0x56d   : > { %v3151_v50 = vpop.permute.xlu1 %3150 }
 0x56e   : > { %v3179_v2 = vsel %vm595_vm4, %v3177_v45, %v3151_v50  ;;  %v2660_v50 = vsel %vm592_vm3, %v2658_v51, %v2625_v49 }
 0x570   : > { %v3149_v1 = vpop.permute.xlu0 %3148 }
 0x571   : > { %v2643_v0 = vpop.permute.xlu1 %2642  ;;  %v3178_v48 = vsel %vm595_vm4, %v3176_v6, %v3149_v1  ;;  %v2662_v1 = vsel %vm595_vm4, %v2660_v50, %v2633_v32 }
 0x572   : > { %v2665_v54 = vsel %vm598_vm5, %v2663_v30, %v2643_v0 }
 0x574   : > { %v2641_v34 = vpop.permute.xlu0 %2640 }
 0x575   : > { %v3159_v46 = vpop.permute.xlu1 %3158  ;;  %v2664_v29 = vsel %vm598_vm5, %v2662_v1, %v2641_v34 }
 0x576   : > { %v3181_v24 = vsel %vm598_vm5, %v3179_v2, %v3159_v46 }
 0x578   : > { %v3157_v15 = vpop.permute.xlu0 %3156 }
 0x579   : > { %v2651_v53 = vpop.permute.xlu1 %2650  ;;  %v3180_v10 = vsel %vm598_vm5, %v3178_v48, %v3157_v15 }
 0x57a   : > { %v2667_v63 = vsel %vm601_vm6, %v2665_v54, %v2651_v53 }
 0x57c   : > { %v2649_v16 = vpop.permute.xlu0 %2648 }
 0x57d   : > { %v3167_v9 = vpop.permute.xlu1 %3166  ;;  %v2666_v46 = vsel %vm601_vm6, %v2664_v29, %v2649_v16 }
 0x57e   : > { %v3183_v58 = vsel %vm601_vm6, %v3181_v24, %v3167_v9 }
 0x580   : > { %v3165_v28 = vpop.permute.xlu0 %3164 }
 0x581   : > { %v3182_v23 = vsel %vm601_vm6, %v3180_v10, %v3165_v28 }
 0x622   : > { %v4932_v4 = vpop.f32.mrb[8].mxu1 }
 0x623   : > { %v3340_v61 = vmul.f32 %v4932_v4, %v3183_v58  ;;  %v3320_v33 = vpop.f32.mrb[9].mxu1 }
 0x624   : > { %v3339_v57 = vmul.f32 %v3320_v33, %v3182_v23 }
 0x625   : > { %v4922_v5 = vpop.f32.mrb[8].mxu0 }
 0x626   : > { %v2836_v25 = vmul.f32 %v4922_v5, %v2667_v63  ;;  %v2816_v49 = vpop.f32.mrb[9].mxu0  ;;  %v3341_v15 = vadd.f32 %v3340_v61, %v3339_v57  ;;  %v4935_v3 = vpop.f32.mrb[10].mxu1 }
 0x627   : > { %v2835_v35 = vmul.f32 %v2816_v49, %v2666_v46  ;;  %v3349_v60 = vmul.f32 %v4935_v3, %v3183_v58  ;;  %v3330_v22 = vpop.f32.mrb[11].mxu1 }
 0x628   : > { %v3348_v36 = vmul.f32 %v3330_v22, %v3182_v23  ;;  %v3342_v47 = vrot.slane %v3341_v15, 4 }
 0x629   : > { %v2837_v37 = vadd.f32 %v2836_v25, %v2835_v35  ;;  %v4925_v32 = vpop.f32.mrb[10].mxu0 }
 0x62a   : > { %v2845_v56 = vmul.f32 %v4925_v32, %v2667_v63  ;;  %v2826_v0 = vpop.f32.mrb[11].mxu0  ;;  %v3350_v55 = vadd.f32 %v3349_v60, %v3348_v36  ;;  %v3343_v2 = vadd.f32 %v3342_v47, %v3341_v15 }
 0x62b   : > { %v2844_v38 = vmul.f32 %v2826_v0, %v2666_v46  ;;  %v2838_v9 = vrot.slane %v2837_v37, 4 }
 0x62c   : > { %v3351_v34 = vrot.slane %v3350_v55, 4  ;;  %v3344_v59 = vrot.slane %v3343_v2, 2 }
 0x62d   : > { %v2846_v21 = vadd.f32 %v2845_v56, %v2844_v38  ;;  %v2839_v62 = vadd.f32 %v2838_v9, %v2837_v37  ;;  %v5349_v56 = vld [vmem:[%s6536_s17 + $0x18] sm:$0xff] }
 0x62e   : > { %v3352_v53 = vadd.f32 %v3351_v34, %v3350_v55  ;;  %v3345_v48 = vadd.f32 %v3344_v59, %v3343_v2 }
 0x62f   : > { %v2847_v26 = vrot.slane %v2846_v21, 4  ;;  %v2840_v6 = vrot.slane %v2839_v62, 2 }
 0x630   : > { %v3353_v39 = vrot.slane %v3352_v53, 2  ;;  %v3346_v51 = vrot.slane %v3345_v48, 1 }
 0x631   : > { %v2848_v20 = vadd.f32 %v2847_v26, %v2846_v21  ;;  %v2841_v28 = vadd.f32 %v2840_v6, %v2839_v62 }
 0x632   : > { %v3354_v16 = vadd.f32 %v3353_v39, %v3352_v53  ;;  %v3347_v31 = vadd.f32 %v3346_v51, %v3345_v48  ;;  %v5350_v53 = vld [vmem:[%s6536_s17 + $0x10] sm:$0xff] }
 0x633   : > { %v2849_v40 = vrot.slane %v2848_v20, 2  ;;  %v2842_v27 = vrot.slane %v2841_v28, 1 }
 0x634   : > { %v3355_v41 = vrot.slane %v3354_v16, 1 }
 0x635   : > { %v2850_v42 = vadd.f32 %v2849_v40, %v2848_v20  ;;  %v2843_v24 = vadd.f32 %v2842_v27, %v2841_v28  ;;  %v4801_v40 = vld [vmem:[%s5804_s7 + $0x18] sm:$0xff] }
 0x636   : > { %v3356_v43 = vadd.f32 %v3355_v41, %v3354_v16 }
 0x637   : > { %v2851_v44 = vrot.slane %v2850_v42, 1 }
 0x638   : > { %3387 = vrot.lane.b32.xlu1 %v3356_v43, %s5590_s10 }
 0x639   : > { %v2852_v45 = vadd.f32 %v2851_v44, %v2850_v42 }
 0x63b   : > { %2883 = vrot.lane.b32.xlu0 %v2852_v45, %s5590_s10 }
 0x63c   : > { %3390 = vrot.lane.b32.xlu1 %v3356_v43, %s5589_s9 }
 0x63f   : > { %2886 = vrot.lane.b32.xlu0 %v2852_v45, %s5589_s9 }
 0x640   : > { %3393 = vrot.lane.b32.xlu1 %v3356_v43, %s5588_s12 }
 0x643   : > { %2889 = vrot.lane.b32.xlu0 %v2852_v45, %s5588_s12 }
 0x644   : > { %3396 = vrot.lane.b32.xlu1 %v3356_v43, %s5587_s26 }
 0x647   : > { %2892 = vrot.lane.b32.xlu0 %v2852_v45, %s5587_s26 }
 0x648   : > { %3399 = vrot.lane.b32.xlu1 %v3356_v43, %s5586_s11 }
 0x64b   : > { %2895 = vrot.lane.b32.xlu0 %v2852_v45, %s5586_s11 }
 0x64c   : > { %3402 = vrot.lane.b32.xlu1 %v3356_v43, %s5584_s29 }
 0x64f   : > { %2898 = vrot.lane.b32.xlu0 %v2852_v45, %s5584_s29 }
 0x650   : > { %3405 = vrot.lane.b32.xlu1 %v3356_v43, %s7478_s28 }
 0x653   : > { %2901 = vrot.lane.b32.xlu0 %v2852_v45, %s7478_s28 }
 0x654   : > { %2857 = vrot.lane.b32.xlu1 %v2843_v24, %s5589_s9 }
 0x657   : > { %2854 = vrot.lane.b32.xlu0 %v2843_v24, %s5590_s10 }
 0x658   : > { %2860 = vrot.lane.b32.xlu1 %v2843_v24, %s5588_s12 }
 0x65b   : > { %3358 = vrot.lane.b32.xlu0 %v3347_v31, %s5590_s10 }
 0x65c   : > { %2863 = vrot.lane.b32.xlu1 %v2843_v24, %s5587_s26 }
 0x65f   : > { %3361 = vrot.lane.b32.xlu0 %v3347_v31, %s5589_s9 }
 0x660   : > { %2866 = vrot.lane.b32.xlu1 %v2843_v24, %s5586_s11 }
 0x663   : > { %3364 = vrot.lane.b32.xlu0 %v3347_v31, %s5588_s12 }
 0x664   : > { %2869 = vrot.lane.b32.xlu1 %v2843_v24, %s5584_s29 }
 0x667   : > { %3367 = vrot.lane.b32.xlu0 %v3347_v31, %s5587_s26 }
 0x668   : > { %2872 = vrot.lane.b32.xlu1 %v2843_v24, %s7478_s28 }
 0x66b   : > { %3370 = vrot.lane.b32.xlu0 %v3347_v31, %s5586_s11 }
 0x66c   : > { %3376 = vrot.lane.b32.xlu1 %v3347_v31, %s7478_s28 }
 0x66f   : > { %3373 = vrot.lane.b32.xlu0 %v3347_v31, %s5584_s29 }
 0x6aa   : > { %v3388_v10 = vpop.permute.xlu1 %3387 }
 0x6ab   : > { %v3408_v54 = vsel %vm811_vm7, %v3356_v43, %v3388_v10 }
 0x6ad   : > { %v2884_v58 = vpop.permute.xlu0 %2883 }
 0x6ae   : > { %v3391_v4 = vpop.permute.xlu1 %3390  ;;  %v2904_v25 = vsel %vm811_vm7, %v2852_v45, %v2884_v58  ;;  %v4792_v45 = vld [vmem:[%s5804_s7 + $0x10] sm:$0xff] }
 0x6af   : > { %v3409_v29 = vsel %vm813_vm8, %v3408_v54, %v3391_v4 }
 0x6b1   : > { %v2887_v50 = vpop.permute.xlu0 %2886 }
 0x6b2   : > { %v3394_v30 = vpop.permute.xlu1 %3393  ;;  %v2905_v49 = vsel %vm813_vm8, %v2904_v25, %v2887_v50 }
 0x6b3   : > { %v3410_v5 = vsel %vm815_vm9, %v3409_v29, %v3394_v30 }
 0x6b5   : > { %v2890_v61 = vpop.permute.xlu0 %2889 }
 0x6b6   : > { %v3397_v23 = vpop.permute.xlu1 %3396  ;;  %v2906_v35 = vsel %vm815_vm9, %v2905_v49, %v2890_v61 }
 0x6b7   : > { %v3411_v46 = vsel %vm817_vm10, %v3410_v5, %v3397_v23 }
 0x6b9   : > { %v2893_v33 = vpop.permute.xlu0 %2892 }
 0x6ba   : > { %v3400_v1 = vpop.permute.xlu1 %3399  ;;  %v2907_v36 = vsel %vm817_vm10, %v2906_v35, %v2893_v33 }
 0x6bb   : > { %v3412_v15 = vsel %vm819_vm11, %v3411_v46, %v3400_v1 }
 0x6bd   : > { %v2896_v57 = vpop.permute.xlu0 %2895 }
 0x6be   : > { %v3403_v63 = vpop.permute.xlu1 %3402  ;;  %v2908_v32 = vsel %vm819_vm11, %v2907_v36, %v2896_v57 }
 0x6bf   : > { %v3413_v60 = vsel %vm821_vm12, %v3412_v15, %v3403_v63 }
 0x6c1   : > { %v2899_v3 = vpop.permute.xlu0 %2898 }
 0x6c2   : > { %v3406_v22 = vpop.permute.xlu1 %3405  ;;  %v2909_v55 = vsel %vm821_vm12, %v2908_v32, %v2899_v3 }
 0x6c3   : > { %v3414_v37 = vsel %vm823_vm13, %v3413_v60, %v3406_v22 }
 0x6c4   : > { %v3418_v0 = vadd.f32 %v5349_v56, %v3414_v37 }
 0x6c5   : > { %v2902_v38 = vpop.permute.xlu0 %2901 }
 0x6c6   : > { %4790 = vst.msk [vmem:[%s6878_s14 + $0x18] sm:$0xff] %vm583_vm0, %v3418_v0  ;;  %v2910_v34 = vsel %vm823_vm13, %v2909_v55, %v2902_v38  ;;  %v2858_v21 = vpop.permute.xlu1 %2857 }
 0x6c7   : > { %v2913_v26 = vadd.f32 %v5350_v53, %v2910_v34 }
 0x6c9   : > { %4780 = vst.msk [vmem:[%s6878_s14 + $0x10] sm:$0xff] %vm583_vm0, %v2913_v26  ;;  %v2855_v39 = vpop.permute.xlu0 %2854 }
 0x6ca   : > { %v2875_v20 = vsel %vm811_vm7, %v2843_v24, %v2855_v39  ;;  %v2861_v16 = vpop.permute.xlu1 %2860 }
 0x6cb   : > { %v2876_v42 = vsel %vm813_vm8, %v2875_v20, %v2858_v21 }
 0x6cc   : > { %v2877_v9 = vsel %vm815_vm9, %v2876_v42, %v2861_v16 }
 0x6cd   : > { %v6889_v41 = vld [vmem:[%s6878_s14 + $0x18] sm:$0xff]  ;;  %v3359_v43 = vpop.permute.xlu0 %3358 }
 0x6ce   : > { %v6893_v44 = vadd.f32 %v4801_v40, %v6889_v41  ;;  %v2864_v62 = vpop.permute.xlu1 %2863  ;;  %v3379_v47 = vsel %vm811_vm7, %v3347_v31, %v3359_v43 }
 0x6cf   : > { %v2878_v6 = vsel %vm817_vm10, %v2877_v9, %v2864_v62 }
 0x6d0   : > { %v6900_v2 = vld [vmem:[%s6878_s14 + $0x10] sm:$0xff]  ;;  %v3986_v28 = vrot.slane %v6893_v44, %v5822_v8  ;;  %v4010_v59 = vrot.slane %v6893_v44, %v5819_v7  ;;  %v6908_v27 = vrot.slane %v6893_v44, %v5828_v11  ;;  %v6912_v48 = vrot.slane %v6893_v44, %v5831_v12 }
 0x6d1   : > { %v6915_v24 = vadd.f32 %v4792_v45, %v6900_v2  ;;  %v3362_v51 = vpop.permute.xlu0 %3361  ;;  %v6919_v31 = vrot.slane %v6893_v44, %v5845_v17  ;;  %v6923_v10 = vrot.slane %v6893_v44, %v5848_v18  ;;  %v6927_v58 = vrot.slane %v6893_v44, %v5851_v19 }
 0x6d2   : > { %v3380_v4 = vsel %vm813_vm8, %v3379_v47, %v3362_v51  ;;  %v2867_v50 = vpop.permute.xlu1 %2866  ;;  %v3987_v30 = vsub.f32 %v5834_v13, %v3986_v28  ;;  %v3988_v61 = vsub.f32 %v5836_v14, %v3986_v28  ;;  %v4011_v23 = vsub.f32 %v5834_v13, %v4010_v59 }
 0x6d3   : > { %v2879_v33 = vsel %vm819_vm11, %v2878_v6, %v2867_v50  ;;  %v3470_v1 = vrot.slane %v6915_v24, %v5822_v8  ;;  %v4012_v54 = vsub.f32 %v5836_v14, %v4010_v59  ;;  %v3494_v57 = vrot.slane %v6915_v24, %v5819_v7 }
 0x6d4   : > { %v3989_v29 = vand.u32 2147483647, %v3987_v30  ;;  %v3990_v63 = vand.u32 2147483647, %v3988_v61  ;;  %v4013_v5 = vand.u32 2147483647, %v4011_v23  ;;  %v3518_v25 = vrot.slane %v6915_v24, %v5828_v11 }
 0x6d5   : > { %v3365_v46 = vpop.permute.xlu0 %3364  ;;  %v3471_v49 = vsub.f32 %v5834_v13, %v3470_v1  ;;  %v3472_v15 = vsub.f32 %v5836_v14, %v3470_v1  ;;  %v4014_v3 = vand.u32 2147483647, %v4012_v54  ;;  %v3495_v35 = vsub.f32 %v5834_v13, %v3494_v57 }
 0x6d6   : > { %v3381_v60 = vsel %vm815_vm9, %v3380_v4, %v3365_v46  ;;  %v2870_v22 = vpop.permute.xlu1 %2869  ;;  %v3991_v36 = vsub.f32 1.0, %v3989_v29  ;;  %v3992_v37 = vsub.f32 1.0, %v3990_v63  ;;  %v4015_v32 = vsub.f32 1.0, %v4013_v5  ;;  %v5351_v4 = vld [vmem:[%s6536_s17] sm:$0xff] }
 0x6d7   : > { %v2880_v56 = vsel %vm821_vm12, %v2879_v33, %v2870_v22  ;;  %v3473_v0 = vand.u32 2147483647, %v3471_v49  ;;  %v3474_v55 = vand.u32 2147483647, %v3472_v15  ;;  %v4016_v38 = vsub.f32 1.0, %v4014_v3 }
 0x6d8   : > { %v3993_v34 = vmax.f32 %v3991_v36, 0.0  ;;  %v3994_v21 = vmax.f32 %v3992_v37, 0.0  ;;  %v4017_v53 = vmax.f32 %v4015_v32, 0.0  ;;  %v3496_v26 = vsub.f32 %v5836_v14, %v3494_v57 }
 0x6d9   : > { %v3368_v39 = vpop.permute.xlu0 %3367  ;;  %v3475_v20 = vsub.f32 1.0, %v3473_v0  ;;  %v3476_v16 = vsub.f32 1.0, %v3474_v55  ;;  %v4018_v40 = vmax.f32 %v4016_v38, 0.0  ;;  %v3497_v42 = vand.u32 2147483647, %v3495_v35 }
 0x6da   : > { %v3382_v43 = vsel %vm817_vm10, %v3381_v60, %v3368_v39  ;;  %v2873_v45 = vpop.permute.xlu1 %2872  ;;  %v5280_v9 = vpack.i.bf16 %v3994_v21, %v3993_v34  ;;  %v3498_v62 = vand.u32 2147483647, %v3496_v26  ;;  %v3519_v47 = vsub.f32 %v5834_v13, %v3518_v25 }
 0x6db   : > { %v2881_v6 = vsel %vm823_vm13, %v2880_v56, %v2873_v45  ;;  %v3477_v28 = vmax.f32 %v3475_v20, 0.0  ;;  %v3478_v59 = vmax.f32 %v3476_v16, 0.0  ;;  %v5290_v51 = vpack.i.bf16 %v4018_v40, %v4017_v53  ;;  %v5352_v40 = vld [vmem:[%s6536_s17 + $0x8] sm:$0xff] }
 0x6dc   : > { %v2911_v50 = vadd.f32 %v5351_v4, %v2881_v6  ;;  %5281 = vrot.lane.b32.xlu0 %v5280_v9, %s7478_s28  ;;  %v3499_v30 = vsub.f32 1.0, %v3497_v42  ;;  %v3500_v61 = vsub.f32 1.0, %v3498_v62  ;;  %v3520_v23 = vsub.f32 %v5836_v14, %v3518_v25 }
 0x6dd   : > { %v3371_v33 = vpop.permute.xlu0 %3370  ;;  %v5275_v1 = vpack.i.bf16 %v3478_v59, %v3477_v28  ;;  %v3521_v54 = vand.u32 2147483647, %v3519_v47  ;;  %v4035_v57 = vsub.f32 %v5834_v13, %v6908_v27  ;;  %v4036_v29 = vsub.f32 %v5836_v14, %v6908_v27 }
 0x6de   : > { %2912 = vst.msk [vmem:[%s6878_s14] sm:$0xff] %vm583_vm0, %v2911_v50  ;;  %v3383_v63 = vsel %vm819_vm11, %v3382_v43, %v3371_v33  ;;  %v3501_v5 = vmax.f32 %v3499_v30, 0.0  ;;  %v3502_v46 = vmax.f32 %v3500_v61, 0.0  ;;  %v3522_v49 = vand.u32 2147483647, %v3520_v23  ;;  %v3377_v60 = vpop.permute.xlu1 %3376 }
 0x6df   : > { %5276 = vrot.lane.b32.xlu1 %v5275_v1, %s7478_s28  ;;  %v3523_v15 = vsub.f32 1.0, %v3521_v54  ;;  %v4037_v25 = vand.u32 2147483647, %v4035_v57  ;;  %v4038_v3 = vand.u32 2147483647, %v4036_v29  ;;  %v3542_v35 = vrot.slane %v6915_v24, %v5831_v12 }
 0x6e0   : > { %5291 = vrot.lane.b32.xlu0 %v5290_v51, %s5584_s29  ;;  %v5285_v22 = vpack.i.bf16 %v3502_v46, %v3501_v5  ;;  %v3524_v27 = vsub.f32 1.0, %v3522_v49  ;;  %v4059_v36 = vsub.f32 %v5834_v13, %v6912_v48  ;;  %v4060_v37 = vsub.f32 %v5836_v14, %v6912_v48 }
 0x6e1   : > { %v3374_v32 = vpop.permute.xlu0 %3373  ;;  %v3525_v56 = vmax.f32 %v3523_v15, 0.0  ;;  %v4039_v0 = vsub.f32 1.0, %v4037_v25  ;;  %v4040_v55 = vsub.f32 1.0, %v4038_v3  ;;  %v3543_v38 = vsub.f32 %v5834_v13, %v3542_v35 }
 0x6e2   : > { %v3384_v34 = vsel %vm821_vm12, %v3383_v63, %v3374_v32  ;;  %v3526_v21 = vmax.f32 %v3524_v27, 0.0  ;;  %v3544_v53 = vsub.f32 %v5836_v14, %v3542_v35  ;;  %v4061_v26 = vand.u32 2147483647, %v4059_v36 }
 0x6e3   : > { %v3385_v39 = vsel %vm823_vm13, %v3384_v34, %v3377_v60  ;;  %5286 = vrot.lane.b32.xlu1 %v5285_v22, %s5584_s29  ;;  %v4041_v20 = vmax.f32 %v4039_v0, 0.0  ;;  %v4042_v48 = vmax.f32 %v4040_v55, 0.0  ;;  %v3545_v16 = vand.u32 2147483647, %v3543_v38 }
 0x6e4   : > { %v3415_v42 = vadd.f32 %v5352_v40, %v3385_v39  ;;  %v5295_v43 = vpack.i.bf16 %v3526_v21, %v3525_v56  ;;  %v3546_v45 = vand.u32 2147483647, %v3544_v53  ;;  %v4062_v9 = vand.u32 2147483647, %v4060_v37 }
 0x6e5   : > { %v6975_v62 = vld [vmem:[%s6878_s14] sm:$0xff]  ;;  %v5300_v47 = vpack.i.bf16 %v4042_v48, %v4041_v20  ;;  %v3547_v6 = vsub.f32 1.0, %v3545_v16  ;;  %v4063_v28 = vsub.f32 1.0, %v4061_v26  ;;  %v3566_v59 = vrot.slane %v6915_v24, %v5845_v17 }
 0x6e6   : > { %4789 = vst.msk [vmem:[%s6878_s14 + $0x8] sm:$0xff] %vm583_vm0, %v3415_v42  ;;  %5296 = vrot.lane.b32.xlu0 %v5295_v43, %s5586_s11  ;;  %4940 = vmatprep.mubr.msk.f32.mxu0 %vm583_vm0, %v6975_v62  ;;  %v3548_v51 = vsub.f32 1.0, %v3546_v45  ;;  %v4064_v4 = vsub.f32 1.0, %v4062_v9  ;;  %v4083_v50 = vsub.f32 %v5834_v13, %v6919_v31  ;;  %v4084_v30 = vsub.f32 %v5836_v14, %v6919_v31 }
 0x6e7   : > { %5301 = vrot.lane.b32.xlu1 %v5300_v47, %s5586_s11  ;;  %4950 = vmatprep.mubr.msk.f32.mxu1 %vm583_vm0, %v6975_v62  ;;  %v3549_v61 = vmax.f32 %v3547_v6, 0.0  ;;  %v4065_v23 = vmax.f32 %v4063_v28, 0.0  ;;  %v3567_v33 = vsub.f32 %v5834_v13, %v3566_v59  ;;  %v3568_v1 = vsub.f32 %v5836_v14, %v3566_v59  ;;  %v4800_v28 = vld [vmem:[%s5804_s7 + $0x8] sm:$0xff] }
 0x6e8   : > { %v3550_v54 = vmax.f32 %v3548_v51, 0.0  ;;  %v4066_v57 = vmax.f32 %v4064_v4, 0.0  ;;  %v4085_v29 = vand.u32 2147483647, %v4083_v50  ;;  %v4086_v63 = vand.u32 2147483647, %v4084_v30 }
 0x6e9   : > { %v3569_v5 = vand.u32 2147483647, %v3567_v33  ;;  %v3570_v46 = vand.u32 2147483647, %v3568_v1  ;;  %v3590_v31 = vrot.slane %v6915_v24, %v5848_v18  ;;  %v4107_v49 = vsub.f32 %v5834_v13, %v6923_v10 }
 0x6ea   : > { %v5305_v15 = vpack.i.bf16 %v3550_v54, %v3549_v61  ;;  %v5310_v25 = vpack.i.bf16 %v4066_v57, %v4065_v23  ;;  %v4087_v3 = vsub.f32 1.0, %v4085_v29  ;;  %v4088_v35 = vsub.f32 1.0, %v4086_v63 }
 0x6eb   : > { %v3571_v60 = vsub.f32 1.0, %v3569_v5  ;;  %v3572_v22 = vsub.f32 1.0, %v3570_v46  ;;  %v3591_v27 = vsub.f32 %v5834_v13, %v3590_v31  ;;  %v3592_v36 = vsub.f32 %v5836_v14, %v3590_v31 }
 0x6ec   : > { %5306 = vrot.lane.b32.xlu0 %v5305_v15, %s5587_s26  ;;  %5311 = vrot.lane.b32.xlu1 %v5310_v25, %s5587_s26  ;;  %v4089_v37 = vmax.f32 %v4087_v3, 0.0  ;;  %v4090_v32 = vmax.f32 %v4088_v35, 0.0  ;;  %v4108_v56 = vsub.f32 %v5836_v14, %v6923_v10  ;;  %v4109_v0 = vand.u32 2147483647, %v4107_v49  ;;  %v3427_v10 = vld [vmem:[%s5804_s7] sm:$0xff] }
 0x6ed   : > { %v3573_v55 = vmax.f32 %v3571_v60, 0.0  ;;  %v3574_v38 = vmax.f32 %v3572_v22, 0.0  ;;  %v3593_v34 = vand.u32 2147483647, %v3591_v27  ;;  %v3594_v21 = vand.u32 2147483647, %v3592_v36 }
 0x6ee   : > { %v5320_v53 = vpack.i.bf16 %v4090_v32, %v4089_v37  ;;  %v4110_v26 = vand.u32 2147483647, %v4108_v56  ;;  %v4111_v39 = vsub.f32 1.0, %v4109_v0  ;;  %v3614_v20 = vrot.slane %v6915_v24, %v5851_v19  ;;  %v7012_v6 = vld [vmem:[%s6878_s14 + $0x8] sm:$0xff] }
 0x6ef   : > { %v5315_v48 = vpack.i.bf16 %v3574_v38, %v3573_v55  ;;  %v3595_v16 = vsub.f32 1.0, %v3593_v34  ;;  %v3596_v40 = vsub.f32 1.0, %v3594_v21  ;;  %v4131_v42 = vsub.f32 %v5834_v13, %v6927_v58 }
 0x6f0   : > { %5321 = vrot.lane.b32.xlu1 %v5320_v53, %s5588_s12  ;;  %v4112_v43 = vsub.f32 1.0, %v4110_v26  ;;  %v4113_v45 = vmax.f32 %v4111_v39, 0.0  ;;  %v3615_v9 = vsub.f32 %v5834_v13, %v3614_v20  ;;  %v3616_v47 = vsub.f32 %v5836_v14, %v3614_v20 }
 0x6f1   : > { %5316 = vrot.lane.b32.xlu0 %v5315_v48, %s5588_s12  ;;  %v3597_v59 = vmax.f32 %v3595_v16, 0.0  ;;  %v3598_v51 = vmax.f32 %v3596_v40, 0.0  ;;  %v4132_v4 = vsub.f32 %v5836_v14, %v6927_v58  ;;  %v4133_v50 = vand.u32 2147483647, %v4131_v42 }
 0x6f2   : > { %v4114_v30 = vmax.f32 %v4112_v43, 0.0  ;;  %v3617_v61 = vand.u32 2147483647, %v3615_v9  ;;  %v3618_v23 = vand.u32 2147483647, %v3616_v47  ;;  %v7019_v33 = vadd.f32 %v3427_v10, %v6975_v62 }
 0x6f3   : > { %v5325_v1 = vpack.i.bf16 %v3598_v51, %v3597_v59  ;;  %v4134_v54 = vand.u32 2147483647, %v4132_v4  ;;  %v4135_v57 = vsub.f32 1.0, %v4133_v50  ;;  %v7022_v29 = vadd.f32 %v4800_v28, %v7012_v6 }
 0x6f4   : > { %v5330_v63 = vpack.i.bf16 %v4114_v30, %v4113_v45  ;;  %v3619_v5 = vsub.f32 1.0, %v3617_v61  ;;  %v3620_v46 = vsub.f32 1.0, %v3618_v23  ;;  %v3458_v31 = vrot.slane %v7019_v33, %v5822_v8 }
 0x6f5   : > { %5326 = vrot.lane.b32.xlu0 %v5325_v1, %s5589_s9  ;;  %v4136_v58 = vsub.f32 1.0, %v4134_v54  ;;  %v4137_v49 = vmax.f32 %v4135_v57, 0.0  ;;  %v3974_v62 = vrot.slane %v7022_v29, %v5822_v8  ;;  %v3482_v15 = vrot.slane %v7019_v33, %v5819_v7 }
 0x6f6   : > { %5331 = vrot.lane.b32.xlu1 %v5330_v63, %s5589_s9  ;;  %v3621_v25 = vmax.f32 %v3619_v5, 0.0  ;;  %v3622_v3 = vmax.f32 %v3620_v46, 0.0  ;;  %v3460_v35 = vsub.f32 %v5836_v14, %v3458_v31  ;;  %v3459_v60 = vsub.f32 %v5834_v13, %v3458_v31 }
 0x6f7   : > { %v4138_v22 = vmax.f32 %v4136_v58, 0.0  ;;  %v3976_v27 = vsub.f32 %v5836_v14, %v3974_v62  ;;  %v3975_v36 = vsub.f32 %v5834_v13, %v3974_v62  ;;  %v3484_v37 = vsub.f32 %v5836_v14, %v3482_v15 }
 0x6f8   : > { %v5335_v32 = vpack.i.bf16 %v3622_v3, %v3621_v25  ;;  %v3462_v8 = vand.u32 2147483647, %v3460_v35  ;;  %v3461_v56 = vand.u32 2147483647, %v3459_v60  ;;  %v3483_v0 = vsub.f32 %v5834_v13, %v3482_v15 }
 0x6f9   : > { %v5340_v55 = vpack.i.bf16 %v4138_v22, %v4137_v49  ;;  %v3978_v38 = vand.u32 2147483647, %v3976_v27  ;;  %v3977_v34 = vand.u32 2147483647, %v3975_v36  ;;  %v3998_v26 = vrot.slane %v7022_v29, %v5819_v7 }
 0x6fa   : > { %5336 = vrot.lane.b32.xlu0 %v5335_v32, %s5590_s10  ;;  %v3464_v21 = vsub.f32 1.0, %v3462_v8  ;;  %v3463_v53 = vsub.f32 1.0, %v3461_v56  ;;  %v3485_v39 = vand.u32 2147483647, %v3483_v0  ;;  %v3486_v16 = vand.u32 2147483647, %v3484_v37 }
 0x6fb   : > { %5341 = vrot.lane.b32.xlu1 %v5340_v55, %s5590_s10  ;;  %v3979_v48 = vsub.f32 1.0, %v3977_v34  ;;  %v3506_v40 = vrot.slane %v7019_v33, %v5828_v11  ;;  %v3980_v10 = vsub.f32 1.0, %v3978_v38  ;;  %v4000_v43 = vsub.f32 %v5836_v14, %v3998_v26 }
 0x6fc   : > { %v3465_v20 = vmax.f32 %v3463_v53, 0.0  ;;  %v3466_v42 = vmax.f32 %v3464_v21, 0.0  ;;  %v3999_v45 = vsub.f32 %v5834_v13, %v3998_v26  ;;  %v3487_v7 = vsub.f32 1.0, %v3485_v39 }
 0x6fd   : > { %v3981_v9 = vmax.f32 %v3979_v48, 0.0  ;;  %v3507_v28 = vsub.f32 %v5834_v13, %v3506_v40  ;;  %v4022_v59 = vrot.slane %v7022_v29, %v5828_v11  ;;  %v3982_v51 = vmax.f32 %v3980_v10, 0.0 }
 0x6fe   : > { %3625 = vrot.lane.b32.xlu0 %v3465_v20, %s7478_s28  ;;  %v4001_v47 = vand.u32 2147483647, %v3999_v45  ;;  %v3488_v4 = vsub.f32 1.0, %v3486_v16  ;;  %v4002_v50 = vand.u32 2147483647, %v4000_v43  ;;  %v3508_v30 = vsub.f32 %v5836_v14, %v3506_v40 }
 0x6ff   : > { %3627 = vrot.lane.b32.xlu1 %v3466_v42, %s7478_s28  ;;  %v3489_v61 = vmax.f32 %v3487_v7, 0.0  ;;  %v3509_v1 = vand.u32 2147483647, %v3507_v28  ;;  %v4023_v54 = vsub.f32 %v5834_v13, %v4022_v59  ;;  %v3530_v57 = vrot.slane %v7019_v33, %v5831_v12 }
 0x700   : > { %v4003_v23 = vsub.f32 1.0, %v4001_v47  ;;  %v3490_v63 = vmax.f32 %v3488_v4, 0.0  ;;  %v4004_v5 = vsub.f32 1.0, %v4002_v50  ;;  %v3510_v11 = vand.u32 2147483647, %v3508_v30 }
 0x701   : > { %v4024_v46 = vsub.f32 %v5836_v14, %v4022_v59  ;;  %v4046_v31 = vrot.slane %v7022_v29, %v5831_v12  ;;  %v3511_v49 = vsub.f32 1.0, %v3509_v1  ;;  %v4025_v62 = vand.u32 2147483647, %v4023_v54 }
 0x702   : > { %4141 = vrot.lane.b32.xlu0 %v3981_v9, %s7478_s28  ;;  %v4005_v58 = vmax.f32 %v4003_v23, 0.0  ;;  %v3531_v15 = vsub.f32 %v5834_v13, %v3530_v57  ;;  %v4006_v25 = vmax.f32 %v4004_v5, 0.0  ;;  %v3512_v3 = vsub.f32 1.0, %v3510_v11 }
 0x703   : > { %4143 = vrot.lane.b32.xlu1 %v3982_v51, %s7478_s28  ;;  %v4026_v35 = vand.u32 2147483647, %v4024_v46  ;;  %v3532_v60 = vsub.f32 %v5836_v14, %v3530_v57  ;;  %v3554_v22 = vrot.slane %v7019_v33, %v5845_v17  ;;  %v3513_v27 = vmax.f32 %v3511_v49, 0.0 }
 0x704   : > { %v4027_v36 = vsub.f32 1.0, %v4025_v62  ;;  %v3533_v12 = vand.u32 2147483647, %v3531_v15  ;;  %v4047_v37 = vsub.f32 %v5834_v13, %v4046_v31  ;;  %v3514_v32 = vmax.f32 %v3512_v3, 0.0 }
 0x705   : > { %v4028_v8 = vsub.f32 1.0, %v4026_v35  ;;  %v3534_v56 = vand.u32 2147483647, %v3532_v60  ;;  %v4048_v0 = vsub.f32 %v5836_v14, %v4046_v31  ;;  %v3555_v55 = vsub.f32 %v5834_v13, %v3554_v22 }
 0x706   : > { %3633 = vrot.lane.b32.xlu0 %v3489_v61, %s5584_s29  ;;  %v4029_v38 = vmax.f32 %v4027_v36, 0.0  ;;  %v3535_v34 = vsub.f32 1.0, %v3533_v12  ;;  %v4049_v21 = vand.u32 2147483647, %v4047_v37  ;;  %v4070_v53 = vrot.slane %v7022_v29, %v5845_v17 }
 0x707   : > { %3635 = vrot.lane.b32.xlu1 %v3490_v63, %s5584_s29  ;;  %v4030_v26 = vmax.f32 %v4028_v8, 0.0  ;;  %v3536_v39 = vsub.f32 1.0, %v3534_v56  ;;  %v4050_v20 = vand.u32 2147483647, %v4048_v0  ;;  %v3556_v48 = vsub.f32 %v5836_v14, %v3554_v22 }
 0x708   : > { %v3557_v16 = vand.u32 2147483647, %v3555_v55  ;;  %v3537_v40 = vmax.f32 %v3535_v34, 0.0  ;;  %v4051_v42 = vsub.f32 1.0, %v4049_v21  ;;  %v4071_v10 = vsub.f32 %v5834_v13, %v4070_v53 }
 0x709   : > { %v3578_v43 = vrot.slane %v7019_v33, %v5848_v18  ;;  %v3538_v45 = vmax.f32 %v3536_v39, 0.0  ;;  %v4052_v7 = vsub.f32 1.0, %v4050_v20  ;;  %v3558_v17 = vand.u32 2147483647, %v3556_v48 }
 0x70a   : > { %4149 = vrot.lane.b32.xlu0 %v4005_v58, %s5584_s29  ;;  %v4072_v9 = vsub.f32 %v5836_v14, %v4070_v53  ;;  %v3559_v47 = vsub.f32 1.0, %v3557_v16  ;;  %v4053_v28 = vmax.f32 %v4051_v42, 0.0  ;;  %v4073_v59 = vand.u32 2147483647, %v4071_v10 }
 0x70b   : > { %4151 = vrot.lane.b32.xlu1 %v4006_v25, %s5584_s29  ;;  %v3579_v51 = vsub.f32 %v5834_v13, %v3578_v43  ;;  %v4094_v4 = vrot.slane %v7022_v29, %v5848_v18  ;;  %v4054_v50 = vmax.f32 %v4052_v7, 0.0  ;;  %v3560_v30 = vsub.f32 1.0, %v3558_v17 }
 0x70c   : > { %v4074_v61 = vand.u32 2147483647, %v4072_v9  ;;  %v3580_v23 = vsub.f32 %v5836_v14, %v3578_v43  ;;  %v3602_v1 = vrot.slane %v7019_v33, %v5851_v19  ;;  %v3561_v54 = vmax.f32 %v3559_v47, 0.0 }
 0x70d   : > { %v4075_v57 = vsub.f32 1.0, %v4073_v59  ;;  %v3581_v63 = vand.u32 2147483647, %v3579_v51  ;;  %v4095_v5 = vsub.f32 %v5834_v13, %v4094_v4  ;;  %v3562_v11 = vmax.f32 %v3560_v30, 0.0 }
 0x70e   : > { %3641 = vrot.lane.b32.xlu0 %v3513_v27, %s5586_s11  ;;  %v4076_v46 = vsub.f32 1.0, %v4074_v61  ;;  %v3582_v18 = vand.u32 2147483647, %v3580_v23  ;;  %v4096_v31 = vsub.f32 %v5836_v14, %v4094_v4  ;;  %v3603_v58 = vsub.f32 %v5834_v13, %v3602_v1 }
 0x70f   : > { %3643 = vrot.lane.b32.xlu1 %v3514_v32, %s5586_s11  ;;  %v4077_v49 = vmax.f32 %v4075_v57, 0.0  ;;  %v3583_v62 = vsub.f32 1.0, %v3581_v63  ;;  %v4097_v15 = vand.u32 2147483647, %v4095_v5  ;;  %v4118_v25 = vrot.slane %v7022_v29, %v5851_v19 }
 0x710   : > { %v4078_v3 = vmax.f32 %v4076_v46, 0.0  ;;  %v3584_v35 = vsub.f32 1.0, %v3582_v18  ;;  %v4098_v60 = vand.u32 2147483647, %v4096_v31  ;;  %v3604_v22 = vsub.f32 %v5836_v14, %v3602_v1 }
 0x711   : > { %v3585_v27 = vmax.f32 %v3583_v62, 0.0  ;;  %v4099_v36 = vsub.f32 1.0, %v4097_v15  ;;  %v3605_v12 = vand.u32 2147483647, %v3603_v58  ;;  %v4119_v37 = vsub.f32 %v5834_v13, %v4118_v25 }
 0x712   : > { %4157 = vrot.lane.b32.xlu0 %v4029_v38, %s5586_s11  ;;  %v3586_v32 = vmax.f32 %v3584_v35, 0.0  ;;  %v4100_v8 = vsub.f32 1.0, %v4098_v60  ;;  %v3606_v56 = vand.u32 2147483647, %v3604_v22  ;;  %v4120_v0 = vsub.f32 %v5836_v14, %v4118_v25 }
 0x713   : > { %4159 = vrot.lane.b32.xlu1 %v4030_v26, %s5586_s11  ;;  %v4101_v19 = vmax.f32 %v4099_v36, 0.0  ;;  %v3607_v55 = vsub.f32 1.0, %v3605_v12  ;;  %v4121_v38 = vand.u32 2147483647, %v4119_v37  ;;  %v3962_v43 = vrot.slane %v6893_v44, %v6030_v52 }
 0x714   : > { %v4102_v34 = vmax.f32 %v4100_v8, 0.0  ;;  %v3608_v21 = vsub.f32 1.0, %v3606_v56  ;;  %v4122_v53 = vand.u32 2147483647, %v4120_v0  ;;  %v3446_v7 = vrot.slane %v6915_v24, %v6030_v52 }
 0x715   : > { %v3609_v26 = vmax.f32 %v3607_v55, 0.0  ;;  %v4123_v39 = vsub.f32 1.0, %v4121_v38  ;;  %v3963_v9 = vsub.f32 %v5834_v13, %v3962_v43  ;;  %v3964_v47 = vsub.f32 %v5836_v14, %v3962_v43 }
 0x716   : > { %3649 = vrot.lane.b32.xlu0 %v3537_v40, %s5587_s26  ;;  %v3610_v20 = vmax.f32 %v3608_v21, 0.0  ;;  %v4124_v48 = vsub.f32 1.0, %v4122_v53  ;;  %v3448_v59 = vsub.f32 %v5836_v14, %v3446_v7 }
 0x717   : > { %3651 = vrot.lane.b32.xlu1 %v3538_v45, %s5587_s26  ;;  %v4125_v16 = vmax.f32 %v4123_v39, 0.0  ;;  %v3966_v30 = vand.u32 2147483647, %v3964_v47 }
 0x718   : > { %v4126_v40 = vmax.f32 %v4124_v48, 0.0  ;;  %v3450_v23 = vand.u32 2147483647, %v3448_v59 }
 0x719   : > { %v3968_v1 = vsub.f32 1.0, %v3966_v30 }
 0x71a   : > { %4165 = vrot.lane.b32.xlu0 %v4053_v28, %s5587_s26  ;;  %v3447_v28 = vsub.f32 %v5834_v13, %v3446_v7  ;;  %v3452_v63 = vsub.f32 1.0, %v3450_v23 }
 0x71b   : > { %4167 = vrot.lane.b32.xlu1 %v4054_v50, %s5587_s26  ;;  %v3965_v50 = vand.u32 2147483647, %v3963_v9  ;;  %v3970_v58 = vmax.f32 %v3968_v1, 0.0 }
 0x71c   : > { %v3449_v61 = vand.u32 2147483647, %v3447_v28 }
 0x71d   : > { %v3967_v44 = vsub.f32 1.0, %v3965_v50 }
 0x71e   : > { %3657 = vrot.lane.b32.xlu0 %v3561_v54, %s5588_s12  ;;  %v3451_v24 = vsub.f32 1.0, %v3449_v61 }
 0x71f   : > { %3659 = vrot.lane.b32.xlu1 %v3562_v11, %s5588_s12  ;;  %v3969_v31 = vmax.f32 %v3967_v44, 0.0 }
 0x720   : > { %v3453_v25 = vmax.f32 %v3451_v24, 0.0 }
 0x722   : > { %4173 = vrot.lane.b32.xlu0 %v4077_v49, %s5588_s12 }
 0x723   : > { %4175 = vrot.lane.b32.xlu1 %v4078_v3, %s5588_s12  ;;  %v3454_v3 = vmax.f32 %v3452_v63, 0.0 }
 0x726   : > { %3665 = vrot.lane.b32.xlu0 %v3585_v27, %s5589_s9 }
 0x727   : > { %3667 = vrot.lane.b32.xlu1 %v3586_v32, %s5589_s9 }
 0x72a   : > { %4181 = vrot.lane.b32.xlu0 %v4101_v19, %s5589_s9 }
 0x72b   : > { %4183 = vrot.lane.b32.xlu1 %v4102_v34, %s5589_s9 }
 0x72e   : > { %3673 = vrot.lane.b32.xlu0 %v3609_v26, %s5590_s10 }
 0x72f   : > { %3675 = vrot.lane.b32.xlu1 %v3610_v20, %s5590_s10 }
 0x732   : > { %4189 = vrot.lane.b32.xlu0 %v4125_v16, %s5590_s10 }
 0x733   : > { %4191 = vrot.lane.b32.xlu1 %v4126_v40, %s5590_s10 }
 0x74e   : > { %v5282_v42 = vpop.permute.xlu0 %5281 }
 0x74f   : > { %v5284_v5 = vunpack.i.h.bf16 %v5282_v42  ;;  %v5283_v11 = vunpack.i.l.bf16 %v5282_v42 }
 0x751   : > { %v5277_v10 = vpop.permute.xlu1 %5276  ;;  %v4266_v27 = vsel %vm583_vm0, %v3970_v58, %v5284_v5  ;;  %v4265_v36 = vsel %vm583_vm0, %v3969_v31, %v5283_v11 }
 0x752   : > { %v5292_v45 = vpop.permute.xlu0 %5291  ;;  %v5279_v46 = vunpack.i.h.bf16 %v5277_v10  ;;  %v5278_v18 = vunpack.i.l.bf16 %v5277_v10 }
 0x753   : > { %v5294_v49 = vunpack.i.h.bf16 %v5292_v45  ;;  %v5293_v62 = vunpack.i.l.bf16 %v5292_v45 }
 0x754   : > { %v3749_v12 = vsel %vm583_vm0, %v3453_v25, %v5278_v18  ;;  %v3750_v37 = vsel %vm583_vm0, %v3454_v3, %v5279_v46 }
 0x755   : > { %v5287_v17 = vpop.permute.xlu1 %5286  ;;  %v4267_v56 = vsel %vm586_vm1, %v4265_v36, %v5293_v62  ;;  %v4268_v0 = vsel %vm586_vm1, %v4266_v27, %v5294_v49 }
 0x756   : > { %v5289_v35 = vunpack.i.h.bf16 %v5287_v17  ;;  %v5288_v60 = vunpack.i.l.bf16 %v5287_v17 }
 0x758   : > { %v5297_v51 = vpop.permute.xlu0 %5296  ;;  %v3751_v38 = vsel %vm586_vm1, %v3749_v12, %v5288_v60  ;;  %v3752_v34 = vsel %vm586_vm1, %v3750_v37, %v5289_v35 }
 0x759   : > { %v5302_v4 = vpop.permute.xlu1 %5301  ;;  %v5299_v32 = vunpack.i.h.bf16 %v5297_v51  ;;  %v5298_v8 = vunpack.i.l.bf16 %v5297_v51 }
 0x75a   : > { %v5304_v19 = vunpack.i.h.bf16 %v5302_v4  ;;  %v5303_v55 = vunpack.i.l.bf16 %v5302_v4 }
 0x75b   : > { %v3754_v42 = vsel %vm589_vm2, %v3752_v34, %v5299_v32  ;;  %v3753_v10 = vsel %vm589_vm2, %v3751_v38, %v5298_v8 }
 0x75c   : > { %v4269_v7 = vsel %vm589_vm2, %v4267_v56, %v5303_v55  ;;  %v4270_v17 = vsel %vm589_vm2, %v4268_v0, %v5304_v19 }
 0x75e   : > { %v5312_v54 = vpop.permute.xlu1 %5311  ;;  %v5307_v57 = vpop.permute.xlu0 %5306 }
 0x75f   : > { %v5314_v21 = vunpack.i.h.bf16 %v5312_v54  ;;  %v5313_v53 = vunpack.i.l.bf16 %v5312_v54  ;;  %v5309_v39 = vunpack.i.h.bf16 %v5307_v57  ;;  %v5308_v20 = vunpack.i.l.bf16 %v5307_v57 }
 0x761   : > { %v4271_v28 = vsel %vm592_vm3, %v4269_v7, %v5313_v53  ;;  %v4272_v59 = vsel %vm592_vm3, %v4270_v17, %v5314_v21  ;;  %v3755_v50 = vsel %vm592_vm3, %v3753_v10, %v5308_v20  ;;  %v3756_v30 = vsel %vm592_vm3, %v3754_v42, %v5309_v39 }
 0x762   : > { %v5322_v15 = vpop.permute.xlu1 %5321  ;;  %v3434_v20 = vrot.slane %v7019_v33, %v6030_v52 }
 0x763   : > { %v5317_v22 = vpop.permute.xlu0 %5316  ;;  %v5324_v48 = vunpack.i.h.bf16 %v5322_v15  ;;  %v5323_v16 = vunpack.i.l.bf16 %v5322_v15 }
 0x764   : > { %v5319_v43 = vunpack.i.h.bf16 %v5317_v22  ;;  %v5318_v45 = vunpack.i.l.bf16 %v5317_v22  ;;  %v3435_v42 = vsub.f32 %v5834_v13, %v3434_v20 }
 0x765   : > { %v4273_v61 = vsel %vm595_vm4, %v4271_v28, %v5323_v16  ;;  %v4274_v23 = vsel %vm595_vm4, %v4272_v59, %v5324_v48  ;;  %v3950_v48 = vrot.slane %v7022_v29, %v6030_v52  ;;  %v3436_v16 = vsub.f32 %v5836_v14, %v3434_v20 }
 0x766   : > { %v3757_v1 = vsel %vm595_vm4, %v3755_v50, %v5318_v45  ;;  %v3758_v54 = vsel %vm595_vm4, %v3756_v30, %v5319_v43  ;;  %v3437_v17 = vand.u32 2147483647, %v3435_v42 }
 0x767   : > { %v5327_v26 = vpop.permute.xlu0 %5326  ;;  %v3952_v10 = vsub.f32 %v5836_v14, %v3950_v48  ;;  %v3951_v45 = vsub.f32 %v5834_v13, %v3950_v48  ;;  %v3438_v7 = vand.u32 2147483647, %v3436_v16 }
 0x768   : > { %v5332_v40 = vpop.permute.xlu1 %5331  ;;  %v5329_v9 = vunpack.i.h.bf16 %v5327_v26  ;;  %v5328_v47 = vunpack.i.l.bf16 %v5327_v26 }
 0x769   : > { %v5334_v51 = vunpack.i.h.bf16 %v5332_v40  ;;  %v5333_v4 = vunpack.i.l.bf16 %v5332_v40  ;;  %v3440_v33 = vsub.f32 1.0, %v3438_v7 }
 0x76a   : > { %v3759_v5 = vsel %vm598_vm5, %v3757_v1, %v5328_v47  ;;  %v3760_v11 = vsel %vm598_vm5, %v3758_v54, %v5329_v9  ;;  %v3954_v9 = vand.u32 2147483647, %v3952_v10  ;;  %v3953_v47 = vand.u32 2147483647, %v3951_v45 }
 0x76b   : > { %v4275_v31 = vsel %vm598_vm5, %v4273_v61, %v5333_v4  ;;  %v4276_v58 = vsel %vm598_vm5, %v4274_v23, %v5334_v51  ;;  %v3439_v51 = vsub.f32 1.0, %v3437_v17  ;;  %v3442_v29 = vmax.f32 %v3440_v33, 0.0 }
 0x76c   : > { %v5337_v44 = vpop.permute.xlu0 %5336  ;;  %v3956_v4 = vsub.f32 1.0, %v3954_v9  ;;  %v3955_v52 = vsub.f32 1.0, %v3953_v47 }
 0x76d   : > { %v5342_v57 = vpop.permute.xlu1 %5341  ;;  %v5339_v24 = vunpack.i.h.bf16 %v5337_v44  ;;  %v5338_v63 = vunpack.i.l.bf16 %v5337_v44  ;;  %v3441_v30 = vmax.f32 %v3439_v51, 0.0 }
 0x76e   : > { %v5344_v46 = vunpack.i.h.bf16 %v5342_v57  ;;  %v5343_v18 = vunpack.i.l.bf16 %v5342_v57  ;;  %v3958_v61 = vmax.f32 %v3956_v4, 0.0  ;;  %v3957_v44 = vmax.f32 %v3955_v52, 0.0 }
 0x76f   : > { %v3761_v49 = vsel %vm601_vm6, %v3759_v5, %v5338_v63  ;;  %v3762_v62 = vsel %vm601_vm6, %v3760_v11, %v5339_v24 }
 0x770   : > { %v4980_v15 = vpack.c.bf16 %v3762_v62, %v3761_v49  ;;  %v4277_v25 = vsel %vm601_vm6, %v4275_v31, %v5343_v18  ;;  %v4278_v3 = vsel %vm601_vm6, %v4276_v58, %v5344_v46  ;;  %v3626_v22 = vpop.permute.xlu0 %3625 }
 0x771   : > { %v4984_v35 = vpack.c.bf16 %v4278_v3, %v4277_v25  ;;  %v3628_v60 = vpop.permute.xlu1 %3627  ;;  %v3679_v13 = vsel %vm583_vm0, %v3441_v30, %v3626_v22 }
 0x772   : > { %4981 = vmatprep.subr.bf16.mxu0 %v4980_v15  ;;  %v3680_v14 = vsel %vm583_vm0, %v3442_v29, %v3628_v60 }
 0x773   : > { %4985 = vmatprep.subr.bf16.mxu1 %v4984_v35  ;;  %4983 = vmatpush3.bf16.msra.mxu0 %v4980_v15 }
 0x774   : > { %4987 = vmatpush3.bf16.msra.mxu1 %v4984_v35  ;;  %v4142_v36 = vpop.permute.xlu0 %4141 }
 0x775   : > { %v4144_v27 = vpop.permute.xlu1 %4143  ;;  %v4195_v57 = vsel %vm583_vm0, %v3957_v44, %v4142_v36 }
 0x776   : > { %4941 = vmatmul.mubr.msk.f32.vlgmr.msra.gmra.mrb[12].mxu0 %vm583_vm0, %v7012_v6  ;;  %v4196_v1 = vsel %vm583_vm0, %v3958_v61, %v4144_v27 }
 0x777   : > { %4951 = vmatmul.mubr.msk.f32.vlgmr.msra.gmra.mrb[12].mxu1 %vm583_vm0, %v7012_v6  ;;  %4943 = vmatprep.mubr.msk.f32.mxu0 %vm583_vm0, %v6900_v2 }
 0x778   : > { %4953 = vmatprep.mubr.msk.f32.mxu1 %vm583_vm0, %v6900_v2  ;;  %v3634_v37 = vpop.permute.xlu0 %3633 }
 0x779   : > { %v3636_v12 = vpop.permute.xlu1 %3635  ;;  %v3681_v24 = vsel %vm586_vm1, %v3679_v13, %v3634_v37 }
 0x77a   : > { %4944 = vmatmul.mubr.msk.f32.gmra.mrb[14].mxu0 %vm583_vm0, %v6889_v41  ;;  %v3682_v54 = vsel %vm586_vm1, %v3680_v14, %v3636_v12 }
 0x77b   : > { %4954 = vmatmul.mubr.msk.f32.gmra.mrb[14].mxu1 %vm583_vm0, %v6889_v41 }
 0x77c   : > { %v4150_v8 = vpop.permute.xlu0 %4149 }
 0x77d   : > { %v4152_v32 = vpop.permute.xlu1 %4151  ;;  %v4197_v11 = vsel %vm586_vm1, %v4195_v57, %v4150_v8 }
 0x77e   : > { %v4198_v63 = vsel %vm586_vm1, %v4196_v1, %v4152_v32 }
 0x780   : > { %v3642_v0 = vpop.permute.xlu0 %3641 }
 0x781   : > { %v3644_v56 = vpop.permute.xlu1 %3643  ;;  %v3683_v46 = vsel %vm589_vm2, %v3681_v24, %v3642_v0 }
 0x782   : > { %v3684_v5 = vsel %vm589_vm2, %v3682_v54, %v3644_v56 }
 0x784   : > { %v4158_v55 = vpop.permute.xlu0 %4157 }
 0x785   : > { %v4160_v19 = vpop.permute.xlu1 %4159  ;;  %v4199_v58 = vsel %vm589_vm2, %v4197_v11, %v4158_v55 }
 0x786   : > { %v4200_v18 = vsel %vm589_vm2, %v4198_v63, %v4160_v19 }
 0x788   : > { %v3650_v2 = vpop.permute.xlu0 %3649 }
 0x789   : > { %v3652_v38 = vpop.permute.xlu1 %3651  ;;  %v3685_v49 = vsel %vm592_vm3, %v3683_v46, %v3650_v2 }
 0x78a   : > { %v3686_v31 = vsel %vm592_vm3, %v3684_v5, %v3652_v38 }
 0x78c   : > { %v4166_v21 = vpop.permute.xlu0 %4165 }
 0x78d   : > { %v4168_v34 = vpop.permute.xlu1 %4167  ;;  %v4201_v3 = vsel %vm592_vm3, %v4199_v58, %v4166_v21 }
 0x78e   : > { %v4202_v62 = vsel %vm592_vm3, %v4200_v18, %v4168_v34 }
 0x790   : > { %v3658_v26 = vpop.permute.xlu0 %3657 }
 0x791   : > { %v3660_v53 = vpop.permute.xlu1 %3659  ;;  %v3687_v35 = vsel %vm595_vm4, %v3685_v49, %v3658_v26 }
 0x792   : > { %v3688_v15 = vsel %vm595_vm4, %v3686_v31, %v3660_v53 }
 0x794   : > { %v4174_v41 = vpop.permute.xlu0 %4173 }
 0x795   : > { %v4176_v39 = vpop.permute.xlu1 %4175  ;;  %v4203_v36 = vsel %vm595_vm4, %v4201_v3, %v4174_v41 }
 0x796   : > { %v4204_v60 = vsel %vm595_vm4, %v4202_v62, %v4176_v39 }
 0x798   : > { %v3666_v43 = vpop.permute.xlu0 %3665 }
 0x799   : > { %v3668_v40 = vpop.permute.xlu1 %3667  ;;  %v3689_v12 = vsel %vm598_vm5, %v3687_v35, %v3666_v43 }
 0x79a   : > { %v3690_v22 = vsel %vm598_vm5, %v3688_v15, %v3668_v40 }
 0x79c   : > { %v4182_v59 = vpop.permute.xlu0 %4181 }
 0x79d   : > { %v4184_v28 = vpop.permute.xlu1 %4183  ;;  %v4205_v56 = vsel %vm598_vm5, %v4203_v36, %v4182_v59 }
 0x79e   : > { %v4206_v37 = vsel %vm598_vm5, %v4204_v60, %v4184_v28 }
 0x7a0   : > { %v3674_v23 = vpop.permute.xlu0 %3673 }
 0x7a1   : > { %v3676_v50 = vpop.permute.xlu1 %3675  ;;  %v3691_v38 = vsel %vm601_vm6, %v3689_v12, %v3674_v23 }
 0x7a2   : > { %v3692_v32 = vsel %vm601_vm6, %v3690_v22, %v3676_v50 }
 0x7a4   : > { %v4190_v27 = vpop.permute.xlu0 %4189 }
 0x7a5   : > { %v4192_v25 = vpop.permute.xlu1 %4191  ;;  %v4207_v53 = vsel %vm601_vm6, %v4205_v56, %v4190_v27 }
 0x7a6   : > { %v4208_v19 = vsel %vm601_vm6, %v4206_v37, %v4192_v25 }
 0x849   : > { %v4942_v8 = vpop.f32.mrb[12].mxu0 }
 0x84a   : > { %v3861_v0 = vmul.f32 %v4942_v8, %v3692_v32  ;;  %v4952_v55 = vpop.f32.mrb[12].mxu1  ;;  %v3841_v2 = vpop.f32.mrb[13].mxu0 }
 0x84b   : > { %v4365_v34 = vmul.f32 %v4952_v55, %v4208_v19  ;;  %v3860_v21 = vmul.f32 %v3841_v2, %v3691_v38  ;;  %v4345_v26 = vpop.f32.mrb[13].mxu1 }
 0x84c   : > { %v4364_v39 = vmul.f32 %v4345_v26, %v4207_v53 }
 0x84d   : > { %v3862_v41 = vadd.f32 %v3861_v0, %v3860_v21  ;;  %v4945_v20 = vpop.f32.mrb[14].mxu0 }
 0x84e   : > { %v4366_v48 = vadd.f32 %v4365_v34, %v4364_v39  ;;  %v3870_v16 = vmul.f32 %v4945_v20, %v3692_v32  ;;  %v4955_v40 = vpop.f32.mrb[14].mxu1  ;;  %v3851_v42 = vpop.f32.mrb[15].mxu0 }
 0x84f   : > { %v3863_v10 = vrot.slane %v3862_v41, 4  ;;  %v4374_v43 = vmul.f32 %v4955_v40, %v4208_v19  ;;  %v3869_v45 = vmul.f32 %v3851_v42, %v3691_v38  ;;  %v4355_v7 = vpop.f32.mrb[15].mxu1 }
 0x850   : > { %v4367_v17 = vrot.slane %v4366_v48, 4  ;;  %v4373_v9 = vmul.f32 %v4355_v7, %v4207_v53 }
 0x851   : > { %v3864_v47 = vadd.f32 %v3863_v10, %v3862_v41  ;;  %v3871_v28 = vadd.f32 %v3870_v16, %v3869_v45 }
 0x852   : > { %v4368_v59 = vadd.f32 %v4367_v17, %v4366_v48  ;;  %v4375_v33 = vadd.f32 %v4374_v43, %v4373_v9 }
 0x853   : > { %v3865_v51 = vrot.slane %v3864_v47, 2  ;;  %v3872_v4 = vrot.slane %v3871_v28, 4 }
 0x854   : > { %v4369_v52 = vrot.slane %v4368_v59, 2  ;;  %v4376_v29 = vrot.slane %v4375_v33, 4 }
 0x855   : > { %v3866_v50 = vadd.f32 %v3865_v51, %v3864_v47  ;;  %v3873_v30 = vadd.f32 %v3872_v4, %v3871_v28 }
 0x856   : > { %v4370_v61 = vadd.f32 %v4369_v52, %v4368_v59  ;;  %v4377_v23 = vadd.f32 %v4376_v29, %v4375_v33 }
 0x857   : > { %v3867_v14 = vrot.slane %v3866_v50, 1  ;;  %v3874_v44 = vrot.slane %v3873_v30, 2 }
 0x858   : > { %v4378_v13 = vrot.slane %v4377_v23, 2  ;;  %v4371_v54 = vrot.slane %v4370_v61, 1 }
 0x859   : > { %v7196_v1 = vadd.f32 %v3867_v14, %v3866_v50  ;;  %v3875_v57 = vadd.f32 %v3874_v44, %v3873_v30 }
 0x85a   : > { %v4379_v24 = vadd.f32 %v4378_v13, %v4377_v23  ;;  %v7200_v5 = vadd.f32 %v4371_v54, %v4370_v61 }
 0x85b   : > { %v3876_v63 = vrot.slane %v3875_v57, 1  ;;  %3879 = vrot.lane.b32.xlu0 %v7196_v1, %s5590_s10 }
 0x85c   : > { %v4380_v46 = vrot.slane %v4379_v24, 1 }
 0x85d   : > { %v7202_v11 = vadd.f32 %v3876_v63, %v3875_v57 }
 0x85e   : > { %v7208_v18 = vadd.f32 %v4380_v46, %v4379_v24 }
 0x85f   : > { %3908 = vrot.lane.b32.xlu1 %v7202_v11, %s5590_s10  ;;  %4383 = vrot.lane.b32.xlu0 %v7200_v5, %s5590_s10 }
 0x863   : > { %3882 = vrot.lane.b32.xlu0 %v7196_v1, %s5589_s9  ;;  %4412 = vrot.lane.b32.xlu1 %v7208_v18, %s5590_s10  ;;  %s7273_s10 = scalar_lea.sflag [#allocation9], %s4451_s15 }
 0x867   : > { %4386 = vrot.lane.b32.xlu0 %v7200_v5, %s5589_s9  ;;  %3911 = vrot.lane.b32.xlu1 %v7202_v11, %s5589_s9 }
 0x86b   : > { %3885 = vrot.lane.b32.xlu0 %v7196_v1, %s5588_s12  ;;  %4415 = vrot.lane.b32.xlu1 %v7208_v18, %s5589_s9 }
 0x86f   : > { %4389 = vrot.lane.b32.xlu0 %v7200_v5, %s5588_s12  ;;  %3914 = vrot.lane.b32.xlu1 %v7202_v11, %s5588_s12 }
 0x873   : > { %3888 = vrot.lane.b32.xlu0 %v7196_v1, %s5587_s26  ;;  %4418 = vrot.lane.b32.xlu1 %v7208_v18, %s5588_s12 }
 0x877   : > { %4392 = vrot.lane.b32.xlu0 %v7200_v5, %s5587_s26  ;;  %3917 = vrot.lane.b32.xlu1 %v7202_v11, %s5587_s26 }
 0x87b   : > { %3891 = vrot.lane.b32.xlu0 %v7196_v1, %s5586_s11  ;;  %4421 = vrot.lane.b32.xlu1 %v7208_v18, %s5587_s26  ;;  %s4491_s26 = sshll.u32 %s6536_s17, 4  ;;  %s7265_s26 = int_to_ptr.vmem [resolvable:$true] %s4491_s26 }
 0x87f   : > { %4395 = vrot.lane.b32.xlu0 %v7200_v5, %s5586_s11  ;;  %3920 = vrot.lane.b32.xlu1 %v7202_v11, %s5586_s11 }
 0x883   : > { %3894 = vrot.lane.b32.xlu0 %v7196_v1, %s5584_s29  ;;  %4424 = vrot.lane.b32.xlu1 %v7208_v18, %s5586_s11  ;;  %s7262_s11 = scalar_lea.hbm %s7471_s3, %s7252_s25 }
 0x887   : > { %4398 = vrot.lane.b32.xlu0 %v7200_v5, %s5584_s29  ;;  %3923 = vrot.lane.b32.xlu1 %v7202_v11, %s5584_s29 }
 0x88b   : > { %3897 = vrot.lane.b32.xlu0 %v7196_v1, %s7478_s28  ;;  %4427 = vrot.lane.b32.xlu1 %v7208_v18, %s5584_s29  ;;  %s5416_s28 = scalar_lea.vmem %s7265_s26, 512  ;;  %s5591_s29 = smov [#allocation8]  }
 0x88c   : > { %p5417_p13 = scmp.ne.s32.totalorder %s7265_s26, %s5416_s28  ;;  %s5420_s23 = sshll.u32 %s5591_s29, 4  ;;  %s5421_s23 = int_to_ptr.vmem [resolvable:$false] %s5420_s23 }
 0x88d   : > { %s5422_s17 = scalar_lea.vmem %s5421_s23, 1024  ;;  %p5423_p5 = scmp.lt.s32.totalorder %s7265_s26, %s5421_s23 }
 0x88e   : > { %p5418_p12 = pnand %p5417_p13, %p7492_p1  ;;  %p5424_p7 = scmp.lt.s32.totalorder %s5422_s17, %s5416_s28 }
 0x890   : > { %p5419_p10 = pneg %p5418_p12  ;;  %p5425_p9 = por %p5424_p7, %p5423_p5 }
 0x892   : > { %p5426_p11 = pnand %p5425_p9, %p5419_p10 }
 0x894   : > { %5429 = shalt.err (!%p5426_p11)
}
 0x895   : > { %s5430_s15 = scalar_lea.hbm %s7262_s11, 512  ;;  %s5434_s9 = scalar_lea.hbm %s7471_s3, 1024 }
 0x896   : > { %p5431_p3 = scmp.ne.s32.totalorder %s7262_s11, %s5430_s15  ;;  %p5435_p2 = scmp.lt.u32.totalorder %s7262_s11, %s7471_s3 }
 0x897   : > { %p5436_p4 = scmp.lt.u32.totalorder %s5434_s9, %s5430_s15  ;;  %p5438_p13 = scmp.lt.u32.totalorder %s5430_s15, %s7262_s11 }
 0x898   : > { %p5432_p8 = pnand %p5431_p3, %p7492_p1 }
 0x899   : > { %p5437_p6 = por %p5436_p4, %p5435_p2 }
 0x89a   : > { %p5433_p0 = pneg %p5432_p8 }
 0x89b   : > { %p5439_p12 = por %p5438_p13, %p5437_p6 }
 0x89d   : > { %p5440_p10 = pnand %p5439_p12, %p5433_p0 }
 0x89f   : > { %5443 = shalt.err (!%p5440_p10)
}
 0x8a0   : > { %s7480_s28 = smov 128   ;;  %s5593_s17 = smov 8  }
 0x8a1   : > { %4993 = dma.vmem_to_hbm [thread:$0]  (%p7492_p1), %s7265_s26, 512, %s7262_s11, %s7273_s10, %s7480_s28, %s7480_s28, %s5593_s17  }
 0x8a2   : > { %s7493_s15 = smov 16   ;;  %s4475_s7 = sshll.u32 %s6172_s16, 4  ;;  %s7311_s7 = int_to_ptr.vmem [resolvable:$true] %s4475_s7 }
 0x8a3   : > { %4401 = vrot.lane.b32.xlu0 %v7200_v5, %s7493_s15  ;;  %3926 = vrot.lane.b32.xlu1 %v7202_v11, %s7493_s15  ;;  %s7309_s29 = scalar_lea.hbm %s7472_s4, %s7252_s25  ;;  %s5444_s11 = scalar_lea.vmem %s7311_s7, 512 }
 0x8a4   : > { %p5445_p5 = scmp.ne.s32.totalorder %s7311_s7, %s5444_s11  ;;  %s5594_s26 = smov [#allocation7]  }
 0x8a5   : > { %s5448_s28 = sshll.u32 %s5594_s26, 4  ;;  %s5449_s28 = int_to_ptr.vmem [resolvable:$false] %s5448_s28 }
 0x8a6   : > { %p5446_p7 = pnand %p5445_p5, %p7492_p1  ;;  %s5450_s16 = scalar_lea.vmem %s5449_s28, 1024 }
 0x8a7   : > { %p5451_p11 = scmp.lt.s32.totalorder %s7311_s7, %s5449_s28  ;;  %p5452_p3 = scmp.lt.s32.totalorder %s5450_s16, %s5444_s11 }
 0x8a8   : > { %p5447_p9 = pneg %p5446_p7 }
 0x8a9   : > { %p5453_p8 = por %p5452_p3, %p5451_p11 }
 0x8ab   : > { %p5454_p0 = pnand %p5453_p8, %p5447_p9 }
 0x8ad   : > { %5457 = shalt.err (!%p5454_p0)
}
 0x8ae   : > { %s5458_s12 = scalar_lea.hbm %s7271_s22, 512  ;;  %s5462_s26 = scalar_lea.hbm %s7470_s2, 1024 }
 0x8af   : > { %p5459_p2 = scmp.ne.s32.totalorder %s7271_s22, %s5458_s12  ;;  %p5463_p13 = scmp.lt.u32.totalorder %s7271_s22, %s7470_s2 }
 0x8b0   : > { %p5464_p12 = scmp.lt.u32.totalorder %s5462_s26, %s5458_s12  ;;  %p5466_p5 = scmp.lt.u32.totalorder %s5458_s12, %s7271_s22 }
 0x8b1   : > { %p5460_p4 = pnand %p5459_p2, %p7492_p1 }
 0x8b2   : > { %p5465_p10 = por %p5464_p12, %p5463_p13 }
 0x8b3   : > { %p5461_p6 = pneg %p5460_p4 }
 0x8b4   : > { %p5467_p7 = por %p5466_p5, %p5465_p10 }
 0x8b6   : > { %p5468_p9 = pnand %p5467_p7, %p5461_p6 }
 0x8b8   : > { %5471 = shalt.err (!%p5468_p9)
}
 0x8b9   : > { %s7494_s11 = smov 128   ;;  %s7495_s16 = scalar_lea.sflag [#allocation4], %s5789_s13  ;;  %4430 = vrot.lane.b32.xlu1 %v7208_v18, %s7493_s15 }
 0x8ba   : > { %4992 = dma.vmem_to_hbm [thread:$0]  (%p7492_p1), %s7311_s7, 512, %s7271_s22, %s7495_s16, %s7494_s11, %s7494_s11, %s5593_s17  }
 0x8bb   : > { %s7496_s0 = sshll.u32 %s6878_s14, 4  ;;  %s5595_s12 = smov [#allocation10]   ;;  %s7343_s0 = int_to_ptr.vmem [resolvable:$true] %s7496_s0 }
 0x8bc   : > { %s5472_s23 = scalar_lea.vmem %s7343_s0, 512  ;;  %s5476_s9 = sshll.u32 %s5595_s12, 4  ;;  %s5477_s9 = int_to_ptr.vmem [resolvable:$false] %s5476_s9 }
 0x8bd   : > { %p5473_p11 = scmp.ne.s32.totalorder %s7343_s0, %s5472_s23  ;;  %s5478_s26 = scalar_lea.vmem %s5477_s9, 1024 }
 0x8be   : > { %p5479_p0 = scmp.lt.s32.totalorder %s7343_s0, %s5477_s9  ;;  %p5480_p2 = scmp.lt.s32.totalorder %s5478_s26, %s5472_s23 }
 0x8bf   : > { %p5474_p3 = pnand %p5473_p11, %p7492_p1 }
 0x8c0   : > { %p5481_p4 = por %p5480_p2, %p5479_p0 }
 0x8c1   : > { %p5475_p8 = pneg %p5474_p3 }
 0x8c3   : > { %p5482_p6 = pnand %p5481_p4, %p5475_p8 }
 0x8c5   : > { %5485 = shalt.err (!%p5482_p6)
}
 0x8c6   : > { %s5486_s22 = scalar_lea.hbm %s7309_s29, 512  ;;  %s5490_s28 = scalar_lea.hbm %s7472_s4, 1024 }
 0x8c7   : > { %p5487_p13 = scmp.ne.s32.totalorder %s7309_s29, %s5486_s22  ;;  %p5491_p5 = scmp.lt.u32.totalorder %s7309_s29, %s7472_s4 }
 0x8c8   : > { %p5492_p7 = scmp.lt.u32.totalorder %s5490_s28, %s5486_s22  ;;  %p5494_p11 = scmp.lt.u32.totalorder %s5486_s22, %s7309_s29 }
 0x8c9   : > { %p5488_p12 = pnand %p5487_p13, %p7492_p1 }
 0x8ca   : > { %p5493_p9 = por %p5492_p7, %p5491_p5 }
 0x8cb   : > { %p5489_p10 = pneg %p5488_p12 }
 0x8cc   : > { %p5495_p3 = por %p5494_p11, %p5493_p9 }
 0x8ce   : > { %p5496_p8 = pnand %p5495_p3, %p5489_p10 }
 0x8d0   : > { %5499 = shalt.err (!%p5496_p8)
}
 0x8d1   : > { %4994 = dma.vmem_to_hbm [thread:$0]  (%p7492_p1), %s7343_s0, 512, %s7309_s29, %s7273_s10, %s7494_s11, %s7494_s11, %s5593_s17   ;;  %v3880_v31 = vpop.permute.xlu0 %3879  ;;  %v3909_v58 = vpop.permute.xlu1 %3908 }
 0x8d2   : > { %v3900_v2 = vsel %vm811_vm7, %v7196_v1, %v3880_v31  ;;  %v3929_v41 = vsel %vm811_vm7, %v7202_v11, %v3909_v58  ;;  %v5353_v28 = vld [vmem:[%s6878_s14] sm:$0xff]  ;;  %s310_s10 = scalar_lea.vmem [#allocation11], %s5792_s8  ;;  %v5354_v54 = vld [vmem:[%s6878_s14 + $0x10] sm:$0xff]  ;;  %s7418_s23 = scalar_lea.hbm %s7473_s5, %s7252_s25 }
 0x8d3   : > { %s4523_s29 = sshll.u32 %s310_s10, 4  ;;  %s4462_s9 = scalar_lea.sflag [#allocation12], %s5789_s13  ;;  %s7410_s29 = int_to_ptr.vmem [resolvable:$true] %s4523_s29 }
 0x8d4   : > { %s5500_s26 = scalar_lea.vmem %s7410_s29, 512  ;;  %s5596_s22 = smov [#allocation11]  }
 0x8d5   : > { %v4384_v49 = vpop.permute.xlu0 %4383  ;;  %v4413_v15 = vpop.permute.xlu1 %4412  ;;  %p5501_p0 = scmp.ne.s32.totalorder %s7410_s29, %s5500_s26  ;;  %s5504_s15 = sshll.u32 %s5596_s22, 4  ;;  %s5505_s15 = int_to_ptr.vmem [resolvable:$false] %s5504_s15 }
 0x8d6   : > { %v4404_v20 = vsel %vm811_vm7, %v7200_v5, %v4384_v49  ;;  %v4433_v33 = vsel %vm811_vm7, %v7208_v18, %v4413_v15  ;;  %s5506_s7 = scalar_lea.vmem %s5505_s15, 1024  ;;  %p5507_p6 = scmp.lt.s32.totalorder %s7410_s29, %s5505_s15 }
 0x8d7   : > { %p5502_p2 = pnand %p5501_p0, %p7492_p1  ;;  %p5508_p13 = scmp.lt.s32.totalorder %s5506_s7, %s5500_s26 }
 0x8d9   : > { %v3883_v62 = vpop.permute.xlu0 %3882  ;;  %v3912_v3 = vpop.permute.xlu1 %3911  ;;  %p5503_p4 = pneg %p5502_p2  ;;  %p5509_p12 = por %p5508_p13, %p5507_p6 }
 0x8da   : > { %v3901_v34 = vsel %vm813_vm8, %v3900_v2, %v3883_v62  ;;  %v3930_v40 = vsel %vm813_vm8, %v3929_v41, %v3912_v3 }
 0x8db   : > { %p5510_p10 = pnand %p5509_p12, %p5503_p4 }
 0x8dd   : > { %v4387_v25 = vpop.permute.xlu0 %4386  ;;  %v4416_v60 = vpop.permute.xlu1 %4415 }
 0x8de   : > { %v4405_v16 = vsel %vm813_vm8, %v4404_v20, %v4387_v25  ;;  %v4434_v52 = vsel %vm813_vm8, %v4433_v33, %v4416_v60 }
 0x8e1   : > { %v3886_v35 = vpop.permute.xlu0 %3885  ;;  %v3915_v27 = vpop.permute.xlu1 %3914 }
 0x8e2   : > { %v3902_v26 = vsel %vm815_vm9, %v3901_v34, %v3886_v35  ;;  %v3931_v7 = vsel %vm815_vm9, %v3930_v40, %v3915_v27 }
 0x8e5   : > { %v4390_v22 = vpop.permute.xlu0 %4389  ;;  %v4419_v12 = vpop.permute.xlu1 %4418 }
 0x8e6   : > { %v4406_v45 = vsel %vm815_vm9, %v4405_v16, %v4390_v22  ;;  %v4435_v23 = vsel %vm815_vm9, %v4434_v52, %v4419_v12 }
 0x8e9   : > { %v3889_v36 = vpop.permute.xlu0 %3888  ;;  %v3918_v32 = vpop.permute.xlu1 %3917 }
 0x8ea   : > { %v3903_v39 = vsel %vm817_vm10, %v3902_v26, %v3889_v36  ;;  %v3932_v47 = vsel %vm817_vm10, %v3931_v7, %v3918_v32 }
 0x8ed   : > { %v4393_v37 = vpop.permute.xlu0 %4392  ;;  %v4422_v56 = vpop.permute.xlu1 %4421 }
 0x8ee   : > { %v4407_v9 = vsel %vm817_vm10, %v4406_v45, %v4393_v37  ;;  %v4436_v13 = vsel %vm817_vm10, %v4435_v23, %v4422_v56 }
 0x8f1   : > { %v3892_v8 = vpop.permute.xlu0 %3891  ;;  %v3921_v19 = vpop.permute.xlu1 %3920 }
 0x8f2   : > { %v3904_v48 = vsel %vm819_vm11, %v3903_v39, %v3892_v8  ;;  %v3933_v4 = vsel %vm819_vm11, %v3932_v47, %v3921_v19 }
 0x8f5   : > { %v4396_v0 = vpop.permute.xlu0 %4395  ;;  %v4425_v38 = vpop.permute.xlu1 %4424 }
 0x8f6   : > { %v4408_v51 = vsel %vm819_vm11, %v4407_v9, %v4396_v0  ;;  %v4437_v24 = vsel %vm819_vm11, %v4436_v13, %v4425_v38 }
 0x8f9   : > { %v3895_v55 = vpop.permute.xlu0 %3894  ;;  %v3924_v53 = vpop.permute.xlu1 %3923 }
 0x8fa   : > { %v3905_v42 = vsel %vm821_vm12, %v3904_v48, %v3895_v55  ;;  %v3934_v50 = vsel %vm821_vm12, %v3933_v4, %v3924_v53 }
 0x8fd   : > { %v4399_v21 = vpop.permute.xlu0 %4398  ;;  %v4428_v43 = vpop.permute.xlu1 %4427 }
 0x8fe   : > { %v4409_v29 = vsel %vm821_vm12, %v4408_v51, %v4399_v21  ;;  %v4438_v63 = vsel %vm821_vm12, %v4437_v24, %v4428_v43 }
 0x901   : > { %v3898_v10 = vpop.permute.xlu0 %3897 }
 0x902   : > { %v3906_v17 = vsel %vm823_vm13, %v3905_v42, %v3898_v10 }
 0x903   : > { %v3936_v59 = vadd.f32 %v5353_v28, %v3906_v17 }
 0x905   : > { %3937 = vst.msk [vmem:[%s310_s10] sm:$0xff] %vm583_vm0, %v3936_v59 }
 0x915   : > { %v4402_v30 = vpop.permute.xlu0 %4401  ;;  %v3927_v61 = vpop.permute.xlu1 %3926 }
 0x916   : > { %v4410_v14 = vsel %vm823_vm13, %v4409_v29, %v4402_v30  ;;  %v3935_v44 = vsel %vm823_vm13, %v3934_v50, %v3927_v61 }
 0x917   : > { %v4440_v1 = vadd.f32 %v7012_v6, %v4410_v14  ;;  %v3938_v57 = vadd.f32 %v5354_v54, %v3935_v44  ;;  %v5355_v6 = vld [vmem:[%s6878_s14 + $0x18] sm:$0xff] }
 0x919   : > { %4806 = vst.msk [vmem:[%s310_s10 + $0x8] sm:$0xff] %vm583_vm0, %v4440_v1  ;;  %4797 = vst.msk [vmem:[%s310_s10 + $0x10] sm:$0xff] %vm583_vm0, %v3938_v57 }
 0x92b   : > { %v4431_v5 = vpop.permute.xlu1 %4430 }
 0x92c   : > { %v4439_v11 = vsel %vm823_vm13, %v4438_v63, %v4431_v5 }
 0x92d   : > { %v4443_v46 = vadd.f32 %v5355_v6, %v4439_v11 }
 0x92f   : > { %4807 = vst.msk [vmem:[%s310_s10 + $0x18] sm:$0xff] %vm583_vm0, %v4443_v46 }
 0x930   : > { %5513 = shalt.err (!%p5510_p10)
}
 0x931   : > { %s5514_s14 = scalar_lea.hbm %s7418_s23, 512  ;;  %s5518_s16 = scalar_lea.hbm %s7473_s5, 1024 }
 0x932   : > { %p5515_p5 = scmp.ne.s32.totalorder %s7418_s23, %s5514_s14  ;;  %p5519_p11 = scmp.lt.u32.totalorder %s7418_s23, %s7473_s5 }
 0x933   : > { %p5520_p3 = scmp.lt.u32.totalorder %s5518_s16, %s5514_s14  ;;  %p5522_p0 = scmp.lt.u32.totalorder %s5514_s14, %s7418_s23 }
 0x934   : > { %p5516_p7 = pnand %p5515_p5, %p7492_p1 }
 0x935   : > { %p5521_p8 = por %p5520_p3, %p5519_p11 }
 0x936   : > { %p5517_p9 = pneg %p5516_p7 }
 0x937   : > { %p5523_p2 = por %p5522_p0, %p5521_p8 }
 0x939   : > { %p5524_p4 = pnand %p5523_p2, %p5517_p9 }
 0x93b   : > { %5527 = shalt.err (!%p5524_p4)
}
 0x93c   : > { %4995 = dma.vmem_to_hbm [thread:$0]  (%p7492_p1), %s7410_s29, 512, %s7418_s23, %s4462_s9, %s7494_s11, %s7494_s11, %s5593_s17  }
 0x93d PF: > { %s4538_s8 = sand.u32 1, %s5566_s18   ;;  %p7497_p6 = scmp.ne.s32.totalorder %s7486_s6, 0 }
 0x93e   : > { %p7498_p13 = scmp.ge.s32.totalorder %s5578_s21, 2  ;;  %s4539_s0 = scalar_lea.sflag [#allocation4], %s4538_s8 }
 0x940   : > { %p5008_p12 = pnand %p7498_p13, %p7497_p6 }
 0x942   : > { %5553 = dma.done.wait (!%p5008_p12), %s4539_s0, 512  }
 0x943   : > { %5555 = vsyncadd (!%p5008_p12), %s4539_s0, 4294966784  ;;  %s7499_s30 = sadd.s32 4294967294, %s5578_s21  }
 0x944   : > { %s4547_s26 = sand.u32 1, %s7499_s30  }
 0x945   : > { %s4548_s22 = scalar_lea.sflag [#allocation9], %s4547_s26 }
 0x946   : > { %5557 = dma.done.wait (!%p5008_p12), %s4548_s22, 1024  }
 0x947   : > { %5559 = vsyncadd (!%p5008_p12), %s4548_s22, 4294966272  ;;  %s4566_s13 = scalar_lea.sflag [#allocation12], %s4538_s8 }
 0x948   : > { %5561 = dma.done.wait (!%p5008_p12), %s4566_s13, 512  }
 0x949   : > { %5563 = vsyncadd (!%p5008_p12), %s4566_s13, 4294966784  ;;  %p28_p1 = scmp.ge.s32.totalorder %s5652_s24, 4   ;;  %s7500_s18 = smov %s5570_s19 }
 0x94a   : > { %s7501_s19 = smov %s5574_s20  ;;  %s7502_s20 = smov %s5664_s27 }
 0x94b   : > { %s7503_s21 = smov %s5652_s24  ;;  %30 = sbr.rel (!%p28_p1) target bundleno = 13 (0xd), region = 153 }
 0x952   :  { %4571 = vsyncpa [#allocation3], 1 }
 0x953   :  { %4573 = vsyncpa [#allocation3 + $0x1], 1 }
 0x954   :  { %4574 = vsyncpa [#allocation6], 1 }
 0x955   :  { %4576 = vsyncpa [#allocation6 + $0x1], 1 }
 0x956   :  { %4577 = vsyncpa [#allocation4], 1 }
 0x957   :  { %4579 = vsyncpa [#allocation4 + $0x1], 1 }
 0x958   :  { %4580 = vsyncpa [#allocation9], 1 }
 0x959   :  { %4582 = vsyncpa [#allocation9 + $0x1], 1 }
 0x95a   :  { %4583 = vsyncpa [#allocation12], 1 }
 0x95b   :  { %4585 = vsyncpa [#allocation12 + $0x1], 1 }

</bundles_post_ra>
